<compile_context>
chip_gen: v7x
topology: tpu7x:2x2x1
jax: 0.10.0
libtpu: 0.0.40
codegen_flags: <defaults>
</compile_context>

<pallas_src>
import functools
import math

import jax
import jax.numpy as jnp
from jax import lax
from jax.experimental import pallas as pl
from jax.experimental.pallas import tpu as pltpu


# ----------------------------------------------------------------------------
# In-kernel helpers (trace-time)
# ----------------------------------------------------------------------------
def _decimation(ow, stride):
    """(ow, stride*(ow-1)+1) 0/1 matrix selecting every `stride`-th row."""
    length = stride * (ow - 1) + 1
    r = lax.broadcasted_iota(jnp.int32, (ow, length), 0)
    c = lax.broadcasted_iota(jnp.int32, (ow, length), 1)
    return (c == stride * r).astype(jnp.float32)


def _conv_loop(in_ref, row0, col0, K, stride, oh_n, ow_n, cin, cout,
               w_ref, b_ref, emit):
    """For oh in [0, oh_n): emit(oh, conv_row(oh)) with conv_row of shape
    (ow_n, cout).

    in_ref : (H, W, cin) VMEM ref (already padded as required)
    w_ref  : (K*K, cin, cout) VMEM ref, taps in (kh, kw) order
    b_ref  : (1, cout) VMEM ref
    emit   : fn(oh, acc) -- fused epilogue (residual / relu / store)
    """
    length = stride * (ow_n - 1) + 1            # window span along W
    bias = b_ref[...]                           # (1, cout)
    dec = _decimation(ow_n, stride) if stride > 1 else None

    def body(oh, carry):
        acc = jnp.zeros((length, cout), jnp.float32)
        for kh in range(K):
            ih = row0 + stride * oh + kh
            for kw in range(K):
                x = in_ref[ih, pl.ds(col0 + kw, length), :]      # (length, cin)
                w = w_ref[kh * K + kw]                           # (cin, cout)
                if cin == 1:
                    acc = acc + x * w                            # broadcast mul
                else:
                    acc = acc + jnp.dot(x, w,
                                        preferred_element_type=jnp.float32)
        if dec is not None:
            # factor the stride-2 column decimation out of the tap sum
            acc = jnp.dot(dec, acc, preferred_element_type=jnp.float32)
        emit(oh, acc + bias)
        return carry

    lax.fori_loop(0, oh_n, body, 0)


# ----------------------------------------------------------------------------
# The fused kernel (one grid step == one sample)
# ----------------------------------------------------------------------------
def _make_kernel(S1, S2, S3, T1, T2, T3):
    def kernel(x_ref,
               w1, b1, w2, b2, wd23, bd23, w3, b3, wd34, bd34, w4, b4,
               wn1, bn1, wn2, bn2, wn3, bn3,
               wf1, bf1, wf2, bf2, wf3, bf3,
               o_ref,
               xs, a1, a2, a3, a4, v1, v2, v3):
        f32 = jnp.float32
        relu = lambda t: jnp.maximum(t, 0.0)

        # --- stage 0: copy padded input sample into scratch, zero the
        #              padded borders of the residual-stack activations.
        xs[...] = x_ref[0]
        a1[...] = jnp.zeros(a1.shape, f32)
        a2[...] = jnp.zeros(a2.shape, f32)
        a3[...] = jnp.zeros(a3.shape, f32)

        dec_s2 = _decimation(S2, 2)    # for fused downsample_2_3 (1x1, s2)
        dec_s3 = _decimation(S3, 2)    # for fused downsample_3_4 (1x1, s2)

        # ---- net1: residual conv stack ----------------------------------
        # layer1: Conv(1,16,3,s2,p1) + ReLU
        def emit1(oh, acc):
            a1[1 + oh, pl.ds(1, S1), :] = relu(acc)
        _conv_loop(xs, 0, 0, 3, 2, S1, S1, 1, 16, w1, b1, emit1)

        # layer2: Conv(16,16,3,s1,p1), += out1, ReLU
        def emit2(oh, acc):
            res = a1[1 + oh, pl.ds(1, S1), :]
            a2[1 + oh, pl.ds(1, S1), :] = relu(acc + res)
        _conv_loop(a1, 0, 0, 3, 1, S1, S1, 16, 16, w2, b2, emit2)

        # layer3: Conv(16,32,3,s2,p1), += downsample_2_3(out2), ReLU
        def emit3(oh, acc):
            row = a2[1 + 2 * oh, pl.ds(1, 2 * S2 - 1), :]          # (2*S2-1, 16)
            idn = jnp.dot(dec_s2, row, preferred_element_type=f32)  # (S2, 16)
            idn = jnp.dot(idn, wd23[...],
                          preferred_element_type=f32) + bd23[...]   # (S2, 32)
            a3[1 + oh, pl.ds(1, S2), :] = relu(acc + idn)
        _conv_loop(a2, 0, 0, 3, 2, S2, S2, 16, 32, w3, b3, emit3)

        # layer4: Conv(32,64,3,s2,p1), += downsample_3_4(out3), ReLU
        def emit4(oh, acc):
            row = a3[1 + 2 * oh, pl.ds(1, 2 * S3 - 1), :]          # (2*S3-1, 32)
            idn = jnp.dot(dec_s3, row, preferred_element_type=f32)  # (S3, 32)
            idn = jnp.dot(idn, wd34[...],
                          preferred_element_type=f32) + bd34[...]   # (S3, 64)
            a4[oh] = relu(acc + idn)
        _conv_loop(a3, 0, 0, 3, 2, S3, S3, 32, 64, w4, b4, emit4)

        # ---- net2: plain conv stack (reads the same padded input, offset 1)
        def emit_n1(oh, acc):
            v1[oh] = relu(acc)
        _conv_loop(xs, 1, 1, 3, 1, T1, T1, 1, 16, wn1, bn1, emit_n1)

        def emit_n2(oh, acc):
            v2[oh] = relu(acc)
        _conv_loop(v1, 0, 0, 5, 2, T2, T2, 16, 32, wn2, bn2, emit_n2)

        def emit_n3(oh, acc):
            v3[oh] = relu(acc)
        _conv_loop(v2, 0, 0, 5, 2, T3, T3, 32, 64, wn3, bn3, emit_n3)

        # ---- grouped conv: per-channel valid correlation -> (1, 64) ------
        q = a4[0] * v3[0]
        for h in range(1, S3):
            q = q + a4[h] * v3[h]                         # (S3, 64)
        feat = jnp.sum(q, axis=0, keepdims=True)          # (1, 64)

        # ---- FC head + log-softmax ---------------------------------------
        h1 = relu(jnp.dot(feat, wf1[...], preferred_element_type=f32)
                  + bf1[...])
        h2 = relu(jnp.dot(h1, wf2[...], preferred_element_type=f32)
                  + bf2[...])
        logits = jnp.dot(h2, wf3[...], preferred_element_type=f32) + bf3[...]
        m = jnp.max(logits, axis=-1, keepdims=True)
        sh = logits - m
        lse = jnp.log(jnp.sum(jnp.exp(sh), axis=-1, keepdims=True))
        o_ref[0] = sh - lse                               # (1, 10) log-probs

    return kernel


# ----------------------------------------------------------------------------
# Wrapper
# ----------------------------------------------------------------------------
def _geometry(side):
    s1 = (side - 1) // 2 + 1        # conv3 s2 p1
    s2 = (s1 - 1) // 2 + 1          # conv3 s2 p1 (== 1x1 s2 p0)
    s3 = (s2 - 1) // 2 + 1
    t1 = side - 2                   # conv3 s1 p0
    t2 = (t1 - 5) // 2 + 1          # conv5 s2 p0
    t3 = (t2 - 5) // 2 + 1
    return s1, s2, s3, t1, t2, t3


_PARAM_ORDER = ("layer1", "layer2", "down23", "layer3", "down34", "layer4",
                "net2_c1", "net2_c2", "net2_c3", "fc1", "fc2", "fc3")


@jax.jit
def acnn_resnet_forward(params, x_nchw):
    x = jnp.transpose(x_nchw.astype(jnp.float32), (0, 2, 3, 1))   # NCHW->NHWC
    n, h, w, _ = x.shape
    assert h == w, "square inputs expected"
    s1, s2, s3, t1, t2, t3 = _geometry(h)
    assert s3 == t3, "branch spatial sizes must match for grouped_conv"

    xp = jnp.pad(x, ((0, 0), (1, 1), (1, 1), (0, 0)))             # net1 pad=1

    flat = []
    for name in _PARAM_ORDER:
        wgt, bias = params[name]
        flat += [wgt, bias]

    def const_spec(a):
        nd = a.ndim
        return pl.BlockSpec(tuple(a.shape), lambda i, _nd=nd: (0,) * _nd)

    in_specs = ([pl.BlockSpec((1, h + 2, h + 2, 1), lambda i: (i, 0, 0, 0))]
                + [const_spec(a) for a in flat])
    out_specs = pl.BlockSpec((1, 1, 10), lambda i: (i, 0, 0))

    scratch = [
        pltpu.VMEM((h + 2, h + 2, 1), jnp.float32),      # padded input sample
        pltpu.VMEM((s1 + 2, s1 + 2, 16), jnp.float32),   # out1 (padded)
        pltpu.VMEM((s1 + 2, s1 + 2, 16), jnp.float32),   # out2 (padded)
        pltpu.VMEM((s2 + 2, s2 + 2, 32), jnp.float32),   # out3 (padded)
        pltpu.VMEM((s3, s3, 64), jnp.float32),           # out4
        pltpu.VMEM((t1, t1, 16), jnp.float32),           # net2 act 1
        pltpu.VMEM((t2, t2, 32), jnp.float32),           # net2 act 2
        pltpu.VMEM((t3, t3, 64), jnp.float32),           # net2 act 3
    ]

    out = pl.pallas_call(
        _make_kernel(s1, s2, s3, t1, t2, t3),
        grid=(n,),
        in_specs=in_specs,
        out_specs=out_specs,
        out_shape=jax.ShapeDtypeStruct((n, 1, 10), jnp.float32),
        scratch_shapes=scratch,
        compiler_params=pltpu.CompilerParams(
            dimension_semantics=("parallel",)),
    )(xp, *flat)
    return out.reshape(n, 10)


# ----------------------------------------------------------------------------
# Parameters (deterministic synthetic init, kernel-friendly layouts)
# ----------------------------------------------------------------------------
def _init_conv(key, k, cin, cout):
    k1, k2 = jax.random.split(key)
    scale = 1.0 / math.sqrt(k * k * cin)
    wgt = jax.random.normal(k1, (k * k, cin, cout), jnp.float32) * scale
    bias = jax.random.normal(k2, (1, cout), jnp.float32) * 0.01
    return wgt, bias


def _init_linear(key, din, dout):
    k1, k2 = jax.random.split(key)
    scale = 1.0 / math.sqrt(din)
    wgt = jax.random.normal(k1, (din, dout), jnp.float32) * scale
    bias = jax.random.normal(k2, (1, dout), jnp.float32) * 0.01
    return wgt, bias


def init_params(key):
    keys = jax.random.split(key, 12)
    p = {}
    p["layer1"] = _init_conv(keys[0], 3, 1, 16)
    p["layer2"] = _init_conv(keys[1], 3, 16, 16)
    wd, bd = _init_conv(keys[2], 1, 16, 32)
    p["down23"] = (wd.reshape(16, 32), bd)
    p["layer3"] = _init_conv(keys[3], 3, 16, 32)
    wd, bd = _init_conv(keys[4], 1, 32, 64)
    p["down34"] = (wd.reshape(32, 64), bd)
    p["layer4"] = _init_conv(keys[5], 3, 32, 64)
    p["net2_c1"] = _init_conv(keys[6], 3, 1, 16)
    p["net2_c2"] = _init_conv(keys[7], 5, 16, 32)
    p["net2_c3"] = _init_conv(keys[8], 5, 32, 64)
    p["fc1"] = _init_linear(keys[9], 64, 32)
    p["fc2"] = _init_linear(keys[10], 32, 16)
    p["fc3"] = _init_linear(keys[11], 16, 10)
    return p


if __name__ == "__main__":
    key = jax.random.PRNGKey(0)
    kx, kp = jax.random.split(key)

    # 23x23 input -> both branches end at 3x3 spatial (see geometry helper)
    x = jax.random.normal(kx, (2, 1, 23, 23), jnp.float32)
    params = init_params(kp)

    out = acnn_resnet_forward(params, x)
    out = jax.block_until_ready(out)

    assert out.shape == (2, 10)
    # log-softmax sanity: rows exponentiate-sum to 1
    assert bool(jnp.allclose(jnp.sum(jnp.exp(out), axis=1), 1.0, atol=1e-4))
    print("KERNEL_OK")
</pallas_src>

<mosaic_0001>
module attributes {stable_mosaic.version = 11 : i64} {
  func.func @kernel(%arg0: i32, %arg1: memref<1x25x25x1xf32, #tpu.memory_space<vmem>>, %arg2: memref<9x1x16xf32, #tpu.memory_space<vmem>>, %arg3: memref<1x16xf32, #tpu.memory_space<vmem>>, %arg4: memref<9x16x16xf32, #tpu.memory_space<vmem>>, %arg5: memref<1x16xf32, #tpu.memory_space<vmem>>, %arg6: memref<16x32xf32, #tpu.memory_space<vmem>>, %arg7: memref<1x32xf32, #tpu.memory_space<vmem>>, %arg8: memref<9x16x32xf32, #tpu.memory_space<vmem>>, %arg9: memref<1x32xf32, #tpu.memory_space<vmem>>, %arg10: memref<32x64xf32, #tpu.memory_space<vmem>>, %arg11: memref<1x64xf32, #tpu.memory_space<vmem>>, %arg12: memref<9x32x64xf32, #tpu.memory_space<vmem>>, %arg13: memref<1x64xf32, #tpu.memory_space<vmem>>, %arg14: memref<9x1x16xf32, #tpu.memory_space<vmem>>, %arg15: memref<1x16xf32, #tpu.memory_space<vmem>>, %arg16: memref<25x16x32xf32, #tpu.memory_space<vmem>>, %arg17: memref<1x32xf32, #tpu.memory_space<vmem>>, %arg18: memref<25x32x64xf32, #tpu.memory_space<vmem>>, %arg19: memref<1x64xf32, #tpu.memory_space<vmem>>, %arg20: memref<64x32xf32, #tpu.memory_space<vmem>>, %arg21: memref<1x32xf32, #tpu.memory_space<vmem>>, %arg22: memref<32x16xf32, #tpu.memory_space<vmem>>, %arg23: memref<1x16xf32, #tpu.memory_space<vmem>>, %arg24: memref<16x10xf32, #tpu.memory_space<vmem>>, %arg25: memref<1x10xf32, #tpu.memory_space<vmem>>, %arg26: memref<1x1x10xf32, #tpu.memory_space<vmem>>, %arg27: memref<25x25x1xf32, #tpu.memory_space<vmem>>, %arg28: memref<14x14x16xf32, #tpu.memory_space<vmem>>, %arg29: memref<14x14x16xf32, #tpu.memory_space<vmem>>, %arg30: memref<8x8x32xf32, #tpu.memory_space<vmem>>, %arg31: memref<3x3x64xf32, #tpu.memory_space<vmem>>, %arg32: memref<21x21x16xf32, #tpu.memory_space<vmem>>, %arg33: memref<9x9x32xf32, #tpu.memory_space<vmem>>, %arg34: memref<3x3x64xf32, #tpu.memory_space<vmem>>) attributes {dimension_semantics = [#tpu.dimension_semantics<parallel>], iteration_bounds = array<i64: 2>, scalar_prefetch = 0 : i64, scratch_operands = 8 : i64, tpu.core_type = #tpu.core_type<tc>, window_params = [{transform_indices = @transform_0, window_bounds = array<i64: 1, 25, 25, 1>}, {pipeline_mode = #tpu.pipeline_mode<synchronous>, transform_indices = @transform_1, window_bounds = array<i64: 9, 1, 16>}, {pipeline_mode = #tpu.pipeline_mode<synchronous>, transform_indices = @transform_2, window_bounds = array<i64: 1, 16>}, {pipeline_mode = #tpu.pipeline_mode<synchronous>, transform_indices = @transform_3, window_bounds = array<i64: 9, 16, 16>}, {pipeline_mode = #tpu.pipeline_mode<synchronous>, transform_indices = @transform_4, window_bounds = array<i64: 1, 16>}, {pipeline_mode = #tpu.pipeline_mode<synchronous>, transform_indices = @transform_5, window_bounds = array<i64: 16, 32>}, {pipeline_mode = #tpu.pipeline_mode<synchronous>, transform_indices = @transform_6, window_bounds = array<i64: 1, 32>}, {pipeline_mode = #tpu.pipeline_mode<synchronous>, transform_indices = @transform_7, window_bounds = array<i64: 9, 16, 32>}, {pipeline_mode = #tpu.pipeline_mode<synchronous>, transform_indices = @transform_8, window_bounds = array<i64: 1, 32>}, {pipeline_mode = #tpu.pipeline_mode<synchronous>, transform_indices = @transform_9, window_bounds = array<i64: 32, 64>}, {pipeline_mode = #tpu.pipeline_mode<synchronous>, transform_indices = @transform_10, window_bounds = array<i64: 1, 64>}, {pipeline_mode = #tpu.pipeline_mode<synchronous>, transform_indices = @transform_11, window_bounds = array<i64: 9, 32, 64>}, {pipeline_mode = #tpu.pipeline_mode<synchronous>, transform_indices = @transform_12, window_bounds = array<i64: 1, 64>}, {pipeline_mode = #tpu.pipeline_mode<synchronous>, transform_indices = @transform_13, window_bounds = array<i64: 9, 1, 16>}, {pipeline_mode = #tpu.pipeline_mode<synchronous>, transform_indices = @transform_14, window_bounds = array<i64: 1, 16>}, {pipeline_mode = #tpu.pipeline_mode<synchronous>, transform_indices = @transform_15, window_bounds = array<i64: 25, 16, 32>}, {pipeline_mode = #tpu.pipeline_mode<synchronous>, transform_indices = @transform_16, window_bounds = array<i64: 1, 32>}, {pipeline_mode = #tpu.pipeline_mode<synchronous>, transform_indices = @transform_17, window_bounds = array<i64: 25, 32, 64>}, {pipeline_mode = #tpu.pipeline_mode<synchronous>, transform_indices = @transform_18, window_bounds = array<i64: 1, 64>}, {pipeline_mode = #tpu.pipeline_mode<synchronous>, transform_indices = @transform_19, window_bounds = array<i64: 64, 32>}, {pipeline_mode = #tpu.pipeline_mode<synchronous>, transform_indices = @transform_20, window_bounds = array<i64: 1, 32>}, {pipeline_mode = #tpu.pipeline_mode<synchronous>, transform_indices = @transform_21, window_bounds = array<i64: 32, 16>}, {pipeline_mode = #tpu.pipeline_mode<synchronous>, transform_indices = @transform_22, window_bounds = array<i64: 1, 16>}, {pipeline_mode = #tpu.pipeline_mode<synchronous>, transform_indices = @transform_23, window_bounds = array<i64: 16, 10>}, {pipeline_mode = #tpu.pipeline_mode<synchronous>, transform_indices = @transform_24, window_bounds = array<i64: 1, 10>}, {transform_indices = @transform_25, window_bounds = array<i64: 1, 1, 10>}]} {
    %c0 = arith.constant 0 : index
    %c0_0 = arith.constant 0 : index
    %c0_1 = arith.constant 0 : index
    %c0_2 = arith.constant 0 : index
    %0 = vector.load %arg1[%c0, %c0_0, %c0_1, %c0_2] : memref<1x25x25x1xf32, #tpu.memory_space<vmem>>, vector<1x25x25x1xf32>
    %1 = vector.shape_cast %0 : vector<1x25x25x1xf32> to vector<25x25x1xf32>
    %c0_3 = arith.constant 0 : index
    %c0_4 = arith.constant 0 : index
    %c0_5 = arith.constant 0 : index
    %2 = vector.load %arg27[%c0_3, %c0_4, %c0_5] : memref<25x25x1xf32, #tpu.memory_space<vmem>>, vector<25x25x1xf32>
    tpu.vector_store %arg27[%c0_3, %c0_4, %c0_5], %1 {strides = array<i32>} : memref<25x25x1xf32, #tpu.memory_space<vmem>>, vector<25x25x1xf32>,
    %cst = arith.constant 0.000000e+00 : f32
    %3 = vector.broadcast %cst : f32 to vector<14x14x16xf32>
    %c0_6 = arith.constant 0 : index
    %c0_7 = arith.constant 0 : index
    %c0_8 = arith.constant 0 : index
    %4 = vector.load %arg28[%c0_6, %c0_7, %c0_8] : memref<14x14x16xf32, #tpu.memory_space<vmem>>, vector<14x14x16xf32>
    tpu.vector_store %arg28[%c0_6, %c0_7, %c0_8], %3 {strides = array<i32>} : memref<14x14x16xf32, #tpu.memory_space<vmem>>, vector<14x14x16xf32>,
    %cst_9 = arith.constant 0.000000e+00 : f32
    %5 = vector.broadcast %cst_9 : f32 to vector<14x14x16xf32>
    %c0_10 = arith.constant 0 : index
    %c0_11 = arith.constant 0 : index
    %c0_12 = arith.constant 0 : index
    %6 = vector.load %arg29[%c0_10, %c0_11, %c0_12] : memref<14x14x16xf32, #tpu.memory_space<vmem>>, vector<14x14x16xf32>
    tpu.vector_store %arg29[%c0_10, %c0_11, %c0_12], %5 {strides = array<i32>} : memref<14x14x16xf32, #tpu.memory_space<vmem>>, vector<14x14x16xf32>,
    %cst_13 = arith.constant 0.000000e+00 : f32
    %7 = vector.broadcast %cst_13 : f32 to vector<8x8x32xf32>
    %c0_14 = arith.constant 0 : index
    %c0_15 = arith.constant 0 : index
    %c0_16 = arith.constant 0 : index
    %8 = vector.load %arg30[%c0_14, %c0_15, %c0_16] : memref<8x8x32xf32, #tpu.memory_space<vmem>>, vector<8x8x32xf32>
    tpu.vector_store %arg30[%c0_14, %c0_15, %c0_16], %7 {strides = array<i32>} : memref<8x8x32xf32, #tpu.memory_space<vmem>>, vector<8x8x32xf32>,
    %9 = tpu.iota {dimensions = array<i32: 0>} : vector<6x11xi32>
    %10 = tpu.iota {dimensions = array<i32: 1>} : vector<6x11xi32>
    %c2_i32 = arith.constant 2 : i32
    %11 = vector.broadcast %c2_i32 : i32 to vector<6x11xi32>
    %12 = arith.muli %11, %9 : vector<6x11xi32>
    %13 = arith.cmpi eq, %10, %12 : vector<6x11xi32>
    %14 = arith.extui %13 : vector<6x11xi1> to vector<6x11xi32>
    %15 = arith.sitofp %14 : vector<6x11xi32> to vector<6x11xf32>
    %16 = tpu.iota {dimensions = array<i32: 0>} : vector<3x5xi32>
    %17 = tpu.iota {dimensions = array<i32: 1>} : vector<3x5xi32>
    %c2_i32_17 = arith.constant 2 : i32
    %18 = vector.broadcast %c2_i32_17 : i32 to vector<3x5xi32>
    %19 = arith.muli %18, %16 : vector<3x5xi32>
    %20 = arith.cmpi eq, %17, %19 : vector<3x5xi32>
    %21 = arith.extui %20 : vector<3x5xi1> to vector<3x5xi32>
    %22 = arith.sitofp %21 : vector<3x5xi32> to vector<3x5xf32>
    %c0_18 = arith.constant 0 : index
    %c0_19 = arith.constant 0 : index
    %23 = vector.load %arg3[%c0_18, %c0_19] : memref<1x16xf32, #tpu.memory_space<vmem>>, vector<1x16xf32>
    %24 = tpu.iota {dimensions = array<i32: 0>} : vector<12x23xi32>
    %25 = tpu.iota {dimensions = array<i32: 1>} : vector<12x23xi32>
    %c2_i32_20 = arith.constant 2 : i32
    %26 = vector.broadcast %c2_i32_20 : i32 to vector<12x23xi32>
    %27 = arith.muli %26, %24 : vector<12x23xi32>
    %28 = arith.cmpi eq, %25, %27 : vector<12x23xi32>
    %29 = arith.extui %28 : vector<12x23xi1> to vector<12x23xi32>
    %30 = arith.sitofp %29 : vector<12x23xi32> to vector<12x23xf32>
    %c0_i32 = arith.constant 0 : i32
    %c12_i32 = arith.constant 12 : i32
    %31 = arith.addi %c0_i32, %c12_i32 : i32
    %c1_i32 = arith.constant 1 : i32
    scf.for %arg35 = %c0_i32 to %31 step %c1_i32  : i32 {
      %cst_97 = arith.constant 0.000000e+00 : f32
      %120 = vector.broadcast %cst_97 : f32 to vector<23x16xf32>
      %c2_i32_98 = arith.constant 2 : i32
      %121 = arith.muli %c2_i32_98, %arg35 : i32
      %c0_i32_99 = arith.constant 0 : i32
      %122 = arith.addi %c0_i32_99, %121 : i32
      %c0_i32_100 = arith.constant 0 : i32
      %123 = arith.addi %122, %c0_i32_100 : i32
      %124 = arith.index_cast %123 : i32 to index
      %c0_101 = arith.constant 0 : index
      %c0_102 = arith.constant 0 : index
      %125 = vector.load %arg27[%124, %c0_101, %c0_102] : memref<25x25x1xf32, #tpu.memory_space<vmem>>, vector<1x23x1xf32>
      %126 = vector.shape_cast %125 : vector<1x23x1xf32> to vector<23x1xf32>
      %c0_103 = arith.constant 0 : index
      %c0_104 = arith.constant 0 : index
      %c0_105 = arith.constant 0 : index
      %127 = vector.load %arg2[%c0_103, %c0_104, %c0_105] : memref<9x1x16xf32, #tpu.memory_space<vmem>>, vector<1x1x16xf32>
      %128 = vector.shape_cast %127 : vector<1x1x16xf32> to vector<1x16xf32>
      %129 = vector.broadcast %126 : vector<23x1xf32> to vector<23x16xf32>
      %130 = vector.broadcast %128 : vector<1x16xf32> to vector<23x16xf32>
      %131 = arith.mulf %129, %130 : vector<23x16xf32>
      %132 = arith.addf %120, %131 : vector<23x16xf32>
      %133 = arith.index_cast %123 : i32 to index
      %c1_106 = arith.constant 1 : index
      %c0_107 = arith.constant 0 : index
      %134 = vector.load %arg27[%133, %c1_106, %c0_107] : memref<25x25x1xf32, #tpu.memory_space<vmem>>, vector<1x23x1xf32>
      %135 = vector.shape_cast %134 : vector<1x23x1xf32> to vector<23x1xf32>
      %c1_108 = arith.constant 1 : index
      %c0_109 = arith.constant 0 : index
      %c0_110 = arith.constant 0 : index
      %136 = vector.load %arg2[%c1_108, %c0_109, %c0_110] : memref<9x1x16xf32, #tpu.memory_space<vmem>>, vector<1x1x16xf32>
      %137 = vector.shape_cast %136 : vector<1x1x16xf32> to vector<1x16xf32>
      %138 = vector.broadcast %135 : vector<23x1xf32> to vector<23x16xf32>
      %139 = vector.broadcast %137 : vector<1x16xf32> to vector<23x16xf32>
      %140 = arith.mulf %138, %139 : vector<23x16xf32>
      %141 = arith.addf %132, %140 : vector<23x16xf32>
      %142 = arith.index_cast %123 : i32 to index
      %c2_111 = arith.constant 2 : index
      %c0_112 = arith.constant 0 : index
      %143 = vector.load %arg27[%142, %c2_111, %c0_112] : memref<25x25x1xf32, #tpu.memory_space<vmem>>, vector<1x23x1xf32>
      %144 = vector.shape_cast %143 : vector<1x23x1xf32> to vector<23x1xf32>
      %c2_113 = arith.constant 2 : index
      %c0_114 = arith.constant 0 : index
      %c0_115 = arith.constant 0 : index
      %145 = vector.load %arg2[%c2_113, %c0_114, %c0_115] : memref<9x1x16xf32, #tpu.memory_space<vmem>>, vector<1x1x16xf32>
      %146 = vector.shape_cast %145 : vector<1x1x16xf32> to vector<1x16xf32>
      %147 = vector.broadcast %144 : vector<23x1xf32> to vector<23x16xf32>
      %148 = vector.broadcast %146 : vector<1x16xf32> to vector<23x16xf32>
      %149 = arith.mulf %147, %148 : vector<23x16xf32>
      %150 = arith.addf %141, %149 : vector<23x16xf32>
      %c2_i32_116 = arith.constant 2 : i32
      %151 = arith.muli %c2_i32_116, %arg35 : i32
      %c0_i32_117 = arith.constant 0 : i32
      %152 = arith.addi %c0_i32_117, %151 : i32
      %c1_i32_118 = arith.constant 1 : i32
      %153 = arith.addi %152, %c1_i32_118 : i32
      %154 = arith.index_cast %153 : i32 to index
      %c0_119 = arith.constant 0 : index
      %c0_120 = arith.constant 0 : index
      %155 = vector.load %arg27[%154, %c0_119, %c0_120] : memref<25x25x1xf32, #tpu.memory_space<vmem>>, vector<1x23x1xf32>
      %156 = vector.shape_cast %155 : vector<1x23x1xf32> to vector<23x1xf32>
      %c3 = arith.constant 3 : index
      %c0_121 = arith.constant 0 : index
      %c0_122 = arith.constant 0 : index
      %157 = vector.load %arg2[%c3, %c0_121, %c0_122] : memref<9x1x16xf32, #tpu.memory_space<vmem>>, vector<1x1x16xf32>
      %158 = vector.shape_cast %157 : vector<1x1x16xf32> to vector<1x16xf32>
      %159 = vector.broadcast %156 : vector<23x1xf32> to vector<23x16xf32>
      %160 = vector.broadcast %158 : vector<1x16xf32> to vector<23x16xf32>
      %161 = arith.mulf %159, %160 : vector<23x16xf32>
      %162 = arith.addf %150, %161 : vector<23x16xf32>
      %163 = arith.index_cast %153 : i32 to index
      %c1_123 = arith.constant 1 : index
      %c0_124 = arith.constant 0 : index
      %164 = vector.load %arg27[%163, %c1_123, %c0_124] : memref<25x25x1xf32, #tpu.memory_space<vmem>>, vector<1x23x1xf32>
      %165 = vector.shape_cast %164 : vector<1x23x1xf32> to vector<23x1xf32>
      %c4 = arith.constant 4 : index
      %c0_125 = arith.constant 0 : index
      %c0_126 = arith.constant 0 : index
      %166 = vector.load %arg2[%c4, %c0_125, %c0_126] : memref<9x1x16xf32, #tpu.memory_space<vmem>>, vector<1x1x16xf32>
      %167 = vector.shape_cast %166 : vector<1x1x16xf32> to vector<1x16xf32>
      %168 = vector.broadcast %165 : vector<23x1xf32> to vector<23x16xf32>
      %169 = vector.broadcast %167 : vector<1x16xf32> to vector<23x16xf32>
      %170 = arith.mulf %168, %169 : vector<23x16xf32>
      %171 = arith.addf %162, %170 : vector<23x16xf32>
      %172 = arith.index_cast %153 : i32 to index
      %c2_127 = arith.constant 2 : index
      %c0_128 = arith.constant 0 : index
      %173 = vector.load %arg27[%172, %c2_127, %c0_128] : memref<25x25x1xf32, #tpu.memory_space<vmem>>, vector<1x23x1xf32>
      %174 = vector.shape_cast %173 : vector<1x23x1xf32> to vector<23x1xf32>
      %c5 = arith.constant 5 : index
      %c0_129 = arith.constant 0 : index
      %c0_130 = arith.constant 0 : index
      %175 = vector.load %arg2[%c5, %c0_129, %c0_130] : memref<9x1x16xf32, #tpu.memory_space<vmem>>, vector<1x1x16xf32>
      %176 = vector.shape_cast %175 : vector<1x1x16xf32> to vector<1x16xf32>
      %177 = vector.broadcast %174 : vector<23x1xf32> to vector<23x16xf32>
      %178 = vector.broadcast %176 : vector<1x16xf32> to vector<23x16xf32>
      %179 = arith.mulf %177, %178 : vector<23x16xf32>
      %180 = arith.addf %171, %179 : vector<23x16xf32>
      %c2_i32_131 = arith.constant 2 : i32
      %181 = arith.muli %c2_i32_131, %arg35 : i32
      %c0_i32_132 = arith.constant 0 : i32
      %182 = arith.addi %c0_i32_132, %181 : i32
      %c2_i32_133 = arith.constant 2 : i32
      %183 = arith.addi %182, %c2_i32_133 : i32
      %184 = arith.index_cast %183 : i32 to index
      %c0_134 = arith.constant 0 : index
      %c0_135 = arith.constant 0 : index
      %185 = vector.load %arg27[%184, %c0_134, %c0_135] : memref<25x25x1xf32, #tpu.memory_space<vmem>>, vector<1x23x1xf32>
      %186 = vector.shape_cast %185 : vector<1x23x1xf32> to vector<23x1xf32>
      %c6 = arith.constant 6 : index
      %c0_136 = arith.constant 0 : index
      %c0_137 = arith.constant 0 : index
      %187 = vector.load %arg2[%c6, %c0_136, %c0_137] : memref<9x1x16xf32, #tpu.memory_space<vmem>>, vector<1x1x16xf32>
      %188 = vector.shape_cast %187 : vector<1x1x16xf32> to vector<1x16xf32>
      %189 = vector.broadcast %186 : vector<23x1xf32> to vector<23x16xf32>
      %190 = vector.broadcast %188 : vector<1x16xf32> to vector<23x16xf32>
      %191 = arith.mulf %189, %190 : vector<23x16xf32>
      %192 = arith.addf %180, %191 : vector<23x16xf32>
      %193 = arith.index_cast %183 : i32 to index
      %c1_138 = arith.constant 1 : index
      %c0_139 = arith.constant 0 : index
      %194 = vector.load %arg27[%193, %c1_138, %c0_139] : memref<25x25x1xf32, #tpu.memory_space<vmem>>, vector<1x23x1xf32>
      %195 = vector.shape_cast %194 : vector<1x23x1xf32> to vector<23x1xf32>
      %c7 = arith.constant 7 : index
      %c0_140 = arith.constant 0 : index
      %c0_141 = arith.constant 0 : index
      %196 = vector.load %arg2[%c7, %c0_140, %c0_141] : memref<9x1x16xf32, #tpu.memory_space<vmem>>, vector<1x1x16xf32>
      %197 = vector.shape_cast %196 : vector<1x1x16xf32> to vector<1x16xf32>
      %198 = vector.broadcast %195 : vector<23x1xf32> to vector<23x16xf32>
      %199 = vector.broadcast %197 : vector<1x16xf32> to vector<23x16xf32>
      %200 = arith.mulf %198, %199 : vector<23x16xf32>
      %201 = arith.addf %192, %200 : vector<23x16xf32>
      %202 = arith.index_cast %183 : i32 to index
      %c2_142 = arith.constant 2 : index
      %c0_143 = arith.constant 0 : index
      %203 = vector.load %arg27[%202, %c2_142, %c0_143] : memref<25x25x1xf32, #tpu.memory_space<vmem>>, vector<1x23x1xf32>
      %204 = vector.shape_cast %203 : vector<1x23x1xf32> to vector<23x1xf32>
      %c8 = arith.constant 8 : index
      %c0_144 = arith.constant 0 : index
      %c0_145 = arith.constant 0 : index
      %205 = vector.load %arg2[%c8, %c0_144, %c0_145] : memref<9x1x16xf32, #tpu.memory_space<vmem>>, vector<1x1x16xf32>
      %206 = vector.shape_cast %205 : vector<1x1x16xf32> to vector<1x16xf32>
      %207 = vector.broadcast %204 : vector<23x1xf32> to vector<23x16xf32>
      %208 = vector.broadcast %206 : vector<1x16xf32> to vector<23x16xf32>
      %209 = arith.mulf %207, %208 : vector<23x16xf32>
      %210 = arith.addf %201, %209 : vector<23x16xf32>
      %cst_146 = arith.constant dense<0.000000e+00> : vector<12x16xf32>
      %211 = tpu.matmul %30, %210, %cst_146 {dimension_numbers = #tpu.dot_dimension_numbers<[1], [0], [0], [1], [0, 0, 1, 1], [], []>} : vector<12x23xf32>, vector<23x16xf32>, vector<12x16xf32> -> vector<12x16xf32>
      %212 = vector.broadcast %23 : vector<1x16xf32> to vector<12x16xf32>
      %213 = arith.addf %211, %212 : vector<12x16xf32>
      %cst_147 = arith.constant 0.000000e+00 : f32
      %214 = vector.broadcast %cst_147 : f32 to vector<12x16xf32>
      %215 = arith.maximumf %213, %214 : vector<12x16xf32>
      %c1_i32_148 = arith.constant 1 : i32
      %216 = arith.addi %c1_i32_148, %arg35 : i32
      %217 = arith.index_cast %216 : i32 to index
      %c1_149 = arith.constant 1 : index
      %c0_150 = arith.constant 0 : index
      %218 = vector.load %arg28[%217, %c1_149, %c0_150] : memref<14x14x16xf32, #tpu.memory_space<vmem>>, vector<1x12x16xf32>
      %219 = vector.shape_cast %218 : vector<1x12x16xf32> to vector<12x16xf32>
      %220 = vector.shape_cast %215 : vector<12x16xf32> to vector<1x12x16xf32>
      tpu.vector_store %arg28[%217, %c1_149, %c0_150], %220 {strides = array<i32>} : memref<14x14x16xf32, #tpu.memory_space<vmem>>, vector<1x12x16xf32>,
    }
    %c12_i32_21 = arith.constant 12 : i32
    %c0_22 = arith.constant 0 : index
    %c0_23 = arith.constant 0 : index
    %32 = vector.load %arg5[%c0_22, %c0_23] : memref<1x16xf32, #tpu.memory_space<vmem>>, vector<1x16xf32>
    %c0_i32_24 = arith.constant 0 : i32
    %c12_i32_25 = arith.constant 12 : i32
    %33 = arith.addi %c0_i32_24, %c12_i32_25 : i32
    %c1_i32_26 = arith.constant 1 : i32
    scf.for %arg35 = %c0_i32_24 to %33 step %c1_i32_26  : i32 {
      %cst_97 = arith.constant 0.000000e+00 : f32
      %120 = vector.broadcast %cst_97 : f32 to vector<12x16xf32>
      %c1_i32_98 = arith.constant 1 : i32
      %121 = arith.muli %c1_i32_98, %arg35 : i32
      %c0_i32_99 = arith.constant 0 : i32
      %122 = arith.addi %c0_i32_99, %121 : i32
      %c0_i32_100 = arith.constant 0 : i32
      %123 = arith.addi %122, %c0_i32_100 : i32
      %124 = arith.index_cast %123 : i32 to index
      %c0_101 = arith.constant 0 : index
      %c0_102 = arith.constant 0 : index
      %125 = vector.load %arg28[%124, %c0_101, %c0_102] : memref<14x14x16xf32, #tpu.memory_space<vmem>>, vector<1x12x16xf32>
      %126 = vector.shape_cast %125 : vector<1x12x16xf32> to vector<12x16xf32>
      %c0_103 = arith.constant 0 : index
      %c0_104 = arith.constant 0 : index
      %c0_105 = arith.constant 0 : index
      %127 = vector.load %arg4[%c0_103, %c0_104, %c0_105] : memref<9x16x16xf32, #tpu.memory_space<vmem>>, vector<1x16x16xf32>
      %128 = vector.shape_cast %127 : vector<1x16x16xf32> to vector<16x16xf32>
      %cst_106 = arith.constant dense<0.000000e+00> : vector<12x16xf32>
      %129 = tpu.matmul %126, %128, %cst_106 {dimension_numbers = #tpu.dot_dimension_numbers<[1], [0], [0], [1], [0, 0, 1, 1], [], []>} : vector<12x16xf32>, vector<16x16xf32>, vector<12x16xf32> -> vector<12x16xf32>
      %130 = arith.addf %120, %129 : vector<12x16xf32>
      %131 = arith.index_cast %123 : i32 to index
      %c1_107 = arith.constant 1 : index
      %c0_108 = arith.constant 0 : index
      %132 = vector.load %arg28[%131, %c1_107, %c0_108] : memref<14x14x16xf32, #tpu.memory_space<vmem>>, vector<1x12x16xf32>
      %133 = vector.shape_cast %132 : vector<1x12x16xf32> to vector<12x16xf32>
      %c1_109 = arith.constant 1 : index
      %c0_110 = arith.constant 0 : index
      %c0_111 = arith.constant 0 : index
      %134 = vector.load %arg4[%c1_109, %c0_110, %c0_111] : memref<9x16x16xf32, #tpu.memory_space<vmem>>, vector<1x16x16xf32>
      %135 = vector.shape_cast %134 : vector<1x16x16xf32> to vector<16x16xf32>
      %cst_112 = arith.constant dense<0.000000e+00> : vector<12x16xf32>
      %136 = tpu.matmul %133, %135, %cst_112 {dimension_numbers = #tpu.dot_dimension_numbers<[1], [0], [0], [1], [0, 0, 1, 1], [], []>} : vector<12x16xf32>, vector<16x16xf32>, vector<12x16xf32> -> vector<12x16xf32>
      %137 = arith.addf %130, %136 : vector<12x16xf32>
      %138 = arith.index_cast %123 : i32 to index
      %c2_113 = arith.constant 2 : index
      %c0_114 = arith.constant 0 : index
      %139 = vector.load %arg28[%138, %c2_113, %c0_114] : memref<14x14x16xf32, #tpu.memory_space<vmem>>, vector<1x12x16xf32>
      %140 = vector.shape_cast %139 : vector<1x12x16xf32> to vector<12x16xf32>
      %c2_115 = arith.constant 2 : index
      %c0_116 = arith.constant 0 : index
      %c0_117 = arith.constant 0 : index
      %141 = vector.load %arg4[%c2_115, %c0_116, %c0_117] : memref<9x16x16xf32, #tpu.memory_space<vmem>>, vector<1x16x16xf32>
      %142 = vector.shape_cast %141 : vector<1x16x16xf32> to vector<16x16xf32>
      %cst_118 = arith.constant dense<0.000000e+00> : vector<12x16xf32>
      %143 = tpu.matmul %140, %142, %cst_118 {dimension_numbers = #tpu.dot_dimension_numbers<[1], [0], [0], [1], [0, 0, 1, 1], [], []>} : vector<12x16xf32>, vector<16x16xf32>, vector<12x16xf32> -> vector<12x16xf32>
      %144 = arith.addf %137, %143 : vector<12x16xf32>
      %c1_i32_119 = arith.constant 1 : i32
      %145 = arith.muli %c1_i32_119, %arg35 : i32
      %c0_i32_120 = arith.constant 0 : i32
      %146 = arith.addi %c0_i32_120, %145 : i32
      %c1_i32_121 = arith.constant 1 : i32
      %147 = arith.addi %146, %c1_i32_121 : i32
      %148 = arith.index_cast %147 : i32 to index
      %c0_122 = arith.constant 0 : index
      %c0_123 = arith.constant 0 : index
      %149 = vector.load %arg28[%148, %c0_122, %c0_123] : memref<14x14x16xf32, #tpu.memory_space<vmem>>, vector<1x12x16xf32>
      %150 = vector.shape_cast %149 : vector<1x12x16xf32> to vector<12x16xf32>
      %c3 = arith.constant 3 : index
      %c0_124 = arith.constant 0 : index
      %c0_125 = arith.constant 0 : index
      %151 = vector.load %arg4[%c3, %c0_124, %c0_125] : memref<9x16x16xf32, #tpu.memory_space<vmem>>, vector<1x16x16xf32>
      %152 = vector.shape_cast %151 : vector<1x16x16xf32> to vector<16x16xf32>
      %cst_126 = arith.constant dense<0.000000e+00> : vector<12x16xf32>
      %153 = tpu.matmul %150, %152, %cst_126 {dimension_numbers = #tpu.dot_dimension_numbers<[1], [0], [0], [1], [0, 0, 1, 1], [], []>} : vector<12x16xf32>, vector<16x16xf32>, vector<12x16xf32> -> vector<12x16xf32>
      %154 = arith.addf %144, %153 : vector<12x16xf32>
      %155 = arith.index_cast %147 : i32 to index
      %c1_127 = arith.constant 1 : index
      %c0_128 = arith.constant 0 : index
      %156 = vector.load %arg28[%155, %c1_127, %c0_128] : memref<14x14x16xf32, #tpu.memory_space<vmem>>, vector<1x12x16xf32>
      %157 = vector.shape_cast %156 : vector<1x12x16xf32> to vector<12x16xf32>
      %c4 = arith.constant 4 : index
      %c0_129 = arith.constant 0 : index
      %c0_130 = arith.constant 0 : index
      %158 = vector.load %arg4[%c4, %c0_129, %c0_130] : memref<9x16x16xf32, #tpu.memory_space<vmem>>, vector<1x16x16xf32>
      %159 = vector.shape_cast %158 : vector<1x16x16xf32> to vector<16x16xf32>
      %cst_131 = arith.constant dense<0.000000e+00> : vector<12x16xf32>
      %160 = tpu.matmul %157, %159, %cst_131 {dimension_numbers = #tpu.dot_dimension_numbers<[1], [0], [0], [1], [0, 0, 1, 1], [], []>} : vector<12x16xf32>, vector<16x16xf32>, vector<12x16xf32> -> vector<12x16xf32>
      %161 = arith.addf %154, %160 : vector<12x16xf32>
      %162 = arith.index_cast %147 : i32 to index
      %c2_132 = arith.constant 2 : index
      %c0_133 = arith.constant 0 : index
      %163 = vector.load %arg28[%162, %c2_132, %c0_133] : memref<14x14x16xf32, #tpu.memory_space<vmem>>, vector<1x12x16xf32>
      %164 = vector.shape_cast %163 : vector<1x12x16xf32> to vector<12x16xf32>
      %c5 = arith.constant 5 : index
      %c0_134 = arith.constant 0 : index
      %c0_135 = arith.constant 0 : index
      %165 = vector.load %arg4[%c5, %c0_134, %c0_135] : memref<9x16x16xf32, #tpu.memory_space<vmem>>, vector<1x16x16xf32>
      %166 = vector.shape_cast %165 : vector<1x16x16xf32> to vector<16x16xf32>
      %cst_136 = arith.constant dense<0.000000e+00> : vector<12x16xf32>
      %167 = tpu.matmul %164, %166, %cst_136 {dimension_numbers = #tpu.dot_dimension_numbers<[1], [0], [0], [1], [0, 0, 1, 1], [], []>} : vector<12x16xf32>, vector<16x16xf32>, vector<12x16xf32> -> vector<12x16xf32>
      %168 = arith.addf %161, %167 : vector<12x16xf32>
      %c1_i32_137 = arith.constant 1 : i32
      %169 = arith.muli %c1_i32_137, %arg35 : i32
      %c0_i32_138 = arith.constant 0 : i32
      %170 = arith.addi %c0_i32_138, %169 : i32
      %c2_i32_139 = arith.constant 2 : i32
      %171 = arith.addi %170, %c2_i32_139 : i32
      %172 = arith.index_cast %171 : i32 to index
      %c0_140 = arith.constant 0 : index
      %c0_141 = arith.constant 0 : index
      %173 = vector.load %arg28[%172, %c0_140, %c0_141] : memref<14x14x16xf32, #tpu.memory_space<vmem>>, vector<1x12x16xf32>
      %174 = vector.shape_cast %173 : vector<1x12x16xf32> to vector<12x16xf32>
      %c6 = arith.constant 6 : index
      %c0_142 = arith.constant 0 : index
      %c0_143 = arith.constant 0 : index
      %175 = vector.load %arg4[%c6, %c0_142, %c0_143] : memref<9x16x16xf32, #tpu.memory_space<vmem>>, vector<1x16x16xf32>
      %176 = vector.shape_cast %175 : vector<1x16x16xf32> to vector<16x16xf32>
      %cst_144 = arith.constant dense<0.000000e+00> : vector<12x16xf32>
      %177 = tpu.matmul %174, %176, %cst_144 {dimension_numbers = #tpu.dot_dimension_numbers<[1], [0], [0], [1], [0, 0, 1, 1], [], []>} : vector<12x16xf32>, vector<16x16xf32>, vector<12x16xf32> -> vector<12x16xf32>
      %178 = arith.addf %168, %177 : vector<12x16xf32>
      %179 = arith.index_cast %171 : i32 to index
      %c1_145 = arith.constant 1 : index
      %c0_146 = arith.constant 0 : index
      %180 = vector.load %arg28[%179, %c1_145, %c0_146] : memref<14x14x16xf32, #tpu.memory_space<vmem>>, vector<1x12x16xf32>
      %181 = vector.shape_cast %180 : vector<1x12x16xf32> to vector<12x16xf32>
      %c7 = arith.constant 7 : index
      %c0_147 = arith.constant 0 : index
      %c0_148 = arith.constant 0 : index
      %182 = vector.load %arg4[%c7, %c0_147, %c0_148] : memref<9x16x16xf32, #tpu.memory_space<vmem>>, vector<1x16x16xf32>
      %183 = vector.shape_cast %182 : vector<1x16x16xf32> to vector<16x16xf32>
      %cst_149 = arith.constant dense<0.000000e+00> : vector<12x16xf32>
      %184 = tpu.matmul %181, %183, %cst_149 {dimension_numbers = #tpu.dot_dimension_numbers<[1], [0], [0], [1], [0, 0, 1, 1], [], []>} : vector<12x16xf32>, vector<16x16xf32>, vector<12x16xf32> -> vector<12x16xf32>
      %185 = arith.addf %178, %184 : vector<12x16xf32>
      %186 = arith.index_cast %171 : i32 to index
      %c2_150 = arith.constant 2 : index
      %c0_151 = arith.constant 0 : index
      %187 = vector.load %arg28[%186, %c2_150, %c0_151] : memref<14x14x16xf32, #tpu.memory_space<vmem>>, vector<1x12x16xf32>
      %188 = vector.shape_cast %187 : vector<1x12x16xf32> to vector<12x16xf32>
      %c8 = arith.constant 8 : index
      %c0_152 = arith.constant 0 : index
      %c0_153 = arith.constant 0 : index
      %189 = vector.load %arg4[%c8, %c0_152, %c0_153] : memref<9x16x16xf32, #tpu.memory_space<vmem>>, vector<1x16x16xf32>
      %190 = vector.shape_cast %189 : vector<1x16x16xf32> to vector<16x16xf32>
      %cst_154 = arith.constant dense<0.000000e+00> : vector<12x16xf32>
      %191 = tpu.matmul %188, %190, %cst_154 {dimension_numbers = #tpu.dot_dimension_numbers<[1], [0], [0], [1], [0, 0, 1, 1], [], []>} : vector<12x16xf32>, vector<16x16xf32>, vector<12x16xf32> -> vector<12x16xf32>
      %192 = arith.addf %185, %191 : vector<12x16xf32>
      %193 = vector.broadcast %32 : vector<1x16xf32> to vector<12x16xf32>
      %194 = arith.addf %192, %193 : vector<12x16xf32>
      %c1_i32_155 = arith.constant 1 : i32
      %195 = arith.addi %c1_i32_155, %arg35 : i32
      %196 = arith.index_cast %195 : i32 to index
      %c1_156 = arith.constant 1 : index
      %c0_157 = arith.constant 0 : index
      %197 = vector.load %arg28[%196, %c1_156, %c0_157] : memref<14x14x16xf32, #tpu.memory_space<vmem>>, vector<1x12x16xf32>
      %198 = vector.shape_cast %197 : vector<1x12x16xf32> to vector<12x16xf32>
      %199 = arith.addf %194, %198 : vector<12x16xf32>
      %cst_158 = arith.constant 0.000000e+00 : f32
      %200 = vector.broadcast %cst_158 : f32 to vector<12x16xf32>
      %201 = arith.maximumf %199, %200 : vector<12x16xf32>
      %c1_i32_159 = arith.constant 1 : i32
      %202 = arith.addi %c1_i32_159, %arg35 : i32
      %203 = arith.index_cast %202 : i32 to index
      %c1_160 = arith.constant 1 : index
      %c0_161 = arith.constant 0 : index
      %204 = vector.load %arg29[%203, %c1_160, %c0_161] : memref<14x14x16xf32, #tpu.memory_space<vmem>>, vector<1x12x16xf32>
      %205 = vector.shape_cast %204 : vector<1x12x16xf32> to vector<12x16xf32>
      %206 = vector.shape_cast %201 : vector<12x16xf32> to vector<1x12x16xf32>
      tpu.vector_store %arg29[%203, %c1_160, %c0_161], %206 {strides = array<i32>} : memref<14x14x16xf32, #tpu.memory_space<vmem>>, vector<1x12x16xf32>,
    }
    %c12_i32_27 = arith.constant 12 : i32
    %c0_28 = arith.constant 0 : index
    %c0_29 = arith.constant 0 : index
    %34 = vector.load %arg9[%c0_28, %c0_29] : memref<1x32xf32, #tpu.memory_space<vmem>>, vector<1x32xf32>
    %35 = tpu.iota {dimensions = array<i32: 0>} : vector<6x11xi32>
    %36 = tpu.iota {dimensions = array<i32: 1>} : vector<6x11xi32>
    %c2_i32_30 = arith.constant 2 : i32
    %37 = vector.broadcast %c2_i32_30 : i32 to vector<6x11xi32>
    %38 = arith.muli %37, %35 : vector<6x11xi32>
    %39 = arith.cmpi eq, %36, %38 : vector<6x11xi32>
    %40 = arith.extui %39 : vector<6x11xi1> to vector<6x11xi32>
    %41 = arith.sitofp %40 : vector<6x11xi32> to vector<6x11xf32>
    %c0_i32_31 = arith.constant 0 : i32
    %c6_i32 = arith.constant 6 : i32
    %42 = arith.addi %c0_i32_31, %c6_i32 : i32
    %c1_i32_32 = arith.constant 1 : i32
    scf.for %arg35 = %c0_i32_31 to %42 step %c1_i32_32  : i32 {
      %cst_97 = arith.constant 0.000000e+00 : f32
      %120 = vector.broadcast %cst_97 : f32 to vector<11x32xf32>
      %c2_i32_98 = arith.constant 2 : i32
      %121 = arith.muli %c2_i32_98, %arg35 : i32
      %c0_i32_99 = arith.constant 0 : i32
      %122 = arith.addi %c0_i32_99, %121 : i32
      %c0_i32_100 = arith.constant 0 : i32
      %123 = arith.addi %122, %c0_i32_100 : i32
      %124 = arith.index_cast %123 : i32 to index
      %c0_101 = arith.constant 0 : index
      %c0_102 = arith.constant 0 : index
      %125 = vector.load %arg29[%124, %c0_101, %c0_102] : memref<14x14x16xf32, #tpu.memory_space<vmem>>, vector<1x11x16xf32>
      %126 = vector.shape_cast %125 : vector<1x11x16xf32> to vector<11x16xf32>
      %c0_103 = arith.constant 0 : index
      %c0_104 = arith.constant 0 : index
      %c0_105 = arith.constant 0 : index
      %127 = vector.load %arg8[%c0_103, %c0_104, %c0_105] : memref<9x16x32xf32, #tpu.memory_space<vmem>>, vector<1x16x32xf32>
      %128 = vector.shape_cast %127 : vector<1x16x32xf32> to vector<16x32xf32>
      %cst_106 = arith.constant dense<0.000000e+00> : vector<11x32xf32>
      %129 = tpu.matmul %126, %128, %cst_106 {dimension_numbers = #tpu.dot_dimension_numbers<[1], [0], [0], [1], [0, 0, 1, 1], [], []>} : vector<11x16xf32>, vector<16x32xf32>, vector<11x32xf32> -> vector<11x32xf32>
      %130 = arith.addf %120, %129 : vector<11x32xf32>
      %131 = arith.index_cast %123 : i32 to index
      %c1_107 = arith.constant 1 : index
      %c0_108 = arith.constant 0 : index
      %132 = vector.load %arg29[%131, %c1_107, %c0_108] : memref<14x14x16xf32, #tpu.memory_space<vmem>>, vector<1x11x16xf32>
      %133 = vector.shape_cast %132 : vector<1x11x16xf32> to vector<11x16xf32>
      %c1_109 = arith.constant 1 : index
      %c0_110 = arith.constant 0 : index
      %c0_111 = arith.constant 0 : index
      %134 = vector.load %arg8[%c1_109, %c0_110, %c0_111] : memref<9x16x32xf32, #tpu.memory_space<vmem>>, vector<1x16x32xf32>
      %135 = vector.shape_cast %134 : vector<1x16x32xf32> to vector<16x32xf32>
      %cst_112 = arith.constant dense<0.000000e+00> : vector<11x32xf32>
      %136 = tpu.matmul %133, %135, %cst_112 {dimension_numbers = #tpu.dot_dimension_numbers<[1], [0], [0], [1], [0, 0, 1, 1], [], []>} : vector<11x16xf32>, vector<16x32xf32>, vector<11x32xf32> -> vector<11x32xf32>
      %137 = arith.addf %130, %136 : vector<11x32xf32>
      %138 = arith.index_cast %123 : i32 to index
      %c2_113 = arith.constant 2 : index
      %c0_114 = arith.constant 0 : index
      %139 = vector.load %arg29[%138, %c2_113, %c0_114] : memref<14x14x16xf32, #tpu.memory_space<vmem>>, vector<1x11x16xf32>
      %140 = vector.shape_cast %139 : vector<1x11x16xf32> to vector<11x16xf32>
      %c2_115 = arith.constant 2 : index
      %c0_116 = arith.constant 0 : index
      %c0_117 = arith.constant 0 : index
      %141 = vector.load %arg8[%c2_115, %c0_116, %c0_117] : memref<9x16x32xf32, #tpu.memory_space<vmem>>, vector<1x16x32xf32>
      %142 = vector.shape_cast %141 : vector<1x16x32xf32> to vector<16x32xf32>
      %cst_118 = arith.constant dense<0.000000e+00> : vector<11x32xf32>
      %143 = tpu.matmul %140, %142, %cst_118 {dimension_numbers = #tpu.dot_dimension_numbers<[1], [0], [0], [1], [0, 0, 1, 1], [], []>} : vector<11x16xf32>, vector<16x32xf32>, vector<11x32xf32> -> vector<11x32xf32>
      %144 = arith.addf %137, %143 : vector<11x32xf32>
      %c2_i32_119 = arith.constant 2 : i32
      %145 = arith.muli %c2_i32_119, %arg35 : i32
      %c0_i32_120 = arith.constant 0 : i32
      %146 = arith.addi %c0_i32_120, %145 : i32
      %c1_i32_121 = arith.constant 1 : i32
      %147 = arith.addi %146, %c1_i32_121 : i32
      %148 = arith.index_cast %147 : i32 to index
      %c0_122 = arith.constant 0 : index
      %c0_123 = arith.constant 0 : index
      %149 = vector.load %arg29[%148, %c0_122, %c0_123] : memref<14x14x16xf32, #tpu.memory_space<vmem>>, vector<1x11x16xf32>
      %150 = vector.shape_cast %149 : vector<1x11x16xf32> to vector<11x16xf32>
      %c3 = arith.constant 3 : index
      %c0_124 = arith.constant 0 : index
      %c0_125 = arith.constant 0 : index
      %151 = vector.load %arg8[%c3, %c0_124, %c0_125] : memref<9x16x32xf32, #tpu.memory_space<vmem>>, vector<1x16x32xf32>
      %152 = vector.shape_cast %151 : vector<1x16x32xf32> to vector<16x32xf32>
      %cst_126 = arith.constant dense<0.000000e+00> : vector<11x32xf32>
      %153 = tpu.matmul %150, %152, %cst_126 {dimension_numbers = #tpu.dot_dimension_numbers<[1], [0], [0], [1], [0, 0, 1, 1], [], []>} : vector<11x16xf32>, vector<16x32xf32>, vector<11x32xf32> -> vector<11x32xf32>
      %154 = arith.addf %144, %153 : vector<11x32xf32>
      %155 = arith.index_cast %147 : i32 to index
      %c1_127 = arith.constant 1 : index
      %c0_128 = arith.constant 0 : index
      %156 = vector.load %arg29[%155, %c1_127, %c0_128] : memref<14x14x16xf32, #tpu.memory_space<vmem>>, vector<1x11x16xf32>
      %157 = vector.shape_cast %156 : vector<1x11x16xf32> to vector<11x16xf32>
      %c4 = arith.constant 4 : index
      %c0_129 = arith.constant 0 : index
      %c0_130 = arith.constant 0 : index
      %158 = vector.load %arg8[%c4, %c0_129, %c0_130] : memref<9x16x32xf32, #tpu.memory_space<vmem>>, vector<1x16x32xf32>
      %159 = vector.shape_cast %158 : vector<1x16x32xf32> to vector<16x32xf32>
      %cst_131 = arith.constant dense<0.000000e+00> : vector<11x32xf32>
      %160 = tpu.matmul %157, %159, %cst_131 {dimension_numbers = #tpu.dot_dimension_numbers<[1], [0], [0], [1], [0, 0, 1, 1], [], []>} : vector<11x16xf32>, vector<16x32xf32>, vector<11x32xf32> -> vector<11x32xf32>
      %161 = arith.addf %154, %160 : vector<11x32xf32>
      %162 = arith.index_cast %147 : i32 to index
      %c2_132 = arith.constant 2 : index
      %c0_133 = arith.constant 0 : index
      %163 = vector.load %arg29[%162, %c2_132, %c0_133] : memref<14x14x16xf32, #tpu.memory_space<vmem>>, vector<1x11x16xf32>
      %164 = vector.shape_cast %163 : vector<1x11x16xf32> to vector<11x16xf32>
      %c5 = arith.constant 5 : index
      %c0_134 = arith.constant 0 : index
      %c0_135 = arith.constant 0 : index
      %165 = vector.load %arg8[%c5, %c0_134, %c0_135] : memref<9x16x32xf32, #tpu.memory_space<vmem>>, vector<1x16x32xf32>
      %166 = vector.shape_cast %165 : vector<1x16x32xf32> to vector<16x32xf32>
      %cst_136 = arith.constant dense<0.000000e+00> : vector<11x32xf32>
      %167 = tpu.matmul %164, %166, %cst_136 {dimension_numbers = #tpu.dot_dimension_numbers<[1], [0], [0], [1], [0, 0, 1, 1], [], []>} : vector<11x16xf32>, vector<16x32xf32>, vector<11x32xf32> -> vector<11x32xf32>
      %168 = arith.addf %161, %167 : vector<11x32xf32>
      %c2_i32_137 = arith.constant 2 : i32
      %169 = arith.muli %c2_i32_137, %arg35 : i32
      %c0_i32_138 = arith.constant 0 : i32
      %170 = arith.addi %c0_i32_138, %169 : i32
      %c2_i32_139 = arith.constant 2 : i32
      %171 = arith.addi %170, %c2_i32_139 : i32
      %172 = arith.index_cast %171 : i32 to index
      %c0_140 = arith.constant 0 : index
      %c0_141 = arith.constant 0 : index
      %173 = vector.load %arg29[%172, %c0_140, %c0_141] : memref<14x14x16xf32, #tpu.memory_space<vmem>>, vector<1x11x16xf32>
      %174 = vector.shape_cast %173 : vector<1x11x16xf32> to vector<11x16xf32>
      %c6 = arith.constant 6 : index
      %c0_142 = arith.constant 0 : index
      %c0_143 = arith.constant 0 : index
      %175 = vector.load %arg8[%c6, %c0_142, %c0_143] : memref<9x16x32xf32, #tpu.memory_space<vmem>>, vector<1x16x32xf32>
      %176 = vector.shape_cast %175 : vector<1x16x32xf32> to vector<16x32xf32>
      %cst_144 = arith.constant dense<0.000000e+00> : vector<11x32xf32>
      %177 = tpu.matmul %174, %176, %cst_144 {dimension_numbers = #tpu.dot_dimension_numbers<[1], [0], [0], [1], [0, 0, 1, 1], [], []>} : vector<11x16xf32>, vector<16x32xf32>, vector<11x32xf32> -> vector<11x32xf32>
      %178 = arith.addf %168, %177 : vector<11x32xf32>
      %179 = arith.index_cast %171 : i32 to index
      %c1_145 = arith.constant 1 : index
      %c0_146 = arith.constant 0 : index
      %180 = vector.load %arg29[%179, %c1_145, %c0_146] : memref<14x14x16xf32, #tpu.memory_space<vmem>>, vector<1x11x16xf32>
      %181 = vector.shape_cast %180 : vector<1x11x16xf32> to vector<11x16xf32>
      %c7 = arith.constant 7 : index
      %c0_147 = arith.constant 0 : index
      %c0_148 = arith.constant 0 : index
      %182 = vector.load %arg8[%c7, %c0_147, %c0_148] : memref<9x16x32xf32, #tpu.memory_space<vmem>>, vector<1x16x32xf32>
      %183 = vector.shape_cast %182 : vector<1x16x32xf32> to vector<16x32xf32>
      %cst_149 = arith.constant dense<0.000000e+00> : vector<11x32xf32>
      %184 = tpu.matmul %181, %183, %cst_149 {dimension_numbers = #tpu.dot_dimension_numbers<[1], [0], [0], [1], [0, 0, 1, 1], [], []>} : vector<11x16xf32>, vector<16x32xf32>, vector<11x32xf32> -> vector<11x32xf32>
      %185 = arith.addf %178, %184 : vector<11x32xf32>
      %186 = arith.index_cast %171 : i32 to index
      %c2_150 = arith.constant 2 : index
      %c0_151 = arith.constant 0 : index
      %187 = vector.load %arg29[%186, %c2_150, %c0_151] : memref<14x14x16xf32, #tpu.memory_space<vmem>>, vector<1x11x16xf32>
      %188 = vector.shape_cast %187 : vector<1x11x16xf32> to vector<11x16xf32>
      %c8 = arith.constant 8 : index
      %c0_152 = arith.constant 0 : index
      %c0_153 = arith.constant 0 : index
      %189 = vector.load %arg8[%c8, %c0_152, %c0_153] : memref<9x16x32xf32, #tpu.memory_space<vmem>>, vector<1x16x32xf32>
      %190 = vector.shape_cast %189 : vector<1x16x32xf32> to vector<16x32xf32>
      %cst_154 = arith.constant dense<0.000000e+00> : vector<11x32xf32>
      %191 = tpu.matmul %188, %190, %cst_154 {dimension_numbers = #tpu.dot_dimension_numbers<[1], [0], [0], [1], [0, 0, 1, 1], [], []>} : vector<11x16xf32>, vector<16x32xf32>, vector<11x32xf32> -> vector<11x32xf32>
      %192 = arith.addf %185, %191 : vector<11x32xf32>
      %cst_155 = arith.constant dense<0.000000e+00> : vector<6x32xf32>
      %193 = tpu.matmul %41, %192, %cst_155 {dimension_numbers = #tpu.dot_dimension_numbers<[1], [0], [0], [1], [0, 0, 1, 1], [], []>} : vector<6x11xf32>, vector<11x32xf32>, vector<6x32xf32> -> vector<6x32xf32>
      %194 = vector.broadcast %34 : vector<1x32xf32> to vector<6x32xf32>
      %195 = arith.addf %193, %194 : vector<6x32xf32>
      %c2_i32_156 = arith.constant 2 : i32
      %196 = arith.muli %c2_i32_156, %arg35 : i32
      %c1_i32_157 = arith.constant 1 : i32
      %197 = arith.addi %c1_i32_157, %196 : i32
      %198 = arith.index_cast %197 : i32 to index
      %c1_158 = arith.constant 1 : index
      %c0_159 = arith.constant 0 : index
      %199 = vector.load %arg29[%198, %c1_158, %c0_159] : memref<14x14x16xf32, #tpu.memory_space<vmem>>, vector<1x11x16xf32>
      %200 = vector.shape_cast %199 : vector<1x11x16xf32> to vector<11x16xf32>
      %cst_160 = arith.constant dense<0.000000e+00> : vector<6x16xf32>
      %201 = tpu.matmul %15, %200, %cst_160 {dimension_numbers = #tpu.dot_dimension_numbers<[1], [0], [0], [1], [0, 0, 1, 1], [], []>} : vector<6x11xf32>, vector<11x16xf32>, vector<6x16xf32> -> vector<6x16xf32>
      %c0_161 = arith.constant 0 : index
      %c0_162 = arith.constant 0 : index
      %202 = vector.load %arg6[%c0_161, %c0_162] : memref<16x32xf32, #tpu.memory_space<vmem>>, vector<16x32xf32>
      %cst_163 = arith.constant dense<0.000000e+00> : vector<6x32xf32>
      %203 = tpu.matmul %201, %202, %cst_163 {dimension_numbers = #tpu.dot_dimension_numbers<[1], [0], [0], [1], [0, 0, 1, 1], [], []>} : vector<6x16xf32>, vector<16x32xf32>, vector<6x32xf32> -> vector<6x32xf32>
      %c0_164 = arith.constant 0 : index
      %c0_165 = arith.constant 0 : index
      %204 = vector.load %arg7[%c0_164, %c0_165] : memref<1x32xf32, #tpu.memory_space<vmem>>, vector<1x32xf32>
      %205 = vector.broadcast %204 : vector<1x32xf32> to vector<6x32xf32>
      %206 = arith.addf %203, %205 : vector<6x32xf32>
      %207 = arith.addf %195, %206 : vector<6x32xf32>
      %cst_166 = arith.constant 0.000000e+00 : f32
      %208 = vector.broadcast %cst_166 : f32 to vector<6x32xf32>
      %209 = arith.maximumf %207, %208 : vector<6x32xf32>
      %c1_i32_167 = arith.constant 1 : i32
      %210 = arith.addi %c1_i32_167, %arg35 : i32
      %211 = arith.index_cast %210 : i32 to index
      %c1_168 = arith.constant 1 : index
      %c0_169 = arith.constant 0 : index
      %212 = vector.load %arg30[%211, %c1_168, %c0_169] : memref<8x8x32xf32, #tpu.memory_space<vmem>>, vector<1x6x32xf32>
      %213 = vector.shape_cast %212 : vector<1x6x32xf32> to vector<6x32xf32>
      %214 = vector.shape_cast %209 : vector<6x32xf32> to vector<1x6x32xf32>
      tpu.vector_store %arg30[%211, %c1_168, %c0_169], %214 {strides = array<i32>} : memref<8x8x32xf32, #tpu.memory_space<vmem>>, vector<1x6x32xf32>,
    }
    %c6_i32_33 = arith.constant 6 : i32
    %c0_34 = arith.constant 0 : index
    %c0_35 = arith.constant 0 : index
    %43 = vector.load %arg13[%c0_34, %c0_35] : memref<1x64xf32, #tpu.memory_space<vmem>>, vector<1x64xf32>
    %44 = tpu.iota {dimensions = array<i32: 0>} : vector<3x5xi32>
    %45 = tpu.iota {dimensions = array<i32: 1>} : vector<3x5xi32>
    %c2_i32_36 = arith.constant 2 : i32
    %46 = vector.broadcast %c2_i32_36 : i32 to vector<3x5xi32>
    %47 = arith.muli %46, %44 : vector<3x5xi32>
    %48 = arith.cmpi eq, %45, %47 : vector<3x5xi32>
    %49 = arith.extui %48 : vector<3x5xi1> to vector<3x5xi32>
    %50 = arith.sitofp %49 : vector<3x5xi32> to vector<3x5xf32>
    %c0_i32_37 = arith.constant 0 : i32
    %c3_i32 = arith.constant 3 : i32
    %51 = arith.addi %c0_i32_37, %c3_i32 : i32
    %c1_i32_38 = arith.constant 1 : i32
    scf.for %arg35 = %c0_i32_37 to %51 step %c1_i32_38  : i32 {
      %cst_97 = arith.constant 0.000000e+00 : f32
      %120 = vector.broadcast %cst_97 : f32 to vector<5x64xf32>
      %c2_i32_98 = arith.constant 2 : i32
      %121 = arith.muli %c2_i32_98, %arg35 : i32
      %c0_i32_99 = arith.constant 0 : i32
      %122 = arith.addi %c0_i32_99, %121 : i32
      %c0_i32_100 = arith.constant 0 : i32
      %123 = arith.addi %122, %c0_i32_100 : i32
      %124 = arith.index_cast %123 : i32 to index
      %c0_101 = arith.constant 0 : index
      %c0_102 = arith.constant 0 : index
      %125 = vector.load %arg30[%124, %c0_101, %c0_102] : memref<8x8x32xf32, #tpu.memory_space<vmem>>, vector<1x5x32xf32>
      %126 = vector.shape_cast %125 : vector<1x5x32xf32> to vector<5x32xf32>
      %c0_103 = arith.constant 0 : index
      %c0_104 = arith.constant 0 : index
      %c0_105 = arith.constant 0 : index
      %127 = vector.load %arg12[%c0_103, %c0_104, %c0_105] : memref<9x32x64xf32, #tpu.memory_space<vmem>>, vector<1x32x64xf32>
      %128 = vector.shape_cast %127 : vector<1x32x64xf32> to vector<32x64xf32>
      %cst_106 = arith.constant dense<0.000000e+00> : vector<5x64xf32>
      %129 = tpu.matmul %126, %128, %cst_106 {dimension_numbers = #tpu.dot_dimension_numbers<[1], [0], [0], [1], [0, 0, 1, 1], [], []>} : vector<5x32xf32>, vector<32x64xf32>, vector<5x64xf32> -> vector<5x64xf32>
      %130 = arith.addf %120, %129 : vector<5x64xf32>
      %131 = arith.index_cast %123 : i32 to index
      %c1_107 = arith.constant 1 : index
      %c0_108 = arith.constant 0 : index
      %132 = vector.load %arg30[%131, %c1_107, %c0_108] : memref<8x8x32xf32, #tpu.memory_space<vmem>>, vector<1x5x32xf32>
      %133 = vector.shape_cast %132 : vector<1x5x32xf32> to vector<5x32xf32>
      %c1_109 = arith.constant 1 : index
      %c0_110 = arith.constant 0 : index
      %c0_111 = arith.constant 0 : index
      %134 = vector.load %arg12[%c1_109, %c0_110, %c0_111] : memref<9x32x64xf32, #tpu.memory_space<vmem>>, vector<1x32x64xf32>
      %135 = vector.shape_cast %134 : vector<1x32x64xf32> to vector<32x64xf32>
      %cst_112 = arith.constant dense<0.000000e+00> : vector<5x64xf32>
      %136 = tpu.matmul %133, %135, %cst_112 {dimension_numbers = #tpu.dot_dimension_numbers<[1], [0], [0], [1], [0, 0, 1, 1], [], []>} : vector<5x32xf32>, vector<32x64xf32>, vector<5x64xf32> -> vector<5x64xf32>
      %137 = arith.addf %130, %136 : vector<5x64xf32>
      %138 = arith.index_cast %123 : i32 to index
      %c2_113 = arith.constant 2 : index
      %c0_114 = arith.constant 0 : index
      %139 = vector.load %arg30[%138, %c2_113, %c0_114] : memref<8x8x32xf32, #tpu.memory_space<vmem>>, vector<1x5x32xf32>
      %140 = vector.shape_cast %139 : vector<1x5x32xf32> to vector<5x32xf32>
      %c2_115 = arith.constant 2 : index
      %c0_116 = arith.constant 0 : index
      %c0_117 = arith.constant 0 : index
      %141 = vector.load %arg12[%c2_115, %c0_116, %c0_117] : memref<9x32x64xf32, #tpu.memory_space<vmem>>, vector<1x32x64xf32>
      %142 = vector.shape_cast %141 : vector<1x32x64xf32> to vector<32x64xf32>
      %cst_118 = arith.constant dense<0.000000e+00> : vector<5x64xf32>
      %143 = tpu.matmul %140, %142, %cst_118 {dimension_numbers = #tpu.dot_dimension_numbers<[1], [0], [0], [1], [0, 0, 1, 1], [], []>} : vector<5x32xf32>, vector<32x64xf32>, vector<5x64xf32> -> vector<5x64xf32>
      %144 = arith.addf %137, %143 : vector<5x64xf32>
      %c2_i32_119 = arith.constant 2 : i32
      %145 = arith.muli %c2_i32_119, %arg35 : i32
      %c0_i32_120 = arith.constant 0 : i32
      %146 = arith.addi %c0_i32_120, %145 : i32
      %c1_i32_121 = arith.constant 1 : i32
      %147 = arith.addi %146, %c1_i32_121 : i32
      %148 = arith.index_cast %147 : i32 to index
      %c0_122 = arith.constant 0 : index
      %c0_123 = arith.constant 0 : index
      %149 = vector.load %arg30[%148, %c0_122, %c0_123] : memref<8x8x32xf32, #tpu.memory_space<vmem>>, vector<1x5x32xf32>
      %150 = vector.shape_cast %149 : vector<1x5x32xf32> to vector<5x32xf32>
      %c3 = arith.constant 3 : index
      %c0_124 = arith.constant 0 : index
      %c0_125 = arith.constant 0 : index
      %151 = vector.load %arg12[%c3, %c0_124, %c0_125] : memref<9x32x64xf32, #tpu.memory_space<vmem>>, vector<1x32x64xf32>
      %152 = vector.shape_cast %151 : vector<1x32x64xf32> to vector<32x64xf32>
      %cst_126 = arith.constant dense<0.000000e+00> : vector<5x64xf32>
      %153 = tpu.matmul %150, %152, %cst_126 {dimension_numbers = #tpu.dot_dimension_numbers<[1], [0], [0], [1], [0, 0, 1, 1], [], []>} : vector<5x32xf32>, vector<32x64xf32>, vector<5x64xf32> -> vector<5x64xf32>
      %154 = arith.addf %144, %153 : vector<5x64xf32>
      %155 = arith.index_cast %147 : i32 to index
      %c1_127 = arith.constant 1 : index
      %c0_128 = arith.constant 0 : index
      %156 = vector.load %arg30[%155, %c1_127, %c0_128] : memref<8x8x32xf32, #tpu.memory_space<vmem>>, vector<1x5x32xf32>
      %157 = vector.shape_cast %156 : vector<1x5x32xf32> to vector<5x32xf32>
      %c4 = arith.constant 4 : index
      %c0_129 = arith.constant 0 : index
      %c0_130 = arith.constant 0 : index
      %158 = vector.load %arg12[%c4, %c0_129, %c0_130] : memref<9x32x64xf32, #tpu.memory_space<vmem>>, vector<1x32x64xf32>
      %159 = vector.shape_cast %158 : vector<1x32x64xf32> to vector<32x64xf32>
      %cst_131 = arith.constant dense<0.000000e+00> : vector<5x64xf32>
      %160 = tpu.matmul %157, %159, %cst_131 {dimension_numbers = #tpu.dot_dimension_numbers<[1], [0], [0], [1], [0, 0, 1, 1], [], []>} : vector<5x32xf32>, vector<32x64xf32>, vector<5x64xf32> -> vector<5x64xf32>
      %161 = arith.addf %154, %160 : vector<5x64xf32>
      %162 = arith.index_cast %147 : i32 to index
      %c2_132 = arith.constant 2 : index
      %c0_133 = arith.constant 0 : index
      %163 = vector.load %arg30[%162, %c2_132, %c0_133] : memref<8x8x32xf32, #tpu.memory_space<vmem>>, vector<1x5x32xf32>
      %164 = vector.shape_cast %163 : vector<1x5x32xf32> to vector<5x32xf32>
      %c5 = arith.constant 5 : index
      %c0_134 = arith.constant 0 : index
      %c0_135 = arith.constant 0 : index
      %165 = vector.load %arg12[%c5, %c0_134, %c0_135] : memref<9x32x64xf32, #tpu.memory_space<vmem>>, vector<1x32x64xf32>
      %166 = vector.shape_cast %165 : vector<1x32x64xf32> to vector<32x64xf32>
      %cst_136 = arith.constant dense<0.000000e+00> : vector<5x64xf32>
      %167 = tpu.matmul %164, %166, %cst_136 {dimension_numbers = #tpu.dot_dimension_numbers<[1], [0], [0], [1], [0, 0, 1, 1], [], []>} : vector<5x32xf32>, vector<32x64xf32>, vector<5x64xf32> -> vector<5x64xf32>
      %168 = arith.addf %161, %167 : vector<5x64xf32>
      %c2_i32_137 = arith.constant 2 : i32
      %169 = arith.muli %c2_i32_137, %arg35 : i32
      %c0_i32_138 = arith.constant 0 : i32
      %170 = arith.addi %c0_i32_138, %169 : i32
      %c2_i32_139 = arith.constant 2 : i32
      %171 = arith.addi %170, %c2_i32_139 : i32
      %172 = arith.index_cast %171 : i32 to index
      %c0_140 = arith.constant 0 : index
      %c0_141 = arith.constant 0 : index
      %173 = vector.load %arg30[%172, %c0_140, %c0_141] : memref<8x8x32xf32, #tpu.memory_space<vmem>>, vector<1x5x32xf32>
      %174 = vector.shape_cast %173 : vector<1x5x32xf32> to vector<5x32xf32>
      %c6 = arith.constant 6 : index
      %c0_142 = arith.constant 0 : index
      %c0_143 = arith.constant 0 : index
      %175 = vector.load %arg12[%c6, %c0_142, %c0_143] : memref<9x32x64xf32, #tpu.memory_space<vmem>>, vector<1x32x64xf32>
      %176 = vector.shape_cast %175 : vector<1x32x64xf32> to vector<32x64xf32>
      %cst_144 = arith.constant dense<0.000000e+00> : vector<5x64xf32>
      %177 = tpu.matmul %174, %176, %cst_144 {dimension_numbers = #tpu.dot_dimension_numbers<[1], [0], [0], [1], [0, 0, 1, 1], [], []>} : vector<5x32xf32>, vector<32x64xf32>, vector<5x64xf32> -> vector<5x64xf32>
      %178 = arith.addf %168, %177 : vector<5x64xf32>
      %179 = arith.index_cast %171 : i32 to index
      %c1_145 = arith.constant 1 : index
      %c0_146 = arith.constant 0 : index
      %180 = vector.load %arg30[%179, %c1_145, %c0_146] : memref<8x8x32xf32, #tpu.memory_space<vmem>>, vector<1x5x32xf32>
      %181 = vector.shape_cast %180 : vector<1x5x32xf32> to vector<5x32xf32>
      %c7 = arith.constant 7 : index
      %c0_147 = arith.constant 0 : index
      %c0_148 = arith.constant 0 : index
      %182 = vector.load %arg12[%c7, %c0_147, %c0_148] : memref<9x32x64xf32, #tpu.memory_space<vmem>>, vector<1x32x64xf32>
      %183 = vector.shape_cast %182 : vector<1x32x64xf32> to vector<32x64xf32>
      %cst_149 = arith.constant dense<0.000000e+00> : vector<5x64xf32>
      %184 = tpu.matmul %181, %183, %cst_149 {dimension_numbers = #tpu.dot_dimension_numbers<[1], [0], [0], [1], [0, 0, 1, 1], [], []>} : vector<5x32xf32>, vector<32x64xf32>, vector<5x64xf32> -> vector<5x64xf32>
      %185 = arith.addf %178, %184 : vector<5x64xf32>
      %186 = arith.index_cast %171 : i32 to index
      %c2_150 = arith.constant 2 : index
      %c0_151 = arith.constant 0 : index
      %187 = vector.load %arg30[%186, %c2_150, %c0_151] : memref<8x8x32xf32, #tpu.memory_space<vmem>>, vector<1x5x32xf32>
      %188 = vector.shape_cast %187 : vector<1x5x32xf32> to vector<5x32xf32>
      %c8 = arith.constant 8 : index
      %c0_152 = arith.constant 0 : index
      %c0_153 = arith.constant 0 : index
      %189 = vector.load %arg12[%c8, %c0_152, %c0_153] : memref<9x32x64xf32, #tpu.memory_space<vmem>>, vector<1x32x64xf32>
      %190 = vector.shape_cast %189 : vector<1x32x64xf32> to vector<32x64xf32>
      %cst_154 = arith.constant dense<0.000000e+00> : vector<5x64xf32>
      %191 = tpu.matmul %188, %190, %cst_154 {dimension_numbers = #tpu.dot_dimension_numbers<[1], [0], [0], [1], [0, 0, 1, 1], [], []>} : vector<5x32xf32>, vector<32x64xf32>, vector<5x64xf32> -> vector<5x64xf32>
      %192 = arith.addf %185, %191 : vector<5x64xf32>
      %cst_155 = arith.constant dense<0.000000e+00> : vector<3x64xf32>
      %193 = tpu.matmul %50, %192, %cst_155 {dimension_numbers = #tpu.dot_dimension_numbers<[1], [0], [0], [1], [0, 0, 1, 1], [], []>} : vector<3x5xf32>, vector<5x64xf32>, vector<3x64xf32> -> vector<3x64xf32>
      %194 = vector.broadcast %43 : vector<1x64xf32> to vector<3x64xf32>
      %195 = arith.addf %193, %194 : vector<3x64xf32>
      %c2_i32_156 = arith.constant 2 : i32
      %196 = arith.muli %c2_i32_156, %arg35 : i32
      %c1_i32_157 = arith.constant 1 : i32
      %197 = arith.addi %c1_i32_157, %196 : i32
      %198 = arith.index_cast %197 : i32 to index
      %c1_158 = arith.constant 1 : index
      %c0_159 = arith.constant 0 : index
      %199 = vector.load %arg30[%198, %c1_158, %c0_159] : memref<8x8x32xf32, #tpu.memory_space<vmem>>, vector<1x5x32xf32>
      %200 = vector.shape_cast %199 : vector<1x5x32xf32> to vector<5x32xf32>
      %cst_160 = arith.constant dense<0.000000e+00> : vector<3x32xf32>
      %201 = tpu.matmul %22, %200, %cst_160 {dimension_numbers = #tpu.dot_dimension_numbers<[1], [0], [0], [1], [0, 0, 1, 1], [], []>} : vector<3x5xf32>, vector<5x32xf32>, vector<3x32xf32> -> vector<3x32xf32>
      %c0_161 = arith.constant 0 : index
      %c0_162 = arith.constant 0 : index
      %202 = vector.load %arg10[%c0_161, %c0_162] : memref<32x64xf32, #tpu.memory_space<vmem>>, vector<32x64xf32>
      %cst_163 = arith.constant dense<0.000000e+00> : vector<3x64xf32>
      %203 = tpu.matmul %201, %202, %cst_163 {dimension_numbers = #tpu.dot_dimension_numbers<[1], [0], [0], [1], [0, 0, 1, 1], [], []>} : vector<3x32xf32>, vector<32x64xf32>, vector<3x64xf32> -> vector<3x64xf32>
      %c0_164 = arith.constant 0 : index
      %c0_165 = arith.constant 0 : index
      %204 = vector.load %arg11[%c0_164, %c0_165] : memref<1x64xf32, #tpu.memory_space<vmem>>, vector<1x64xf32>
      %205 = vector.broadcast %204 : vector<1x64xf32> to vector<3x64xf32>
      %206 = arith.addf %203, %205 : vector<3x64xf32>
      %207 = arith.addf %195, %206 : vector<3x64xf32>
      %cst_166 = arith.constant 0.000000e+00 : f32
      %208 = vector.broadcast %cst_166 : f32 to vector<3x64xf32>
      %209 = arith.maximumf %207, %208 : vector<3x64xf32>
      %210 = arith.index_cast %arg35 : i32 to index
      %c0_167 = arith.constant 0 : index
      %c0_168 = arith.constant 0 : index
      %211 = vector.load %arg31[%210, %c0_167, %c0_168] : memref<3x3x64xf32, #tpu.memory_space<vmem>>, vector<1x3x64xf32>
      %212 = vector.shape_cast %211 : vector<1x3x64xf32> to vector<3x64xf32>
      %213 = vector.shape_cast %209 : vector<3x64xf32> to vector<1x3x64xf32>
      tpu.vector_store %arg31[%210, %c0_167, %c0_168], %213 {strides = array<i32>} : memref<3x3x64xf32, #tpu.memory_space<vmem>>, vector<1x3x64xf32>,
    }
    %c3_i32_39 = arith.constant 3 : i32
    %c0_40 = arith.constant 0 : index
    %c0_41 = arith.constant 0 : index
    %52 = vector.load %arg15[%c0_40, %c0_41] : memref<1x16xf32, #tpu.memory_space<vmem>>, vector<1x16xf32>
    %c0_i32_42 = arith.constant 0 : i32
    %c21_i32 = arith.constant 21 : i32
    %53 = arith.addi %c0_i32_42, %c21_i32 : i32
    %c1_i32_43 = arith.constant 1 : i32
    scf.for %arg35 = %c0_i32_42 to %53 step %c1_i32_43  : i32 {
      %cst_97 = arith.constant 0.000000e+00 : f32
      %120 = vector.broadcast %cst_97 : f32 to vector<21x16xf32>
      %c1_i32_98 = arith.constant 1 : i32
      %121 = arith.muli %c1_i32_98, %arg35 : i32
      %c1_i32_99 = arith.constant 1 : i32
      %122 = arith.addi %c1_i32_99, %121 : i32
      %c0_i32_100 = arith.constant 0 : i32
      %123 = arith.addi %122, %c0_i32_100 : i32
      %124 = arith.index_cast %123 : i32 to index
      %c1_101 = arith.constant 1 : index
      %c0_102 = arith.constant 0 : index
      %125 = vector.load %arg27[%124, %c1_101, %c0_102] : memref<25x25x1xf32, #tpu.memory_space<vmem>>, vector<1x21x1xf32>
      %126 = vector.shape_cast %125 : vector<1x21x1xf32> to vector<21x1xf32>
      %c0_103 = arith.constant 0 : index
      %c0_104 = arith.constant 0 : index
      %c0_105 = arith.constant 0 : index
      %127 = vector.load %arg14[%c0_103, %c0_104, %c0_105] : memref<9x1x16xf32, #tpu.memory_space<vmem>>, vector<1x1x16xf32>
      %128 = vector.shape_cast %127 : vector<1x1x16xf32> to vector<1x16xf32>
      %129 = vector.broadcast %126 : vector<21x1xf32> to vector<21x16xf32>
      %130 = vector.broadcast %128 : vector<1x16xf32> to vector<21x16xf32>
      %131 = arith.mulf %129, %130 : vector<21x16xf32>
      %132 = arith.addf %120, %131 : vector<21x16xf32>
      %133 = arith.index_cast %123 : i32 to index
      %c2_106 = arith.constant 2 : index
      %c0_107 = arith.constant 0 : index
      %134 = vector.load %arg27[%133, %c2_106, %c0_107] : memref<25x25x1xf32, #tpu.memory_space<vmem>>, vector<1x21x1xf32>
      %135 = vector.shape_cast %134 : vector<1x21x1xf32> to vector<21x1xf32>
      %c1_108 = arith.constant 1 : index
      %c0_109 = arith.constant 0 : index
      %c0_110 = arith.constant 0 : index
      %136 = vector.load %arg14[%c1_108, %c0_109, %c0_110] : memref<9x1x16xf32, #tpu.memory_space<vmem>>, vector<1x1x16xf32>
      %137 = vector.shape_cast %136 : vector<1x1x16xf32> to vector<1x16xf32>
      %138 = vector.broadcast %135 : vector<21x1xf32> to vector<21x16xf32>
      %139 = vector.broadcast %137 : vector<1x16xf32> to vector<21x16xf32>
      %140 = arith.mulf %138, %139 : vector<21x16xf32>
      %141 = arith.addf %132, %140 : vector<21x16xf32>
      %142 = arith.index_cast %123 : i32 to index
      %c3 = arith.constant 3 : index
      %c0_111 = arith.constant 0 : index
      %143 = vector.load %arg27[%142, %c3, %c0_111] : memref<25x25x1xf32, #tpu.memory_space<vmem>>, vector<1x21x1xf32>
      %144 = vector.shape_cast %143 : vector<1x21x1xf32> to vector<21x1xf32>
      %c2_112 = arith.constant 2 : index
      %c0_113 = arith.constant 0 : index
      %c0_114 = arith.constant 0 : index
      %145 = vector.load %arg14[%c2_112, %c0_113, %c0_114] : memref<9x1x16xf32, #tpu.memory_space<vmem>>, vector<1x1x16xf32>
      %146 = vector.shape_cast %145 : vector<1x1x16xf32> to vector<1x16xf32>
      %147 = vector.broadcast %144 : vector<21x1xf32> to vector<21x16xf32>
      %148 = vector.broadcast %146 : vector<1x16xf32> to vector<21x16xf32>
      %149 = arith.mulf %147, %148 : vector<21x16xf32>
      %150 = arith.addf %141, %149 : vector<21x16xf32>
      %c1_i32_115 = arith.constant 1 : i32
      %151 = arith.muli %c1_i32_115, %arg35 : i32
      %c1_i32_116 = arith.constant 1 : i32
      %152 = arith.addi %c1_i32_116, %151 : i32
      %c1_i32_117 = arith.constant 1 : i32
      %153 = arith.addi %152, %c1_i32_117 : i32
      %154 = arith.index_cast %153 : i32 to index
      %c1_118 = arith.constant 1 : index
      %c0_119 = arith.constant 0 : index
      %155 = vector.load %arg27[%154, %c1_118, %c0_119] : memref<25x25x1xf32, #tpu.memory_space<vmem>>, vector<1x21x1xf32>
      %156 = vector.shape_cast %155 : vector<1x21x1xf32> to vector<21x1xf32>
      %c3_120 = arith.constant 3 : index
      %c0_121 = arith.constant 0 : index
      %c0_122 = arith.constant 0 : index
      %157 = vector.load %arg14[%c3_120, %c0_121, %c0_122] : memref<9x1x16xf32, #tpu.memory_space<vmem>>, vector<1x1x16xf32>
      %158 = vector.shape_cast %157 : vector<1x1x16xf32> to vector<1x16xf32>
      %159 = vector.broadcast %156 : vector<21x1xf32> to vector<21x16xf32>
      %160 = vector.broadcast %158 : vector<1x16xf32> to vector<21x16xf32>
      %161 = arith.mulf %159, %160 : vector<21x16xf32>
      %162 = arith.addf %150, %161 : vector<21x16xf32>
      %163 = arith.index_cast %153 : i32 to index
      %c2_123 = arith.constant 2 : index
      %c0_124 = arith.constant 0 : index
      %164 = vector.load %arg27[%163, %c2_123, %c0_124] : memref<25x25x1xf32, #tpu.memory_space<vmem>>, vector<1x21x1xf32>
      %165 = vector.shape_cast %164 : vector<1x21x1xf32> to vector<21x1xf32>
      %c4 = arith.constant 4 : index
      %c0_125 = arith.constant 0 : index
      %c0_126 = arith.constant 0 : index
      %166 = vector.load %arg14[%c4, %c0_125, %c0_126] : memref<9x1x16xf32, #tpu.memory_space<vmem>>, vector<1x1x16xf32>
      %167 = vector.shape_cast %166 : vector<1x1x16xf32> to vector<1x16xf32>
      %168 = vector.broadcast %165 : vector<21x1xf32> to vector<21x16xf32>
      %169 = vector.broadcast %167 : vector<1x16xf32> to vector<21x16xf32>
      %170 = arith.mulf %168, %169 : vector<21x16xf32>
      %171 = arith.addf %162, %170 : vector<21x16xf32>
      %172 = arith.index_cast %153 : i32 to index
      %c3_127 = arith.constant 3 : index
      %c0_128 = arith.constant 0 : index
      %173 = vector.load %arg27[%172, %c3_127, %c0_128] : memref<25x25x1xf32, #tpu.memory_space<vmem>>, vector<1x21x1xf32>
      %174 = vector.shape_cast %173 : vector<1x21x1xf32> to vector<21x1xf32>
      %c5 = arith.constant 5 : index
      %c0_129 = arith.constant 0 : index
      %c0_130 = arith.constant 0 : index
      %175 = vector.load %arg14[%c5, %c0_129, %c0_130] : memref<9x1x16xf32, #tpu.memory_space<vmem>>, vector<1x1x16xf32>
      %176 = vector.shape_cast %175 : vector<1x1x16xf32> to vector<1x16xf32>
      %177 = vector.broadcast %174 : vector<21x1xf32> to vector<21x16xf32>
      %178 = vector.broadcast %176 : vector<1x16xf32> to vector<21x16xf32>
      %179 = arith.mulf %177, %178 : vector<21x16xf32>
      %180 = arith.addf %171, %179 : vector<21x16xf32>
      %c1_i32_131 = arith.constant 1 : i32
      %181 = arith.muli %c1_i32_131, %arg35 : i32
      %c1_i32_132 = arith.constant 1 : i32
      %182 = arith.addi %c1_i32_132, %181 : i32
      %c2_i32_133 = arith.constant 2 : i32
      %183 = arith.addi %182, %c2_i32_133 : i32
      %184 = arith.index_cast %183 : i32 to index
      %c1_134 = arith.constant 1 : index
      %c0_135 = arith.constant 0 : index
      %185 = vector.load %arg27[%184, %c1_134, %c0_135] : memref<25x25x1xf32, #tpu.memory_space<vmem>>, vector<1x21x1xf32>
      %186 = vector.shape_cast %185 : vector<1x21x1xf32> to vector<21x1xf32>
      %c6 = arith.constant 6 : index
      %c0_136 = arith.constant 0 : index
      %c0_137 = arith.constant 0 : index
      %187 = vector.load %arg14[%c6, %c0_136, %c0_137] : memref<9x1x16xf32, #tpu.memory_space<vmem>>, vector<1x1x16xf32>
      %188 = vector.shape_cast %187 : vector<1x1x16xf32> to vector<1x16xf32>
      %189 = vector.broadcast %186 : vector<21x1xf32> to vector<21x16xf32>
      %190 = vector.broadcast %188 : vector<1x16xf32> to vector<21x16xf32>
      %191 = arith.mulf %189, %190 : vector<21x16xf32>
      %192 = arith.addf %180, %191 : vector<21x16xf32>
      %193 = arith.index_cast %183 : i32 to index
      %c2_138 = arith.constant 2 : index
      %c0_139 = arith.constant 0 : index
      %194 = vector.load %arg27[%193, %c2_138, %c0_139] : memref<25x25x1xf32, #tpu.memory_space<vmem>>, vector<1x21x1xf32>
      %195 = vector.shape_cast %194 : vector<1x21x1xf32> to vector<21x1xf32>
      %c7 = arith.constant 7 : index
      %c0_140 = arith.constant 0 : index
      %c0_141 = arith.constant 0 : index
      %196 = vector.load %arg14[%c7, %c0_140, %c0_141] : memref<9x1x16xf32, #tpu.memory_space<vmem>>, vector<1x1x16xf32>
      %197 = vector.shape_cast %196 : vector<1x1x16xf32> to vector<1x16xf32>
      %198 = vector.broadcast %195 : vector<21x1xf32> to vector<21x16xf32>
      %199 = vector.broadcast %197 : vector<1x16xf32> to vector<21x16xf32>
      %200 = arith.mulf %198, %199 : vector<21x16xf32>
      %201 = arith.addf %192, %200 : vector<21x16xf32>
      %202 = arith.index_cast %183 : i32 to index
      %c3_142 = arith.constant 3 : index
      %c0_143 = arith.constant 0 : index
      %203 = vector.load %arg27[%202, %c3_142, %c0_143] : memref<25x25x1xf32, #tpu.memory_space<vmem>>, vector<1x21x1xf32>
      %204 = vector.shape_cast %203 : vector<1x21x1xf32> to vector<21x1xf32>
      %c8 = arith.constant 8 : index
      %c0_144 = arith.constant 0 : index
      %c0_145 = arith.constant 0 : index
      %205 = vector.load %arg14[%c8, %c0_144, %c0_145] : memref<9x1x16xf32, #tpu.memory_space<vmem>>, vector<1x1x16xf32>
      %206 = vector.shape_cast %205 : vector<1x1x16xf32> to vector<1x16xf32>
      %207 = vector.broadcast %204 : vector<21x1xf32> to vector<21x16xf32>
      %208 = vector.broadcast %206 : vector<1x16xf32> to vector<21x16xf32>
      %209 = arith.mulf %207, %208 : vector<21x16xf32>
      %210 = arith.addf %201, %209 : vector<21x16xf32>
      %211 = vector.broadcast %52 : vector<1x16xf32> to vector<21x16xf32>
      %212 = arith.addf %210, %211 : vector<21x16xf32>
      %cst_146 = arith.constant 0.000000e+00 : f32
      %213 = vector.broadcast %cst_146 : f32 to vector<21x16xf32>
      %214 = arith.maximumf %212, %213 : vector<21x16xf32>
      %215 = arith.index_cast %arg35 : i32 to index
      %c0_147 = arith.constant 0 : index
      %c0_148 = arith.constant 0 : index
      %216 = vector.load %arg32[%215, %c0_147, %c0_148] : memref<21x21x16xf32, #tpu.memory_space<vmem>>, vector<1x21x16xf32>
      %217 = vector.shape_cast %216 : vector<1x21x16xf32> to vector<21x16xf32>
      %218 = vector.shape_cast %214 : vector<21x16xf32> to vector<1x21x16xf32>
      tpu.vector_store %arg32[%215, %c0_147, %c0_148], %218 {strides = array<i32>} : memref<21x21x16xf32, #tpu.memory_space<vmem>>, vector<1x21x16xf32>,
    }
    %c21_i32_44 = arith.constant 21 : i32
    %c0_45 = arith.constant 0 : index
    %c0_46 = arith.constant 0 : index
    %54 = vector.load %arg17[%c0_45, %c0_46] : memref<1x32xf32, #tpu.memory_space<vmem>>, vector<1x32xf32>
    %55 = tpu.iota {dimensions = array<i32: 0>} : vector<9x17xi32>
    %56 = tpu.iota {dimensions = array<i32: 1>} : vector<9x17xi32>
    %c2_i32_47 = arith.constant 2 : i32
    %57 = vector.broadcast %c2_i32_47 : i32 to vector<9x17xi32>
    %58 = arith.muli %57, %55 : vector<9x17xi32>
    %59 = arith.cmpi eq, %56, %58 : vector<9x17xi32>
    %60 = arith.extui %59 : vector<9x17xi1> to vector<9x17xi32>
    %61 = arith.sitofp %60 : vector<9x17xi32> to vector<9x17xf32>
    %c0_i32_48 = arith.constant 0 : i32
    %c9_i32 = arith.constant 9 : i32
    %62 = arith.addi %c0_i32_48, %c9_i32 : i32
    %c1_i32_49 = arith.constant 1 : i32
    scf.for %arg35 = %c0_i32_48 to %62 step %c1_i32_49  : i32 {
      %cst_97 = arith.constant 0.000000e+00 : f32
      %120 = vector.broadcast %cst_97 : f32 to vector<17x32xf32>
      %c2_i32_98 = arith.constant 2 : i32
      %121 = arith.muli %c2_i32_98, %arg35 : i32
      %c0_i32_99 = arith.constant 0 : i32
      %122 = arith.addi %c0_i32_99, %121 : i32
      %c0_i32_100 = arith.constant 0 : i32
      %123 = arith.addi %122, %c0_i32_100 : i32
      %124 = arith.index_cast %123 : i32 to index
      %c0_101 = arith.constant 0 : index
      %c0_102 = arith.constant 0 : index
      %125 = vector.load %arg32[%124, %c0_101, %c0_102] : memref<21x21x16xf32, #tpu.memory_space<vmem>>, vector<1x17x16xf32>
      %126 = vector.shape_cast %125 : vector<1x17x16xf32> to vector<17x16xf32>
      %c0_103 = arith.constant 0 : index
      %c0_104 = arith.constant 0 : index
      %c0_105 = arith.constant 0 : index
      %127 = vector.load %arg16[%c0_103, %c0_104, %c0_105] : memref<25x16x32xf32, #tpu.memory_space<vmem>>, vector<1x16x32xf32>
      %128 = vector.shape_cast %127 : vector<1x16x32xf32> to vector<16x32xf32>
      %cst_106 = arith.constant dense<0.000000e+00> : vector<17x32xf32>
      %129 = tpu.matmul %126, %128, %cst_106 {dimension_numbers = #tpu.dot_dimension_numbers<[1], [0], [0], [1], [0, 0, 1, 1], [], []>} : vector<17x16xf32>, vector<16x32xf32>, vector<17x32xf32> -> vector<17x32xf32>
      %130 = arith.addf %120, %129 : vector<17x32xf32>
      %131 = arith.index_cast %123 : i32 to index
      %c1_107 = arith.constant 1 : index
      %c0_108 = arith.constant 0 : index
      %132 = vector.load %arg32[%131, %c1_107, %c0_108] : memref<21x21x16xf32, #tpu.memory_space<vmem>>, vector<1x17x16xf32>
      %133 = vector.shape_cast %132 : vector<1x17x16xf32> to vector<17x16xf32>
      %c1_109 = arith.constant 1 : index
      %c0_110 = arith.constant 0 : index
      %c0_111 = arith.constant 0 : index
      %134 = vector.load %arg16[%c1_109, %c0_110, %c0_111] : memref<25x16x32xf32, #tpu.memory_space<vmem>>, vector<1x16x32xf32>
      %135 = vector.shape_cast %134 : vector<1x16x32xf32> to vector<16x32xf32>
      %cst_112 = arith.constant dense<0.000000e+00> : vector<17x32xf32>
      %136 = tpu.matmul %133, %135, %cst_112 {dimension_numbers = #tpu.dot_dimension_numbers<[1], [0], [0], [1], [0, 0, 1, 1], [], []>} : vector<17x16xf32>, vector<16x32xf32>, vector<17x32xf32> -> vector<17x32xf32>
      %137 = arith.addf %130, %136 : vector<17x32xf32>
      %138 = arith.index_cast %123 : i32 to index
      %c2_113 = arith.constant 2 : index
      %c0_114 = arith.constant 0 : index
      %139 = vector.load %arg32[%138, %c2_113, %c0_114] : memref<21x21x16xf32, #tpu.memory_space<vmem>>, vector<1x17x16xf32>
      %140 = vector.shape_cast %139 : vector<1x17x16xf32> to vector<17x16xf32>
      %c2_115 = arith.constant 2 : index
      %c0_116 = arith.constant 0 : index
      %c0_117 = arith.constant 0 : index
      %141 = vector.load %arg16[%c2_115, %c0_116, %c0_117] : memref<25x16x32xf32, #tpu.memory_space<vmem>>, vector<1x16x32xf32>
      %142 = vector.shape_cast %141 : vector<1x16x32xf32> to vector<16x32xf32>
      %cst_118 = arith.constant dense<0.000000e+00> : vector<17x32xf32>
      %143 = tpu.matmul %140, %142, %cst_118 {dimension_numbers = #tpu.dot_dimension_numbers<[1], [0], [0], [1], [0, 0, 1, 1], [], []>} : vector<17x16xf32>, vector<16x32xf32>, vector<17x32xf32> -> vector<17x32xf32>
      %144 = arith.addf %137, %143 : vector<17x32xf32>
      %145 = arith.index_cast %123 : i32 to index
      %c3 = arith.constant 3 : index
      %c0_119 = arith.constant 0 : index
      %146 = vector.load %arg32[%145, %c3, %c0_119] : memref<21x21x16xf32, #tpu.memory_space<vmem>>, vector<1x17x16xf32>
      %147 = vector.shape_cast %146 : vector<1x17x16xf32> to vector<17x16xf32>
      %c3_120 = arith.constant 3 : index
      %c0_121 = arith.constant 0 : index
      %c0_122 = arith.constant 0 : index
      %148 = vector.load %arg16[%c3_120, %c0_121, %c0_122] : memref<25x16x32xf32, #tpu.memory_space<vmem>>, vector<1x16x32xf32>
      %149 = vector.shape_cast %148 : vector<1x16x32xf32> to vector<16x32xf32>
      %cst_123 = arith.constant dense<0.000000e+00> : vector<17x32xf32>
      %150 = tpu.matmul %147, %149, %cst_123 {dimension_numbers = #tpu.dot_dimension_numbers<[1], [0], [0], [1], [0, 0, 1, 1], [], []>} : vector<17x16xf32>, vector<16x32xf32>, vector<17x32xf32> -> vector<17x32xf32>
      %151 = arith.addf %144, %150 : vector<17x32xf32>
      %152 = arith.index_cast %123 : i32 to index
      %c4 = arith.constant 4 : index
      %c0_124 = arith.constant 0 : index
      %153 = vector.load %arg32[%152, %c4, %c0_124] : memref<21x21x16xf32, #tpu.memory_space<vmem>>, vector<1x17x16xf32>
      %154 = vector.shape_cast %153 : vector<1x17x16xf32> to vector<17x16xf32>
      %c4_125 = arith.constant 4 : index
      %c0_126 = arith.constant 0 : index
      %c0_127 = arith.constant 0 : index
      %155 = vector.load %arg16[%c4_125, %c0_126, %c0_127] : memref<25x16x32xf32, #tpu.memory_space<vmem>>, vector<1x16x32xf32>
      %156 = vector.shape_cast %155 : vector<1x16x32xf32> to vector<16x32xf32>
      %cst_128 = arith.constant dense<0.000000e+00> : vector<17x32xf32>
      %157 = tpu.matmul %154, %156, %cst_128 {dimension_numbers = #tpu.dot_dimension_numbers<[1], [0], [0], [1], [0, 0, 1, 1], [], []>} : vector<17x16xf32>, vector<16x32xf32>, vector<17x32xf32> -> vector<17x32xf32>
      %158 = arith.addf %151, %157 : vector<17x32xf32>
      %c2_i32_129 = arith.constant 2 : i32
      %159 = arith.muli %c2_i32_129, %arg35 : i32
      %c0_i32_130 = arith.constant 0 : i32
      %160 = arith.addi %c0_i32_130, %159 : i32
      %c1_i32_131 = arith.constant 1 : i32
      %161 = arith.addi %160, %c1_i32_131 : i32
      %162 = arith.index_cast %161 : i32 to index
      %c0_132 = arith.constant 0 : index
      %c0_133 = arith.constant 0 : index
      %163 = vector.load %arg32[%162, %c0_132, %c0_133] : memref<21x21x16xf32, #tpu.memory_space<vmem>>, vector<1x17x16xf32>
      %164 = vector.shape_cast %163 : vector<1x17x16xf32> to vector<17x16xf32>
      %c5 = arith.constant 5 : index
      %c0_134 = arith.constant 0 : index
      %c0_135 = arith.constant 0 : index
      %165 = vector.load %arg16[%c5, %c0_134, %c0_135] : memref<25x16x32xf32, #tpu.memory_space<vmem>>, vector<1x16x32xf32>
      %166 = vector.shape_cast %165 : vector<1x16x32xf32> to vector<16x32xf32>
      %cst_136 = arith.constant dense<0.000000e+00> : vector<17x32xf32>
      %167 = tpu.matmul %164, %166, %cst_136 {dimension_numbers = #tpu.dot_dimension_numbers<[1], [0], [0], [1], [0, 0, 1, 1], [], []>} : vector<17x16xf32>, vector<16x32xf32>, vector<17x32xf32> -> vector<17x32xf32>
      %168 = arith.addf %158, %167 : vector<17x32xf32>
      %169 = arith.index_cast %161 : i32 to index
      %c1_137 = arith.constant 1 : index
      %c0_138 = arith.constant 0 : index
      %170 = vector.load %arg32[%169, %c1_137, %c0_138] : memref<21x21x16xf32, #tpu.memory_space<vmem>>, vector<1x17x16xf32>
      %171 = vector.shape_cast %170 : vector<1x17x16xf32> to vector<17x16xf32>
      %c6 = arith.constant 6 : index
      %c0_139 = arith.constant 0 : index
      %c0_140 = arith.constant 0 : index
      %172 = vector.load %arg16[%c6, %c0_139, %c0_140] : memref<25x16x32xf32, #tpu.memory_space<vmem>>, vector<1x16x32xf32>
      %173 = vector.shape_cast %172 : vector<1x16x32xf32> to vector<16x32xf32>
      %cst_141 = arith.constant dense<0.000000e+00> : vector<17x32xf32>
      %174 = tpu.matmul %171, %173, %cst_141 {dimension_numbers = #tpu.dot_dimension_numbers<[1], [0], [0], [1], [0, 0, 1, 1], [], []>} : vector<17x16xf32>, vector<16x32xf32>, vector<17x32xf32> -> vector<17x32xf32>
      %175 = arith.addf %168, %174 : vector<17x32xf32>
      %176 = arith.index_cast %161 : i32 to index
      %c2_142 = arith.constant 2 : index
      %c0_143 = arith.constant 0 : index
      %177 = vector.load %arg32[%176, %c2_142, %c0_143] : memref<21x21x16xf32, #tpu.memory_space<vmem>>, vector<1x17x16xf32>
      %178 = vector.shape_cast %177 : vector<1x17x16xf32> to vector<17x16xf32>
      %c7 = arith.constant 7 : index
      %c0_144 = arith.constant 0 : index
      %c0_145 = arith.constant 0 : index
      %179 = vector.load %arg16[%c7, %c0_144, %c0_145] : memref<25x16x32xf32, #tpu.memory_space<vmem>>, vector<1x16x32xf32>
      %180 = vector.shape_cast %179 : vector<1x16x32xf32> to vector<16x32xf32>
      %cst_146 = arith.constant dense<0.000000e+00> : vector<17x32xf32>
      %181 = tpu.matmul %178, %180, %cst_146 {dimension_numbers = #tpu.dot_dimension_numbers<[1], [0], [0], [1], [0, 0, 1, 1], [], []>} : vector<17x16xf32>, vector<16x32xf32>, vector<17x32xf32> -> vector<17x32xf32>
      %182 = arith.addf %175, %181 : vector<17x32xf32>
      %183 = arith.index_cast %161 : i32 to index
      %c3_147 = arith.constant 3 : index
      %c0_148 = arith.constant 0 : index
      %184 = vector.load %arg32[%183, %c3_147, %c0_148] : memref<21x21x16xf32, #tpu.memory_space<vmem>>, vector<1x17x16xf32>
      %185 = vector.shape_cast %184 : vector<1x17x16xf32> to vector<17x16xf32>
      %c8 = arith.constant 8 : index
      %c0_149 = arith.constant 0 : index
      %c0_150 = arith.constant 0 : index
      %186 = vector.load %arg16[%c8, %c0_149, %c0_150] : memref<25x16x32xf32, #tpu.memory_space<vmem>>, vector<1x16x32xf32>
      %187 = vector.shape_cast %186 : vector<1x16x32xf32> to vector<16x32xf32>
      %cst_151 = arith.constant dense<0.000000e+00> : vector<17x32xf32>
      %188 = tpu.matmul %185, %187, %cst_151 {dimension_numbers = #tpu.dot_dimension_numbers<[1], [0], [0], [1], [0, 0, 1, 1], [], []>} : vector<17x16xf32>, vector<16x32xf32>, vector<17x32xf32> -> vector<17x32xf32>
      %189 = arith.addf %182, %188 : vector<17x32xf32>
      %190 = arith.index_cast %161 : i32 to index
      %c4_152 = arith.constant 4 : index
      %c0_153 = arith.constant 0 : index
      %191 = vector.load %arg32[%190, %c4_152, %c0_153] : memref<21x21x16xf32, #tpu.memory_space<vmem>>, vector<1x17x16xf32>
      %192 = vector.shape_cast %191 : vector<1x17x16xf32> to vector<17x16xf32>
      %c9 = arith.constant 9 : index
      %c0_154 = arith.constant 0 : index
      %c0_155 = arith.constant 0 : index
      %193 = vector.load %arg16[%c9, %c0_154, %c0_155] : memref<25x16x32xf32, #tpu.memory_space<vmem>>, vector<1x16x32xf32>
      %194 = vector.shape_cast %193 : vector<1x16x32xf32> to vector<16x32xf32>
      %cst_156 = arith.constant dense<0.000000e+00> : vector<17x32xf32>
      %195 = tpu.matmul %192, %194, %cst_156 {dimension_numbers = #tpu.dot_dimension_numbers<[1], [0], [0], [1], [0, 0, 1, 1], [], []>} : vector<17x16xf32>, vector<16x32xf32>, vector<17x32xf32> -> vector<17x32xf32>
      %196 = arith.addf %189, %195 : vector<17x32xf32>
      %c2_i32_157 = arith.constant 2 : i32
      %197 = arith.muli %c2_i32_157, %arg35 : i32
      %c0_i32_158 = arith.constant 0 : i32
      %198 = arith.addi %c0_i32_158, %197 : i32
      %c2_i32_159 = arith.constant 2 : i32
      %199 = arith.addi %198, %c2_i32_159 : i32
      %200 = arith.index_cast %199 : i32 to index
      %c0_160 = arith.constant 0 : index
      %c0_161 = arith.constant 0 : index
      %201 = vector.load %arg32[%200, %c0_160, %c0_161] : memref<21x21x16xf32, #tpu.memory_space<vmem>>, vector<1x17x16xf32>
      %202 = vector.shape_cast %201 : vector<1x17x16xf32> to vector<17x16xf32>
      %c10 = arith.constant 10 : index
      %c0_162 = arith.constant 0 : index
      %c0_163 = arith.constant 0 : index
      %203 = vector.load %arg16[%c10, %c0_162, %c0_163] : memref<25x16x32xf32, #tpu.memory_space<vmem>>, vector<1x16x32xf32>
      %204 = vector.shape_cast %203 : vector<1x16x32xf32> to vector<16x32xf32>
      %cst_164 = arith.constant dense<0.000000e+00> : vector<17x32xf32>
      %205 = tpu.matmul %202, %204, %cst_164 {dimension_numbers = #tpu.dot_dimension_numbers<[1], [0], [0], [1], [0, 0, 1, 1], [], []>} : vector<17x16xf32>, vector<16x32xf32>, vector<17x32xf32> -> vector<17x32xf32>
      %206 = arith.addf %196, %205 : vector<17x32xf32>
      %207 = arith.index_cast %199 : i32 to index
      %c1_165 = arith.constant 1 : index
      %c0_166 = arith.constant 0 : index
      %208 = vector.load %arg32[%207, %c1_165, %c0_166] : memref<21x21x16xf32, #tpu.memory_space<vmem>>, vector<1x17x16xf32>
      %209 = vector.shape_cast %208 : vector<1x17x16xf32> to vector<17x16xf32>
      %c11 = arith.constant 11 : index
      %c0_167 = arith.constant 0 : index
      %c0_168 = arith.constant 0 : index
      %210 = vector.load %arg16[%c11, %c0_167, %c0_168] : memref<25x16x32xf32, #tpu.memory_space<vmem>>, vector<1x16x32xf32>
      %211 = vector.shape_cast %210 : vector<1x16x32xf32> to vector<16x32xf32>
      %cst_169 = arith.constant dense<0.000000e+00> : vector<17x32xf32>
      %212 = tpu.matmul %209, %211, %cst_169 {dimension_numbers = #tpu.dot_dimension_numbers<[1], [0], [0], [1], [0, 0, 1, 1], [], []>} : vector<17x16xf32>, vector<16x32xf32>, vector<17x32xf32> -> vector<17x32xf32>
      %213 = arith.addf %206, %212 : vector<17x32xf32>
      %214 = arith.index_cast %199 : i32 to index
      %c2_170 = arith.constant 2 : index
      %c0_171 = arith.constant 0 : index
      %215 = vector.load %arg32[%214, %c2_170, %c0_171] : memref<21x21x16xf32, #tpu.memory_space<vmem>>, vector<1x17x16xf32>
      %216 = vector.shape_cast %215 : vector<1x17x16xf32> to vector<17x16xf32>
      %c12 = arith.constant 12 : index
      %c0_172 = arith.constant 0 : index
      %c0_173 = arith.constant 0 : index
      %217 = vector.load %arg16[%c12, %c0_172, %c0_173] : memref<25x16x32xf32, #tpu.memory_space<vmem>>, vector<1x16x32xf32>
      %218 = vector.shape_cast %217 : vector<1x16x32xf32> to vector<16x32xf32>
      %cst_174 = arith.constant dense<0.000000e+00> : vector<17x32xf32>
      %219 = tpu.matmul %216, %218, %cst_174 {dimension_numbers = #tpu.dot_dimension_numbers<[1], [0], [0], [1], [0, 0, 1, 1], [], []>} : vector<17x16xf32>, vector<16x32xf32>, vector<17x32xf32> -> vector<17x32xf32>
      %220 = arith.addf %213, %219 : vector<17x32xf32>
      %221 = arith.index_cast %199 : i32 to index
      %c3_175 = arith.constant 3 : index
      %c0_176 = arith.constant 0 : index
      %222 = vector.load %arg32[%221, %c3_175, %c0_176] : memref<21x21x16xf32, #tpu.memory_space<vmem>>, vector<1x17x16xf32>
      %223 = vector.shape_cast %222 : vector<1x17x16xf32> to vector<17x16xf32>
      %c13 = arith.constant 13 : index
      %c0_177 = arith.constant 0 : index
      %c0_178 = arith.constant 0 : index
      %224 = vector.load %arg16[%c13, %c0_177, %c0_178] : memref<25x16x32xf32, #tpu.memory_space<vmem>>, vector<1x16x32xf32>
      %225 = vector.shape_cast %224 : vector<1x16x32xf32> to vector<16x32xf32>
      %cst_179 = arith.constant dense<0.000000e+00> : vector<17x32xf32>
      %226 = tpu.matmul %223, %225, %cst_179 {dimension_numbers = #tpu.dot_dimension_numbers<[1], [0], [0], [1], [0, 0, 1, 1], [], []>} : vector<17x16xf32>, vector<16x32xf32>, vector<17x32xf32> -> vector<17x32xf32>
      %227 = arith.addf %220, %226 : vector<17x32xf32>
      %228 = arith.index_cast %199 : i32 to index
      %c4_180 = arith.constant 4 : index
      %c0_181 = arith.constant 0 : index
      %229 = vector.load %arg32[%228, %c4_180, %c0_181] : memref<21x21x16xf32, #tpu.memory_space<vmem>>, vector<1x17x16xf32>
      %230 = vector.shape_cast %229 : vector<1x17x16xf32> to vector<17x16xf32>
      %c14 = arith.constant 14 : index
      %c0_182 = arith.constant 0 : index
      %c0_183 = arith.constant 0 : index
      %231 = vector.load %arg16[%c14, %c0_182, %c0_183] : memref<25x16x32xf32, #tpu.memory_space<vmem>>, vector<1x16x32xf32>
      %232 = vector.shape_cast %231 : vector<1x16x32xf32> to vector<16x32xf32>
      %cst_184 = arith.constant dense<0.000000e+00> : vector<17x32xf32>
      %233 = tpu.matmul %230, %232, %cst_184 {dimension_numbers = #tpu.dot_dimension_numbers<[1], [0], [0], [1], [0, 0, 1, 1], [], []>} : vector<17x16xf32>, vector<16x32xf32>, vector<17x32xf32> -> vector<17x32xf32>
      %234 = arith.addf %227, %233 : vector<17x32xf32>
      %c2_i32_185 = arith.constant 2 : i32
      %235 = arith.muli %c2_i32_185, %arg35 : i32
      %c0_i32_186 = arith.constant 0 : i32
      %236 = arith.addi %c0_i32_186, %235 : i32
      %c3_i32_187 = arith.constant 3 : i32
      %237 = arith.addi %236, %c3_i32_187 : i32
      %238 = arith.index_cast %237 : i32 to index
      %c0_188 = arith.constant 0 : index
      %c0_189 = arith.constant 0 : index
      %239 = vector.load %arg32[%238, %c0_188, %c0_189] : memref<21x21x16xf32, #tpu.memory_space<vmem>>, vector<1x17x16xf32>
      %240 = vector.shape_cast %239 : vector<1x17x16xf32> to vector<17x16xf32>
      %c15 = arith.constant 15 : index
      %c0_190 = arith.constant 0 : index
      %c0_191 = arith.constant 0 : index
      %241 = vector.load %arg16[%c15, %c0_190, %c0_191] : memref<25x16x32xf32, #tpu.memory_space<vmem>>, vector<1x16x32xf32>
      %242 = vector.shape_cast %241 : vector<1x16x32xf32> to vector<16x32xf32>
      %cst_192 = arith.constant dense<0.000000e+00> : vector<17x32xf32>
      %243 = tpu.matmul %240, %242, %cst_192 {dimension_numbers = #tpu.dot_dimension_numbers<[1], [0], [0], [1], [0, 0, 1, 1], [], []>} : vector<17x16xf32>, vector<16x32xf32>, vector<17x32xf32> -> vector<17x32xf32>
      %244 = arith.addf %234, %243 : vector<17x32xf32>
      %245 = arith.index_cast %237 : i32 to index
      %c1_193 = arith.constant 1 : index
      %c0_194 = arith.constant 0 : index
      %246 = vector.load %arg32[%245, %c1_193, %c0_194] : memref<21x21x16xf32, #tpu.memory_space<vmem>>, vector<1x17x16xf32>
      %247 = vector.shape_cast %246 : vector<1x17x16xf32> to vector<17x16xf32>
      %c16 = arith.constant 16 : index
      %c0_195 = arith.constant 0 : index
      %c0_196 = arith.constant 0 : index
      %248 = vector.load %arg16[%c16, %c0_195, %c0_196] : memref<25x16x32xf32, #tpu.memory_space<vmem>>, vector<1x16x32xf32>
      %249 = vector.shape_cast %248 : vector<1x16x32xf32> to vector<16x32xf32>
      %cst_197 = arith.constant dense<0.000000e+00> : vector<17x32xf32>
      %250 = tpu.matmul %247, %249, %cst_197 {dimension_numbers = #tpu.dot_dimension_numbers<[1], [0], [0], [1], [0, 0, 1, 1], [], []>} : vector<17x16xf32>, vector<16x32xf32>, vector<17x32xf32> -> vector<17x32xf32>
      %251 = arith.addf %244, %250 : vector<17x32xf32>
      %252 = arith.index_cast %237 : i32 to index
      %c2_198 = arith.constant 2 : index
      %c0_199 = arith.constant 0 : index
      %253 = vector.load %arg32[%252, %c2_198, %c0_199] : memref<21x21x16xf32, #tpu.memory_space<vmem>>, vector<1x17x16xf32>
      %254 = vector.shape_cast %253 : vector<1x17x16xf32> to vector<17x16xf32>
      %c17 = arith.constant 17 : index
      %c0_200 = arith.constant 0 : index
      %c0_201 = arith.constant 0 : index
      %255 = vector.load %arg16[%c17, %c0_200, %c0_201] : memref<25x16x32xf32, #tpu.memory_space<vmem>>, vector<1x16x32xf32>
      %256 = vector.shape_cast %255 : vector<1x16x32xf32> to vector<16x32xf32>
      %cst_202 = arith.constant dense<0.000000e+00> : vector<17x32xf32>
      %257 = tpu.matmul %254, %256, %cst_202 {dimension_numbers = #tpu.dot_dimension_numbers<[1], [0], [0], [1], [0, 0, 1, 1], [], []>} : vector<17x16xf32>, vector<16x32xf32>, vector<17x32xf32> -> vector<17x32xf32>
      %258 = arith.addf %251, %257 : vector<17x32xf32>
      %259 = arith.index_cast %237 : i32 to index
      %c3_203 = arith.constant 3 : index
      %c0_204 = arith.constant 0 : index
      %260 = vector.load %arg32[%259, %c3_203, %c0_204] : memref<21x21x16xf32, #tpu.memory_space<vmem>>, vector<1x17x16xf32>
      %261 = vector.shape_cast %260 : vector<1x17x16xf32> to vector<17x16xf32>
      %c18 = arith.constant 18 : index
      %c0_205 = arith.constant 0 : index
      %c0_206 = arith.constant 0 : index
      %262 = vector.load %arg16[%c18, %c0_205, %c0_206] : memref<25x16x32xf32, #tpu.memory_space<vmem>>, vector<1x16x32xf32>
      %263 = vector.shape_cast %262 : vector<1x16x32xf32> to vector<16x32xf32>
      %cst_207 = arith.constant dense<0.000000e+00> : vector<17x32xf32>
      %264 = tpu.matmul %261, %263, %cst_207 {dimension_numbers = #tpu.dot_dimension_numbers<[1], [0], [0], [1], [0, 0, 1, 1], [], []>} : vector<17x16xf32>, vector<16x32xf32>, vector<17x32xf32> -> vector<17x32xf32>
      %265 = arith.addf %258, %264 : vector<17x32xf32>
      %266 = arith.index_cast %237 : i32 to index
      %c4_208 = arith.constant 4 : index
      %c0_209 = arith.constant 0 : index
      %267 = vector.load %arg32[%266, %c4_208, %c0_209] : memref<21x21x16xf32, #tpu.memory_space<vmem>>, vector<1x17x16xf32>
      %268 = vector.shape_cast %267 : vector<1x17x16xf32> to vector<17x16xf32>
      %c19 = arith.constant 19 : index
      %c0_210 = arith.constant 0 : index
      %c0_211 = arith.constant 0 : index
      %269 = vector.load %arg16[%c19, %c0_210, %c0_211] : memref<25x16x32xf32, #tpu.memory_space<vmem>>, vector<1x16x32xf32>
      %270 = vector.shape_cast %269 : vector<1x16x32xf32> to vector<16x32xf32>
      %cst_212 = arith.constant dense<0.000000e+00> : vector<17x32xf32>
      %271 = tpu.matmul %268, %270, %cst_212 {dimension_numbers = #tpu.dot_dimension_numbers<[1], [0], [0], [1], [0, 0, 1, 1], [], []>} : vector<17x16xf32>, vector<16x32xf32>, vector<17x32xf32> -> vector<17x32xf32>
      %272 = arith.addf %265, %271 : vector<17x32xf32>
      %c2_i32_213 = arith.constant 2 : i32
      %273 = arith.muli %c2_i32_213, %arg35 : i32
      %c0_i32_214 = arith.constant 0 : i32
      %274 = arith.addi %c0_i32_214, %273 : i32
      %c4_i32 = arith.constant 4 : i32
      %275 = arith.addi %274, %c4_i32 : i32
      %276 = arith.index_cast %275 : i32 to index
      %c0_215 = arith.constant 0 : index
      %c0_216 = arith.constant 0 : index
      %277 = vector.load %arg32[%276, %c0_215, %c0_216] : memref<21x21x16xf32, #tpu.memory_space<vmem>>, vector<1x17x16xf32>
      %278 = vector.shape_cast %277 : vector<1x17x16xf32> to vector<17x16xf32>
      %c20 = arith.constant 20 : index
      %c0_217 = arith.constant 0 : index
      %c0_218 = arith.constant 0 : index
      %279 = vector.load %arg16[%c20, %c0_217, %c0_218] : memref<25x16x32xf32, #tpu.memory_space<vmem>>, vector<1x16x32xf32>
      %280 = vector.shape_cast %279 : vector<1x16x32xf32> to vector<16x32xf32>
      %cst_219 = arith.constant dense<0.000000e+00> : vector<17x32xf32>
      %281 = tpu.matmul %278, %280, %cst_219 {dimension_numbers = #tpu.dot_dimension_numbers<[1], [0], [0], [1], [0, 0, 1, 1], [], []>} : vector<17x16xf32>, vector<16x32xf32>, vector<17x32xf32> -> vector<17x32xf32>
      %282 = arith.addf %272, %281 : vector<17x32xf32>
      %283 = arith.index_cast %275 : i32 to index
      %c1_220 = arith.constant 1 : index
      %c0_221 = arith.constant 0 : index
      %284 = vector.load %arg32[%283, %c1_220, %c0_221] : memref<21x21x16xf32, #tpu.memory_space<vmem>>, vector<1x17x16xf32>
      %285 = vector.shape_cast %284 : vector<1x17x16xf32> to vector<17x16xf32>
      %c21 = arith.constant 21 : index
      %c0_222 = arith.constant 0 : index
      %c0_223 = arith.constant 0 : index
      %286 = vector.load %arg16[%c21, %c0_222, %c0_223] : memref<25x16x32xf32, #tpu.memory_space<vmem>>, vector<1x16x32xf32>
      %287 = vector.shape_cast %286 : vector<1x16x32xf32> to vector<16x32xf32>
      %cst_224 = arith.constant dense<0.000000e+00> : vector<17x32xf32>
      %288 = tpu.matmul %285, %287, %cst_224 {dimension_numbers = #tpu.dot_dimension_numbers<[1], [0], [0], [1], [0, 0, 1, 1], [], []>} : vector<17x16xf32>, vector<16x32xf32>, vector<17x32xf32> -> vector<17x32xf32>
      %289 = arith.addf %282, %288 : vector<17x32xf32>
      %290 = arith.index_cast %275 : i32 to index
      %c2_225 = arith.constant 2 : index
      %c0_226 = arith.constant 0 : index
      %291 = vector.load %arg32[%290, %c2_225, %c0_226] : memref<21x21x16xf32, #tpu.memory_space<vmem>>, vector<1x17x16xf32>
      %292 = vector.shape_cast %291 : vector<1x17x16xf32> to vector<17x16xf32>
      %c22 = arith.constant 22 : index
      %c0_227 = arith.constant 0 : index
      %c0_228 = arith.constant 0 : index
      %293 = vector.load %arg16[%c22, %c0_227, %c0_228] : memref<25x16x32xf32, #tpu.memory_space<vmem>>, vector<1x16x32xf32>
      %294 = vector.shape_cast %293 : vector<1x16x32xf32> to vector<16x32xf32>
      %cst_229 = arith.constant dense<0.000000e+00> : vector<17x32xf32>
      %295 = tpu.matmul %292, %294, %cst_229 {dimension_numbers = #tpu.dot_dimension_numbers<[1], [0], [0], [1], [0, 0, 1, 1], [], []>} : vector<17x16xf32>, vector<16x32xf32>, vector<17x32xf32> -> vector<17x32xf32>
      %296 = arith.addf %289, %295 : vector<17x32xf32>
      %297 = arith.index_cast %275 : i32 to index
      %c3_230 = arith.constant 3 : index
      %c0_231 = arith.constant 0 : index
      %298 = vector.load %arg32[%297, %c3_230, %c0_231] : memref<21x21x16xf32, #tpu.memory_space<vmem>>, vector<1x17x16xf32>
      %299 = vector.shape_cast %298 : vector<1x17x16xf32> to vector<17x16xf32>
      %c23 = arith.constant 23 : index
      %c0_232 = arith.constant 0 : index
      %c0_233 = arith.constant 0 : index
      %300 = vector.load %arg16[%c23, %c0_232, %c0_233] : memref<25x16x32xf32, #tpu.memory_space<vmem>>, vector<1x16x32xf32>
      %301 = vector.shape_cast %300 : vector<1x16x32xf32> to vector<16x32xf32>
      %cst_234 = arith.constant dense<0.000000e+00> : vector<17x32xf32>
      %302 = tpu.matmul %299, %301, %cst_234 {dimension_numbers = #tpu.dot_dimension_numbers<[1], [0], [0], [1], [0, 0, 1, 1], [], []>} : vector<17x16xf32>, vector<16x32xf32>, vector<17x32xf32> -> vector<17x32xf32>
      %303 = arith.addf %296, %302 : vector<17x32xf32>
      %304 = arith.index_cast %275 : i32 to index
      %c4_235 = arith.constant 4 : index
      %c0_236 = arith.constant 0 : index
      %305 = vector.load %arg32[%304, %c4_235, %c0_236] : memref<21x21x16xf32, #tpu.memory_space<vmem>>, vector<1x17x16xf32>
      %306 = vector.shape_cast %305 : vector<1x17x16xf32> to vector<17x16xf32>
      %c24 = arith.constant 24 : index
      %c0_237 = arith.constant 0 : index
      %c0_238 = arith.constant 0 : index
      %307 = vector.load %arg16[%c24, %c0_237, %c0_238] : memref<25x16x32xf32, #tpu.memory_space<vmem>>, vector<1x16x32xf32>
      %308 = vector.shape_cast %307 : vector<1x16x32xf32> to vector<16x32xf32>
      %cst_239 = arith.constant dense<0.000000e+00> : vector<17x32xf32>
      %309 = tpu.matmul %306, %308, %cst_239 {dimension_numbers = #tpu.dot_dimension_numbers<[1], [0], [0], [1], [0, 0, 1, 1], [], []>} : vector<17x16xf32>, vector<16x32xf32>, vector<17x32xf32> -> vector<17x32xf32>
      %310 = arith.addf %303, %309 : vector<17x32xf32>
      %cst_240 = arith.constant dense<0.000000e+00> : vector<9x32xf32>
      %311 = tpu.matmul %61, %310, %cst_240 {dimension_numbers = #tpu.dot_dimension_numbers<[1], [0], [0], [1], [0, 0, 1, 1], [], []>} : vector<9x17xf32>, vector<17x32xf32>, vector<9x32xf32> -> vector<9x32xf32>
      %312 = vector.broadcast %54 : vector<1x32xf32> to vector<9x32xf32>
      %313 = arith.addf %311, %312 : vector<9x32xf32>
      %cst_241 = arith.constant 0.000000e+00 : f32
      %314 = vector.broadcast %cst_241 : f32 to vector<9x32xf32>
      %315 = arith.maximumf %313, %314 : vector<9x32xf32>
      %316 = arith.index_cast %arg35 : i32 to index
      %c0_242 = arith.constant 0 : index
      %c0_243 = arith.constant 0 : index
      %317 = vector.load %arg33[%316, %c0_242, %c0_243] : memref<9x9x32xf32, #tpu.memory_space<vmem>>, vector<1x9x32xf32>
      %318 = vector.shape_cast %317 : vector<1x9x32xf32> to vector<9x32xf32>
      %319 = vector.shape_cast %315 : vector<9x32xf32> to vector<1x9x32xf32>
      tpu.vector_store %arg33[%316, %c0_242, %c0_243], %319 {strides = array<i32>} : memref<9x9x32xf32, #tpu.memory_space<vmem>>, vector<1x9x32xf32>,
    }
    %c9_i32_50 = arith.constant 9 : i32
    %c0_51 = arith.constant 0 : index
    %c0_52 = arith.constant 0 : index
    %63 = vector.load %arg19[%c0_51, %c0_52] : memref<1x64xf32, #tpu.memory_space<vmem>>, vector<1x64xf32>
    %64 = tpu.iota {dimensions = array<i32: 0>} : vector<3x5xi32>
    %65 = tpu.iota {dimensions = array<i32: 1>} : vector<3x5xi32>
    %c2_i32_53 = arith.constant 2 : i32
    %66 = vector.broadcast %c2_i32_53 : i32 to vector<3x5xi32>
    %67 = arith.muli %66, %64 : vector<3x5xi32>
    %68 = arith.cmpi eq, %65, %67 : vector<3x5xi32>
    %69 = arith.extui %68 : vector<3x5xi1> to vector<3x5xi32>
    %70 = arith.sitofp %69 : vector<3x5xi32> to vector<3x5xf32>
    %c0_i32_54 = arith.constant 0 : i32
    %c3_i32_55 = arith.constant 3 : i32
    %71 = arith.addi %c0_i32_54, %c3_i32_55 : i32
    %c1_i32_56 = arith.constant 1 : i32
    scf.for %arg35 = %c0_i32_54 to %71 step %c1_i32_56  : i32 {
      %cst_97 = arith.constant 0.000000e+00 : f32
      %120 = vector.broadcast %cst_97 : f32 to vector<5x64xf32>
      %c2_i32_98 = arith.constant 2 : i32
      %121 = arith.muli %c2_i32_98, %arg35 : i32
      %c0_i32_99 = arith.constant 0 : i32
      %122 = arith.addi %c0_i32_99, %121 : i32
      %c0_i32_100 = arith.constant 0 : i32
      %123 = arith.addi %122, %c0_i32_100 : i32
      %124 = arith.index_cast %123 : i32 to index
      %c0_101 = arith.constant 0 : index
      %c0_102 = arith.constant 0 : index
      %125 = vector.load %arg33[%124, %c0_101, %c0_102] : memref<9x9x32xf32, #tpu.memory_space<vmem>>, vector<1x5x32xf32>
      %126 = vector.shape_cast %125 : vector<1x5x32xf32> to vector<5x32xf32>
      %c0_103 = arith.constant 0 : index
      %c0_104 = arith.constant 0 : index
      %c0_105 = arith.constant 0 : index
      %127 = vector.load %arg18[%c0_103, %c0_104, %c0_105] : memref<25x32x64xf32, #tpu.memory_space<vmem>>, vector<1x32x64xf32>
      %128 = vector.shape_cast %127 : vector<1x32x64xf32> to vector<32x64xf32>
      %cst_106 = arith.constant dense<0.000000e+00> : vector<5x64xf32>
      %129 = tpu.matmul %126, %128, %cst_106 {dimension_numbers = #tpu.dot_dimension_numbers<[1], [0], [0], [1], [0, 0, 1, 1], [], []>} : vector<5x32xf32>, vector<32x64xf32>, vector<5x64xf32> -> vector<5x64xf32>
      %130 = arith.addf %120, %129 : vector<5x64xf32>
      %131 = arith.index_cast %123 : i32 to index
      %c1_107 = arith.constant 1 : index
      %c0_108 = arith.constant 0 : index
      %132 = vector.load %arg33[%131, %c1_107, %c0_108] : memref<9x9x32xf32, #tpu.memory_space<vmem>>, vector<1x5x32xf32>
      %133 = vector.shape_cast %132 : vector<1x5x32xf32> to vector<5x32xf32>
      %c1_109 = arith.constant 1 : index
      %c0_110 = arith.constant 0 : index
      %c0_111 = arith.constant 0 : index
      %134 = vector.load %arg18[%c1_109, %c0_110, %c0_111] : memref<25x32x64xf32, #tpu.memory_space<vmem>>, vector<1x32x64xf32>
      %135 = vector.shape_cast %134 : vector<1x32x64xf32> to vector<32x64xf32>
      %cst_112 = arith.constant dense<0.000000e+00> : vector<5x64xf32>
      %136 = tpu.matmul %133, %135, %cst_112 {dimension_numbers = #tpu.dot_dimension_numbers<[1], [0], [0], [1], [0, 0, 1, 1], [], []>} : vector<5x32xf32>, vector<32x64xf32>, vector<5x64xf32> -> vector<5x64xf32>
      %137 = arith.addf %130, %136 : vector<5x64xf32>
      %138 = arith.index_cast %123 : i32 to index
      %c2_113 = arith.constant 2 : index
      %c0_114 = arith.constant 0 : index
      %139 = vector.load %arg33[%138, %c2_113, %c0_114] : memref<9x9x32xf32, #tpu.memory_space<vmem>>, vector<1x5x32xf32>
      %140 = vector.shape_cast %139 : vector<1x5x32xf32> to vector<5x32xf32>
      %c2_115 = arith.constant 2 : index
      %c0_116 = arith.constant 0 : index
      %c0_117 = arith.constant 0 : index
      %141 = vector.load %arg18[%c2_115, %c0_116, %c0_117] : memref<25x32x64xf32, #tpu.memory_space<vmem>>, vector<1x32x64xf32>
      %142 = vector.shape_cast %141 : vector<1x32x64xf32> to vector<32x64xf32>
      %cst_118 = arith.constant dense<0.000000e+00> : vector<5x64xf32>
      %143 = tpu.matmul %140, %142, %cst_118 {dimension_numbers = #tpu.dot_dimension_numbers<[1], [0], [0], [1], [0, 0, 1, 1], [], []>} : vector<5x32xf32>, vector<32x64xf32>, vector<5x64xf32> -> vector<5x64xf32>
      %144 = arith.addf %137, %143 : vector<5x64xf32>
      %145 = arith.index_cast %123 : i32 to index
      %c3 = arith.constant 3 : index
      %c0_119 = arith.constant 0 : index
      %146 = vector.load %arg33[%145, %c3, %c0_119] : memref<9x9x32xf32, #tpu.memory_space<vmem>>, vector<1x5x32xf32>
      %147 = vector.shape_cast %146 : vector<1x5x32xf32> to vector<5x32xf32>
      %c3_120 = arith.constant 3 : index
      %c0_121 = arith.constant 0 : index
      %c0_122 = arith.constant 0 : index
      %148 = vector.load %arg18[%c3_120, %c0_121, %c0_122] : memref<25x32x64xf32, #tpu.memory_space<vmem>>, vector<1x32x64xf32>
      %149 = vector.shape_cast %148 : vector<1x32x64xf32> to vector<32x64xf32>
      %cst_123 = arith.constant dense<0.000000e+00> : vector<5x64xf32>
      %150 = tpu.matmul %147, %149, %cst_123 {dimension_numbers = #tpu.dot_dimension_numbers<[1], [0], [0], [1], [0, 0, 1, 1], [], []>} : vector<5x32xf32>, vector<32x64xf32>, vector<5x64xf32> -> vector<5x64xf32>
      %151 = arith.addf %144, %150 : vector<5x64xf32>
      %152 = arith.index_cast %123 : i32 to index
      %c4 = arith.constant 4 : index
      %c0_124 = arith.constant 0 : index
      %153 = vector.load %arg33[%152, %c4, %c0_124] : memref<9x9x32xf32, #tpu.memory_space<vmem>>, vector<1x5x32xf32>
      %154 = vector.shape_cast %153 : vector<1x5x32xf32> to vector<5x32xf32>
      %c4_125 = arith.constant 4 : index
      %c0_126 = arith.constant 0 : index
      %c0_127 = arith.constant 0 : index
      %155 = vector.load %arg18[%c4_125, %c0_126, %c0_127] : memref<25x32x64xf32, #tpu.memory_space<vmem>>, vector<1x32x64xf32>
      %156 = vector.shape_cast %155 : vector<1x32x64xf32> to vector<32x64xf32>
      %cst_128 = arith.constant dense<0.000000e+00> : vector<5x64xf32>
      %157 = tpu.matmul %154, %156, %cst_128 {dimension_numbers = #tpu.dot_dimension_numbers<[1], [0], [0], [1], [0, 0, 1, 1], [], []>} : vector<5x32xf32>, vector<32x64xf32>, vector<5x64xf32> -> vector<5x64xf32>
      %158 = arith.addf %151, %157 : vector<5x64xf32>
      %c2_i32_129 = arith.constant 2 : i32
      %159 = arith.muli %c2_i32_129, %arg35 : i32
      %c0_i32_130 = arith.constant 0 : i32
      %160 = arith.addi %c0_i32_130, %159 : i32
      %c1_i32_131 = arith.constant 1 : i32
      %161 = arith.addi %160, %c1_i32_131 : i32
      %162 = arith.index_cast %161 : i32 to index
      %c0_132 = arith.constant 0 : index
      %c0_133 = arith.constant 0 : index
      %163 = vector.load %arg33[%162, %c0_132, %c0_133] : memref<9x9x32xf32, #tpu.memory_space<vmem>>, vector<1x5x32xf32>
      %164 = vector.shape_cast %163 : vector<1x5x32xf32> to vector<5x32xf32>
      %c5 = arith.constant 5 : index
      %c0_134 = arith.constant 0 : index
      %c0_135 = arith.constant 0 : index
      %165 = vector.load %arg18[%c5, %c0_134, %c0_135] : memref<25x32x64xf32, #tpu.memory_space<vmem>>, vector<1x32x64xf32>
      %166 = vector.shape_cast %165 : vector<1x32x64xf32> to vector<32x64xf32>
      %cst_136 = arith.constant dense<0.000000e+00> : vector<5x64xf32>
      %167 = tpu.matmul %164, %166, %cst_136 {dimension_numbers = #tpu.dot_dimension_numbers<[1], [0], [0], [1], [0, 0, 1, 1], [], []>} : vector<5x32xf32>, vector<32x64xf32>, vector<5x64xf32> -> vector<5x64xf32>
      %168 = arith.addf %158, %167 : vector<5x64xf32>
      %169 = arith.index_cast %161 : i32 to index
      %c1_137 = arith.constant 1 : index
      %c0_138 = arith.constant 0 : index
      %170 = vector.load %arg33[%169, %c1_137, %c0_138] : memref<9x9x32xf32, #tpu.memory_space<vmem>>, vector<1x5x32xf32>
      %171 = vector.shape_cast %170 : vector<1x5x32xf32> to vector<5x32xf32>
      %c6 = arith.constant 6 : index
      %c0_139 = arith.constant 0 : index
      %c0_140 = arith.constant 0 : index
      %172 = vector.load %arg18[%c6, %c0_139, %c0_140] : memref<25x32x64xf32, #tpu.memory_space<vmem>>, vector<1x32x64xf32>
      %173 = vector.shape_cast %172 : vector<1x32x64xf32> to vector<32x64xf32>
      %cst_141 = arith.constant dense<0.000000e+00> : vector<5x64xf32>
      %174 = tpu.matmul %171, %173, %cst_141 {dimension_numbers = #tpu.dot_dimension_numbers<[1], [0], [0], [1], [0, 0, 1, 1], [], []>} : vector<5x32xf32>, vector<32x64xf32>, vector<5x64xf32> -> vector<5x64xf32>
      %175 = arith.addf %168, %174 : vector<5x64xf32>
      %176 = arith.index_cast %161 : i32 to index
      %c2_142 = arith.constant 2 : index
      %c0_143 = arith.constant 0 : index
      %177 = vector.load %arg33[%176, %c2_142, %c0_143] : memref<9x9x32xf32, #tpu.memory_space<vmem>>, vector<1x5x32xf32>
      %178 = vector.shape_cast %177 : vector<1x5x32xf32> to vector<5x32xf32>
      %c7 = arith.constant 7 : index
      %c0_144 = arith.constant 0 : index
      %c0_145 = arith.constant 0 : index
      %179 = vector.load %arg18[%c7, %c0_144, %c0_145] : memref<25x32x64xf32, #tpu.memory_space<vmem>>, vector<1x32x64xf32>
      %180 = vector.shape_cast %179 : vector<1x32x64xf32> to vector<32x64xf32>
      %cst_146 = arith.constant dense<0.000000e+00> : vector<5x64xf32>
      %181 = tpu.matmul %178, %180, %cst_146 {dimension_numbers = #tpu.dot_dimension_numbers<[1], [0], [0], [1], [0, 0, 1, 1], [], []>} : vector<5x32xf32>, vector<32x64xf32>, vector<5x64xf32> -> vector<5x64xf32>
      %182 = arith.addf %175, %181 : vector<5x64xf32>
      %183 = arith.index_cast %161 : i32 to index
      %c3_147 = arith.constant 3 : index
      %c0_148 = arith.constant 0 : index
      %184 = vector.load %arg33[%183, %c3_147, %c0_148] : memref<9x9x32xf32, #tpu.memory_space<vmem>>, vector<1x5x32xf32>
      %185 = vector.shape_cast %184 : vector<1x5x32xf32> to vector<5x32xf32>
      %c8 = arith.constant 8 : index
      %c0_149 = arith.constant 0 : index
      %c0_150 = arith.constant 0 : index
      %186 = vector.load %arg18[%c8, %c0_149, %c0_150] : memref<25x32x64xf32, #tpu.memory_space<vmem>>, vector<1x32x64xf32>
      %187 = vector.shape_cast %186 : vector<1x32x64xf32> to vector<32x64xf32>
      %cst_151 = arith.constant dense<0.000000e+00> : vector<5x64xf32>
      %188 = tpu.matmul %185, %187, %cst_151 {dimension_numbers = #tpu.dot_dimension_numbers<[1], [0], [0], [1], [0, 0, 1, 1], [], []>} : vector<5x32xf32>, vector<32x64xf32>, vector<5x64xf32> -> vector<5x64xf32>
      %189 = arith.addf %182, %188 : vector<5x64xf32>
      %190 = arith.index_cast %161 : i32 to index
      %c4_152 = arith.constant 4 : index
      %c0_153 = arith.constant 0 : index
      %191 = vector.load %arg33[%190, %c4_152, %c0_153] : memref<9x9x32xf32, #tpu.memory_space<vmem>>, vector<1x5x32xf32>
      %192 = vector.shape_cast %191 : vector<1x5x32xf32> to vector<5x32xf32>
      %c9 = arith.constant 9 : index
      %c0_154 = arith.constant 0 : index
      %c0_155 = arith.constant 0 : index
      %193 = vector.load %arg18[%c9, %c0_154, %c0_155] : memref<25x32x64xf32, #tpu.memory_space<vmem>>, vector<1x32x64xf32>
      %194 = vector.shape_cast %193 : vector<1x32x64xf32> to vector<32x64xf32>
      %cst_156 = arith.constant dense<0.000000e+00> : vector<5x64xf32>
      %195 = tpu.matmul %192, %194, %cst_156 {dimension_numbers = #tpu.dot_dimension_numbers<[1], [0], [0], [1], [0, 0, 1, 1], [], []>} : vector<5x32xf32>, vector<32x64xf32>, vector<5x64xf32> -> vector<5x64xf32>
      %196 = arith.addf %189, %195 : vector<5x64xf32>
      %c2_i32_157 = arith.constant 2 : i32
      %197 = arith.muli %c2_i32_157, %arg35 : i32
      %c0_i32_158 = arith.constant 0 : i32
      %198 = arith.addi %c0_i32_158, %197 : i32
      %c2_i32_159 = arith.constant 2 : i32
      %199 = arith.addi %198, %c2_i32_159 : i32
      %200 = arith.index_cast %199 : i32 to index
      %c0_160 = arith.constant 0 : index
      %c0_161 = arith.constant 0 : index
      %201 = vector.load %arg33[%200, %c0_160, %c0_161] : memref<9x9x32xf32, #tpu.memory_space<vmem>>, vector<1x5x32xf32>
      %202 = vector.shape_cast %201 : vector<1x5x32xf32> to vector<5x32xf32>
      %c10 = arith.constant 10 : index
      %c0_162 = arith.constant 0 : index
      %c0_163 = arith.constant 0 : index
      %203 = vector.load %arg18[%c10, %c0_162, %c0_163] : memref<25x32x64xf32, #tpu.memory_space<vmem>>, vector<1x32x64xf32>
      %204 = vector.shape_cast %203 : vector<1x32x64xf32> to vector<32x64xf32>
      %cst_164 = arith.constant dense<0.000000e+00> : vector<5x64xf32>
      %205 = tpu.matmul %202, %204, %cst_164 {dimension_numbers = #tpu.dot_dimension_numbers<[1], [0], [0], [1], [0, 0, 1, 1], [], []>} : vector<5x32xf32>, vector<32x64xf32>, vector<5x64xf32> -> vector<5x64xf32>
      %206 = arith.addf %196, %205 : vector<5x64xf32>
      %207 = arith.index_cast %199 : i32 to index
      %c1_165 = arith.constant 1 : index
      %c0_166 = arith.constant 0 : index
      %208 = vector.load %arg33[%207, %c1_165, %c0_166] : memref<9x9x32xf32, #tpu.memory_space<vmem>>, vector<1x5x32xf32>
      %209 = vector.shape_cast %208 : vector<1x5x32xf32> to vector<5x32xf32>
      %c11 = arith.constant 11 : index
      %c0_167 = arith.constant 0 : index
      %c0_168 = arith.constant 0 : index
      %210 = vector.load %arg18[%c11, %c0_167, %c0_168] : memref<25x32x64xf32, #tpu.memory_space<vmem>>, vector<1x32x64xf32>
      %211 = vector.shape_cast %210 : vector<1x32x64xf32> to vector<32x64xf32>
      %cst_169 = arith.constant dense<0.000000e+00> : vector<5x64xf32>
      %212 = tpu.matmul %209, %211, %cst_169 {dimension_numbers = #tpu.dot_dimension_numbers<[1], [0], [0], [1], [0, 0, 1, 1], [], []>} : vector<5x32xf32>, vector<32x64xf32>, vector<5x64xf32> -> vector<5x64xf32>
      %213 = arith.addf %206, %212 : vector<5x64xf32>
      %214 = arith.index_cast %199 : i32 to index
      %c2_170 = arith.constant 2 : index
      %c0_171 = arith.constant 0 : index
      %215 = vector.load %arg33[%214, %c2_170, %c0_171] : memref<9x9x32xf32, #tpu.memory_space<vmem>>, vector<1x5x32xf32>
      %216 = vector.shape_cast %215 : vector<1x5x32xf32> to vector<5x32xf32>
      %c12 = arith.constant 12 : index
      %c0_172 = arith.constant 0 : index
      %c0_173 = arith.constant 0 : index
      %217 = vector.load %arg18[%c12, %c0_172, %c0_173] : memref<25x32x64xf32, #tpu.memory_space<vmem>>, vector<1x32x64xf32>
      %218 = vector.shape_cast %217 : vector<1x32x64xf32> to vector<32x64xf32>
      %cst_174 = arith.constant dense<0.000000e+00> : vector<5x64xf32>
      %219 = tpu.matmul %216, %218, %cst_174 {dimension_numbers = #tpu.dot_dimension_numbers<[1], [0], [0], [1], [0, 0, 1, 1], [], []>} : vector<5x32xf32>, vector<32x64xf32>, vector<5x64xf32> -> vector<5x64xf32>
      %220 = arith.addf %213, %219 : vector<5x64xf32>
      %221 = arith.index_cast %199 : i32 to index
      %c3_175 = arith.constant 3 : index
      %c0_176 = arith.constant 0 : index
      %222 = vector.load %arg33[%221, %c3_175, %c0_176] : memref<9x9x32xf32, #tpu.memory_space<vmem>>, vector<1x5x32xf32>
      %223 = vector.shape_cast %222 : vector<1x5x32xf32> to vector<5x32xf32>
      %c13 = arith.constant 13 : index
      %c0_177 = arith.constant 0 : index
      %c0_178 = arith.constant 0 : index
      %224 = vector.load %arg18[%c13, %c0_177, %c0_178] : memref<25x32x64xf32, #tpu.memory_space<vmem>>, vector<1x32x64xf32>
      %225 = vector.shape_cast %224 : vector<1x32x64xf32> to vector<32x64xf32>
      %cst_179 = arith.constant dense<0.000000e+00> : vector<5x64xf32>
      %226 = tpu.matmul %223, %225, %cst_179 {dimension_numbers = #tpu.dot_dimension_numbers<[1], [0], [0], [1], [0, 0, 1, 1], [], []>} : vector<5x32xf32>, vector<32x64xf32>, vector<5x64xf32> -> vector<5x64xf32>
      %227 = arith.addf %220, %226 : vector<5x64xf32>
      %228 = arith.index_cast %199 : i32 to index
      %c4_180 = arith.constant 4 : index
      %c0_181 = arith.constant 0 : index
      %229 = vector.load %arg33[%228, %c4_180, %c0_181] : memref<9x9x32xf32, #tpu.memory_space<vmem>>, vector<1x5x32xf32>
      %230 = vector.shape_cast %229 : vector<1x5x32xf32> to vector<5x32xf32>
      %c14 = arith.constant 14 : index
      %c0_182 = arith.constant 0 : index
      %c0_183 = arith.constant 0 : index
      %231 = vector.load %arg18[%c14, %c0_182, %c0_183] : memref<25x32x64xf32, #tpu.memory_space<vmem>>, vector<1x32x64xf32>
      %232 = vector.shape_cast %231 : vector<1x32x64xf32> to vector<32x64xf32>
      %cst_184 = arith.constant dense<0.000000e+00> : vector<5x64xf32>
      %233 = tpu.matmul %230, %232, %cst_184 {dimension_numbers = #tpu.dot_dimension_numbers<[1], [0], [0], [1], [0, 0, 1, 1], [], []>} : vector<5x32xf32>, vector<32x64xf32>, vector<5x64xf32> -> vector<5x64xf32>
      %234 = arith.addf %227, %233 : vector<5x64xf32>
      %c2_i32_185 = arith.constant 2 : i32
      %235 = arith.muli %c2_i32_185, %arg35 : i32
      %c0_i32_186 = arith.constant 0 : i32
      %236 = arith.addi %c0_i32_186, %235 : i32
      %c3_i32_187 = arith.constant 3 : i32
      %237 = arith.addi %236, %c3_i32_187 : i32
      %238 = arith.index_cast %237 : i32 to index
      %c0_188 = arith.constant 0 : index
      %c0_189 = arith.constant 0 : index
      %239 = vector.load %arg33[%238, %c0_188, %c0_189] : memref<9x9x32xf32, #tpu.memory_space<vmem>>, vector<1x5x32xf32>
      %240 = vector.shape_cast %239 : vector<1x5x32xf32> to vector<5x32xf32>
      %c15 = arith.constant 15 : index
      %c0_190 = arith.constant 0 : index
      %c0_191 = arith.constant 0 : index
      %241 = vector.load %arg18[%c15, %c0_190, %c0_191] : memref<25x32x64xf32, #tpu.memory_space<vmem>>, vector<1x32x64xf32>
      %242 = vector.shape_cast %241 : vector<1x32x64xf32> to vector<32x64xf32>
      %cst_192 = arith.constant dense<0.000000e+00> : vector<5x64xf32>
      %243 = tpu.matmul %240, %242, %cst_192 {dimension_numbers = #tpu.dot_dimension_numbers<[1], [0], [0], [1], [0, 0, 1, 1], [], []>} : vector<5x32xf32>, vector<32x64xf32>, vector<5x64xf32> -> vector<5x64xf32>
      %244 = arith.addf %234, %243 : vector<5x64xf32>
      %245 = arith.index_cast %237 : i32 to index
      %c1_193 = arith.constant 1 : index
      %c0_194 = arith.constant 0 : index
      %246 = vector.load %arg33[%245, %c1_193, %c0_194] : memref<9x9x32xf32, #tpu.memory_space<vmem>>, vector<1x5x32xf32>
      %247 = vector.shape_cast %246 : vector<1x5x32xf32> to vector<5x32xf32>
      %c16 = arith.constant 16 : index
      %c0_195 = arith.constant 0 : index
      %c0_196 = arith.constant 0 : index
      %248 = vector.load %arg18[%c16, %c0_195, %c0_196] : memref<25x32x64xf32, #tpu.memory_space<vmem>>, vector<1x32x64xf32>
      %249 = vector.shape_cast %248 : vector<1x32x64xf32> to vector<32x64xf32>
      %cst_197 = arith.constant dense<0.000000e+00> : vector<5x64xf32>
      %250 = tpu.matmul %247, %249, %cst_197 {dimension_numbers = #tpu.dot_dimension_numbers<[1], [0], [0], [1], [0, 0, 1, 1], [], []>} : vector<5x32xf32>, vector<32x64xf32>, vector<5x64xf32> -> vector<5x64xf32>
      %251 = arith.addf %244, %250 : vector<5x64xf32>
      %252 = arith.index_cast %237 : i32 to index
      %c2_198 = arith.constant 2 : index
      %c0_199 = arith.constant 0 : index
      %253 = vector.load %arg33[%252, %c2_198, %c0_199] : memref<9x9x32xf32, #tpu.memory_space<vmem>>, vector<1x5x32xf32>
      %254 = vector.shape_cast %253 : vector<1x5x32xf32> to vector<5x32xf32>
      %c17 = arith.constant 17 : index
      %c0_200 = arith.constant 0 : index
      %c0_201 = arith.constant 0 : index
      %255 = vector.load %arg18[%c17, %c0_200, %c0_201] : memref<25x32x64xf32, #tpu.memory_space<vmem>>, vector<1x32x64xf32>
      %256 = vector.shape_cast %255 : vector<1x32x64xf32> to vector<32x64xf32>
      %cst_202 = arith.constant dense<0.000000e+00> : vector<5x64xf32>
      %257 = tpu.matmul %254, %256, %cst_202 {dimension_numbers = #tpu.dot_dimension_numbers<[1], [0], [0], [1], [0, 0, 1, 1], [], []>} : vector<5x32xf32>, vector<32x64xf32>, vector<5x64xf32> -> vector<5x64xf32>
      %258 = arith.addf %251, %257 : vector<5x64xf32>
      %259 = arith.index_cast %237 : i32 to index
      %c3_203 = arith.constant 3 : index
      %c0_204 = arith.constant 0 : index
      %260 = vector.load %arg33[%259, %c3_203, %c0_204] : memref<9x9x32xf32, #tpu.memory_space<vmem>>, vector<1x5x32xf32>
      %261 = vector.shape_cast %260 : vector<1x5x32xf32> to vector<5x32xf32>
      %c18 = arith.constant 18 : index
      %c0_205 = arith.constant 0 : index
      %c0_206 = arith.constant 0 : index
      %262 = vector.load %arg18[%c18, %c0_205, %c0_206] : memref<25x32x64xf32, #tpu.memory_space<vmem>>, vector<1x32x64xf32>
      %263 = vector.shape_cast %262 : vector<1x32x64xf32> to vector<32x64xf32>
      %cst_207 = arith.constant dense<0.000000e+00> : vector<5x64xf32>
      %264 = tpu.matmul %261, %263, %cst_207 {dimension_numbers = #tpu.dot_dimension_numbers<[1], [0], [0], [1], [0, 0, 1, 1], [], []>} : vector<5x32xf32>, vector<32x64xf32>, vector<5x64xf32> -> vector<5x64xf32>
      %265 = arith.addf %258, %264 : vector<5x64xf32>
      %266 = arith.index_cast %237 : i32 to index
      %c4_208 = arith.constant 4 : index
      %c0_209 = arith.constant 0 : index
      %267 = vector.load %arg33[%266, %c4_208, %c0_209] : memref<9x9x32xf32, #tpu.memory_space<vmem>>, vector<1x5x32xf32>
      %268 = vector.shape_cast %267 : vector<1x5x32xf32> to vector<5x32xf32>
      %c19 = arith.constant 19 : index
      %c0_210 = arith.constant 0 : index
      %c0_211 = arith.constant 0 : index
      %269 = vector.load %arg18[%c19, %c0_210, %c0_211] : memref<25x32x64xf32, #tpu.memory_space<vmem>>, vector<1x32x64xf32>
      %270 = vector.shape_cast %269 : vector<1x32x64xf32> to vector<32x64xf32>
      %cst_212 = arith.constant dense<0.000000e+00> : vector<5x64xf32>
      %271 = tpu.matmul %268, %270, %cst_212 {dimension_numbers = #tpu.dot_dimension_numbers<[1], [0], [0], [1], [0, 0, 1, 1], [], []>} : vector<5x32xf32>, vector<32x64xf32>, vector<5x64xf32> -> vector<5x64xf32>
      %272 = arith.addf %265, %271 : vector<5x64xf32>
      %c2_i32_213 = arith.constant 2 : i32
      %273 = arith.muli %c2_i32_213, %arg35 : i32
      %c0_i32_214 = arith.constant 0 : i32
      %274 = arith.addi %c0_i32_214, %273 : i32
      %c4_i32 = arith.constant 4 : i32
      %275 = arith.addi %274, %c4_i32 : i32
      %276 = arith.index_cast %275 : i32 to index
      %c0_215 = arith.constant 0 : index
      %c0_216 = arith.constant 0 : index
      %277 = vector.load %arg33[%276, %c0_215, %c0_216] : memref<9x9x32xf32, #tpu.memory_space<vmem>>, vector<1x5x32xf32>
      %278 = vector.shape_cast %277 : vector<1x5x32xf32> to vector<5x32xf32>
      %c20 = arith.constant 20 : index
      %c0_217 = arith.constant 0 : index
      %c0_218 = arith.constant 0 : index
      %279 = vector.load %arg18[%c20, %c0_217, %c0_218] : memref<25x32x64xf32, #tpu.memory_space<vmem>>, vector<1x32x64xf32>
      %280 = vector.shape_cast %279 : vector<1x32x64xf32> to vector<32x64xf32>
      %cst_219 = arith.constant dense<0.000000e+00> : vector<5x64xf32>
      %281 = tpu.matmul %278, %280, %cst_219 {dimension_numbers = #tpu.dot_dimension_numbers<[1], [0], [0], [1], [0, 0, 1, 1], [], []>} : vector<5x32xf32>, vector<32x64xf32>, vector<5x64xf32> -> vector<5x64xf32>
      %282 = arith.addf %272, %281 : vector<5x64xf32>
      %283 = arith.index_cast %275 : i32 to index
      %c1_220 = arith.constant 1 : index
      %c0_221 = arith.constant 0 : index
      %284 = vector.load %arg33[%283, %c1_220, %c0_221] : memref<9x9x32xf32, #tpu.memory_space<vmem>>, vector<1x5x32xf32>
      %285 = vector.shape_cast %284 : vector<1x5x32xf32> to vector<5x32xf32>
      %c21 = arith.constant 21 : index
      %c0_222 = arith.constant 0 : index
      %c0_223 = arith.constant 0 : index
      %286 = vector.load %arg18[%c21, %c0_222, %c0_223] : memref<25x32x64xf32, #tpu.memory_space<vmem>>, vector<1x32x64xf32>
      %287 = vector.shape_cast %286 : vector<1x32x64xf32> to vector<32x64xf32>
      %cst_224 = arith.constant dense<0.000000e+00> : vector<5x64xf32>
      %288 = tpu.matmul %285, %287, %cst_224 {dimension_numbers = #tpu.dot_dimension_numbers<[1], [0], [0], [1], [0, 0, 1, 1], [], []>} : vector<5x32xf32>, vector<32x64xf32>, vector<5x64xf32> -> vector<5x64xf32>
      %289 = arith.addf %282, %288 : vector<5x64xf32>
      %290 = arith.index_cast %275 : i32 to index
      %c2_225 = arith.constant 2 : index
      %c0_226 = arith.constant 0 : index
      %291 = vector.load %arg33[%290, %c2_225, %c0_226] : memref<9x9x32xf32, #tpu.memory_space<vmem>>, vector<1x5x32xf32>
      %292 = vector.shape_cast %291 : vector<1x5x32xf32> to vector<5x32xf32>
      %c22 = arith.constant 22 : index
      %c0_227 = arith.constant 0 : index
      %c0_228 = arith.constant 0 : index
      %293 = vector.load %arg18[%c22, %c0_227, %c0_228] : memref<25x32x64xf32, #tpu.memory_space<vmem>>, vector<1x32x64xf32>
      %294 = vector.shape_cast %293 : vector<1x32x64xf32> to vector<32x64xf32>
      %cst_229 = arith.constant dense<0.000000e+00> : vector<5x64xf32>
      %295 = tpu.matmul %292, %294, %cst_229 {dimension_numbers = #tpu.dot_dimension_numbers<[1], [0], [0], [1], [0, 0, 1, 1], [], []>} : vector<5x32xf32>, vector<32x64xf32>, vector<5x64xf32> -> vector<5x64xf32>
      %296 = arith.addf %289, %295 : vector<5x64xf32>
      %297 = arith.index_cast %275 : i32 to index
      %c3_230 = arith.constant 3 : index
      %c0_231 = arith.constant 0 : index
      %298 = vector.load %arg33[%297, %c3_230, %c0_231] : memref<9x9x32xf32, #tpu.memory_space<vmem>>, vector<1x5x32xf32>
      %299 = vector.shape_cast %298 : vector<1x5x32xf32> to vector<5x32xf32>
      %c23 = arith.constant 23 : index
      %c0_232 = arith.constant 0 : index
      %c0_233 = arith.constant 0 : index
      %300 = vector.load %arg18[%c23, %c0_232, %c0_233] : memref<25x32x64xf32, #tpu.memory_space<vmem>>, vector<1x32x64xf32>
      %301 = vector.shape_cast %300 : vector<1x32x64xf32> to vector<32x64xf32>
      %cst_234 = arith.constant dense<0.000000e+00> : vector<5x64xf32>
      %302 = tpu.matmul %299, %301, %cst_234 {dimension_numbers = #tpu.dot_dimension_numbers<[1], [0], [0], [1], [0, 0, 1, 1], [], []>} : vector<5x32xf32>, vector<32x64xf32>, vector<5x64xf32> -> vector<5x64xf32>
      %303 = arith.addf %296, %302 : vector<5x64xf32>
      %304 = arith.index_cast %275 : i32 to index
      %c4_235 = arith.constant 4 : index
      %c0_236 = arith.constant 0 : index
      %305 = vector.load %arg33[%304, %c4_235, %c0_236] : memref<9x9x32xf32, #tpu.memory_space<vmem>>, vector<1x5x32xf32>
      %306 = vector.shape_cast %305 : vector<1x5x32xf32> to vector<5x32xf32>
      %c24 = arith.constant 24 : index
      %c0_237 = arith.constant 0 : index
      %c0_238 = arith.constant 0 : index
      %307 = vector.load %arg18[%c24, %c0_237, %c0_238] : memref<25x32x64xf32, #tpu.memory_space<vmem>>, vector<1x32x64xf32>
      %308 = vector.shape_cast %307 : vector<1x32x64xf32> to vector<32x64xf32>
      %cst_239 = arith.constant dense<0.000000e+00> : vector<5x64xf32>
      %309 = tpu.matmul %306, %308, %cst_239 {dimension_numbers = #tpu.dot_dimension_numbers<[1], [0], [0], [1], [0, 0, 1, 1], [], []>} : vector<5x32xf32>, vector<32x64xf32>, vector<5x64xf32> -> vector<5x64xf32>
      %310 = arith.addf %303, %309 : vector<5x64xf32>
      %cst_240 = arith.constant dense<0.000000e+00> : vector<3x64xf32>
      %311 = tpu.matmul %70, %310, %cst_240 {dimension_numbers = #tpu.dot_dimension_numbers<[1], [0], [0], [1], [0, 0, 1, 1], [], []>} : vector<3x5xf32>, vector<5x64xf32>, vector<3x64xf32> -> vector<3x64xf32>
      %312 = vector.broadcast %63 : vector<1x64xf32> to vector<3x64xf32>
      %313 = arith.addf %311, %312 : vector<3x64xf32>
      %cst_241 = arith.constant 0.000000e+00 : f32
      %314 = vector.broadcast %cst_241 : f32 to vector<3x64xf32>
      %315 = arith.maximumf %313, %314 : vector<3x64xf32>
      %316 = arith.index_cast %arg35 : i32 to index
      %c0_242 = arith.constant 0 : index
      %c0_243 = arith.constant 0 : index
      %317 = vector.load %arg34[%316, %c0_242, %c0_243] : memref<3x3x64xf32, #tpu.memory_space<vmem>>, vector<1x3x64xf32>
      %318 = vector.shape_cast %317 : vector<1x3x64xf32> to vector<3x64xf32>
      %319 = vector.shape_cast %315 : vector<3x64xf32> to vector<1x3x64xf32>
      tpu.vector_store %arg34[%316, %c0_242, %c0_243], %319 {strides = array<i32>} : memref<3x3x64xf32, #tpu.memory_space<vmem>>, vector<1x3x64xf32>,
    }
    %c3_i32_57 = arith.constant 3 : i32
    %c0_58 = arith.constant 0 : index
    %c0_59 = arith.constant 0 : index
    %c0_60 = arith.constant 0 : index
    %72 = vector.load %arg31[%c0_58, %c0_59, %c0_60] : memref<3x3x64xf32, #tpu.memory_space<vmem>>, vector<1x3x64xf32>
    %73 = vector.shape_cast %72 : vector<1x3x64xf32> to vector<3x64xf32>
    %c0_61 = arith.constant 0 : index
    %c0_62 = arith.constant 0 : index
    %c0_63 = arith.constant 0 : index
    %74 = vector.load %arg34[%c0_61, %c0_62, %c0_63] : memref<3x3x64xf32, #tpu.memory_space<vmem>>, vector<1x3x64xf32>
    %75 = vector.shape_cast %74 : vector<1x3x64xf32> to vector<3x64xf32>
    %76 = arith.mulf %73, %75 : vector<3x64xf32>
    %c1 = arith.constant 1 : index
    %c0_64 = arith.constant 0 : index
    %c0_65 = arith.constant 0 : index
    %77 = vector.load %arg31[%c1, %c0_64, %c0_65] : memref<3x3x64xf32, #tpu.memory_space<vmem>>, vector<1x3x64xf32>
    %78 = vector.shape_cast %77 : vector<1x3x64xf32> to vector<3x64xf32>
    %c1_66 = arith.constant 1 : index
    %c0_67 = arith.constant 0 : index
    %c0_68 = arith.constant 0 : index
    %79 = vector.load %arg34[%c1_66, %c0_67, %c0_68] : memref<3x3x64xf32, #tpu.memory_space<vmem>>, vector<1x3x64xf32>
    %80 = vector.shape_cast %79 : vector<1x3x64xf32> to vector<3x64xf32>
    %81 = arith.mulf %78, %80 : vector<3x64xf32>
    %82 = arith.addf %76, %81 : vector<3x64xf32>
    %c2 = arith.constant 2 : index
    %c0_69 = arith.constant 0 : index
    %c0_70 = arith.constant 0 : index
    %83 = vector.load %arg31[%c2, %c0_69, %c0_70] : memref<3x3x64xf32, #tpu.memory_space<vmem>>, vector<1x3x64xf32>
    %84 = vector.shape_cast %83 : vector<1x3x64xf32> to vector<3x64xf32>
    %c2_71 = arith.constant 2 : index
    %c0_72 = arith.constant 0 : index
    %c0_73 = arith.constant 0 : index
    %85 = vector.load %arg34[%c2_71, %c0_72, %c0_73] : memref<3x3x64xf32, #tpu.memory_space<vmem>>, vector<1x3x64xf32>
    %86 = vector.shape_cast %85 : vector<1x3x64xf32> to vector<3x64xf32>
    %87 = arith.mulf %84, %86 : vector<3x64xf32>
    %88 = arith.addf %82, %87 : vector<3x64xf32>
    %cst_74 = arith.constant dense<0.000000e+00> : vector<64xf32>
    %89 = vector.multi_reduction <add>, %88, %cst_74 [0] : vector<3x64xf32> to vector<64xf32>
    %90 = vector.shape_cast %89 : vector<64xf32> to vector<1x64xf32>
    %c0_75 = arith.constant 0 : index
    %c0_76 = arith.constant 0 : index
    %91 = vector.load %arg20[%c0_75, %c0_76] : memref<64x32xf32, #tpu.memory_space<vmem>>, vector<64x32xf32>
    %cst_77 = arith.constant dense<0.000000e+00> : vector<1x32xf32>
    %92 = tpu.matmul %90, %91, %cst_77 {dimension_numbers = #tpu.dot_dimension_numbers<[1], [0], [0], [1], [0, 0, 1, 1], [], []>} : vector<1x64xf32>, vector<64x32xf32>, vector<1x32xf32> -> vector<1x32xf32>
    %c0_78 = arith.constant 0 : index
    %c0_79 = arith.constant 0 : index
    %93 = vector.load %arg21[%c0_78, %c0_79] : memref<1x32xf32, #tpu.memory_space<vmem>>, vector<1x32xf32>
    %94 = arith.addf %92, %93 : vector<1x32xf32>
    %cst_80 = arith.constant 0.000000e+00 : f32
    %95 = vector.broadcast %cst_80 : f32 to vector<1x32xf32>
    %96 = arith.maximumf %94, %95 : vector<1x32xf32>
    %c0_81 = arith.constant 0 : index
    %c0_82 = arith.constant 0 : index
    %97 = vector.load %arg22[%c0_81, %c0_82] : memref<32x16xf32, #tpu.memory_space<vmem>>, vector<32x16xf32>
    %cst_83 = arith.constant dense<0.000000e+00> : vector<1x16xf32>
    %98 = tpu.matmul %96, %97, %cst_83 {dimension_numbers = #tpu.dot_dimension_numbers<[1], [0], [0], [1], [0, 0, 1, 1], [], []>} : vector<1x32xf32>, vector<32x16xf32>, vector<1x16xf32> -> vector<1x16xf32>
    %c0_84 = arith.constant 0 : index
    %c0_85 = arith.constant 0 : index
    %99 = vector.load %arg23[%c0_84, %c0_85] : memref<1x16xf32, #tpu.memory_space<vmem>>, vector<1x16xf32>
    %100 = arith.addf %98, %99 : vector<1x16xf32>
    %cst_86 = arith.constant 0.000000e+00 : f32
    %101 = vector.broadcast %cst_86 : f32 to vector<1x16xf32>
    %102 = arith.maximumf %100, %101 : vector<1x16xf32>
    %c0_87 = arith.constant 0 : index
    %c0_88 = arith.constant 0 : index
    %103 = vector.load %arg24[%c0_87, %c0_88] : memref<16x10xf32, #tpu.memory_space<vmem>>, vector<16x10xf32>
    %cst_89 = arith.constant dense<0.000000e+00> : vector<1x10xf32>
    %104 = tpu.matmul %102, %103, %cst_89 {dimension_numbers = #tpu.dot_dimension_numbers<[1], [0], [0], [1], [0, 0, 1, 1], [], []>} : vector<1x16xf32>, vector<16x10xf32>, vector<1x10xf32> -> vector<1x10xf32>
    %c0_90 = arith.constant 0 : index
    %c0_91 = arith.constant 0 : index
    %105 = vector.load %arg25[%c0_90, %c0_91] : memref<1x10xf32, #tpu.memory_space<vmem>>, vector<1x10xf32>
    %106 = arith.addf %104, %105 : vector<1x10xf32>
    %cst_92 = arith.constant dense<0xFF800000> : vector<1xf32>
    %107 = vector.multi_reduction <maximumf>, %106, %cst_92 [1] : vector<1x10xf32> to vector<1xf32>
    %108 = vector.shape_cast %107 : vector<1xf32> to vector<1x1xf32>
    %109 = vector.broadcast %108 : vector<1x1xf32> to vector<1x10xf32>
    %110 = arith.subf %106, %109 : vector<1x10xf32>
    %111 = math.exp %110 : vector<1x10xf32>
    %cst_93 = arith.constant dense<0.000000e+00> : vector<1xf32>
    %112 = vector.multi_reduction <add>, %111, %cst_93 [1] : vector<1x10xf32> to vector<1xf32>
    %113 = vector.shape_cast %112 : vector<1xf32> to vector<1x1xf32>
    %114 = math.log %113 : vector<1x1xf32>
    %115 = vector.broadcast %114 : vector<1x1xf32> to vector<1x10xf32>
    %116 = arith.subf %110, %115 : vector<1x10xf32>
    %c0_94 = arith.constant 0 : index
    %c0_95 = arith.constant 0 : index
    %c0_96 = arith.constant 0 : index
    %117 = vector.load %arg26[%c0_94, %c0_95, %c0_96] : memref<1x1x10xf32, #tpu.memory_space<vmem>>, vector<1x1x10xf32>
    %118 = vector.shape_cast %117 : vector<1x1x10xf32> to vector<1x10xf32>
    %119 = vector.shape_cast %116 : vector<1x10xf32> to vector<1x1x10xf32>
    tpu.vector_store %arg26[%c0_94, %c0_95, %c0_96], %119 {strides = array<i32>} : memref<1x1x10xf32, #tpu.memory_space<vmem>>, vector<1x1x10xf32>,
    return
  }
  func.func @transform_0(%arg0: i32) -> (i32, i32, i32, i32) {
    %c0_i32 = arith.constant 0 : i32
    %c0_i32_0 = arith.constant 0 : i32
    %c0_i32_1 = arith.constant 0 : i32
    %c0_i32_2 = arith.constant 0 : i32
    return %arg0, %c0_i32, %c0_i32_0, %c0_i32_1 : i32, i32, i32, i32
  }
  func.func @transform_1(%arg0: i32) -> (i32, i32, i32) {
    %c0_i32 = arith.constant 0 : i32
    %c0_i32_0 = arith.constant 0 : i32
    %c0_i32_1 = arith.constant 0 : i32
    %c0_i32_2 = arith.constant 0 : i32
    return %c0_i32, %c0_i32_0, %c0_i32_1 : i32, i32, i32
  }
  func.func @transform_2(%arg0: i32) -> (i32, i32) {
    %c0_i32 = arith.constant 0 : i32
    %c0_i32_0 = arith.constant 0 : i32
    %c0_i32_1 = arith.constant 0 : i32
    return %c0_i32, %c0_i32_0 : i32, i32
  }
  func.func @transform_3(%arg0: i32) -> (i32, i32, i32) {
    %c0_i32 = arith.constant 0 : i32
    %c0_i32_0 = arith.constant 0 : i32
    %c0_i32_1 = arith.constant 0 : i32
    %c0_i32_2 = arith.constant 0 : i32
    return %c0_i32, %c0_i32_0, %c0_i32_1 : i32, i32, i32
  }
  func.func @transform_4(%arg0: i32) -> (i32, i32) {
    %c0_i32 = arith.constant 0 : i32
    %c0_i32_0 = arith.constant 0 : i32
    %c0_i32_1 = arith.constant 0 : i32
    return %c0_i32, %c0_i32_0 : i32, i32
  }
  func.func @transform_5(%arg0: i32) -> (i32, i32) {
    %c0_i32 = arith.constant 0 : i32
    %c0_i32_0 = arith.constant 0 : i32
    %c0_i32_1 = arith.constant 0 : i32
    return %c0_i32, %c0_i32_0 : i32, i32
  }
  func.func @transform_6(%arg0: i32) -> (i32, i32) {
    %c0_i32 = arith.constant 0 : i32
    %c0_i32_0 = arith.constant 0 : i32
    %c0_i32_1 = arith.constant 0 : i32
    return %c0_i32, %c0_i32_0 : i32, i32
  }
  func.func @transform_7(%arg0: i32) -> (i32, i32, i32) {
    %c0_i32 = arith.constant 0 : i32
    %c0_i32_0 = arith.constant 0 : i32
    %c0_i32_1 = arith.constant 0 : i32
    %c0_i32_2 = arith.constant 0 : i32
    return %c0_i32, %c0_i32_0, %c0_i32_1 : i32, i32, i32
  }
  func.func @transform_8(%arg0: i32) -> (i32, i32) {
    %c0_i32 = arith.constant 0 : i32
    %c0_i32_0 = arith.constant 0 : i32
    %c0_i32_1 = arith.constant 0 : i32
    return %c0_i32, %c0_i32_0 : i32, i32
  }
  func.func @transform_9(%arg0: i32) -> (i32, i32) {
    %c0_i32 = arith.constant 0 : i32
    %c0_i32_0 = arith.constant 0 : i32
    %c0_i32_1 = arith.constant 0 : i32
    return %c0_i32, %c0_i32_0 : i32, i32
  }
  func.func @transform_10(%arg0: i32) -> (i32, i32) {
    %c0_i32 = arith.constant 0 : i32
    %c0_i32_0 = arith.constant 0 : i32
    %c0_i32_1 = arith.constant 0 : i32
    return %c0_i32, %c0_i32_0 : i32, i32
  }
  func.func @transform_11(%arg0: i32) -> (i32, i32, i32) {
    %c0_i32 = arith.constant 0 : i32
    %c0_i32_0 = arith.constant 0 : i32
    %c0_i32_1 = arith.constant 0 : i32
    %c0_i32_2 = arith.constant 0 : i32
    return %c0_i32, %c0_i32_0, %c0_i32_1 : i32, i32, i32
  }
  func.func @transform_12(%arg0: i32) -> (i32, i32) {
    %c0_i32 = arith.constant 0 : i32
    %c0_i32_0 = arith.constant 0 : i32
    %c0_i32_1 = arith.constant 0 : i32
    return %c0_i32, %c0_i32_0 : i32, i32
  }
  func.func @transform_13(%arg0: i32) -> (i32, i32, i32) {
    %c0_i32 = arith.constant 0 : i32
    %c0_i32_0 = arith.constant 0 : i32
    %c0_i32_1 = arith.constant 0 : i32
    %c0_i32_2 = arith.constant 0 : i32
    return %c0_i32, %c0_i32_0, %c0_i32_1 : i32, i32, i32
  }
  func.func @transform_14(%arg0: i32) -> (i32, i32) {
    %c0_i32 = arith.constant 0 : i32
    %c0_i32_0 = arith.constant 0 : i32
    %c0_i32_1 = arith.constant 0 : i32
    return %c0_i32, %c0_i32_0 : i32, i32
  }
  func.func @transform_15(%arg0: i32) -> (i32, i32, i32) {
    %c0_i32 = arith.constant 0 : i32
    %c0_i32_0 = arith.constant 0 : i32
    %c0_i32_1 = arith.constant 0 : i32
    %c0_i32_2 = arith.constant 0 : i32
    return %c0_i32, %c0_i32_0, %c0_i32_1 : i32, i32, i32
  }
  func.func @transform_16(%arg0: i32) -> (i32, i32) {
    %c0_i32 = arith.constant 0 : i32
    %c0_i32_0 = arith.constant 0 : i32
    %c0_i32_1 = arith.constant 0 : i32
    return %c0_i32, %c0_i32_0 : i32, i32
  }
  func.func @transform_17(%arg0: i32) -> (i32, i32, i32) {
    %c0_i32 = arith.constant 0 : i32
    %c0_i32_0 = arith.constant 0 : i32
    %c0_i32_1 = arith.constant 0 : i32
    %c0_i32_2 = arith.constant 0 : i32
    return %c0_i32, %c0_i32_0, %c0_i32_1 : i32, i32, i32
  }
  func.func @transform_18(%arg0: i32) -> (i32, i32) {
    %c0_i32 = arith.constant 0 : i32
    %c0_i32_0 = arith.constant 0 : i32
    %c0_i32_1 = arith.constant 0 : i32
    return %c0_i32, %c0_i32_0 : i32, i32
  }
  func.func @transform_19(%arg0: i32) -> (i32, i32) {
    %c0_i32 = arith.constant 0 : i32
    %c0_i32_0 = arith.constant 0 : i32
    %c0_i32_1 = arith.constant 0 : i32
    return %c0_i32, %c0_i32_0 : i32, i32
  }
  func.func @transform_20(%arg0: i32) -> (i32, i32) {
    %c0_i32 = arith.constant 0 : i32
    %c0_i32_0 = arith.constant 0 : i32
    %c0_i32_1 = arith.constant 0 : i32
    return %c0_i32, %c0_i32_0 : i32, i32
  }
  func.func @transform_21(%arg0: i32) -> (i32, i32) {
    %c0_i32 = arith.constant 0 : i32
    %c0_i32_0 = arith.constant 0 : i32
    %c0_i32_1 = arith.constant 0 : i32
    return %c0_i32, %c0_i32_0 : i32, i32
  }
  func.func @transform_22(%arg0: i32) -> (i32, i32) {
    %c0_i32 = arith.constant 0 : i32
    %c0_i32_0 = arith.constant 0 : i32
    %c0_i32_1 = arith.constant 0 : i32
    return %c0_i32, %c0_i32_0 : i32, i32
  }
  func.func @transform_23(%arg0: i32) -> (i32, i32) {
    %c0_i32 = arith.constant 0 : i32
    %c0_i32_0 = arith.constant 0 : i32
    %c0_i32_1 = arith.constant 0 : i32
    return %c0_i32, %c0_i32_0 : i32, i32
  }
  func.func @transform_24(%arg0: i32) -> (i32, i32) {
    %c0_i32 = arith.constant 0 : i32
    %c0_i32_0 = arith.constant 0 : i32
    %c0_i32_1 = arith.constant 0 : i32
    return %c0_i32, %c0_i32_0 : i32, i32
  }
  func.func @transform_25(%arg0: i32) -> (i32, i32, i32) {
    %c0_i32 = arith.constant 0 : i32
    %c0_i32_0 = arith.constant 0 : i32
    %c0_i32_1 = arith.constant 0 : i32
    return %arg0, %c0_i32, %c0_i32_0 : i32, i32, i32
  }
}

</mosaic_0001>

<bundles_post_ra>
// kernel: acnn_resnet_forward.1
= control target key start
LH: loop header
LB: loop body
LE: loop exit
PB: predicated region body
PF: predicated region fallthrough
CT: control target
= control target key end

     0   :  { %s14901_s0 = inlined_call_operand.vmem [shape: f32[2,25,25,1], index: 0, kind: input, shape index: {}]   ;;  %s14902_s1 = inlined_call_operand.vmem [shape: f32[9,1,16], index: 1, kind: input, shape index: {}]   ;;  %s14903_s2 = inlined_call_operand.vmem [shape: f32[1,16], index: 2, kind: input, shape index: {}]   ;;  %s14904_s3 = inlined_call_operand.vmem [shape: f32[9,16,16], index: 3, kind: input, shape index: {}]   ;;  %s14905_s4 = inlined_call_operand.vmem [shape: f32[1,16], index: 4, kind: input, shape index: {}]   ;;  %s14906_s5 = inlined_call_operand.vmem [shape: f32[16,32], index: 5, kind: input, shape index: {}]   ;;  %s14907_s6 = inlined_call_operand.vmem [shape: f32[1,32], index: 6, kind: input, shape index: {}]   ;;  %s14908_s7 = inlined_call_operand.vmem [shape: f32[9,16,32], index: 7, kind: input, shape index: {}]   ;;  %s14909_s8 = inlined_call_operand.vmem [shape: f32[1,32], index: 8, kind: input, shape index: {}]   ;;  %s14910_s9 = inlined_call_operand.vmem [shape: f32[32,64], index: 9, kind: input, shape index: {}]   ;;  %s14911_s10 = inlined_call_operand.vmem [shape: f32[1,64], index: 10, kind: input, shape index: {}]   ;;  %s14912_s11 = inlined_call_operand.vmem [shape: f32[9,32,64], index: 11, kind: input, shape index: {}]   ;;  %s14913_s12 = inlined_call_operand.vmem [shape: f32[1,64], index: 12, kind: input, shape index: {}]   ;;  %s14914_s13 = inlined_call_operand.vmem [shape: f32[9,1,16], index: 13, kind: input, shape index: {}]   ;;  %s14915_s14 = inlined_call_operand.vmem [shape: f32[1,16], index: 14, kind: input, shape index: {}]   ;;  %s14916_s15 = inlined_call_operand.vmem [shape: f32[25,16,32], index: 15, kind: input, shape index: {}]   ;;  %s14917_s16 = inlined_call_operand.vmem [shape: f32[1,32], index: 16, kind: input, shape index: {}]   ;;  %s14918_s17 = inlined_call_operand.vmem [shape: f32[25,32,64], index: 17, kind: input, shape index: {}]   ;;  %s14919_s18 = inlined_call_operand.vmem [shape: f32[1,64], index: 18, kind: input, shape index: {}]   ;;  %s14920_s19 = inlined_call_operand.vmem [shape: f32[64,32], index: 19, kind: input, shape index: {}]   ;;  %s14921_s20 = inlined_call_operand.vmem [shape: f32[1,32], index: 20, kind: input, shape index: {}]   ;;  %s14922_s21 = inlined_call_operand.vmem [shape: f32[32,16], index: 21, kind: input, shape index: {}]   ;;  %s14923_s22 = inlined_call_operand.vmem [shape: f32[1,16], index: 22, kind: input, shape index: {}]   ;;  %s14924_s23 = inlined_call_operand.vmem [shape: f32[16,10], index: 23, kind: input, shape index: {}]   ;;  %s14925_s24 = inlined_call_operand.vmem [shape: f32[1,10], index: 24, kind: input, shape index: {}]   ;;  %s14926_s25 = inlined_call_operand.hbm [shape: f32[2,1,10], index: 25, kind: output, shape index: {}]  }
   0x1   :  { %14945 = sst [smem:[#allocation20_spill]] %s14901_s0 }
   0x2   :  { %14946 = sst [smem:[#allocation21_spill]] %s14902_s1 }
   0x3   :  { %14947 = sst [smem:[#allocation22_spill]] %s14903_s2 }
   0x4   :  { %14948 = sst [smem:[#allocation23_spill]] %s14904_s3 }
   0x5   :  { %14949 = sst [smem:[#allocation24_spill]] %s14905_s4 }
   0x6   :  { %14950 = sst [smem:[#allocation25_spill]] %s14906_s5 }
   0x7   :  { %14951 = sst [smem:[#allocation26_spill]] %s14907_s6 }
   0x8   :  { %14952 = sst [smem:[#allocation27_spill]] %s14908_s7 }
   0x9   :  { %14953 = sst [smem:[#allocation28_spill]] %s14909_s8 }
   0xa   :  { %14954 = sst [smem:[#allocation29_spill]] %s14910_s9 }
   0xb   :  { %14955 = sst [smem:[#allocation30_spill]] %s14926_s25 }
   0xc   :  { %30 = vsyncpa [#allocation11], 0 }
   0xd   :  { %32 = vsyncpa [#allocation11 + $0x1], 0  ;;  %s12787_s29 = smov 0   ;;  %s12789_s2 = smov 0  }
   0xe   :  { %s12791_s6 = smov 0   ;;  %s12793_s30 = smov 0  }
   0xf LB: > { %14956 = sst [smem:[#allocation13_spill]] %s12596_s29  ;;  %s12808_s7 = sadd.s32 4294967295, %s12608_s30   ;;  %s12608_s30 = sphi %s12793_s30, %s14985_s30   ;;  %s12604_s6 = sphi %s12791_s6, %s14987_s6   ;;  %s12600_s2 = sphi %s12789_s2, %s14989_s2   ;;  %s12596_s29 = sphi %s12787_s29, %s14988_s29  }
  0x10   : > { %14957 = sst [smem:[#allocation14_spill]] %s12604_s6  ;;  %s9764_s3 = sadd.s32 4294967294, %s12608_s30  }
  0x11   : > { %14958 = sst [smem:[#allocation15_spill]] %s12608_s30  ;;  %s12812_s26 = sadd.s32 1, %s12608_s30  }
  0x12   : > { %14959 = sst [smem:[#allocation16_spill]] %s12812_s26  ;;  %s575_s1 = sadd.s32 1, %s12604_s6 }
  0x13   : > { %s572_s8 = ssub.s32 %s12608_s30, %s12812_s26  ;;  %p585_p0 = scmp.ne.s32.totalorder %s12604_s6, %s12600_s2 }
  0x14   : > { %p573_p1 = scmp.eq.s32.totalorder %s572_s8, 0  ;;  %p586_p2 = scmp.eq.s32.totalorder %s12808_s7, 1 }
  0x15   : > { %p591_p3 = scmp.ne.s32.totalorder %s12600_s2, %s12596_s29  ;;  %p592_p4 = scmp.eq.s32.totalorder %s9764_s3, 1 }
  0x16   : > { %s12823_s27 = scalar_select %p573_p1, %s12604_s6, %s575_s1  }
  0x17   : > { %p12825_p5 = por %p586_p2, %p585_p0  ;;  %p12829_p6 = por %p592_p4, %p591_p3 }
  0x18   : > { %14960 = sst [smem:[#allocation17_spill]] %s12823_s27  ;;  %p9767_p7 = scmp.ge.s32.totalorder %s12608_s30, 1 }
  0x19   : > { %s14961_s4 = scalar_select %p12825_p5, 1, 0 }
  0x1a   : > { %s14963_s28 = scalar_select %p12829_p6, 1, 0 }
  0x1b   : > { %14962 = sst [smem:[#allocation18_spill]] %s14961_s4  ;;  %p690_p8 = scmp.lt.s32.totalorder %s12608_s30, 3 }
  0x1c   : > { %14964 = sst [smem:[#allocation19_spill]] %s14963_s28 }
  0x1d   : > { %p691_p9 = pnand %p9767_p7, %p690_p8 }
  0x1e   : > { %p757_p10 = scmp.lt.s32.totalorder (!%p691_p9), %s12808_s7, 1  ;;  %vm964_vm0 = vcmask (!%p691_p9), 130048   ;;  %v12638_v0 = vmov (!%p691_p9), 0.0   ;;  %vm966_vm1 = vcmask (!%p691_p9), 128000   ;;  %v1031_v1 = vlaneseq (!%p691_p9)  ;;  %s14965_s3 = sld [smem:[#allocation22_spill]] (!%p691_p9) }
  0x1f   : > { %694 = sbr.rel (%p691_p9) target bundleno = 4527 (0x11af), region = 120  ;;  %965 = vst.msk [vmem:[#allocation3] sm:$0xff] (!%p691_p9), %vm964_vm0, %v12638_v0  ;;  %968 = vst.msk [vmem:[#allocation3 + $0x10] sm:$0xff] (!%p691_p9), %vm964_vm0, %v12638_v0  ;;  %vm1022_vm2 = vcmask (!%p691_p9), 261120   ;;  %vm862_vm3 = vcmask (!%p691_p9), 7168   ;;  %vm866_vm4 = vcmask (!%p691_p9), 0  }
  0x20   : > { %970 = vst.msk [vmem:[#allocation3 + $0x20] sm:$0xff] (!%p691_p9), %vm964_vm0, %v12638_v0  ;;  %972 = vst.msk [vmem:[#allocation3 + $0x30] sm:$0xff] (!%p691_p9), %vm964_vm0, %v12638_v0  ;;  %v1032_v3 = vshrl.u32 (!%p691_p9), %v1031_v1, 7  ;;  %v1034_v4 = vand.u32 (!%p691_p9), 127, %v1031_v1  ;;  %s13191_s5 = smov (!%p691_p9), 0  }
  0x21   : > { %974 = vst.msk [vmem:[#allocation3 + $0x40] sm:$0xff] (!%p691_p9), %vm964_vm0, %v12638_v0  ;;  %976 = vst.msk [vmem:[#allocation3 + $0x50] sm:$0xff] (!%p691_p9), %vm964_vm0, %v12638_v0 }
  0x22   : > { %978 = vst.msk [vmem:[#allocation3 + $0x60] sm:$0xff] (!%p691_p9), %vm964_vm0, %v12638_v0  ;;  %980 = vst.msk [vmem:[#allocation3 + $0x70] sm:$0xff] (!%p691_p9), %vm964_vm0, %v12638_v0  ;;  %v1035_v5 = vmul.u32 (!%p691_p9), 2, %v1032_v3  ;;  %v1040_v6 = vadd.s32 (!%p691_p9), 8, %v1032_v3 }
  0x23   : > { %982 = vst.msk [vmem:[#allocation3 + $0x80] sm:$0xff] (!%p691_p9), %vm964_vm0, %v12638_v0  ;;  %984 = vst.msk [vmem:[#allocation3 + $0x90] sm:$0xff] (!%p691_p9), %vm964_vm0, %v12638_v0 }
  0x24   : > { %986 = vst.msk [vmem:[#allocation3 + $0xa0] sm:$0xff] (!%p691_p9), %vm964_vm0, %v12638_v0  ;;  %988 = vst.msk [vmem:[#allocation3 + $0xb0] sm:$0xff] (!%p691_p9), %vm964_vm0, %v12638_v0  ;;  %v12896_v2 = vld [vmem:[%s14965_s3] ss:$0 sm:$0xff] (!%p691_p9)  ;;  %s14966_s3 = sld [smem:[#allocation20_spill]] (!%p691_p9)  ;;  %vm1036_vm5 = vcmp.eq.s32.totalorder (!%p691_p9), %v1034_v4, %v1035_v5  ;;  %v1041_v10 = vmul.u32 (!%p691_p9), 2, %v1040_v6 }
  0x25   : > { %990 = vst.msk [vmem:[#allocation3 + $0xc0] sm:$0xff] (!%p691_p9), %vm964_vm0, %v12638_v0  ;;  %992 = vst.msk [vmem:[#allocation3 + $0xd0] sm:$0xff] (!%p691_p9), %vm964_vm0, %v12638_v0  ;;  %v12991_v14 = vsel (!%p691_p9), %vm1036_vm5, 1.0, %v12638_v0 }
  0x26   : > { %994 = vst.msk [vmem:[#allocation4] sm:$0xff] %vm964_vm0, %v12638_v0  ;;  %996 = vst.msk [vmem:[#allocation4 + $0x10] sm:$0xff] %vm964_vm0, %v12638_v0  ;;  %s12901_s1 = scalar_select %p757_p10, %s12808_s7, 1  ;;  %vm1042_vm6 = vcmp.eq.s32.totalorder %v1034_v4, %v1041_v10 }
  0x27   : > { %998 = vst.msk [vmem:[#allocation4 + $0x20] sm:$0xff] %vm964_vm0, %v12638_v0  ;;  %1000 = vst.msk [vmem:[#allocation4 + $0x30] sm:$0xff] %vm964_vm0, %v12638_v0  ;;  %v13006_v21 = vsel %vm1042_vm6, 1.0, %v12638_v0 }
  0x28   : > { %1002 = vst.msk [vmem:[#allocation4 + $0x40] sm:$0xff] %vm964_vm0, %v12638_v0  ;;  %1004 = vst.msk [vmem:[#allocation4 + $0x50] sm:$0xff] %vm964_vm0, %v12638_v0  ;;  %s12396_s8 = smul.u32 800, %s12901_s1  ;;  %s14967_s1 = sand.u32 1, %s12600_s2  }
  0x29   : > { %1006 = vst.msk [vmem:[#allocation4 + $0x60] sm:$0xff] %vm964_vm0, %v12638_v0  ;;  %1008 = vst.msk [vmem:[#allocation4 + $0x70] sm:$0xff] %vm964_vm0, %v12638_v0 }
  0x2a   : > { %1010 = vst.msk [vmem:[#allocation4 + $0x80] sm:$0xff] %vm964_vm0, %v12638_v0  ;;  %1012 = vst.msk [vmem:[#allocation4 + $0x90] sm:$0xff] %vm964_vm0, %v12638_v0  ;;  %s12979_s9 = scalar_lea.vmem %s14966_s3, %s12396_s8  ;;  %s13189_s8 = scalar_lea.vmem [#allocation10], %s14967_s1 }
  0x2b   : > { %1014 = vst.msk [vmem:[#allocation4 + $0xa0] sm:$0xff] %vm964_vm0, %v12638_v0  ;;  %1016 = vst.msk [vmem:[#allocation4 + $0xb0] sm:$0xff] %vm964_vm0, %v12638_v0  ;;  %v762_v7 = vld [vmem:[%s12979_s9] sm:$0xff]  ;;  %v763_v8 = vld [vmem:[%s12979_s9 + $0x8] sm:$0xff] }
  0x2c   : > { %1018 = vst.msk [vmem:[#allocation4 + $0xc0] sm:$0xff] %vm964_vm0, %v12638_v0  ;;  %1020 = vst.msk [vmem:[#allocation4 + $0xd0] sm:$0xff] %vm964_vm0, %v12638_v0  ;;  %v764_v9 = vld [vmem:[%s12979_s9 + $0x10] sm:$0xff]  ;;  %v765_v11 = vld [vmem:[%s12979_s9 + $0x18] sm:$0x1] }
  0x2d   : > { %967 = vst.msk [vmem:[#allocation3 + $0x8] sm:$0x3f] %vm966_vm1, %v12638_v0  ;;  %969 = vst.msk [vmem:[#allocation3 + $0x18] sm:$0x3f] %vm966_vm1, %v12638_v0  ;;  %v766_v12 = vld [vmem:[%s12979_s9 + $0x20] sm:$0xff]  ;;  %v767_v13 = vld [vmem:[%s12979_s9 + $0x28] sm:$0xff] }
  0x2e   : > { %971 = vst.msk [vmem:[#allocation3 + $0x28] sm:$0x3f] %vm966_vm1, %v12638_v0  ;;  %973 = vst.msk [vmem:[#allocation3 + $0x38] sm:$0x3f] %vm966_vm1, %v12638_v0  ;;  %v768_v15 = vld [vmem:[%s12979_s9 + $0x30] sm:$0xff]  ;;  %v770_v17 = vld [vmem:[%s12979_s9 + $0x40] sm:$0xff] }
  0x2f   : > { %975 = vst.msk [vmem:[#allocation3 + $0x48] sm:$0x3f] %vm966_vm1, %v12638_v0  ;;  %977 = vst.msk [vmem:[#allocation3 + $0x58] sm:$0x3f] %vm966_vm1, %v12638_v0  ;;  %v769_v16 = vld [vmem:[%s12979_s9 + $0x38] sm:$0x1] }
  0x30   : > { %979 = vst.msk [vmem:[#allocation3 + $0x68] sm:$0x3f] %vm966_vm1, %v12638_v0  ;;  %981 = vst.msk [vmem:[#allocation3 + $0x78] sm:$0x3f] %vm966_vm1, %v12638_v0  ;;  %v771_v18 = vld [vmem:[%s12979_s9 + $0x48] sm:$0xff]  ;;  %v772_v19 = vld [vmem:[%s12979_s9 + $0x50] sm:$0xff] }
  0x31   : > { %983 = vst.msk [vmem:[#allocation3 + $0x88] sm:$0x3f] %vm966_vm1, %v12638_v0  ;;  %985 = vst.msk [vmem:[#allocation3 + $0x98] sm:$0x3f] %vm966_vm1, %v12638_v0  ;;  %v773_v20 = vld [vmem:[%s12979_s9 + $0x58] sm:$0x1] }
  0x32   : > { %987 = vst.msk [vmem:[#allocation3 + $0xa8] sm:$0x3f] %vm966_vm1, %v12638_v0  ;;  %989 = vst.msk [vmem:[#allocation3 + $0xb8] sm:$0x3f] %vm966_vm1, %v12638_v0  ;;  %v774_v22 = vld [vmem:[%s12979_s9 + $0x60] sm:$0xff]  ;;  %v775_v23 = vld [vmem:[%s12979_s9 + $0x68] sm:$0xff] }
  0x33   : > { %991 = vst.msk [vmem:[#allocation3 + $0xc8] sm:$0x3f] %vm966_vm1, %v12638_v0  ;;  %993 = vst.msk [vmem:[#allocation3 + $0xd8] sm:$0x3f] %vm966_vm1, %v12638_v0  ;;  %v776_v24 = vld [vmem:[%s12979_s9 + $0x70] sm:$0xff]  ;;  %v778_v26 = vld [vmem:[%s12979_s9 + $0x80] sm:$0xff] }
  0x34   : > { %995 = vst.msk [vmem:[#allocation4 + $0x8] sm:$0x3f] %vm966_vm1, %v12638_v0  ;;  %997 = vst.msk [vmem:[#allocation4 + $0x18] sm:$0x3f] %vm966_vm1, %v12638_v0  ;;  %v777_v25 = vld [vmem:[%s12979_s9 + $0x78] sm:$0x1] }
  0x35   : > { %999 = vst.msk [vmem:[#allocation4 + $0x28] sm:$0x3f] %vm966_vm1, %v12638_v0  ;;  %1001 = vst.msk [vmem:[#allocation4 + $0x38] sm:$0x3f] %vm966_vm1, %v12638_v0  ;;  %v779_v27 = vld [vmem:[%s12979_s9 + $0x88] sm:$0xff]  ;;  %v780_v28 = vld [vmem:[%s12979_s9 + $0x90] sm:$0xff] }
  0x36   : > { %1003 = vst.msk [vmem:[#allocation4 + $0x48] sm:$0x3f] %vm966_vm1, %v12638_v0  ;;  %1005 = vst.msk [vmem:[#allocation4 + $0x58] sm:$0x3f] %vm966_vm1, %v12638_v0  ;;  %v781_v29 = vld [vmem:[%s12979_s9 + $0x98] sm:$0x1] }
  0x37   : > { %1007 = vst.msk [vmem:[#allocation4 + $0x68] sm:$0x3f] %vm966_vm1, %v12638_v0  ;;  %1009 = vst.msk [vmem:[#allocation4 + $0x78] sm:$0x3f] %vm966_vm1, %v12638_v0  ;;  %v782_v30 = vld [vmem:[%s12979_s9 + $0xa0] sm:$0xff]  ;;  %v783_v31 = vld [vmem:[%s12979_s9 + $0xa8] sm:$0xff] }
  0x38   : > { %1011 = vst.msk [vmem:[#allocation4 + $0x88] sm:$0x3f] %vm966_vm1, %v12638_v0  ;;  %1013 = vst.msk [vmem:[#allocation4 + $0x98] sm:$0x3f] %vm966_vm1, %v12638_v0  ;;  %v784_v32 = vld [vmem:[%s12979_s9 + $0xb0] sm:$0xff]  ;;  %v786_v34 = vld [vmem:[%s12979_s9 + $0xc0] sm:$0xff] }
  0x39   : > { %1015 = vst.msk [vmem:[#allocation4 + $0xa8] sm:$0x3f] %vm966_vm1, %v12638_v0  ;;  %1017 = vst.msk [vmem:[#allocation4 + $0xb8] sm:$0x3f] %vm966_vm1, %v12638_v0  ;;  %v785_v33 = vld [vmem:[%s12979_s9 + $0xb8] sm:$0x1] }
  0x3a   : > { %1019 = vst.msk [vmem:[#allocation4 + $0xc8] sm:$0x3f] %vm966_vm1, %v12638_v0  ;;  %1021 = vst.msk [vmem:[#allocation4 + $0xd8] sm:$0x3f] %vm966_vm1, %v12638_v0  ;;  %v787_v35 = vld [vmem:[%s12979_s9 + $0xc8] sm:$0xff]  ;;  %v788_v36 = vld [vmem:[%s12979_s9 + $0xd0] sm:$0xff] }
  0x3b   : > { %1023 = vst.msk [vmem:[#allocation5] sm:$0xff] %vm1022_vm2, %v12638_v0  ;;  %1024 = vst.msk [vmem:[#allocation5 + $0x8] sm:$0xff] %vm1022_vm2, %v12638_v0  ;;  %v789_v37 = vld [vmem:[%s12979_s9 + $0xd8] sm:$0x1]  ;;  %v790_v38 = vld [vmem:[%s12979_s9 + $0xe0] sm:$0xff] }
  0x3c   : > { %1025 = vst.msk [vmem:[#allocation5 + $0x10] sm:$0xff] %vm1022_vm2, %v12638_v0  ;;  %1026 = vst.msk [vmem:[#allocation5 + $0x18] sm:$0xff] %vm1022_vm2, %v12638_v0  ;;  %v791_v39 = vld [vmem:[%s12979_s9 + $0xe8] sm:$0xff]  ;;  %v792_v40 = vld [vmem:[%s12979_s9 + $0xf0] sm:$0xff] }
  0x3d   : > { %1027 = vst.msk [vmem:[#allocation5 + $0x20] sm:$0xff] %vm1022_vm2, %v12638_v0  ;;  %1028 = vst.msk [vmem:[#allocation5 + $0x28] sm:$0xff] %vm1022_vm2, %v12638_v0  ;;  %v793_v41 = vld [vmem:[%s12979_s9 + $0xf8] sm:$0x1]  ;;  %v794_v42 = vld [vmem:[%s12979_s9 + $0x100] sm:$0xff] }
  0x3e   : > { %1029 = vst.msk [vmem:[#allocation5 + $0x30] sm:$0xff] %vm1022_vm2, %v12638_v0  ;;  %1030 = vst.msk [vmem:[#allocation5 + $0x38] sm:$0xff] %vm1022_vm2, %v12638_v0  ;;  %v795_v43 = vld [vmem:[%s12979_s9 + $0x108] sm:$0xff]  ;;  %v796_v44 = vld [vmem:[%s12979_s9 + $0x110] sm:$0xff] }
  0x3f   : > { %863 = vst.msk [vmem:[#allocation2] sm:$0xff] %vm862_vm3, %v762_v7  ;;  %864 = vst.msk [vmem:[#allocation2 + $0x8] sm:$0xff] %vm862_vm3, %v763_v8  ;;  %v797_v45 = vld [vmem:[%s12979_s9 + $0x118] sm:$0x1]  ;;  %v798_v46 = vld [vmem:[%s12979_s9 + $0x120] sm:$0xff] }
  0x40   : > { %865 = vst.msk [vmem:[#allocation2 + $0x10] sm:$0xff] %vm862_vm3, %v764_v9  ;;  %868 = vst.msk [vmem:[#allocation2 + $0x20] sm:$0xff] %vm862_vm3, %v766_v12  ;;  %v799_v47 = vld [vmem:[%s12979_s9 + $0x128] sm:$0xff]  ;;  %v800_v48 = vld [vmem:[%s12979_s9 + $0x130] sm:$0xff] }
  0x41   : > { %867 = vst.msk [vmem:[#allocation2 + $0x18] sm:$0x1] %vm866_vm4, %v765_v11  ;;  %871 = vst.msk [vmem:[#allocation2 + $0x38] sm:$0x1] %vm866_vm4, %v769_v16  ;;  %v801_v49 = vld [vmem:[%s12979_s9 + $0x138] sm:$0x1] }
  0x42   : > { %869 = vst.msk [vmem:[#allocation2 + $0x28] sm:$0xff] %vm862_vm3, %v767_v13  ;;  %870 = vst.msk [vmem:[#allocation2 + $0x30] sm:$0xff] %vm862_vm3, %v768_v15  ;;  %v802_v50 = vld [vmem:[%s12979_s9 + $0x140] sm:$0xff]  ;;  %v803_v51 = vld [vmem:[%s12979_s9 + $0x148] sm:$0xff] }
  0x43   : > { %872 = vst.msk [vmem:[#allocation2 + $0x40] sm:$0xff] %vm862_vm3, %v770_v17  ;;  %873 = vst.msk [vmem:[#allocation2 + $0x48] sm:$0xff] %vm862_vm3, %v771_v18  ;;  %v804_v52 = vld [vmem:[%s12979_s9 + $0x150] sm:$0xff]  ;;  %v805_v53 = vld [vmem:[%s12979_s9 + $0x158] sm:$0x1] }
  0x44   : > { %874 = vst.msk [vmem:[#allocation2 + $0x50] sm:$0xff] %vm862_vm3, %v772_v19  ;;  %876 = vst.msk [vmem:[#allocation2 + $0x60] sm:$0xff] %vm862_vm3, %v774_v22  ;;  %v806_v54 = vld [vmem:[%s12979_s9 + $0x160] sm:$0xff]  ;;  %v807_v55 = vld [vmem:[%s12979_s9 + $0x168] sm:$0xff] }
  0x45   : > { %875 = vst.msk [vmem:[#allocation2 + $0x58] sm:$0x1] %vm866_vm4, %v773_v20  ;;  %879 = vst.msk [vmem:[#allocation2 + $0x78] sm:$0x1] %vm866_vm4, %v777_v25  ;;  %v808_v56 = vld [vmem:[%s12979_s9 + $0x170] sm:$0xff]  ;;  %v810_v58 = vld [vmem:[%s12979_s9 + $0x180] sm:$0xff] }
  0x46   : > { %877 = vst.msk [vmem:[#allocation2 + $0x68] sm:$0xff] %vm862_vm3, %v775_v23  ;;  %878 = vst.msk [vmem:[#allocation2 + $0x70] sm:$0xff] %vm862_vm3, %v776_v24  ;;  %v809_v57 = vld [vmem:[%s12979_s9 + $0x178] sm:$0x1]  ;;  %v811_v59 = vld [vmem:[%s12979_s9 + $0x188] sm:$0xff] }
  0x47   : > { %880 = vst.msk [vmem:[#allocation2 + $0x80] sm:$0xff] %vm862_vm3, %v778_v26  ;;  %881 = vst.msk [vmem:[#allocation2 + $0x88] sm:$0xff] %vm862_vm3, %v779_v27  ;;  %v812_v60 = vld [vmem:[%s12979_s9 + $0x190] sm:$0xff]  ;;  %v813_v61 = vld [vmem:[%s12979_s9 + $0x198] sm:$0x1] }
  0x48   : > { %882 = vst.msk [vmem:[#allocation2 + $0x90] sm:$0xff] %vm862_vm3, %v780_v28  ;;  %884 = vst.msk [vmem:[#allocation2 + $0xa0] sm:$0xff] %vm862_vm3, %v782_v30  ;;  %v814_v62 = vld [vmem:[%s12979_s9 + $0x1a0] sm:$0xff]  ;;  %v815_v63 = vld [vmem:[%s12979_s9 + $0x1a8] sm:$0xff] }
  0x49   : > { %883 = vst.msk [vmem:[#allocation2 + $0x98] sm:$0x1] %vm866_vm4, %v781_v29  ;;  %887 = vst.msk [vmem:[#allocation2 + $0xb8] sm:$0x1] %vm866_vm4, %v785_v33  ;;  %v816_v1 = vld [vmem:[%s12979_s9 + $0x1b0] sm:$0xff]  ;;  %v818_v4 = vld [vmem:[%s12979_s9 + $0x1c0] sm:$0xff] }
  0x4a   : > { %885 = vst.msk [vmem:[#allocation2 + $0xa8] sm:$0xff] %vm862_vm3, %v783_v31  ;;  %886 = vst.msk [vmem:[#allocation2 + $0xb0] sm:$0xff] %vm862_vm3, %v784_v32  ;;  %v817_v3 = vld [vmem:[%s12979_s9 + $0x1b8] sm:$0x1]  ;;  %v819_v5 = vld [vmem:[%s12979_s9 + $0x1c8] sm:$0xff] }
  0x4b   : > { %888 = vst.msk [vmem:[#allocation2 + $0xc0] sm:$0xff] %vm862_vm3, %v786_v34  ;;  %889 = vst.msk [vmem:[#allocation2 + $0xc8] sm:$0xff] %vm862_vm3, %v787_v35  ;;  %v820_v6 = vld [vmem:[%s12979_s9 + $0x1d0] sm:$0xff]  ;;  %v821_v7 = vld [vmem:[%s12979_s9 + $0x1d8] sm:$0x1] }
  0x4c   : > { %890 = vst.msk [vmem:[#allocation2 + $0xd0] sm:$0xff] %vm862_vm3, %v788_v36  ;;  %892 = vst.msk [vmem:[#allocation2 + $0xe0] sm:$0xff] %vm862_vm3, %v790_v38  ;;  %v822_v8 = vld [vmem:[%s12979_s9 + $0x1e0] sm:$0xff]  ;;  %v823_v9 = vld [vmem:[%s12979_s9 + $0x1e8] sm:$0xff] }
  0x4d   : > { %891 = vst.msk [vmem:[#allocation2 + $0xd8] sm:$0x1] %vm866_vm4, %v789_v37  ;;  %895 = vst.msk [vmem:[#allocation2 + $0xf8] sm:$0x1] %vm866_vm4, %v793_v41  ;;  %v824_v10 = vld [vmem:[%s12979_s9 + $0x1f0] sm:$0xff]  ;;  %v826_v12 = vld [vmem:[%s12979_s9 + $0x200] sm:$0xff] }
  0x4e   : > { %893 = vst.msk [vmem:[#allocation2 + $0xe8] sm:$0xff] %vm862_vm3, %v791_v39  ;;  %894 = vst.msk [vmem:[#allocation2 + $0xf0] sm:$0xff] %vm862_vm3, %v792_v40  ;;  %v825_v11 = vld [vmem:[%s12979_s9 + $0x1f8] sm:$0x1]  ;;  %v827_v13 = vld [vmem:[%s12979_s9 + $0x208] sm:$0xff] }
  0x4f   : > { %896 = vst.msk [vmem:[#allocation2 + $0x100] sm:$0xff] %vm862_vm3, %v794_v42  ;;  %897 = vst.msk [vmem:[#allocation2 + $0x108] sm:$0xff] %vm862_vm3, %v795_v43  ;;  %v828_v15 = vld [vmem:[%s12979_s9 + $0x210] sm:$0xff]  ;;  %v829_v16 = vld [vmem:[%s12979_s9 + $0x218] sm:$0x1] }
  0x50   : > { %898 = vst.msk [vmem:[#allocation2 + $0x110] sm:$0xff] %vm862_vm3, %v796_v44  ;;  %900 = vst.msk [vmem:[#allocation2 + $0x120] sm:$0xff] %vm862_vm3, %v798_v46  ;;  %v830_v17 = vld [vmem:[%s12979_s9 + $0x220] sm:$0xff]  ;;  %v831_v18 = vld [vmem:[%s12979_s9 + $0x228] sm:$0xff] }
  0x51   : > { %899 = vst.msk [vmem:[#allocation2 + $0x118] sm:$0x1] %vm866_vm4, %v797_v45  ;;  %903 = vst.msk [vmem:[#allocation2 + $0x138] sm:$0x1] %vm866_vm4, %v801_v49  ;;  %v832_v19 = vld [vmem:[%s12979_s9 + $0x230] sm:$0xff]  ;;  %v834_v22 = vld [vmem:[%s12979_s9 + $0x240] sm:$0xff] }
  0x52   : > { %901 = vst.msk [vmem:[#allocation2 + $0x128] sm:$0xff] %vm862_vm3, %v799_v47  ;;  %902 = vst.msk [vmem:[#allocation2 + $0x130] sm:$0xff] %vm862_vm3, %v800_v48  ;;  %v833_v20 = vld [vmem:[%s12979_s9 + $0x238] sm:$0x1]  ;;  %v835_v23 = vld [vmem:[%s12979_s9 + $0x248] sm:$0xff] }
  0x53   : > { %904 = vst.msk [vmem:[#allocation2 + $0x140] sm:$0xff] %vm862_vm3, %v802_v50  ;;  %905 = vst.msk [vmem:[#allocation2 + $0x148] sm:$0xff] %vm862_vm3, %v803_v51  ;;  %v836_v24 = vld [vmem:[%s12979_s9 + $0x250] sm:$0xff]  ;;  %v837_v25 = vld [vmem:[%s12979_s9 + $0x258] sm:$0x1] }
  0x54   : > { %906 = vst.msk [vmem:[#allocation2 + $0x150] sm:$0xff] %vm862_vm3, %v804_v52  ;;  %908 = vst.msk [vmem:[#allocation2 + $0x160] sm:$0xff] %vm862_vm3, %v806_v54  ;;  %v838_v26 = vld [vmem:[%s12979_s9 + $0x260] sm:$0xff]  ;;  %v839_v27 = vld [vmem:[%s12979_s9 + $0x268] sm:$0xff] }
  0x55   : > { %907 = vst.msk [vmem:[#allocation2 + $0x158] sm:$0x1] %vm866_vm4, %v805_v53  ;;  %911 = vst.msk [vmem:[#allocation2 + $0x178] sm:$0x1] %vm866_vm4, %v809_v57  ;;  %v840_v28 = vld [vmem:[%s12979_s9 + $0x270] sm:$0xff]  ;;  %v842_v30 = vld [vmem:[%s12979_s9 + $0x280] sm:$0xff] }
  0x56   : > { %909 = vst.msk [vmem:[#allocation2 + $0x168] sm:$0xff] %vm862_vm3, %v807_v55  ;;  %910 = vst.msk [vmem:[#allocation2 + $0x170] sm:$0xff] %vm862_vm3, %v808_v56  ;;  %v841_v29 = vld [vmem:[%s12979_s9 + $0x278] sm:$0x1]  ;;  %v843_v31 = vld [vmem:[%s12979_s9 + $0x288] sm:$0xff] }
  0x57   : > { %912 = vst.msk [vmem:[#allocation2 + $0x180] sm:$0xff] %vm862_vm3, %v810_v58  ;;  %913 = vst.msk [vmem:[#allocation2 + $0x188] sm:$0xff] %vm862_vm3, %v811_v59  ;;  %v844_v32 = vld [vmem:[%s12979_s9 + $0x290] sm:$0xff]  ;;  %v845_v33 = vld [vmem:[%s12979_s9 + $0x298] sm:$0x1] }
  0x58   : > { %914 = vst.msk [vmem:[#allocation2 + $0x190] sm:$0xff] %vm862_vm3, %v812_v60  ;;  %916 = vst.msk [vmem:[#allocation2 + $0x1a0] sm:$0xff] %vm862_vm3, %v814_v62  ;;  %v846_v34 = vld [vmem:[%s12979_s9 + $0x2a0] sm:$0xff]  ;;  %v847_v35 = vld [vmem:[%s12979_s9 + $0x2a8] sm:$0xff] }
  0x59   : > { %915 = vst.msk [vmem:[#allocation2 + $0x198] sm:$0x1] %vm866_vm4, %v813_v61  ;;  %919 = vst.msk [vmem:[#allocation2 + $0x1b8] sm:$0x1] %vm866_vm4, %v817_v3  ;;  %v848_v36 = vld [vmem:[%s12979_s9 + $0x2b0] sm:$0xff]  ;;  %v850_v38 = vld [vmem:[%s12979_s9 + $0x2c0] sm:$0xff] }
  0x5a   : > { %917 = vst.msk [vmem:[#allocation2 + $0x1a8] sm:$0xff] %vm862_vm3, %v815_v63  ;;  %918 = vst.msk [vmem:[#allocation2 + $0x1b0] sm:$0xff] %vm862_vm3, %v816_v1  ;;  %v849_v37 = vld [vmem:[%s12979_s9 + $0x2b8] sm:$0x1]  ;;  %v851_v39 = vld [vmem:[%s12979_s9 + $0x2c8] sm:$0xff] }
  0x5b   : > { %920 = vst.msk [vmem:[#allocation2 + $0x1c0] sm:$0xff] %vm862_vm3, %v818_v4  ;;  %921 = vst.msk [vmem:[#allocation2 + $0x1c8] sm:$0xff] %vm862_vm3, %v819_v5  ;;  %v852_v40 = vld [vmem:[%s12979_s9 + $0x2d0] sm:$0xff]  ;;  %v853_v41 = vld [vmem:[%s12979_s9 + $0x2d8] sm:$0x1] }
  0x5c   : > { %922 = vst.msk [vmem:[#allocation2 + $0x1d0] sm:$0xff] %vm862_vm3, %v820_v6  ;;  %924 = vst.msk [vmem:[#allocation2 + $0x1e0] sm:$0xff] %vm862_vm3, %v822_v8  ;;  %v854_v42 = vld [vmem:[%s12979_s9 + $0x2e0] sm:$0xff]  ;;  %v855_v43 = vld [vmem:[%s12979_s9 + $0x2e8] sm:$0xff] }
  0x5d   : > { %923 = vst.msk [vmem:[#allocation2 + $0x1d8] sm:$0x1] %vm866_vm4, %v821_v7  ;;  %927 = vst.msk [vmem:[#allocation2 + $0x1f8] sm:$0x1] %vm866_vm4, %v825_v11  ;;  %v856_v44 = vld [vmem:[%s12979_s9 + $0x2f0] sm:$0xff]  ;;  %v858_v46 = vld [vmem:[%s12979_s9 + $0x300] sm:$0xff] }
  0x5e   : > { %925 = vst.msk [vmem:[#allocation2 + $0x1e8] sm:$0xff] %vm862_vm3, %v823_v9  ;;  %926 = vst.msk [vmem:[#allocation2 + $0x1f0] sm:$0xff] %vm862_vm3, %v824_v10  ;;  %v857_v45 = vld [vmem:[%s12979_s9 + $0x2f8] sm:$0x1]  ;;  %v859_v47 = vld [vmem:[%s12979_s9 + $0x308] sm:$0xff] }
  0x5f   : > { %928 = vst.msk [vmem:[#allocation2 + $0x200] sm:$0xff] %vm862_vm3, %v826_v12  ;;  %929 = vst.msk [vmem:[#allocation2 + $0x208] sm:$0xff] %vm862_vm3, %v827_v13  ;;  %v860_v48 = vld [vmem:[%s12979_s9 + $0x310] sm:$0xff]  ;;  %v861_v49 = vld [vmem:[%s12979_s9 + $0x318] sm:$0x1] }
  0x60   : > { %930 = vst.msk [vmem:[#allocation2 + $0x210] sm:$0xff] %vm862_vm3, %v828_v15  ;;  %932 = vst.msk [vmem:[#allocation2 + $0x220] sm:$0xff] %vm862_vm3, %v830_v17 }
  0x61   : > { %931 = vst.msk [vmem:[#allocation2 + $0x218] sm:$0x1] %vm866_vm4, %v829_v16  ;;  %935 = vst.msk [vmem:[#allocation2 + $0x238] sm:$0x1] %vm866_vm4, %v833_v20 }
  0x62   : > { %933 = vst.msk [vmem:[#allocation2 + $0x228] sm:$0xff] %vm862_vm3, %v831_v18  ;;  %934 = vst.msk [vmem:[#allocation2 + $0x230] sm:$0xff] %vm862_vm3, %v832_v19 }
  0x63   : > { %936 = vst.msk [vmem:[#allocation2 + $0x240] sm:$0xff] %vm862_vm3, %v834_v22  ;;  %937 = vst.msk [vmem:[#allocation2 + $0x248] sm:$0xff] %vm862_vm3, %v835_v23 }
  0x64   : > { %938 = vst.msk [vmem:[#allocation2 + $0x250] sm:$0xff] %vm862_vm3, %v836_v24  ;;  %940 = vst.msk [vmem:[#allocation2 + $0x260] sm:$0xff] %vm862_vm3, %v838_v26 }
  0x65   : > { %939 = vst.msk [vmem:[#allocation2 + $0x258] sm:$0x1] %vm866_vm4, %v837_v25  ;;  %943 = vst.msk [vmem:[#allocation2 + $0x278] sm:$0x1] %vm866_vm4, %v841_v29 }
  0x66   : > { %941 = vst.msk [vmem:[#allocation2 + $0x268] sm:$0xff] %vm862_vm3, %v839_v27  ;;  %942 = vst.msk [vmem:[#allocation2 + $0x270] sm:$0xff] %vm862_vm3, %v840_v28 }
  0x67   : > { %944 = vst.msk [vmem:[#allocation2 + $0x280] sm:$0xff] %vm862_vm3, %v842_v30  ;;  %945 = vst.msk [vmem:[#allocation2 + $0x288] sm:$0xff] %vm862_vm3, %v843_v31 }
  0x68   : > { %946 = vst.msk [vmem:[#allocation2 + $0x290] sm:$0xff] %vm862_vm3, %v844_v32  ;;  %948 = vst.msk [vmem:[#allocation2 + $0x2a0] sm:$0xff] %vm862_vm3, %v846_v34 }
  0x69   : > { %947 = vst.msk [vmem:[#allocation2 + $0x298] sm:$0x1] %vm866_vm4, %v845_v33  ;;  %951 = vst.msk [vmem:[#allocation2 + $0x2b8] sm:$0x1] %vm866_vm4, %v849_v37 }
  0x6a   : > { %949 = vst.msk [vmem:[#allocation2 + $0x2a8] sm:$0xff] %vm862_vm3, %v847_v35  ;;  %950 = vst.msk [vmem:[#allocation2 + $0x2b0] sm:$0xff] %vm862_vm3, %v848_v36 }
  0x6b   : > { %952 = vst.msk [vmem:[#allocation2 + $0x2c0] sm:$0xff] %vm862_vm3, %v850_v38  ;;  %953 = vst.msk [vmem:[#allocation2 + $0x2c8] sm:$0xff] %vm862_vm3, %v851_v39 }
  0x6c   : > { %954 = vst.msk [vmem:[#allocation2 + $0x2d0] sm:$0xff] %vm862_vm3, %v852_v40  ;;  %956 = vst.msk [vmem:[#allocation2 + $0x2e0] sm:$0xff] %vm862_vm3, %v854_v42 }
  0x6d   : > { %955 = vst.msk [vmem:[#allocation2 + $0x2d8] sm:$0x1] %vm866_vm4, %v853_v41  ;;  %959 = vst.msk [vmem:[#allocation2 + $0x2f8] sm:$0x1] %vm866_vm4, %v857_v45 }
  0x6e   : > { %957 = vst.msk [vmem:[#allocation2 + $0x2e8] sm:$0xff] %vm862_vm3, %v855_v43  ;;  %958 = vst.msk [vmem:[#allocation2 + $0x2f0] sm:$0xff] %vm862_vm3, %v856_v44 }
  0x6f   : > { %960 = vst.msk [vmem:[#allocation2 + $0x300] sm:$0xff] %vm862_vm3, %v858_v46  ;;  %961 = vst.msk [vmem:[#allocation2 + $0x308] sm:$0xff] %vm862_vm3, %v859_v47 }
  0x70   : > { %962 = vst.msk [vmem:[#allocation2 + $0x310] sm:$0xff] %vm862_vm3, %v860_v48 }
  0x71   : > { %963 = vst.msk [vmem:[#allocation2 + $0x318] sm:$0x1] %vm866_vm4, %v861_v49 }
  0x72 LB: >> { %v12639_v50 = vmov 0   ;;  %s10401_s0 = sshll.u32 %s12612_s5, 6  ;;  %vm1353_vm7 = vcmask 187392   ;;  %vm1360_vm8 = vcmask 1046528   ;;  %s9816_s6 = sshll.u32 %s12612_s5, 4  ;;  %vm1445_vm9 = vcmask 125952   ;;  %s12612_s5 = sphi %s13191_s5, %s1050_s5  }
  0x73   : >> { %12511 = vset.pattern.permute.xlu1 %v12639_v50  ;;  %12510 = vset.pattern.permute.xlu0 %v12639_v50  ;;  %s13197_s3 = scalar_lea.vmem [#allocation2], %s10401_s0  ;;  %s14968_s0 = sld [smem:[#allocation21_spill]] }
  0x74   : >> { %10835 = vmatprep.mubr.msk.f32.mxu0 %vm1353_vm7, %v12991_v14  ;;  %s9613_s26 = scalar_lea.vmem [#allocation3], %s9816_s6  ;;  %s1050_s5 = sadd.s32 1, %s12612_s5  }
  0x75   : >> { %p1047_p11 = scmp.ge.s32.totalorder %s1050_s5, 12  }
  0x76   : > { %s14969_s28 = sld [smem:[#allocation24_spill]] (%p1047_p11) }
  0x78   : >> { %v1085_v51 = vld [vmem:[%s13197_s3 + $0x1] sm:$0xff]  ;;  %v1086_v53 = vld [vmem:[%s13197_s3 + $0x9] sm:$0xff]  ;;  %v1087_v59 = vld [vmem:[%s13197_s3 + $0x11] sm:$0x7f] }
  0x79   : >> { %v1054_v52 = vld [vmem:[%s13197_s3] sm:$0xff]  ;;  %1092 = vperm.xlu1 %12511, %v1085_v51   ;;  %v1055_v54 = vld [vmem:[%s13197_s3 + $0x8] sm:$0xff]  ;;  %v1056_v60 = vld [vmem:[%s13197_s3 + $0x10] sm:$0x7f] }
  0x7a   : >> { %1060 = vperm.xlu0 %12510, %v1054_v52   ;;  %v1118_v55 = vld [vmem:[%s13197_s3 + $0xa] sm:$0xff]  ;;  %v1117_v56 = vld [vmem:[%s13197_s3 + $0x2] sm:$0xff]  ;;  %v1119_v1 = vld [vmem:[%s13197_s3 + $0x12] sm:$0x7f] }
  0x7b   : >> { %v9781_v57 = vld [vmem:[%s13197_s3 + $0x28] sm:$0xff]  ;;  %v9780_v58 = vld [vmem:[%s13197_s3 + $0x20] sm:$0xff]  ;;  %v9782_v3 = vld [vmem:[%s13197_s3 + $0x30] sm:$0x7f] }
  0x7c   : >> { %v9786_v61 = vld [vmem:[%s13197_s3 + $0x29] sm:$0xff]  ;;  %v9785_v62 = vld [vmem:[%s13197_s3 + $0x21] sm:$0xff]  ;;  %v9787_v8 = vld [vmem:[%s13197_s3 + $0x31] sm:$0x7f] }
  0x7d   : >> { %1097 = vperm.xlu1 %12511, %v1086_v53   ;;  %v9790_v63 = vld [vmem:[%s13197_s3 + $0x22] sm:$0xff]  ;;  %v9791_v4 = vld [vmem:[%s13197_s3 + $0x2a] sm:$0xff]  ;;  %v9792_v9 = vld [vmem:[%s13197_s3 + $0x32] sm:$0x7f] }
  0x7e   : >> { %1065 = vperm.xlu0 %12510, %v1055_v54   ;;  %v9798_v5 = vld [vmem:[%s13197_s3 + $0x48] sm:$0xff]  ;;  %v9797_v6 = vld [vmem:[%s13197_s3 + $0x40] sm:$0xff]  ;;  %v9804_v13 = vld [vmem:[%s13197_s3 + $0x51] sm:$0x7f] }
  0x7f   : >> { %v9802_v7 = vld [vmem:[%s13197_s3 + $0x41] sm:$0xff]  ;;  %v9803_v10 = vld [vmem:[%s13197_s3 + $0x49] sm:$0xff]  ;;  %v9809_v16 = vld [vmem:[%s13197_s3 + $0x52] sm:$0x7f] }
  0x80   : >> { %v9808_v11 = vld [vmem:[%s13197_s3 + $0x4a] sm:$0xff]  ;;  %v9807_v12 = vld [vmem:[%s13197_s3 + $0x42] sm:$0xff]  ;;  %v9775_v32 = vld [vmem:[%s14968_s0 + $0x1] ss:$0 sm:$0xff] }
  0x81   : >> { %1129 = vperm.xlu1 %12511, %v1118_v55   ;;  %v9799_v15 = vld [vmem:[%s13197_s3 + $0x50] sm:$0x7f]  ;;  %v9773_v33 = vld [vmem:[%s14968_s0] ss:$0 sm:$0xff]  ;;  %v9777_v34 = vld [vmem:[%s14968_s0 + $0x2] ss:$0 sm:$0xff] }
  0x82   : >> { %1124 = vperm.xlu0 %12510, %v1117_v56   ;;  %v9784_v41 = vld [vmem:[%s14968_s0 + $0x3] ss:$0 sm:$0xff]  ;;  %v9789_v44 = vld [vmem:[%s14968_s0 + $0x4] ss:$0 sm:$0xff]  ;;  %v9794_v51 = vld [vmem:[%s14968_s0 + $0x5] ss:$0 sm:$0xff] }
  0x83   : >> { %v9801_v56 = vld [vmem:[%s14968_s0 + $0x6] ss:$0 sm:$0xff]  ;;  %s13270_s3 = smov (%p1047_p11), 0  }
  0x85   : >> { %1164 = vperm.xlu1 %12511, %v9781_v57  }
  0x86   : >> { %1159 = vperm.xlu0 %12510, %v9780_v58  }
  0x89   : >> { %1102 = vperm.xlu1 %12511, %v1087_v59  }
  0x8a   : >> { %1070 = vperm.xlu0 %12510, %v1056_v60  }
  0x8d   : >> { %1196 = vperm.xlu1 %12511, %v9786_v61  }
  0x8e   : >> { %1191 = vperm.xlu0 %12510, %v9785_v62  }
  0x91   : >> { %1223 = vperm.xlu1 %12511, %v9790_v63  }
  0x92   : >> { %1134 = vperm.xlu0 %12510, %v1119_v1  }
  0x95   : >> { %1169 = vperm.xlu1 %12511, %v9782_v3   ;;  %v9806_v3 = vld [vmem:[%s14968_s0 + $0x7] ss:$0 sm:$0xff] }
  0x96   : >> { %1228 = vperm.xlu0 %12510, %v9791_v4  }
  0x99   : >> { %1263 = vperm.xlu1 %12511, %v9798_v5  }
  0x9a   : >> { %1258 = vperm.xlu0 %12510, %v9797_v6  }
  0x9d   : >> { %1290 = vperm.xlu1 %12511, %v9802_v7  }
  0x9e   : >> { %1201 = vperm.xlu0 %12510, %v9787_v8  }
  0xa1   : >> { %1233 = vperm.xlu1 %12511, %v9792_v9  }
  0xa2   : >> { %1295 = vperm.xlu0 %12510, %v9803_v10  }
  0xa5   : >> { %1327 = vperm.xlu1 %12511, %v9808_v11  }
  0xa6   : >> { %1322 = vperm.xlu0 %12510, %v9807_v12  }
  0xa9   : >> { %1300 = vperm.xlu1 %12511, %v9804_v13  }
  0xaa   : >> { %1268 = vperm.xlu0 %12510, %v9799_v15  }
  0xae   : >> { %1332 = vperm.xlu0 %12510, %v9809_v16  }
  0xf8   : >> { %v1093_v17 = vpop.permute.xlu1 %1092 }
  0xf9   : >> { %v1061_v18 = vpop.permute.xlu0 %1060  ;;  %v1111_v35 = vmul.f32 %v9775_v32, %v1093_v17 }
  0xfa   : >> { %v1079_v36 = vmul.f32 %v9773_v33, %v1061_v18 }
  0xfc   : >> { %v1098_v19 = vpop.permute.xlu1 %1097  ;;  %v1114_v45 = vadd.f32 %v1111_v35, %v1079_v36 }
  0xfd   : >> { %v1066_v20 = vpop.permute.xlu0 %1065  ;;  %v1112_v39 = vmul.f32 %v9775_v32, %v1098_v19 }
  0xfe   : >> { %v1080_v40 = vmul.f32 %v9773_v33, %v1066_v20  ;;  %v9811_v20 = vld [vmem:[%s14968_s0 + $0x8] ss:$0 sm:$0xff] }
 0x100   : >> { %v1130_v22 = vpop.permute.xlu1 %1129  ;;  %v1115_v49 = vadd.f32 %v1112_v39, %v1080_v40 }
 0x101   : >> { %v1125_v23 = vpop.permute.xlu0 %1124  ;;  %v1144_v43 = vmul.f32 %v9777_v34, %v1130_v22 }
 0x102   : >> { %v1143_v42 = vmul.f32 %v9777_v34, %v1125_v23 }
 0x103   : >> { %v1147_v54 = vadd.f32 %v1144_v43, %v1115_v49 }
 0x104   : >> { %v1165_v24 = vpop.permute.xlu1 %1164  ;;  %v1146_v52 = vadd.f32 %v1143_v42, %v1114_v45 }
 0x105   : >> { %v1160_v25 = vpop.permute.xlu0 %1159  ;;  %v1179_v50 = vmul.f32 %v9784_v41, %v1165_v24 }
 0x106   : >> { %v1178_v46 = vmul.f32 %v9784_v41, %v1160_v25 }
 0x107   : >> { %v1182_v63 = vadd.f32 %v1179_v50, %v1147_v54 }
 0x108   : >> { %v1103_v26 = vpop.permute.xlu1 %1102  ;;  %v1181_v57 = vadd.f32 %v1178_v46, %v1146_v52  ;;  %v13268_v52 = vld [vmem:[%s14969_s28] ss:$0 sm:$0xff] (%p1047_p11) }
 0x109   : >> { %v1071_v27 = vpop.permute.xlu0 %1070  ;;  %v1113_v58 = vmul.f32 %v9775_v32, %v1103_v26 }
 0x10a   : >> { %v1081_v59 = vmul.f32 %v9773_v33, %v1071_v27 }
 0x10c   : >> { %v1197_v28 = vpop.permute.xlu1 %1196  ;;  %v1116_v9 = vadd.f32 %v1113_v58, %v1081_v59 }
 0x10d   : >> { %v1192_v29 = vpop.permute.xlu0 %1191  ;;  %v1211_v55 = vmul.f32 %v9789_v44, %v1197_v28 }
 0x10e   : >> { %v1210_v53 = vmul.f32 %v9789_v44, %v1192_v29 }
 0x10f   : >> { %v1214_v7 = vadd.f32 %v1211_v55, %v1182_v63 }
 0x110   : >> { %v1224_v30 = vpop.permute.xlu1 %1223  ;;  %v1213_v4 = vadd.f32 %v1210_v53, %v1181_v57 }
 0x111   : >> { %v1135_v31 = vpop.permute.xlu0 %1134  ;;  %v1242_v60 = vmul.f32 %v9794_v51, %v1224_v30 }
 0x112   : >> { %v1145_v5 = vmul.f32 %v9777_v34, %v1135_v31 }
 0x113   : >> { %v1245_v10 = vadd.f32 %v1242_v60, %v1213_v4 }
 0x114   : >> { %v1170_v37 = vpop.permute.xlu1 %1169  ;;  %v1148_v18 = vadd.f32 %v1145_v5, %v1116_v9 }
 0x115   : >> { %v1229_v38 = vpop.permute.xlu0 %1228  ;;  %v1180_v11 = vmul.f32 %v9784_v41, %v1170_v37 }
 0x116   : >> { %v1243_v1 = vmul.f32 %v9794_v51, %v1229_v38 }
 0x117   : >> { %v1183_v24 = vadd.f32 %v1180_v11, %v1148_v18 }
 0x118   : >> { %v1264_v47 = vpop.permute.xlu1 %1263  ;;  %v1246_v16 = vadd.f32 %v1243_v1, %v1214_v7 }
 0x119   : >> { %v1259_v48 = vpop.permute.xlu0 %1258  ;;  %v1278_v8 = vmul.f32 %v9801_v56, %v1264_v47 }
 0x11a   : >> { %v1277_v6 = vmul.f32 %v9801_v56, %v1259_v48 }
 0x11b   : >> { %v1281_v22 = vadd.f32 %v1278_v8, %v1246_v16 }
 0x11c   : >> { %v1291_v61 = vpop.permute.xlu1 %1290  ;;  %v1280_v19 = vadd.f32 %v1277_v6, %v1245_v10 }
 0x11d   : >> { %v1202_v62 = vpop.permute.xlu0 %1201  ;;  %v1309_v12 = vmul.f32 %v9806_v3, %v1291_v61 }
 0x11e   : >> { %v1212_v23 = vmul.f32 %v9789_v44, %v1202_v62 }
 0x11f   : >> { %v1312_v25 = vadd.f32 %v1309_v12, %v1280_v19 }
 0x120   : >> { %v1234_v13 = vpop.permute.xlu1 %1233  ;;  %v1215_v32 = vadd.f32 %v1212_v23, %v1183_v24 }
 0x121   : >> { %v1296_v15 = vpop.permute.xlu0 %1295  ;;  %v1244_v28 = vmul.f32 %v9794_v51, %v1234_v13 }
 0x122   : >> { %v1310_v17 = vmul.f32 %v9806_v3, %v1296_v15 }
 0x123   : >> { %v1247_v37 = vadd.f32 %v1244_v28, %v1215_v32 }
 0x124   : >> { %v1328_v26 = vpop.permute.xlu1 %1327  ;;  %v1313_v29 = vadd.f32 %v1310_v17, %v1281_v22 }
 0x125   : >> { %v1323_v27 = vpop.permute.xlu0 %1322  ;;  %v1342_v30 = vmul.f32 %v9811_v20, %v1328_v26 }
 0x126   : >> { %v1341_v31 = vmul.f32 %v9811_v20, %v1323_v27 }
 0x127   : >> { %v1345_v33 = vadd.f32 %v1342_v30, %v1313_v29 }
 0x128   : >> { %v1344_v34 = vadd.f32 %v1341_v31, %v1312_v25  ;;  %v1301_v35 = vpop.permute.xlu1 %1300 }
 0x129   : >> { %v1269_v36 = vpop.permute.xlu0 %1268  ;;  %v1311_v40 = vmul.f32 %v9806_v3, %v1301_v35 }
 0x12a   : >> { %v1279_v38 = vmul.f32 %v9801_v56, %v1269_v36  ;;  %v11756_v39 = vpack.c.bf16 %v1345_v33, %v1344_v34 }
 0x12c   : >> { %v1282_v41 = vadd.f32 %v1279_v38, %v1247_v37  ;;  %11757 = vmatprep.subr.bf16.mxu0 %v11756_v39 }
 0x12d   : >> { %11759 = vmatpush3.bf16.msra.mxu0 %v11756_v39  ;;  %v1333_v42 = vpop.permute.xlu0 %1332 }
 0x12e   : >> { %v1314_v43 = vadd.f32 %v1311_v40, %v1282_v41  ;;  %v1343_v44 = vmul.f32 %v9811_v20, %v1333_v42 }
 0x130   : >> { %v1346_v45 = vadd.f32 %v1343_v44, %v1314_v43 }
 0x132   : >> { %10833 = vmatprep.subr.msk.mxu0 %vm1360_vm8, %v1346_v45 }
 0x133   : >> { %10834 = vmatpush3.msk.msra.mxu0 %vm1360_vm8, %v1346_v45 }
 0x134   : >> { %10836 = vmatmul.mubr.msk.f32.vlgmr.msra.gmra.mrb[0].mxu0 %vm1353_vm7, %v13006_v21 }
 0x207   : >> { %v10837_v46 = vpop.f32.mrb[0].mxu0  ;;  %1049 = sbr.rel (!%p1047_p11) target bundleno = 114 (0x72), region = 328 }
 0x208   : >> { %v1436_v47 = vadd.f32 %v10837_v46, %v12896_v2  ;;  %v1430_v48 = vpop.f32.mrb[1].mxu0 }
 0x209   : >> { %v1431_v49 = vadd.f32 %v12896_v2, %v1430_v48 }
 0x20a   : >> { %v1440_v50 = vmax.f32 %v1436_v47, 0.0 }
 0x20b   : >> { %v1439_v51 = vmax.f32 %v1431_v49, 0.0 }
 0x20c   : >> { %9818 = vst.msk [vmem:[%s9613_s26 + $0x19] sm:$0xf] %vm1445_vm9, %v1440_v50 }
 0x20d   : >> { %9817 = vst.msk [vmem:[%s9613_s26 + $0x11] sm:$0xff] %vm964_vm0, %v1439_v51 }
 0x20e LB: >> { %s14970_s6 = sld [smem:[#allocation23_spill]]  ;;  %s9819_s0 = sshll.u32 %s12616_s3, 4  ;;  %s12616_s3 = sphi %s13270_s3, %s1453_s3  }
 0x20f   : >> { %s13314_s5 = scalar_lea.vmem [#allocation3], %s9819_s0  ;;  %s1453_s3 = sadd.s32 1, %s12616_s3  }
 0x210   : >> { %p1450_p12 = scmp.ge.s32.totalorder %s1453_s3, 12  }
 0x211   : > { %s14972_s9 = sld [smem:[#allocation28_spill]] (%p1450_p12)  ;;  %s13392_s1 = smov (%p1450_p12), 0  }
 0x214   : >> { %s14971_s26 = smov %s14970_s6  ;;  %v9820_v53 = vld [vmem:[%s14970_s6 + $0x10] sm:$0xff]  ;;  %v1460_v6 = vld [vmem:[%s13314_s5 + $0x1] sm:$0xff]  ;;  %v1461_v8 = vld [vmem:[%s13314_s5 + $0x9] sm:$0xf] }
 0x215   : >> { %v9821_v2 = vld [vmem:[%s14971_s26 + $0x18] sm:$0xff]  ;;  %v9839_v54 = vld [vmem:[%s14971_s26 + $0x40] sm:$0xff]  ;;  %v9840_v56 = vld [vmem:[%s14971_s26 + $0x48] sm:$0xff]  ;;  %10842 = vmatprep.mubr.msk.f32.mxu1 %vm964_vm0, %v1460_v6 }
 0x216   : >> { %v11760_v55 = vpack.c.bf16 %v9821_v2, %v9820_v53  ;;  %v9845_v57 = vld [vmem:[%s14971_s26 + $0x50] sm:$0xff]  ;;  %v9846_v58 = vld [vmem:[%s14971_s26 + $0x58] sm:$0xff]  ;;  %v11776_v59 = vpack.c.bf16 %v9840_v56, %v9839_v54  ;;  %v1458_v61 = vld [vmem:[%s14971_s26] sm:$0xff] }
 0x217   : >> { %v11780_v60 = vpack.c.bf16 %v9846_v58, %v9845_v57  ;;  %v1459_v62 = vld [vmem:[%s14971_s26 + $0x8] sm:$0xff]  ;;  %v9852_v63 = vld [vmem:[%s14971_s26 + $0x60] sm:$0xff]  ;;  %v13318_v7 = vld [vmem:[%s13314_s5 + $0x11] sm:$0xff] }
 0x218   : >> { %11761 = vmatprep.subr.bf16.mxu1 %v11760_v55  ;;  %v11764_v1 = vpack.c.bf16 %v1459_v62, %v1458_v61  ;;  %v9853_v3 = vld [vmem:[%s14971_s26 + $0x68] sm:$0xff]  ;;  %v9826_v4 = vld [vmem:[%s14971_s26 + $0x20] sm:$0xff]  ;;  %11777 = vmatprep.subr.bf16.mxu0 %v11776_v59  ;;  %v13323_v9 = vld [vmem:[%s13314_s5 + $0x19] sm:$0xf] }
 0x219   : >> { %v9827_v5 = vld [vmem:[%s14971_s26 + $0x28] sm:$0xff]  ;;  %11763 = vmatpush3.bf16.msra.mxu1 %v11760_v55  ;;  %11779 = vmatpush3.bf16.msra.mxu0 %v11776_v59  ;;  %v1456_v10 = vld [vmem:[%s13314_s5] sm:$0xff]  ;;  %v11784_v11 = vpack.c.bf16 %v9853_v3, %v9852_v63  ;;  %v9843_v12 = vld [vmem:[%s13314_s5 + $0x12] sm:$0xff] }
 0x21a   : >> { %10870 = vmatprep.mubr.msk.f32.mxu0 %vm964_vm0, %v13318_v7  ;;  %11781 = vmatprep.subr.bf16.mxu0 %v11780_v60  ;;  %v11768_v13 = vpack.c.bf16 %v9827_v5, %v9826_v4  ;;  %v9858_v15 = vld [vmem:[%s14971_s26 + $0x70] sm:$0xff]  ;;  %v9859_v16 = vld [vmem:[%s14971_s26 + $0x78] sm:$0xff]  ;;  %v1457_v17 = vld [vmem:[%s13314_s5 + $0x8] sm:$0xf] }
 0x21b   : >> { %11765 = vmatprep.subr.bf16.mxu1 %v11764_v1  ;;  %v9833_v18 = vld [vmem:[%s14971_s26 + $0x30] sm:$0xff]  ;;  %v9834_v19 = vld [vmem:[%s14971_s26 + $0x38] sm:$0xff]  ;;  %v1627_v22 = vld [vmem:[%s13314_s5 + $0x2] sm:$0xff]  ;;  %v11788_v23 = vpack.c.bf16 %v9859_v16, %v9858_v15 }
 0x21c   : >> { %10843 = vmatmul.mubr.msk.f32.vlgmr.msra.gmra.mrb[0].mxu1 %vm964_vm0, %v1461_v8  ;;  %10871 = vmatmul.mubr.msk.f32.vlgmr.msra.gmra.mrb[0].mxu0 %vm964_vm0, %v13323_v9  ;;  %v9844_v20 = vld [vmem:[%s13314_s5 + $0x1a] sm:$0xf]  ;;  %v9850_v24 = vld [vmem:[%s13314_s5 + $0x20] sm:$0xff]  ;;  %v11772_v25 = vpack.c.bf16 %v9834_v19, %v9833_v18  ;;  %v9865_v27 = vld [vmem:[%s14971_s26 + $0x88] sm:$0xff] }
 0x21d   : >> { %11767 = vmatpush3.bf16.msra.mxu1 %v11764_v1  ;;  %11783 = vmatpush3.bf16.msra.mxu0 %v11780_v60  ;;  %v9864_v26 = vld [vmem:[%s14971_s26 + $0x80] sm:$0xff]  ;;  %v1628_v28 = vld [vmem:[%s13314_s5 + $0xa] sm:$0xf]  ;;  %v9831_v30 = vld [vmem:[%s13314_s5 + $0x10] sm:$0xff] }
 0x21e   : >> { %10849 = vmatprep.mubr.msk.f32.mxu1 %vm964_vm0, %v1456_v10  ;;  %10877 = vmatprep.mubr.msk.f32.mxu0 %vm964_vm0, %v9843_v12  ;;  %v9851_v29 = vld [vmem:[%s13314_s5 + $0x28] sm:$0xf]  ;;  %v11792_v31 = vpack.c.bf16 %v9865_v27, %v9864_v26  ;;  %v9832_v33 = vld [vmem:[%s13314_s5 + $0x18] sm:$0xf]  ;;  %v13390_v49 = vld [vmem:[%s14972_s9] ss:$0 sm:$0xff] (%p1450_p12) }
 0x21f   : >> { %11785 = vmatprep.subr.bf16.mxu0 %v11784_v11  ;;  %11769 = vmatprep.subr.bf16.mxu1 %v11768_v13  ;;  %v9856_v32 = vld [vmem:[%s13314_s5 + $0x21] sm:$0xff]  ;;  %v9857_v34 = vld [vmem:[%s13314_s5 + $0x29] sm:$0xf] }
 0x220   : >> { %v9862_v35 = vld [vmem:[%s13314_s5 + $0x22] sm:$0xff]  ;;  %v9863_v36 = vld [vmem:[%s13314_s5 + $0x2a] sm:$0xf]  ;;  %s9624_s5 = scalar_lea.vmem [#allocation4], %s9819_s0 }
 0x224   : >> { %10850 = vmatmul.mubr.msk.f32.vlgmr.msra.gmra.mrb[0].mxu1 %vm964_vm0, %v1457_v17  ;;  %10878 = vmatmul.mubr.msk.f32.vlgmr.msra.gmra.mrb[0].mxu0 %vm964_vm0, %v9844_v20 }
 0x225   : >> { %11771 = vmatpush3.bf16.msra.mxu1 %v11768_v13  ;;  %11787 = vmatpush3.bf16.msra.mxu0 %v11784_v11 }
 0x226   : >> { %10856 = vmatprep.mubr.msk.f32.mxu1 %vm964_vm0, %v1627_v22  ;;  %10884 = vmatprep.mubr.msk.f32.mxu0 %vm964_vm0, %v9850_v24 }
 0x227   : >> { %11789 = vmatprep.subr.bf16.mxu0 %v11788_v23  ;;  %11773 = vmatprep.subr.bf16.mxu1 %v11772_v25 }
 0x22c   : >> { %10857 = vmatmul.mubr.msk.f32.vlgmr.msra.gmra.mrb[0].mxu1 %vm964_vm0, %v1628_v28  ;;  %10885 = vmatmul.mubr.msk.f32.vlgmr.msra.gmra.mrb[0].mxu0 %vm964_vm0, %v9851_v29 }
 0x22d   : >> { %11775 = vmatpush3.bf16.msra.mxu1 %v11772_v25  ;;  %11791 = vmatpush3.bf16.msra.mxu0 %v11788_v23 }
 0x22e   : >> { %10863 = vmatprep.mubr.msk.f32.mxu1 %vm964_vm0, %v9831_v30  ;;  %10891 = vmatprep.mubr.msk.f32.mxu0 %vm964_vm0, %v9856_v32 }
 0x22f   : >> { %11793 = vmatprep.subr.bf16.mxu0 %v11792_v31 }
 0x234   : >> { %10864 = vmatmul.mubr.msk.f32.vlgmr.msra.gmra.mrb[0].mxu1 %vm964_vm0, %v9832_v33  ;;  %10892 = vmatmul.mubr.msk.f32.vlgmr.msra.gmra.mrb[0].mxu0 %vm964_vm0, %v9857_v34 }
 0x235   : >> { %11795 = vmatpush3.bf16.msra.mxu0 %v11792_v31  ;;  %10898 = vmatprep.mubr.msk.f32.mxu0 %vm964_vm0, %v9862_v35 }
 0x23c   : >> { %10899 = vmatmul.mubr.msk.f32.vlgmr.msra.gmra.mrb[0].mxu0 %vm964_vm0, %v9863_v36 }
 0x307   : >> { %v10865_v37 = vpop.f32.mrb[0].mxu1 }
 0x308   : >> { %v1795_v38 = vpop.f32.mrb[1].mxu1 }
 0x30f   : >> { %v10900_v39 = vpop.f32.mrb[0].mxu0 }
 0x310   : >> { %v12153_v40 = vadd.f32 %v10900_v39, %v10865_v37  ;;  %v2238_v41 = vpop.f32.mrb[1].mxu0 }
 0x311   : >> { %v12154_v42 = vadd.f32 %v2238_v41, %v1795_v38 }
 0x312   : >> { %v2256_v43 = vadd.f32 %v12153_v40, %v13268_v52 }
 0x313   : >> { %v2255_v44 = vadd.f32 %v12154_v42, %v13268_v52  ;;  %1452 = sbr.rel (!%p1450_p12) target bundleno = 526 (0x20e), region = 339 }
 0x314   : >> { %v2258_v45 = vadd.f32 %v13323_v9, %v2256_v43 }
 0x315   : >> { %v2257_v46 = vadd.f32 %v13318_v7, %v2255_v44 }
 0x316   : >> { %v2260_v47 = vmax.f32 %v2258_v45, 0.0 }
 0x317   : >> { %v2259_v48 = vmax.f32 %v2257_v46, 0.0 }
 0x318   : >> { %9871 = vst.msk [vmem:[%s9624_s5 + $0x19] sm:$0xf] %vm1445_vm9, %v2260_v47 }
 0x319   : >> { %9870 = vst.msk [vmem:[%s9624_s5 + $0x11] sm:$0xff] %vm964_vm0, %v2259_v48 }
 0x31a LB: >> { %s14973_s30 = sld [smem:[#allocation27_spill]]  ;;  %v12640_v35 = vmov 0.0|0.0   ;;  %vm12641_vm10 = vmmov 0   ;;  %v12642_v36 = vmov 0.0   ;;  %vm3078_vm11 = vcmask 1042432   ;;  %s14975_s4 = sld [smem:[#allocation25_spill]]  ;;  %s12620_s1 = sphi %s13392_s1, %s2271_s1  }
 0x31b   : >> { %vm12643_vm12 = vmmov 1   ;;  %vm3074_vm14 = vcmask 89088   ;;  %s14976_s29 = sld [smem:[#allocation26_spill]]  ;;  %s9931_s3 = sshll.u32 %s12620_s1, 3  ;;  %vm3311_vm15 = vcmask 259072  }
 0x31c   : >> { %vm11834_vm13 = vmpackc.low %vm3078_vm11, %vm12643_vm12  ;;  %s9637_s28 = scalar_lea.vmem [#allocation5], %s9931_s3 }
 0x320   : >> { %s14974_s27 = smov %s14973_s30  ;;  %v9888_v50 = vld [vmem:[%s14973_s30 + $0x30] sm:$0xff]  ;;  %s10404_s30 = sshll.u32 %s12620_s1, 5  ;;  %v3224_v44 = vld [vmem:[%s14975_s4] sm:$0xff]  ;;  %v3225_v45 = vld [vmem:[%s14975_s4 + $0x8] sm:$0xff] }
 0x321   : >> { %v9889_v51 = vld [vmem:[%s14974_s27 + $0x38] sm:$0xff]  ;;  %v9894_v52 = vld [vmem:[%s14974_s27 + $0x40] sm:$0xff]  ;;  %v9895_v2 = vld [vmem:[%s14974_s27 + $0x48] sm:$0xff]  ;;  %s13428_s0 = scalar_lea.vmem [#allocation4], %s10404_s30  ;;  %v11841_v46 = vpack.c.bf16 %v3225_v45, %v3224_v44  ;;  %s2271_s1 = sadd.s32 1, %s12620_s1  }
 0x322   : >> { %v11808_v53 = vpack.c.bf16 %v9889_v51, %v9888_v50  ;;  %v9874_v54 = vld [vmem:[%s14974_s27 + $0x10] sm:$0xff]  ;;  %v9875_v55 = vld [vmem:[%s14974_s27 + $0x18] sm:$0xff]  ;;  %v11812_v56 = vpack.c.bf16 %v9895_v2, %v9894_v52  ;;  %v2277_v60 = vld [vmem:[%s14974_s27] sm:$0xff]  ;;  %p2268_p13 = scmp.ge.s32.totalorder %s2271_s1, 6  }
 0x323   : >> { %v11796_v57 = vpack.c.bf16 %v9875_v55, %v9874_v54  ;;  %v9900_v58 = vld [vmem:[%s14974_s27 + $0x50] sm:$0xff]  ;;  %v9901_v59 = vld [vmem:[%s14974_s27 + $0x58] sm:$0xff]  ;;  %v2278_v61 = vld [vmem:[%s14974_s27 + $0x8] sm:$0xff]  ;;  %s13526_s25 = smov (%p2268_p13), 0  }
 0x324   : >> { %11809 = vmatprep.subr.bf16.mxu0 %v11808_v53  ;;  %v9886_v62 = vld [vmem:[%s13428_s0 + $0x10] sm:$0xff]  ;;  %v9887_v63 = vld [vmem:[%s13428_s0 + $0x18] sm:$0x7]  ;;  %v2279_v1 = vld [vmem:[%s13428_s0 + $0x1] sm:$0xff]  ;;  %v11800_v3 = vpack.c.bf16 %v2278_v61, %v2277_v60  ;;  %v11816_v6 = vpack.c.bf16 %v9901_v59, %v9900_v58 }
 0x325   : >> { %11811 = vmatpush3.bf16.msra.mxu0 %v11808_v53  ;;  %11797 = vmatprep.subr.bf16.mxu1 %v11796_v57  ;;  %v13435_v4 = vld [vmem:[%s13428_s0 + $0x11] sm:$0xff]  ;;  %v13438_v5 = vld [vmem:[%s13428_s0 + $0x19] sm:$0x7]  ;;  %v2280_v7 = vld [vmem:[%s13428_s0 + $0x9] sm:$0x7] }
 0x326   : >> { %10926 = vmatprep.mubr.msk.f32.mxu0 %vm964_vm0, %v9886_v62  ;;  %11813 = vmatprep.subr.bf16.mxu0 %v11812_v56  ;;  %v11837_v8 = vpack.c.bf16 %v13438_v5, %v13435_v4  ;;  %v2275_v9 = vld [vmem:[%s13428_s0] sm:$0xff]  ;;  %v9881_v11 = vld [vmem:[%s14974_s27 + $0x28] sm:$0xff]  ;;  %v9898_v16 = vld [vmem:[%s13428_s0 + $0x12] sm:$0xff] }
 0x327   : >> { %11799 = vmatpush3.bf16.msra.mxu1 %v11796_v57  ;;  %10905 = vmatprep.mubr.msk.f32.mxu1 %vm964_vm0, %v2279_v1  ;;  %v9880_v10 = vld [vmem:[%s14974_s27 + $0x20] sm:$0xff]  ;;  %v9909_v15 = vld [vmem:[%s14974_s27 + $0x68] sm:$0xff]  ;;  %v9914_v20 = vld [vmem:[%s14974_s27 + $0x70] sm:$0xff] }
 0x328   : >> { %10927 = vmatmul.mubr.msk.f32.vlgmr.msra.gmra.mrb[0].mxu0 %vm964_vm0, %v9887_v63  ;;  %11801 = vmatprep.subr.bf16.mxu1 %v11800_v3  ;;  %v11804_v12 = vpack.c.bf16 %v9881_v11, %v9880_v10  ;;  %v9908_v13 = vld [vmem:[%s14974_s27 + $0x60] sm:$0xff]  ;;  %v2276_v18 = vld [vmem:[%s13428_s0 + $0x8] sm:$0x7]  ;;  %v9915_v22 = vld [vmem:[%s14974_s27 + $0x78] sm:$0xff] }
 0x329   : >> { %11815 = vmatpush3.bf16.msra.mxu0 %v11812_v56  ;;  %10933 = vmatprep.mubr.msk.f32.mxu0 %vm964_vm0, %v13435_v4  ;;  %v11820_v17 = vpack.c.bf16 %v9909_v15, %v9908_v13  ;;  %v2446_v19 = vld [vmem:[%s13428_s0 + $0x2] sm:$0xff]  ;;  %v9899_v23 = vld [vmem:[%s13428_s0 + $0x1a] sm:$0x7]  ;;  %v11824_v25 = vpack.c.bf16 %v9915_v22, %v9914_v20  ;;  %v2447_v26 = vld [vmem:[%s13428_s0 + $0xa] sm:$0x7] }
 0x32a   : >> { %10906 = vmatmul.mubr.msk.f32.vlgmr.msra.gmra.mrb[0].mxu1 %vm964_vm0, %v2280_v7  ;;  %11817 = vmatprep.subr.bf16.mxu0 %v11816_v6  ;;  %v9906_v24 = vld [vmem:[%s13428_s0 + $0x20] sm:$0xff]  ;;  %v9921_v28 = vld [vmem:[%s14974_s27 + $0x88] sm:$0xff] }
 0x32b   : >> { %11803 = vmatpush3.bf16.msra.mxu1 %v11800_v3  ;;  %10912 = vmatprep.mubr.msk.f32.mxu1 %vm964_vm0, %v2275_v9  ;;  %v9920_v27 = vld [vmem:[%s14974_s27 + $0x80] sm:$0xff]  ;;  %v9907_v29 = vld [vmem:[%s13428_s0 + $0x28] sm:$0x7] }
 0x32c   : >> { %11805 = vmatprep.subr.bf16.mxu1 %v11804_v12  ;;  %v9912_v30 = vld [vmem:[%s13428_s0 + $0x21] sm:$0xff]  ;;  %v11828_v31 = vpack.c.bf16 %v9921_v28, %v9920_v27  ;;  %v9913_v32 = vld [vmem:[%s13428_s0 + $0x29] sm:$0x7]  ;;  %v9929_v50 = vld [vmem:[%s14976_s29] ss:$0 sm:$0xff] }
 0x32d   : >> { %v9918_v33 = vld [vmem:[%s13428_s0 + $0x22] sm:$0xff]  ;;  %v9919_v34 = vld [vmem:[%s13428_s0 + $0x2a] sm:$0x7]  ;;  %v12171_v51 = vadd.f32 %v9929_v50, %v13390_v49  ;;  %v13524_v55 = vld [vmem:[%s14913_s12] ss:$0 sm:$0xff] (%p2268_p13) }
 0x330   : >> { %10934 = vmatmul.mubr.msk.f32.vlgmr.msra.gmra.mrb[0].mxu0 %vm964_vm0, %v13438_v5 }
 0x331   : >> { %11819 = vmatpush3.bf16.msra.mxu0 %v11816_v6  ;;  %10940 = vmatprep.mubr.msk.f32.mxu0 %vm964_vm0, %v9898_v16 }
 0x332   : >> { %10913 = vmatmul.mubr.msk.f32.vlgmr.msra.gmra.mrb[0].mxu1 %vm964_vm0, %v2276_v18  ;;  %11821 = vmatprep.subr.bf16.mxu0 %v11820_v17 }
 0x333   : >> { %11807 = vmatpush3.bf16.msra.mxu1 %v11804_v12  ;;  %10919 = vmatprep.mubr.msk.f32.mxu1 %vm964_vm0, %v2446_v19 }
 0x334   : >> { %11832 = vmatprep.subr.bf16.mxu1 %v12640_v35 }
 0x338   : >> { %10941 = vmatmul.mubr.msk.f32.vlgmr.msra.gmra.mrb[0].mxu0 %vm964_vm0, %v9899_v23 }
 0x339   : >> { %11823 = vmatpush3.bf16.msra.mxu0 %v11820_v17  ;;  %10947 = vmatprep.mubr.msk.f32.mxu0 %vm964_vm0, %v9906_v24 }
 0x33a   : >> { %10920 = vmatmul.mubr.msk.f32.vlgmr.msra.gmra.mrb[0].mxu1 %vm964_vm0, %v2447_v26  ;;  %11825 = vmatprep.subr.bf16.mxu0 %v11824_v25 }
 0x33b   : >> { %10968 = vmatprep.mubr.msk.f32.mxu1 %vm12641_vm10, %v12642_v36 }
 0x340   : >> { %10948 = vmatmul.mubr.msk.f32.vlgmr.msra.gmra.mrb[0].mxu0 %vm964_vm0, %v9907_v29 }
 0x341   : >> { %11827 = vmatpush3.bf16.msra.mxu0 %v11824_v25  ;;  %10954 = vmatprep.mubr.msk.f32.mxu0 %vm964_vm0, %v9912_v30 }
 0x342   : >> { %11829 = vmatprep.subr.bf16.mxu0 %v11828_v31 }
 0x348   : >> { %10955 = vmatmul.mubr.msk.f32.vlgmr.msra.gmra.mrb[0].mxu0 %vm964_vm0, %v9913_v32 }
 0x349   : >> { %11831 = vmatpush3.bf16.msra.mxu0 %v11828_v31  ;;  %10961 = vmatprep.mubr.msk.f32.mxu0 %vm964_vm0, %v9918_v33 }
 0x350   : >> { %10962 = vmatmul.mubr.msk.f32.vlgmr.msra.gmra.mrb[0].mxu0 %vm964_vm0, %v9919_v34 }
 0x40d   : >> { %v10921_v37 = vpop.f32.mrb[0].mxu1 }
 0x40e   : >> { %v2523_v38 = vpop.f32.mrb[1].mxu1 }
 0x423   : >> { %v10963_v39 = vpop.f32.mrb[0].mxu0 }
 0x424   : >> { %v12169_v40 = vadd.f32 %v10963_v39, %v10921_v37  ;;  %v3057_v41 = vpop.f32.mrb[1].mxu0 }
 0x425   : >> { %v12170_v42 = vadd.f32 %v3057_v41, %v2523_v38 }
 0x427   : >> { %v11833_v43 = vpack.c.bf16 %v12169_v40, %v12170_v42 }
 0x429   : >> { %11835 = vmatpush3.bf16.msk.msra.mxu1 %vm11834_vm13, %v11833_v43 }
 0x42a   : >> { %11836 = vmatprep.subr.bf16.mxu1 %v12640_v35 }
 0x42c   : >> { %10969 = vmatmul.mubr.msk.f32.vlgmr.msra.gmra.mrb[2].mxu1 %vm3074_vm14, %v12991_v14 }
 0x42d   : >> { %11839 = vmatpush3.bf16.msk.msra.mxu1 %vm11834_vm13, %v11837_v8  ;;  %10975 = vmatprep.mubr.msk.f32.mxu1 %vm12641_vm10, %v12642_v36 }
 0x42e   : >> { %11840 = vmatprep.subr.bf16.mxu1 %v12640_v35 }
 0x430   : >> { %10976 = vmatmul.mubr.msk.f32.vlgmr.msra.gmra.mrb[4].mxu1 %vm3074_vm14, %v12991_v14 }
 0x431   : >> { %11842 = vmatpush3.bf16.msra.mxu1 %v11841_v46  ;;  %10982 = vmatprep.mubr.msk.f32.mxu1 %vm12641_vm10, %v12642_v36 }
 0x503   : >> { %v3220_v47 = vpop.f32.mrb[4].mxu1 }
 0x504   : >> { %v10977_v48 = vpop.f32.mrb[5].mxu1  ;;  %10983 = vmatmul.mubr.msk.f32.vlgmr.msra.gmra.mrb[2].mxu1 %vm964_vm0, %v3220_v47 }
 0x5d6   : > { %2270 = sbr.rel (!%p2268_p13) target bundleno = 794 (0x31a), region = 350 }
 0x5d7   : >> { %v3302_v52 = vpop.f32.mrb[2].mxu1 }
 0x5d8   : >> { %v12172_v53 = vadd.f32 %v12171_v51, %v3302_v52  ;;  %v10984_v2 = vpop.f32.mrb[3].mxu1 }
 0x5da   : >> { %v3307_v54 = vmax.f32 %v12172_v53, 0.0 }
 0x5dc   : >> { %9932 = vst.msk [vmem:[%s9637_s28 + $0x9] sm:$0x3f] %vm3311_vm15, %v3307_v54 }
 0x5dd LB: >> { %v9949_v56 = vld [vmem:[%s14912_s11 + $0x60] sm:$0xff]  ;;  %v9950_v49 = vld [vmem:[%s14912_s11 + $0x68] sm:$0xff]  ;;  %v9951_v57 = vld [vmem:[%s14912_s11 + $0x70] sm:$0xff]  ;;  %v12644_v58 = vmov 0.0|0.0   ;;  %vm12645_vm1 = vmmov 0   ;;  %v12646_v63 = vmov 0.0   ;;  %s12624_s25 = sphi %s13526_s25, %s3319_s25  }
 0x5de   : >> { %11861 = vmatprep.subr.bf16.mxu0 %v12644_v58  ;;  %v11862_v59 = vpack.c.bf16 %v9950_v49, %v9949_v56  ;;  %v9952_v60 = vld [vmem:[%s14912_s11 + $0x78] sm:$0xff]  ;;  %11843 = vmatprep.subr.bf16.mxu1 %v12644_v58  ;;  %v9935_v61 = vld [vmem:[%s14912_s11 + $0x20] sm:$0xff]  ;;  %v9936_v62 = vld [vmem:[%s14912_s11 + $0x28] sm:$0xff]  ;;  %s10407_s6 = sshll.u32 %s12624_s25, 4  ;;  %vm4056_vm3 = vcmask 1044480   ;;  %vm4052_vm4 = vcmask 39936  }
 0x5df   : >> { %11026 = vmatprep.mubr.msk.f32.mxu0 %vm12645_vm1, %v12646_v63  ;;  %v11844_v1 = vpack.c.bf16 %v9936_v62, %v9935_v61  ;;  %v9937_v3 = vld [vmem:[%s14912_s11 + $0x30] sm:$0xff]  ;;  %10993 = vmatprep.mubr.msk.f32.mxu1 %vm12645_vm1, %v12646_v63  ;;  %v11865_v4 = vpack.c.bf16 %v9952_v60, %v9951_v57  ;;  %v9938_v5 = vld [vmem:[%s14912_s11 + $0x38] sm:$0xff]  ;;  %v9955_v6 = vld [vmem:[%s14912_s11 + $0x80] sm:$0xff]  ;;  %s13576_s3 = scalar_lea.vmem [#allocation5], %s10407_s6  ;;  %s14977_s9 = sld [smem:[#allocation29_spill]]  ;;  %vm4290_vm5 = vcmask 518144  }
 0x5e0   : >> { %11863 = vmatpush3.bf16.msra.mxu0 %v11862_v59  ;;  %v9956_v7 = vld [vmem:[%s14912_s11 + $0x88] sm:$0xff]  ;;  %v11847_v8 = vpack.c.bf16 %v9938_v5, %v9937_v3  ;;  %v3324_v9 = vld [vmem:[%s14912_s11] sm:$0xff]  ;;  %v9957_v13 = vld [vmem:[%s14912_s11 + $0x90] sm:$0xff]  ;;  %s9993_s6 = sshll.u32 %s12624_s25, 2  ;;  %s3319_s25 = sadd.s32 1, %s12624_s25  }
 0x5e1   : >> { %11864 = vmatprep.subr.bf16.mxu0 %v12644_v58  ;;  %11845 = vmatpush3.bf16.msra.mxu1 %v11844_v1  ;;  %v3325_v10 = vld [vmem:[%s14912_s11 + $0x8] sm:$0xff]  ;;  %v11868_v12 = vpack.c.bf16 %v9956_v7, %v9955_v6  ;;  %v9958_v15 = vld [vmem:[%s14912_s11 + $0x98] sm:$0xff]  ;;  %v3326_v18 = vld [vmem:[%s14912_s11 + $0x10] sm:$0xff]  ;;  %s4289_s1 = scalar_lea.vmem [#allocation6], %s9993_s6  ;;  %p3316_p0 = scmp.ge.s32.totalorder %s3319_s25, 3  }
 0x5e2   : >> { %11846 = vmatprep.subr.bf16.mxu1 %v12644_v58  ;;  %v11850_v17 = vpack.c.bf16 %v3325_v10, %v3324_v9  ;;  %v3327_v19 = vld [vmem:[%s14912_s11 + $0x18] sm:$0xff]  ;;  %v11871_v20 = vpack.c.bf16 %v9958_v15, %v9957_v13  ;;  %v9961_v22 = vld [vmem:[%s14912_s11 + $0xa0] sm:$0xff]  ;;  %v9962_v23 = vld [vmem:[%s14912_s11 + $0xa8] sm:$0xff]  ;;  %s13743_s29 = smov (%p3316_p0), 0  }
 0x5e3   : >> { %v9948_v11 = vld [vmem:[%s13576_s3 + $0x8] sm:$0x1f]  ;;  %v3328_v16 = vld [vmem:[%s13576_s3 + $0x1] sm:$0x1f]  ;;  %v11853_v24 = vpack.c.bf16 %v3327_v19, %v3326_v18  ;;  %v11874_v28 = vpack.c.bf16 %v9962_v23, %v9961_v22  ;;  %v9963_v29 = vld [vmem:[%s14912_s11 + $0xb0] sm:$0xff] }
 0x5e4   : >> { %11866 = vmatpush3.bf16.msra.mxu0 %v11865_v4  ;;  %v9941_v25 = vld [vmem:[%s14912_s11 + $0x40] sm:$0xff]  ;;  %v9942_v26 = vld [vmem:[%s14912_s11 + $0x48] sm:$0xff]  ;;  %v9964_v30 = vld [vmem:[%s14912_s11 + $0xb8] sm:$0xff] }
 0x5e5   : >> { %11867 = vmatprep.subr.bf16.mxu0 %v12644_v58  ;;  %11848 = vmatpush3.bf16.msra.mxu1 %v11847_v8  ;;  %v13615_v27 = vld [vmem:[%s13576_s3 + $0x9] sm:$0x1f]  ;;  %v3323_v31 = vld [vmem:[%s13576_s3] sm:$0x1f]  ;;  %v11856_v32 = vpack.c.bf16 %v9942_v26, %v9941_v25  ;;  %v9943_v33 = vld [vmem:[%s14912_s11 + $0x50] sm:$0xff]  ;;  %v11877_v35 = vpack.c.bf16 %v9964_v30, %v9963_v29 }
 0x5e6   : >> { %11849 = vmatprep.subr.bf16.mxu1 %v12644_v58  ;;  %v9944_v34 = vld [vmem:[%s14912_s11 + $0x58] sm:$0xff]  ;;  %v9969_v36 = vld [vmem:[%s14912_s11 + $0xc0] sm:$0xff]  ;;  %v9970_v37 = vld [vmem:[%s14912_s11 + $0xc8] sm:$0xff] }
 0x5e7   : >> { %11027 = vmatmul.mubr.msk.f32.vlgmr.msra.gmra.mrb[0].mxu0 %vm1022_vm2, %v9948_v11  ;;  %v11859_v38 = vpack.c.bf16 %v9944_v34, %v9943_v33  ;;  %v9960_v39 = vld [vmem:[%s13576_s3 + $0xa] sm:$0x1f]  ;;  %v11880_v40 = vpack.c.bf16 %v9970_v37, %v9969_v36  ;;  %v9971_v41 = vld [vmem:[%s14912_s11 + $0xd0] sm:$0xff]  ;;  %v9972_v42 = vld [vmem:[%s14912_s11 + $0xd8] sm:$0xff] }
 0x5e8   : >> { %11869 = vmatpush3.bf16.msra.mxu0 %v11868_v12  ;;  %10994 = vmatmul.mubr.msk.f32.vlgmr.msra.gmra.mrb[0].mxu1 %vm1022_vm2, %v3328_v16  ;;  %v3480_v43 = vld [vmem:[%s13576_s3 + $0x2] sm:$0x1f]  ;;  %v11883_v44 = vpack.c.bf16 %v9972_v42, %v9971_v41  ;;  %v9976_v46 = vld [vmem:[%s14912_s11 + $0xe8] sm:$0xff]  ;;  %v9968_v47 = vld [vmem:[%s13576_s3 + $0x10] sm:$0x1f] }
 0x5e9   : >> { %11870 = vmatprep.subr.bf16.mxu0 %v12644_v58  ;;  %11037 = vmatprep.mubr.msk.f32.mxu0 %vm12645_vm1, %v12646_v63  ;;  %v9975_v45 = vld [vmem:[%s14912_s11 + $0xe0] sm:$0xff]  ;;  %v9977_v50 = vld [vmem:[%s14912_s11 + $0xf0] sm:$0xff]  ;;  %v9978_v51 = vld [vmem:[%s14912_s11 + $0xf8] sm:$0xff] }
 0x5ea   : >> { %11851 = vmatpush3.bf16.msra.mxu1 %v11850_v17  ;;  %11004 = vmatprep.mubr.msk.f32.mxu1 %vm12645_vm1, %v12646_v63  ;;  %v11886_v48 = vpack.c.bf16 %v9976_v46, %v9975_v45  ;;  %v11889_v52 = vpack.c.bf16 %v9978_v51, %v9977_v50  ;;  %v9981_v53 = vld [vmem:[%s14912_s11 + $0x100] sm:$0xff]  ;;  %v9982_v2 = vld [vmem:[%s14912_s11 + $0x108] sm:$0xff]  ;;  %v9974_v54 = vld [vmem:[%s13576_s3 + $0x11] sm:$0x1f] }
 0x5eb   : >> { %11852 = vmatprep.subr.bf16.mxu1 %v12644_v58  ;;  %v11892_v56 = vpack.c.bf16 %v9982_v2, %v9981_v53  ;;  %v9983_v49 = vld [vmem:[%s14912_s11 + $0x110] sm:$0xff]  ;;  %v9984_v57 = vld [vmem:[%s14912_s11 + $0x118] sm:$0xff]  ;;  %v4202_v5 = vld [vmem:[%s14977_s9] sm:$0xff] }
 0x5ec   : >> { %11872 = vmatpush3.bf16.msra.mxu0 %v11871_v20  ;;  %v11895_v59 = vpack.c.bf16 %v9984_v57, %v9983_v49  ;;  %v9980_v60 = vld [vmem:[%s13576_s3 + $0x12] sm:$0x1f]  ;;  %v4203_v6 = vld [vmem:[%s14977_s9 + $0x8] sm:$0xff]  ;;  %v4205_v9 = vld [vmem:[%s14977_s9 + $0x18] sm:$0xff] }
 0x5ed   : >> { %11873 = vmatprep.subr.bf16.mxu0 %v12644_v58  ;;  %v11898_v7 = vpack.c.bf16 %v4203_v6, %v4202_v5  ;;  %v4204_v8 = vld [vmem:[%s14977_s9 + $0x10] sm:$0xff]  ;;  %v9991_v13 = vld [vmem:[%s14911_s10] ss:$0 sm:$0xff] }
 0x5ee   : >> { %11854 = vmatpush3.bf16.msra.mxu1 %v11853_v24  ;;  %v11901_v10 = vpack.c.bf16 %v4205_v9, %v4204_v8  ;;  %v12190_v15 = vadd.f32 %v9991_v13, %v13524_v55 }
 0x5ef   : >> { %11038 = vmatmul.mubr.msk.f32.vlgmr.msra.gmra.mrb[0].mxu0 %vm1022_vm2, %v13615_v27  ;;  %11855 = vmatprep.subr.bf16.mxu1 %v12644_v58 }
 0x5f0   : >> { %11875 = vmatpush3.bf16.msra.mxu0 %v11874_v28  ;;  %11048 = vmatprep.mubr.msk.f32.mxu0 %vm12645_vm1, %v12646_v63 }
 0x5f1   : >> { %11876 = vmatprep.subr.bf16.mxu0 %v12644_v58  ;;  %11005 = vmatmul.mubr.msk.f32.vlgmr.msra.gmra.mrb[0].mxu1 %vm1022_vm2, %v3323_v31 }
 0x5f2   : >> { %11857 = vmatpush3.bf16.msra.mxu1 %v11856_v32  ;;  %11015 = vmatprep.mubr.msk.f32.mxu1 %vm12645_vm1, %v12646_v63 }
 0x5f3   : >> { %11858 = vmatprep.subr.bf16.mxu1 %v12644_v58 }
 0x5f4   : >> { %11878 = vmatpush3.bf16.msra.mxu0 %v11877_v35 }
 0x5f5   : >> { %11879 = vmatprep.subr.bf16.mxu0 %v12644_v58 }
 0x5f6   : >> { %11860 = vmatpush3.bf16.msra.mxu1 %v11859_v38 }
 0x5f7   : >> { %11049 = vmatmul.mubr.msk.f32.vlgmr.msra.gmra.mrb[0].mxu0 %vm1022_vm2, %v9960_v39  ;;  %11084 = vmatprep.subr.mxu1 %v12646_v63 }
 0x5f8   : >> { %11881 = vmatpush3.bf16.msra.mxu0 %v11880_v40  ;;  %11059 = vmatprep.mubr.msk.f32.mxu0 %vm12645_vm1, %v12646_v63 }
 0x5f9   : >> { %11882 = vmatprep.subr.bf16.mxu0 %v12644_v58  ;;  %11016 = vmatmul.mubr.msk.f32.vlgmr.msra.gmra.mrb[0].mxu1 %vm1022_vm2, %v3480_v43 }
 0x5fa   : >> { %11086 = vmatprep.mubr.msk.f32.mxu1 %vm12645_vm1, %v12646_v63 }
 0x5fc   : >> { %11884 = vmatpush3.bf16.msra.mxu0 %v11883_v44 }
 0x5fd   : >> { %11885 = vmatprep.subr.bf16.mxu0 %v12644_v58 }
 0x5ff   : >> { %11060 = vmatmul.mubr.msk.f32.vlgmr.msra.gmra.mrb[0].mxu0 %vm1022_vm2, %v9968_v47 }
 0x600   : >> { %11887 = vmatpush3.bf16.msra.mxu0 %v11886_v48  ;;  %11070 = vmatprep.mubr.msk.f32.mxu0 %vm12645_vm1, %v12646_v63 }
 0x601   : >> { %11888 = vmatprep.subr.bf16.mxu0 %v12644_v58 }
 0x604   : >> { %11890 = vmatpush3.bf16.msra.mxu0 %v11889_v52 }
 0x605   : >> { %11891 = vmatprep.subr.bf16.mxu0 %v12644_v58 }
 0x607   : >> { %11071 = vmatmul.mubr.msk.f32.vlgmr.msra.gmra.mrb[0].mxu0 %vm1022_vm2, %v9974_v54 }
 0x608   : >> { %11893 = vmatpush3.bf16.msra.mxu0 %v11892_v56  ;;  %11081 = vmatprep.mubr.msk.f32.mxu0 %vm12645_vm1, %v12646_v63 }
 0x609   : >> { %11894 = vmatprep.subr.bf16.mxu0 %v12644_v58 }
 0x60c   : >> { %11896 = vmatpush3.bf16.msra.mxu0 %v11895_v59 }
 0x60f   : >> { %11082 = vmatmul.mubr.msk.f32.vlgmr.msra.gmra.mrb[0].mxu0 %vm1022_vm2, %v9980_v60 }
 0x6cc   : >> { %v3555_v61 = vpop.f32.mrb[0].mxu1 }
 0x6cd   : >> { %v11017_v62 = vpop.f32.mrb[1].mxu1 }
 0x6e2   : >> { %v4041_v1 = vpop.f32.mrb[0].mxu0 }
 0x6e3   : >> { %v12189_v3 = vadd.f32 %v4041_v1, %v3555_v61  ;;  %v11083_v4 = vpop.f32.mrb[1].mxu0 }
 0x6e5   : >> { %11085 = vmatpush3.msk.msra.mxu1 %vm4056_vm3, %v12189_v3 }
 0x6e6   : >> { %11087 = vmatmul.mubr.msk.f32.vlgmr.msra.gmra.mrb[2].mxu1 %vm4052_vm4, %v12991_v14  ;;  %11089 = vmatprep.subr.mxu1 %v12646_v63 }
 0x6e7   : >> { %11090 = vmatpush3.msk.msra.mxu1 %vm4056_vm3, %v13615_v27  ;;  %11091 = vmatprep.mubr.msk.f32.mxu1 %vm12645_vm1, %v12646_v63 }
 0x6e8   : >> { %11897 = vmatprep.subr.bf16.mxu1 %v12644_v58 }
 0x6ea   : >> { %11092 = vmatmul.mubr.msk.f32.vlgmr.msra.gmra.mrb[4].mxu1 %vm4052_vm4, %v12991_v14 }
 0x6eb   : >> { %11899 = vmatpush3.bf16.msra.mxu1 %v11898_v7  ;;  %11102 = vmatprep.mubr.msk.f32.mxu1 %vm12645_vm1, %v12646_v63 }
 0x6ec   : >> { %11900 = vmatprep.subr.bf16.mxu1 %v12644_v58  ;;  %v13741_v58 = vld [vmem:[%s14915_s14] ss:$0 sm:$0xff] (%p3316_p0) }
 0x6ef   : >> { %11902 = vmatpush3.bf16.msra.mxu1 %v11901_v10 }
 0x7bd   : >> { %v4198_v11 = vpop.f32.mrb[4].mxu1 }
 0x7be   : >> { %11103 = vmatmul.mubr.msk.f32.vlgmr.msra.gmra.mrb[2].mxu1 %vm1022_vm2, %v4198_v11  ;;  %v11093_v12 = vpop.f32.mrb[5].mxu1 }
 0x890   : > { %3318 = sbr.rel (!%p3316_p0) target bundleno = 1501 (0x5dd), region = 361 }
 0x891   : >> { %v4282_v16 = vpop.f32.mrb[2].mxu1 }
 0x892   : >> { %v12191_v17 = vadd.f32 %v12190_v15, %v4282_v16  ;;  %v11104_v18 = vpop.f32.mrb[3].mxu1 }
 0x894   : >> { %v4287_v19 = vmax.f32 %v12191_v17, 0.0 }
 0x896   : >> { %4291 = vst.msk [vmem:[%s4289_s1] sm:$0x7] %vm4290_vm5, %v4287_v19 }
 0x897 LB: >> { %v12647_v63 = vmov 0   ;;  %s9994_s28 = sshll.u32 %s12628_s29, 5  ;;  %v10003_v3 = vld [vmem:[%s14914_s13 + $0x1] ss:$0 sm:$0xff]  ;;  %v9998_v4 = vld [vmem:[%s14914_s13] ss:$0 sm:$0xff]  ;;  %s12628_s29 = sphi %s13743_s29, %s4298_s29  }
 0x898   : >> { %12513 = vset.pattern.permute.xlu1 %v12647_v63  ;;  %12512 = vset.pattern.permute.xlu0 %v12647_v63  ;;  %s13749_s5 = scalar_lea.vmem [#allocation2], %s9994_s28  ;;  %v10008_v5 = vld [vmem:[%s14914_s13 + $0x2] ss:$0 sm:$0xff]  ;;  %v10014_v10 = vld [vmem:[%s14914_s13 + $0x3] ss:$0 sm:$0xff]  ;;  %s4607_s25 = smul.u32 24, %s12628_s29 }
 0x899   : >> { %v9997_v55 = vld [vmem:[%s13749_s5 + $0x31] sm:$0x1f]  ;;  %v9995_v20 = vld [vmem:[%s13749_s5 + $0x21] sm:$0xff]  ;;  %v9996_v23 = vld [vmem:[%s13749_s5 + $0x29] sm:$0xff]  ;;  %vm4611_vm6 = vcmask 126976   ;;  %s4298_s29 = sadd.s32 1, %s12628_s29  }
 0x89a   : >> { %4318 = vperm.xlu1 %12513, %v9997_v55   ;;  %4308 = vperm.xlu0 %12512, %v9995_v20   ;;  %v9999_v22 = vld [vmem:[%s13749_s5 + $0x22] sm:$0xff]  ;;  %v10001_v24 = vld [vmem:[%s13749_s5 + $0x32] sm:$0x1f]  ;;  %v10000_v25 = vld [vmem:[%s13749_s5 + $0x2a] sm:$0xff]  ;;  %s4608_s0 = scalar_lea.vmem [#allocation7], %s4607_s25  ;;  %p4295_p1 = scmp.ge.s32.totalorder %s4298_s29, 21  }
 0x89b   : >> { %v10005_v26 = vld [vmem:[%s13749_s5 + $0x2b] sm:$0xff]  ;;  %v10004_v27 = vld [vmem:[%s13749_s5 + $0x23] sm:$0xff]  ;;  %v10006_v29 = vld [vmem:[%s13749_s5 + $0x33] sm:$0x1f]  ;;  %s13819_s1 = smov (%p4295_p1), 0  }
 0x89c   : >> { %v10010_v28 = vld [vmem:[%s13749_s5 + $0x41] sm:$0xff]  ;;  %v10012_v30 = vld [vmem:[%s13749_s5 + $0x51] sm:$0x1f]  ;;  %v10011_v31 = vld [vmem:[%s13749_s5 + $0x49] sm:$0xff] }
 0x89d   : >> { %v10016_v32 = vld [vmem:[%s13749_s5 + $0x4a] sm:$0xff]  ;;  %v10015_v33 = vld [vmem:[%s13749_s5 + $0x42] sm:$0xff]  ;;  %v10017_v35 = vld [vmem:[%s13749_s5 + $0x52] sm:$0x1f] }
 0x89e   : >> { %4340 = vperm.xlu1 %12513, %v9999_v22   ;;  %4313 = vperm.xlu0 %12512, %v9996_v23   ;;  %v10020_v34 = vld [vmem:[%s13749_s5 + $0x43] sm:$0xff]  ;;  %v10022_v36 = vld [vmem:[%s13749_s5 + $0x53] sm:$0x1f]  ;;  %v10021_v37 = vld [vmem:[%s13749_s5 + $0x4b] sm:$0xff] }
 0x89f   : >> { %v10027_v38 = vld [vmem:[%s13749_s5 + $0x69] sm:$0xff]  ;;  %v10026_v39 = vld [vmem:[%s13749_s5 + $0x61] sm:$0xff]  ;;  %v10028_v41 = vld [vmem:[%s13749_s5 + $0x71] sm:$0x1f] }
 0x8a0   : >> { %v10031_v40 = vld [vmem:[%s13749_s5 + $0x62] sm:$0xff]  ;;  %v10033_v42 = vld [vmem:[%s13749_s5 + $0x72] sm:$0x1f]  ;;  %v10032_v43 = vld [vmem:[%s13749_s5 + $0x6a] sm:$0xff] }
 0x8a1   : >> { %v10037_v44 = vld [vmem:[%s13749_s5 + $0x6b] sm:$0xff]  ;;  %v10036_v45 = vld [vmem:[%s13749_s5 + $0x63] sm:$0xff]  ;;  %v10038_v46 = vld [vmem:[%s13749_s5 + $0x73] sm:$0x1f] }
 0x8a2   : >> { %4350 = vperm.xlu1 %12513, %v10001_v24   ;;  %4345 = vperm.xlu0 %12512, %v10000_v25   ;;  %v10019_v16 = vld [vmem:[%s14914_s13 + $0x4] ss:$0 sm:$0xff]  ;;  %v10024_v23 = vld [vmem:[%s14914_s13 + $0x5] ss:$0 sm:$0xff] }
 0x8a6   : >> { %4377 = vperm.xlu1 %12513, %v10005_v26   ;;  %4372 = vperm.xlu0 %12512, %v10004_v27  }
 0x8aa   : >> { %4407 = vperm.xlu1 %12513, %v10010_v28   ;;  %4382 = vperm.xlu0 %12512, %v10006_v29  }
 0x8ae   : >> { %4417 = vperm.xlu1 %12513, %v10012_v30   ;;  %4412 = vperm.xlu0 %12512, %v10011_v31   ;;  %v10030_v30 = vld [vmem:[%s14914_s13 + $0x6] ss:$0 sm:$0xff] }
 0x8b2   : >> { %4444 = vperm.xlu1 %12513, %v10016_v32   ;;  %4439 = vperm.xlu0 %12512, %v10015_v33  }
 0x8b6   : >> { %4471 = vperm.xlu1 %12513, %v10020_v34   ;;  %4449 = vperm.xlu0 %12512, %v10017_v35  }
 0x8ba   : >> { %4481 = vperm.xlu1 %12513, %v10022_v36   ;;  %4476 = vperm.xlu0 %12512, %v10021_v37  }
 0x8be   : >> { %4511 = vperm.xlu1 %12513, %v10027_v38   ;;  %4506 = vperm.xlu0 %12512, %v10026_v39   ;;  %v10035_v39 = vld [vmem:[%s14914_s13 + $0x7] ss:$0 sm:$0xff] }
 0x8c2   : >> { %4538 = vperm.xlu1 %12513, %v10031_v40   ;;  %4516 = vperm.xlu0 %12512, %v10028_v41  }
 0x8c6   : >> { %4548 = vperm.xlu1 %12513, %v10033_v42   ;;  %4543 = vperm.xlu0 %12512, %v10032_v43  }
 0x8ca   : >> { %4575 = vperm.xlu1 %12513, %v10037_v44   ;;  %4570 = vperm.xlu0 %12512, %v10036_v45  }
 0x8ce   : >> { %4580 = vperm.xlu0 %12512, %v10038_v46  }
 0x919   : >> { %v4319_v47 = vpop.permute.xlu1 %4318  ;;  %v4309_v48 = vpop.permute.xlu0 %4308 }
 0x91a   : >> { %v4327_v11 = vmul.f32 %v9998_v4, %v4309_v48  ;;  %v4329_v24 = vmul.f32 %v9998_v4, %v4319_v47 }
 0x91d   : >> { %v4341_v50 = vpop.permute.xlu1 %4340  ;;  %v4314_v51 = vpop.permute.xlu0 %4313 }
 0x91e   : >> { %v4359_v6 = vmul.f32 %v10003_v3, %v4341_v50  ;;  %v4328_v13 = vmul.f32 %v9998_v4, %v4314_v51 }
 0x920   : >> { %v4362_v17 = vadd.f32 %v4359_v6, %v4327_v11 }
 0x921   : >> { %v4351_v52 = vpop.permute.xlu1 %4350  ;;  %v4346_v53 = vpop.permute.xlu0 %4345 }
 0x922   : >> { %v4360_v9 = vmul.f32 %v10003_v3, %v4346_v53  ;;  %v4361_v18 = vmul.f32 %v10003_v3, %v4351_v52 }
 0x924   : >> { %v4363_v20 = vadd.f32 %v4360_v9, %v4328_v13  ;;  %v4364_v31 = vadd.f32 %v4361_v18, %v4329_v24 }
 0x925   : >> { %v4378_v2 = vpop.permute.xlu1 %4377  ;;  %v4373_v54 = vpop.permute.xlu0 %4372 }
 0x926   : >> { %v4391_v12 = vmul.f32 %v10008_v5, %v4373_v54  ;;  %v4392_v15 = vmul.f32 %v10008_v5, %v4378_v2 }
 0x928   : >> { %v4394_v25 = vadd.f32 %v4391_v12, %v4362_v17  ;;  %v4395_v28 = vadd.f32 %v4392_v15, %v4363_v20 }
 0x929   : >> { %v4408_v56 = vpop.permute.xlu1 %4407  ;;  %v4383_v49 = vpop.permute.xlu0 %4382 }
 0x92a   : >> { %v4426_v19 = vmul.f32 %v10014_v10, %v4408_v56  ;;  %v4393_v26 = vmul.f32 %v10008_v5, %v4383_v49  ;;  %v10040_v49 = vld [vmem:[%s14914_s13 + $0x8] ss:$0 sm:$0xff] }
 0x92c   : >> { %v4429_v32 = vadd.f32 %v4426_v19, %v4394_v25  ;;  %v4396_v40 = vadd.f32 %v4393_v26, %v4364_v31 }
 0x92d   : >> { %v4418_v57 = vpop.permute.xlu1 %4417  ;;  %v4413_v59 = vpop.permute.xlu0 %4412 }
 0x92e   : >> { %v4427_v22 = vmul.f32 %v10014_v10, %v4413_v59  ;;  %v4428_v33 = vmul.f32 %v10014_v10, %v4418_v57 }
 0x930   : >> { %v4430_v37 = vadd.f32 %v4427_v22, %v4395_v28  ;;  %v4431_v46 = vadd.f32 %v4428_v33, %v4396_v40 }
 0x931   : >> { %v4445_v60 = vpop.permute.xlu1 %4444  ;;  %v4440_v61 = vpop.permute.xlu0 %4439 }
 0x932   : >> { %v4458_v27 = vmul.f32 %v10019_v16, %v4440_v61  ;;  %v4459_v29 = vmul.f32 %v10019_v16, %v4445_v60 }
 0x934   : >> { %v4461_v41 = vadd.f32 %v4458_v27, %v4429_v32  ;;  %v4462_v44 = vadd.f32 %v4459_v29, %v4430_v37 }
 0x935   : >> { %v4472_v62 = vpop.permute.xlu1 %4471  ;;  %v4450_v1 = vpop.permute.xlu0 %4449 }
 0x936   : >> { %v4490_v34 = vmul.f32 %v10024_v23, %v4472_v62  ;;  %v4460_v42 = vmul.f32 %v10019_v16, %v4450_v1 }
 0x938   : >> { %v4493_v47 = vadd.f32 %v4490_v34, %v4461_v41  ;;  %v4463_v54 = vadd.f32 %v4460_v42, %v4431_v46 }
 0x939   : >> { %v4482_v7 = vpop.permute.xlu1 %4481  ;;  %v4477_v8 = vpop.permute.xlu0 %4476 }
 0x93a   : >> { %v4491_v38 = vmul.f32 %v10024_v23, %v4477_v8  ;;  %v4492_v48 = vmul.f32 %v10024_v23, %v4482_v7 }
 0x93c   : >> { %v4494_v53 = vadd.f32 %v4491_v38, %v4462_v44  ;;  %v4495_v60 = vadd.f32 %v4492_v48, %v4463_v54 }
 0x93d   : >> { %v4512_v63 = vpop.permute.xlu1 %4511  ;;  %v4507_v55 = vpop.permute.xlu0 %4506 }
 0x93e   : >> { %v4525_v43 = vmul.f32 %v10030_v30, %v4507_v55  ;;  %v4526_v45 = vmul.f32 %v10030_v30, %v4512_v63  ;;  %v13817_v55 = vld [vmem:[%s14917_s16] ss:$0 sm:$0xff] (%p4295_p1) }
 0x940   : >> { %v4528_v56 = vadd.f32 %v4525_v43, %v4493_v47  ;;  %v4529_v57 = vadd.f32 %v4526_v45, %v4494_v53 }
 0x941   : >> { %v4539_v35 = vpop.permute.xlu1 %4538  ;;  %v4517_v36 = vpop.permute.xlu0 %4516 }
 0x942   : >> { %v4557_v50 = vmul.f32 %v10035_v39, %v4539_v35  ;;  %v4527_v59 = vmul.f32 %v10030_v30, %v4517_v36 }
 0x944   : >> { %v4560_v61 = vadd.f32 %v4557_v50, %v4528_v56  ;;  %v4530_v7 = vadd.f32 %v4527_v59, %v4495_v60 }
 0x945   : >> { %v4549_v51 = vpop.permute.xlu1 %4548  ;;  %v4544_v52 = vpop.permute.xlu0 %4543 }
 0x946   : >> { %v4558_v2 = vmul.f32 %v10035_v39, %v4544_v52  ;;  %v4559_v3 = vmul.f32 %v10035_v39, %v4549_v51 }
 0x948   : >> { %v4561_v4 = vadd.f32 %v4558_v2, %v4529_v57  ;;  %v4562_v11 = vadd.f32 %v4559_v3, %v4530_v7 }
 0x949   : >> { %v4576_v62 = vpop.permute.xlu1 %4575  ;;  %v4571_v1 = vpop.permute.xlu0 %4570 }
 0x94a   : >> { %v4590_v5 = vmul.f32 %v10040_v49, %v4576_v62  ;;  %v4589_v6 = vmul.f32 %v10040_v49, %v4571_v1 }
 0x94c   : >> { %v4593_v8 = vadd.f32 %v4590_v5, %v4561_v4  ;;  %v4592_v9 = vadd.f32 %v4589_v6, %v4560_v61 }
 0x94d   : >> { %v4581_v10 = vpop.permute.xlu0 %4580 }
 0x94e   : >> { %v4602_v12 = vadd.f32 %v13741_v58, %v4593_v8  ;;  %v4601_v13 = vadd.f32 %v13741_v58, %v4592_v9  ;;  %v4591_v15 = vmul.f32 %v10040_v49, %v4581_v10 }
 0x950   : >> { %v4605_v16 = vmax.f32 %v4602_v12, 0.0  ;;  %v4604_v17 = vmax.f32 %v4601_v13, 0.0  ;;  %v4594_v18 = vadd.f32 %v4591_v15, %v4562_v11  ;;  %4297 = sbr.rel (!%p4295_p1) target bundleno = 2199 (0x897), region = 372 }
 0x952   : >> { %4610 = vst.msk [vmem:[%s4608_s0 + $0x8] sm:$0xff] %vm964_vm0, %v4605_v16  ;;  %4609 = vst.msk [vmem:[%s4608_s0] sm:$0xff] %vm964_vm0, %v4604_v17  ;;  %v4603_v19 = vadd.f32 %v13741_v58, %v4594_v18 }
 0x954   : >> { %v4606_v63 = vmax.f32 %v4603_v19, 0.0 }
 0x956   : >> { %4612 = vst.msk [vmem:[%s4608_s0 + $0x10] sm:$0x1f] %vm4611_vm6, %v4606_v63 }
 0x957 LB: >> { %v10044_v20 = vld [vmem:[%s14916_s15 + $0x10] sm:$0xff]  ;;  %v10045_v58 = vld [vmem:[%s14916_s15 + $0x18] sm:$0xff]  ;;  %v10130_v22 = vld [vmem:[%s14916_s15 + $0xc0] sm:$0xff]  ;;  %v12648_v23 = vmov 0.0|0.0   ;;  %vm12649_vm7 = vmmov 0   ;;  %v12650_v29 = vmov 0.0   ;;  %s12632_s1 = sphi %s13819_s1, %s4619_s1  }
 0x958   : >> { %11903 = vmatprep.subr.bf16.mxu1 %v12648_v23  ;;  %11939 = vmatprep.subr.bf16.mxu0 %v12648_v23  ;;  %v11904_v24 = vpack.c.bf16 %v10045_v58, %v10044_v20  ;;  %v10131_v25 = vld [vmem:[%s14916_s15 + $0xc8] sm:$0xff]  ;;  %v10138_v26 = vld [vmem:[%s14916_s15 + $0xd0] sm:$0xff]  ;;  %v10139_v27 = vld [vmem:[%s14916_s15 + $0xd8] sm:$0xff]  ;;  %s10043_s29 = smul.u32 48, %s12632_s1  ;;  %vm7084_vm8 = vcmask 138240   ;;  %vm7091_vm9 = vcmask 1040384  }
 0x959   : >> { %v11940_v28 = vpack.c.bf16 %v10131_v25, %v10130_v22  ;;  %11109 = vmatprep.mubr.msk.f32.mxu1 %vm12649_vm7, %v12650_v29  ;;  %11265 = vmatprep.mubr.msk.f32.mxu0 %vm12649_vm7, %v12650_v29  ;;  %v4626_v30 = vld [vmem:[%s14916_s15] sm:$0xff]  ;;  %v4627_v31 = vld [vmem:[%s14916_s15 + $0x8] sm:$0xff]  ;;  %v11943_v32 = vpack.c.bf16 %v10139_v27, %v10138_v26  ;;  %v10156_v53 = vld [vmem:[%s14916_s15 + $0xf0] sm:$0xff]  ;;  %vm7175_vm10 = vcmask 253952  }
 0x95a   : >> { %11905 = vmatpush3.bf16.msra.mxu1 %v11904_v24  ;;  %s13856_s6 = scalar_lea.vmem [#allocation7], %s10043_s29  ;;  %v11907_v35 = vpack.c.bf16 %v4627_v31, %v4626_v30  ;;  %v10146_v40 = vld [vmem:[%s14916_s15 + $0xe0] sm:$0xff]  ;;  %v10147_v41 = vld [vmem:[%s14916_s15 + $0xe8] sm:$0xff]  ;;  %v10157_v2 = vld [vmem:[%s14916_s15 + $0xf8] sm:$0xff] }
 0x95b   : >> { %11941 = vmatpush3.bf16.msra.mxu0 %v11940_v28  ;;  %11906 = vmatprep.subr.bf16.mxu1 %v12648_v23  ;;  %v10052_v42 = vld [vmem:[%s14916_s15 + $0x20] sm:$0xff]  ;;  %v10053_v43 = vld [vmem:[%s14916_s15 + $0x28] sm:$0xff]  ;;  %v11946_v46 = vpack.c.bf16 %v10147_v41, %v10146_v40  ;;  %v10057_v54 = vld [vmem:[%s14916_s15 + $0x30] sm:$0xff]  ;;  %v11949_v59 = vpack.c.bf16 %v10157_v2, %v10156_v53 }
 0x95c   : >> { %11942 = vmatprep.subr.bf16.mxu0 %v12648_v23  ;;  %v11910_v47 = vpack.c.bf16 %v10053_v43, %v10052_v42  ;;  %v10058_v56 = vld [vmem:[%s14916_s15 + $0x38] sm:$0xff]  ;;  %v10164_v4 = vld [vmem:[%s14916_s15 + $0x100] sm:$0xff]  ;;  %v10165_v5 = vld [vmem:[%s14916_s15 + $0x108] sm:$0xff] }
 0x95d   : >> { %v4628_v33 = vld [vmem:[%s13856_s6 + $0x1] sm:$0xff]  ;;  %v10127_v34 = vld [vmem:[%s13856_s6 + $0x32] sm:$0xff]  ;;  %v4629_v36 = vld [vmem:[%s13856_s6 + $0x9] sm:$0xff]  ;;  %v11913_v60 = vpack.c.bf16 %v10058_v56, %v10057_v54  ;;  %v11952_v10 = vpack.c.bf16 %v10165_v5, %v10164_v4 }
 0x95e   : >> { %11110 = vmatmul.mubr.msk.f32.vlgmr.msra.gmra.mrb[0].mxu1 %vm964_vm0, %v4628_v33  ;;  %11266 = vmatmul.mubr.msk.f32.vlgmr.msra.gmra.mrb[0].mxu0 %vm964_vm0, %v10127_v34  ;;  %v10128_v37 = vld [vmem:[%s13856_s6 + $0x3a] sm:$0xff]  ;;  %v4630_v38 = vld [vmem:[%s13856_s6 + $0x11] sm:$0x1]  ;;  %v10129_v39 = vld [vmem:[%s13856_s6 + $0x42] sm:$0x1] }
 0x95f   : >> { %11112 = vmatprep.mubr.msk.f32.mxu1 %vm12649_vm7, %v12650_v29  ;;  %11268 = vmatprep.mubr.msk.f32.mxu0 %vm12649_vm7, %v12650_v29  ;;  %v4623_v44 = vld [vmem:[%s13856_s6] sm:$0xff]  ;;  %v10135_v45 = vld [vmem:[%s13856_s6 + $0x33] sm:$0xff]  ;;  %v4624_v48 = vld [vmem:[%s13856_s6 + $0x8] sm:$0xff] }
 0x960   : >> { %11944 = vmatpush3.bf16.msra.mxu0 %v11943_v32  ;;  %11908 = vmatpush3.bf16.msra.mxu1 %v11907_v35  ;;  %v10136_v50 = vld [vmem:[%s13856_s6 + $0x3b] sm:$0xff]  ;;  %v4625_v51 = vld [vmem:[%s13856_s6 + $0x10] sm:$0x1]  ;;  %v10137_v52 = vld [vmem:[%s13856_s6 + $0x43] sm:$0x1] }
 0x961   : >> { %11945 = vmatprep.subr.bf16.mxu0 %v12648_v23  ;;  %11909 = vmatprep.subr.bf16.mxu1 %v12648_v23  ;;  %v4812_v49 = vld [vmem:[%s13856_s6 + $0x2] sm:$0xff]  ;;  %v10143_v57 = vld [vmem:[%s13856_s6 + $0x34] sm:$0xff]  ;;  %v4813_v61 = vld [vmem:[%s13856_s6 + $0xa] sm:$0xff] }
 0x962   : >> { %11113 = vmatmul.mubr.msk.f32.gmra.mrb[2].mxu1 %vm964_vm0, %v4629_v36  ;;  %11269 = vmatmul.mubr.msk.f32.gmra.mrb[2].mxu0 %vm964_vm0, %v10128_v37  ;;  %v10144_v62 = vld [vmem:[%s13856_s6 + $0x3c] sm:$0xff]  ;;  %v4814_v1 = vld [vmem:[%s13856_s6 + $0x12] sm:$0x1]  ;;  %v10145_v3 = vld [vmem:[%s13856_s6 + $0x44] sm:$0x1] }
 0x963   : >> { %11115 = vmatprep.mubr.msk.f32.mxu1 %vm12649_vm7, %v12650_v29  ;;  %11271 = vmatprep.mubr.msk.f32.mxu0 %vm12649_vm7, %v12650_v29  ;;  %v10062_v6 = vld [vmem:[%s14916_s15 + $0x40] sm:$0xff]  ;;  %v10063_v7 = vld [vmem:[%s14916_s15 + $0x48] sm:$0xff]  ;;  %v10154_v13 = vld [vmem:[%s13856_s6 + $0x50] sm:$0xff] }
 0x964   : >> { %v4910_v8 = vld [vmem:[%s13856_s6 + $0x3] sm:$0xff]  ;;  %v11916_v11 = vpack.c.bf16 %v10063_v7, %v10062_v6  ;;  %v4911_v12 = vld [vmem:[%s13856_s6 + $0xb] sm:$0xff]  ;;  %v4912_v15 = vld [vmem:[%s13856_s6 + $0x13] sm:$0x1] }
 0x965   : >> { %v10153_v9 = vld [vmem:[%s13856_s6 + $0x48] sm:$0xff]  ;;  %v10155_v16 = vld [vmem:[%s13856_s6 + $0x58] sm:$0x1]  ;;  %v10172_v17 = vld [vmem:[%s14916_s15 + $0x110] sm:$0xff] }
 0x966   : >> { %11116 = vmatmul.mubr.msk.f32.gmra.mrb[4].mxu1 %vm964_vm0, %v4630_v38  ;;  %11272 = vmatmul.mubr.msk.f32.gmra.mrb[4].mxu0 %vm964_vm0, %v10129_v39  ;;  %v10173_v18 = vld [vmem:[%s14916_s15 + $0x118] sm:$0xff]  ;;  %v10072_v19 = vld [vmem:[%s14916_s15 + $0x50] sm:$0xff]  ;;  %v5008_v20 = vld [vmem:[%s13856_s6 + $0x4] sm:$0xff] }
 0x967   : >> { %11122 = vmatprep.mubr.msk.f32.mxu1 %vm12649_vm7, %v12650_v29  ;;  %11278 = vmatprep.mubr.msk.f32.mxu0 %vm12649_vm7, %v12650_v29  ;;  %v10073_v63 = vld [vmem:[%s14916_s15 + $0x58] sm:$0xff]  ;;  %v10161_v58 = vld [vmem:[%s13856_s6 + $0x49] sm:$0xff]  ;;  %v11955_v22 = vpack.c.bf16 %v10173_v18, %v10172_v17  ;;  %v5010_v27 = vld [vmem:[%s13856_s6 + $0x14] sm:$0x1] }
 0x968   : >> { %v11919_v24 = vpack.c.bf16 %v10073_v63, %v10072_v19  ;;  %v5009_v25 = vld [vmem:[%s13856_s6 + $0xc] sm:$0xff]  ;;  %v10163_v28 = vld [vmem:[%s13856_s6 + $0x59] sm:$0x1]  ;;  %v10180_v30 = vld [vmem:[%s14916_s15 + $0x120] sm:$0xff] }
 0x969   : >> { %v10162_v26 = vld [vmem:[%s13856_s6 + $0x51] sm:$0xff]  ;;  %v10181_v31 = vld [vmem:[%s14916_s15 + $0x128] sm:$0xff]  ;;  %v10080_v32 = vld [vmem:[%s14916_s15 + $0x60] sm:$0xff] }
 0x96a   : >> { %11123 = vmatmul.mubr.msk.f32.vlgmr.msra.gmra.mrb[0].mxu1 %vm964_vm0, %v4623_v44  ;;  %11279 = vmatmul.mubr.msk.f32.vlgmr.msra.gmra.mrb[0].mxu0 %vm964_vm0, %v10135_v45  ;;  %v10081_v33 = vld [vmem:[%s14916_s15 + $0x68] sm:$0xff]  ;;  %v10069_v34 = vld [vmem:[%s13856_s6 + $0x18] sm:$0xff]  ;;  %v11958_v36 = vpack.c.bf16 %v10181_v31, %v10180_v30  ;;  %v10070_v38 = vld [vmem:[%s13856_s6 + $0x20] sm:$0xff] }
 0x96b   : >> { %11125 = vmatprep.mubr.msk.f32.mxu1 %vm12649_vm7, %v12650_v29  ;;  %11281 = vmatprep.mubr.msk.f32.mxu0 %vm12649_vm7, %v12650_v29  ;;  %v10169_v35 = vld [vmem:[%s13856_s6 + $0x4a] sm:$0xff]  ;;  %v11922_v37 = vpack.c.bf16 %v10081_v33, %v10080_v32  ;;  %v10170_v39 = vld [vmem:[%s13856_s6 + $0x52] sm:$0xff]  ;;  %v10071_v40 = vld [vmem:[%s13856_s6 + $0x28] sm:$0x1] }
 0x96c   : >> { %11947 = vmatpush3.bf16.msra.mxu0 %v11946_v46  ;;  %11911 = vmatpush3.bf16.msra.mxu1 %v11910_v47  ;;  %v10171_v41 = vld [vmem:[%s13856_s6 + $0x5a] sm:$0x1]  ;;  %v10188_v42 = vld [vmem:[%s14916_s15 + $0x130] sm:$0xff]  ;;  %v10079_v53 = vld [vmem:[%s13856_s6 + $0x29] sm:$0x1] }
 0x96d   : >> { %11948 = vmatprep.subr.bf16.mxu0 %v12648_v23  ;;  %11912 = vmatprep.subr.bf16.mxu1 %v12648_v23  ;;  %v10189_v43 = vld [vmem:[%s14916_s15 + $0x138] sm:$0xff]  ;;  %v10088_v44 = vld [vmem:[%s14916_s15 + $0x70] sm:$0xff]  ;;  %v10198_v54 = vld [vmem:[%s14916_s15 + $0x140] sm:$0xff] }
 0x96e   : >> { %11126 = vmatmul.mubr.msk.f32.gmra.mrb[2].mxu1 %vm964_vm0, %v4624_v48  ;;  %11282 = vmatmul.mubr.msk.f32.gmra.mrb[2].mxu0 %vm964_vm0, %v10136_v50  ;;  %v10089_v45 = vld [vmem:[%s14916_s15 + $0x78] sm:$0xff]  ;;  %v10177_v47 = vld [vmem:[%s13856_s6 + $0x4b] sm:$0xff]  ;;  %v11961_v48 = vpack.c.bf16 %v10189_v43, %v10188_v42  ;;  %v10087_v4 = vld [vmem:[%s13856_s6 + $0x2a] sm:$0x1] }
 0x96f   : >> { %11128 = vmatprep.mubr.msk.f32.mxu1 %vm12649_vm7, %v12650_v29  ;;  %11284 = vmatprep.mubr.msk.f32.mxu0 %vm12649_vm7, %v12650_v29  ;;  %v10077_v46 = vld [vmem:[%s13856_s6 + $0x19] sm:$0xff]  ;;  %v11925_v50 = vpack.c.bf16 %v10089_v45, %v10088_v44  ;;  %v10199_v56 = vld [vmem:[%s14916_s15 + $0x148] sm:$0xff]  ;;  %v10206_v6 = vld [vmem:[%s14916_s15 + $0x150] sm:$0xff] }
 0x970   : >> { %v10179_v2 = vld [vmem:[%s13856_s6 + $0x5b] sm:$0x1]  ;;  %v10187_v5 = vld [vmem:[%s13856_s6 + $0x5c] sm:$0x1]  ;;  %v10095_v17 = vld [vmem:[%s13856_s6 + $0x2b] sm:$0x1] }
 0x971   : >> { %v10207_v7 = vld [vmem:[%s14916_s15 + $0x158] sm:$0xff]  ;;  %v10197_v18 = vld [vmem:[%s13856_s6 + $0x70] sm:$0x1]  ;;  %v10214_v19 = vld [vmem:[%s14916_s15 + $0x160] sm:$0xff] }
 0x972   : >> { %11129 = vmatmul.mubr.msk.f32.gmra.mrb[4].mxu1 %vm964_vm0, %v4625_v51  ;;  %11285 = vmatmul.mubr.msk.f32.gmra.mrb[4].mxu0 %vm964_vm0, %v10137_v52  ;;  %v10078_v51 = vld [vmem:[%s13856_s6 + $0x21] sm:$0xff]  ;;  %v10178_v52 = vld [vmem:[%s13856_s6 + $0x53] sm:$0xff]  ;;  %v10103_v30 = vld [vmem:[%s13856_s6 + $0x2c] sm:$0x1] }
 0x973   : >> { %11135 = vmatprep.mubr.msk.f32.mxu1 %vm12649_vm7, %v12650_v29  ;;  %11291 = vmatprep.mubr.msk.f32.mxu0 %vm12649_vm7, %v12650_v29  ;;  %v10215_v63 = vld [vmem:[%s14916_s15 + $0x168] sm:$0xff]  ;;  %v10205_v31 = vld [vmem:[%s13856_s6 + $0x71] sm:$0x1]  ;;  %v10223_v33 = vld [vmem:[%s14916_s15 + $0x178] sm:$0xff] }
 0x974   : >> { %v10222_v32 = vld [vmem:[%s14916_s15 + $0x170] sm:$0xff]  ;;  %v10113_v42 = vld [vmem:[%s13856_s6 + $0x40] sm:$0x1] }
 0x975   : >> { %v10213_v43 = vld [vmem:[%s13856_s6 + $0x72] sm:$0x1]  ;;  %v10230_v44 = vld [vmem:[%s14916_s15 + $0x180] sm:$0xff] }
 0x976   : >> { %11136 = vmatmul.mubr.msk.f32.vlgmr.msra.gmra.mrb[0].mxu1 %vm964_vm0, %v4812_v49  ;;  %11292 = vmatmul.mubr.msk.f32.vlgmr.msra.gmra.mrb[0].mxu0 %vm964_vm0, %v10143_v57  ;;  %v10096_v49 = vld [vmem:[%s14916_s15 + $0x80] sm:$0xff]  ;;  %v10097_v57 = vld [vmem:[%s14916_s15 + $0x88] sm:$0xff]  ;;  %v10119_v45 = vld [vmem:[%s13856_s6 + $0x31] sm:$0xff] }
 0x977   : >> { %11138 = vmatprep.mubr.msk.f32.mxu1 %vm12649_vm7, %v12650_v29  ;;  %11294 = vmatprep.mubr.msk.f32.mxu0 %vm12649_vm7, %v12650_v29 }
 0x978   : >> { %11950 = vmatpush3.bf16.msra.mxu0 %v11949_v59  ;;  %11914 = vmatpush3.bf16.msra.mxu1 %v11913_v60  ;;  %v10085_v59 = vld [vmem:[%s13856_s6 + $0x1a] sm:$0xff]  ;;  %v10185_v60 = vld [vmem:[%s13856_s6 + $0x4c] sm:$0xff] }
 0x979   : >> { %11951 = vmatprep.subr.bf16.mxu0 %v12648_v23  ;;  %11915 = vmatprep.subr.bf16.mxu1 %v12648_v23 }
 0x97a   : >> { %11139 = vmatmul.mubr.msk.f32.gmra.mrb[2].mxu1 %vm964_vm0, %v4813_v61  ;;  %11295 = vmatmul.mubr.msk.f32.gmra.mrb[2].mxu0 %vm964_vm0, %v10144_v62  ;;  %v11964_v61 = vpack.c.bf16 %v10199_v56, %v10198_v54  ;;  %v11928_v62 = vpack.c.bf16 %v10097_v57, %v10096_v49  ;;  %v10229_v54 = vld [vmem:[%s13856_s6 + $0x74] sm:$0x1] }
 0x97b   : >> { %11141 = vmatprep.mubr.msk.f32.mxu1 %vm12649_vm7, %v12650_v29  ;;  %11297 = vmatprep.mubr.msk.f32.mxu0 %vm12649_vm7, %v12650_v29 }
 0x97e   : >> { %11142 = vmatmul.mubr.msk.f32.gmra.mrb[4].mxu1 %vm964_vm0, %v4814_v1  ;;  %11298 = vmatmul.mubr.msk.f32.gmra.mrb[4].mxu0 %vm964_vm0, %v10145_v3  ;;  %v10086_v1 = vld [vmem:[%s13856_s6 + $0x22] sm:$0xff]  ;;  %v10186_v3 = vld [vmem:[%s13856_s6 + $0x54] sm:$0xff] }
 0x97f   : >> { %11148 = vmatprep.mubr.msk.f32.mxu1 %vm12649_vm7, %v12650_v29  ;;  %11304 = vmatprep.mubr.msk.f32.mxu0 %vm12649_vm7, %v12650_v29 }
 0x982   : >> { %11149 = vmatmul.mubr.msk.f32.vlgmr.msra.gmra.mrb[0].mxu1 %vm964_vm0, %v4910_v8  ;;  %11305 = vmatmul.mubr.msk.f32.vlgmr.msra.gmra.mrb[0].mxu0 %vm964_vm0, %v10153_v9  ;;  %v10104_v8 = vld [vmem:[%s14916_s15 + $0x90] sm:$0xff]  ;;  %v10105_v9 = vld [vmem:[%s14916_s15 + $0x98] sm:$0xff] }
 0x983   : >> { %11151 = vmatprep.mubr.msk.f32.mxu1 %vm12649_vm7, %v12650_v29  ;;  %11307 = vmatprep.mubr.msk.f32.mxu0 %vm12649_vm7, %v12650_v29 }
 0x984   : >> { %11953 = vmatpush3.bf16.msra.mxu0 %v11952_v10  ;;  %11917 = vmatpush3.bf16.msra.mxu1 %v11916_v11  ;;  %v10093_v10 = vld [vmem:[%s13856_s6 + $0x1b] sm:$0xff] }
 0x985   : >> { %11954 = vmatprep.subr.bf16.mxu0 %v12648_v23  ;;  %11918 = vmatprep.subr.bf16.mxu1 %v12648_v23  ;;  %v10195_v11 = vld [vmem:[%s13856_s6 + $0x60] sm:$0xff] }
 0x986   : >> { %11152 = vmatmul.mubr.msk.f32.gmra.mrb[2].mxu1 %vm964_vm0, %v4911_v12  ;;  %11308 = vmatmul.mubr.msk.f32.gmra.mrb[2].mxu0 %vm964_vm0, %v10154_v13  ;;  %v11967_v12 = vpack.c.bf16 %v10207_v7, %v10206_v6  ;;  %v11931_v13 = vpack.c.bf16 %v10105_v9, %v10104_v8 }
 0x987   : >> { %11154 = vmatprep.mubr.msk.f32.mxu1 %vm12649_vm7, %v12650_v29  ;;  %11310 = vmatprep.mubr.msk.f32.mxu0 %vm12649_vm7, %v12650_v29 }
 0x98a   : >> { %11155 = vmatmul.mubr.msk.f32.gmra.mrb[4].mxu1 %vm964_vm0, %v4912_v15  ;;  %11311 = vmatmul.mubr.msk.f32.gmra.mrb[4].mxu0 %vm964_vm0, %v10155_v16  ;;  %v10094_v15 = vld [vmem:[%s13856_s6 + $0x23] sm:$0xff] }
 0x98b   : >> { %11161 = vmatprep.mubr.msk.f32.mxu1 %vm12649_vm7, %v12650_v29  ;;  %11317 = vmatprep.mubr.msk.f32.mxu0 %vm12649_vm7, %v12650_v29  ;;  %v10196_v16 = vld [vmem:[%s13856_s6 + $0x68] sm:$0xff] }
 0x98e   : >> { %11162 = vmatmul.mubr.msk.f32.vlgmr.msra.gmra.mrb[0].mxu1 %vm964_vm0, %v5008_v20  ;;  %11318 = vmatmul.mubr.msk.f32.vlgmr.msra.gmra.mrb[0].mxu0 %vm964_vm0, %v10161_v58  ;;  %v10114_v20 = vld [vmem:[%s14916_s15 + $0xa0] sm:$0xff]  ;;  %v10115_v58 = vld [vmem:[%s14916_s15 + $0xa8] sm:$0xff] }
 0x98f   : >> { %11164 = vmatprep.mubr.msk.f32.mxu1 %vm12649_vm7, %v12650_v29  ;;  %11320 = vmatprep.mubr.msk.f32.mxu0 %vm12649_vm7, %v12650_v29 }
 0x990   : >> { %11956 = vmatpush3.bf16.msra.mxu0 %v11955_v22  ;;  %11920 = vmatpush3.bf16.msra.mxu1 %v11919_v24  ;;  %v10101_v22 = vld [vmem:[%s13856_s6 + $0x1c] sm:$0xff] }
 0x991   : >> { %11957 = vmatprep.subr.bf16.mxu0 %v12648_v23  ;;  %11921 = vmatprep.subr.bf16.mxu1 %v12648_v23  ;;  %v10203_v24 = vld [vmem:[%s13856_s6 + $0x61] sm:$0xff] }
 0x992   : >> { %11165 = vmatmul.mubr.msk.f32.gmra.mrb[2].mxu1 %vm964_vm0, %v5009_v25  ;;  %11321 = vmatmul.mubr.msk.f32.gmra.mrb[2].mxu0 %vm964_vm0, %v10162_v26  ;;  %v11970_v25 = vpack.c.bf16 %v10215_v63, %v10214_v19  ;;  %v11934_v26 = vpack.c.bf16 %v10115_v58, %v10114_v20 }
 0x993   : >> { %11167 = vmatprep.mubr.msk.f32.mxu1 %vm12649_vm7, %v12650_v29  ;;  %11323 = vmatprep.mubr.msk.f32.mxu0 %vm12649_vm7, %v12650_v29 }
 0x996   : >> { %11168 = vmatmul.mubr.msk.f32.gmra.mrb[4].mxu1 %vm964_vm0, %v5010_v27  ;;  %11324 = vmatmul.mubr.msk.f32.gmra.mrb[4].mxu0 %vm964_vm0, %v10163_v28  ;;  %v10102_v27 = vld [vmem:[%s13856_s6 + $0x24] sm:$0xff] }
 0x997   : >> { %11174 = vmatprep.mubr.msk.f32.mxu1 %vm12649_vm7, %v12650_v29  ;;  %11330 = vmatprep.mubr.msk.f32.mxu0 %vm12649_vm7, %v12650_v29  ;;  %v10204_v28 = vld [vmem:[%s13856_s6 + $0x69] sm:$0xff] }
 0x99a   : >> { %11175 = vmatmul.mubr.msk.f32.vlgmr.msra.gmra.mrb[0].mxu1 %vm964_vm0, %v10069_v34  ;;  %11331 = vmatmul.mubr.msk.f32.vlgmr.msra.gmra.mrb[0].mxu0 %vm964_vm0, %v10169_v35  ;;  %v10122_v34 = vld [vmem:[%s14916_s15 + $0xb0] sm:$0xff]  ;;  %v10123_v35 = vld [vmem:[%s14916_s15 + $0xb8] sm:$0xff] }
 0x99b   : >> { %11177 = vmatprep.mubr.msk.f32.mxu1 %vm12649_vm7, %v12650_v29  ;;  %11333 = vmatprep.mubr.msk.f32.mxu0 %vm12649_vm7, %v12650_v29 }
 0x99c   : >> { %11959 = vmatpush3.bf16.msra.mxu0 %v11958_v36  ;;  %11923 = vmatpush3.bf16.msra.mxu1 %v11922_v37  ;;  %v10111_v36 = vld [vmem:[%s13856_s6 + $0x30] sm:$0xff]  ;;  %v10211_v37 = vld [vmem:[%s13856_s6 + $0x62] sm:$0xff] }
 0x99d   : >> { %11960 = vmatprep.subr.bf16.mxu0 %v12648_v23  ;;  %11924 = vmatprep.subr.bf16.mxu1 %v12648_v23 }
 0x99e   : >> { %11178 = vmatmul.mubr.msk.f32.gmra.mrb[2].mxu1 %vm964_vm0, %v10070_v38  ;;  %11334 = vmatmul.mubr.msk.f32.gmra.mrb[2].mxu0 %vm964_vm0, %v10170_v39  ;;  %v11973_v38 = vpack.c.bf16 %v10223_v33, %v10222_v32  ;;  %v11937_v39 = vpack.c.bf16 %v10123_v35, %v10122_v34 }
 0x99f   : >> { %11180 = vmatprep.mubr.msk.f32.mxu1 %vm12649_vm7, %v12650_v29  ;;  %11336 = vmatprep.mubr.msk.f32.mxu0 %vm12649_vm7, %v12650_v29 }
 0x9a2   : >> { %11181 = vmatmul.mubr.msk.f32.gmra.mrb[4].mxu1 %vm964_vm0, %v10071_v40  ;;  %11337 = vmatmul.mubr.msk.f32.gmra.mrb[4].mxu0 %vm964_vm0, %v10171_v41  ;;  %v10112_v40 = vld [vmem:[%s13856_s6 + $0x38] sm:$0xff]  ;;  %v10212_v41 = vld [vmem:[%s13856_s6 + $0x6a] sm:$0xff] }
 0x9a3   : >> { %11187 = vmatprep.mubr.msk.f32.mxu1 %vm12649_vm7, %v12650_v29  ;;  %11343 = vmatprep.mubr.msk.f32.mxu0 %vm12649_vm7, %v12650_v29 }
 0x9a6   : >> { %11188 = vmatmul.mubr.msk.f32.vlgmr.msra.gmra.mrb[0].mxu1 %vm964_vm0, %v10077_v46  ;;  %11344 = vmatmul.mubr.msk.f32.vlgmr.msra.gmra.mrb[0].mxu0 %vm964_vm0, %v10177_v47  ;;  %v10219_v46 = vld [vmem:[%s13856_s6 + $0x63] sm:$0xff] }
 0x9a7   : >> { %11190 = vmatprep.mubr.msk.f32.mxu1 %vm12649_vm7, %v12650_v29  ;;  %11346 = vmatprep.mubr.msk.f32.mxu0 %vm12649_vm7, %v12650_v29 }
 0x9a8   : >> { %11962 = vmatpush3.bf16.msra.mxu0 %v11961_v48  ;;  %11926 = vmatpush3.bf16.msra.mxu1 %v11925_v50  ;;  %v10120_v48 = vld [vmem:[%s13856_s6 + $0x39] sm:$0xff]  ;;  %v10220_v50 = vld [vmem:[%s13856_s6 + $0x6b] sm:$0xff] }
 0x9a9   : >> { %11963 = vmatprep.subr.bf16.mxu0 %v12648_v23  ;;  %11927 = vmatprep.subr.bf16.mxu1 %v12648_v23 }
 0x9aa   : >> { %11191 = vmatmul.mubr.msk.f32.gmra.mrb[2].mxu1 %vm964_vm0, %v10078_v51  ;;  %11347 = vmatmul.mubr.msk.f32.gmra.mrb[2].mxu0 %vm964_vm0, %v10178_v52  ;;  %v10121_v51 = vld [vmem:[%s13856_s6 + $0x41] sm:$0x1]  ;;  %v10221_v52 = vld [vmem:[%s13856_s6 + $0x73] sm:$0x1] }
 0x9ab   : >> { %11193 = vmatprep.mubr.msk.f32.mxu1 %vm12649_vm7, %v12650_v29  ;;  %11349 = vmatprep.mubr.msk.f32.mxu0 %vm12649_vm7, %v12650_v29 }
 0x9ae   : >> { %11194 = vmatmul.mubr.msk.f32.gmra.mrb[4].mxu1 %vm964_vm0, %v10079_v53  ;;  %11350 = vmatmul.mubr.msk.f32.gmra.mrb[4].mxu0 %vm964_vm0, %v10179_v2  ;;  %v10227_v53 = vld [vmem:[%s13856_s6 + $0x64] sm:$0xff]  ;;  %v10228_v2 = vld [vmem:[%s13856_s6 + $0x6c] sm:$0xff]  ;;  %s10239_s6 = sshll.u32 %s12632_s1, 4  ;;  %s4619_s1 = sadd.s32 1, %s12632_s1  }
 0x9af   : >> { %11200 = vmatprep.mubr.msk.f32.mxu1 %vm12649_vm7, %v12650_v29  ;;  %11356 = vmatprep.mubr.msk.f32.mxu0 %vm12649_vm7, %v12650_v29  ;;  %s7173_s5 = scalar_lea.vmem [#allocation8], %s10239_s6  ;;  %p4616_p2 = scmp.ge.s32.totalorder %s4619_s1, 9  }
 0x9b0   : > { %s14318_s26 = smov (%p4616_p2), 0  }
 0x9b2   : >> { %11201 = vmatmul.mubr.msk.f32.vlgmr.msra.gmra.mrb[0].mxu1 %vm964_vm0, %v10085_v59  ;;  %11357 = vmatmul.mubr.msk.f32.vlgmr.msra.gmra.mrb[0].mxu0 %vm964_vm0, %v10185_v60 }
 0x9b3   : >> { %11203 = vmatprep.mubr.msk.f32.mxu1 %vm12649_vm7, %v12650_v29  ;;  %11359 = vmatprep.mubr.msk.f32.mxu0 %vm12649_vm7, %v12650_v29 }
 0x9b4   : >> { %11965 = vmatpush3.bf16.msra.mxu0 %v11964_v61  ;;  %11929 = vmatpush3.bf16.msra.mxu1 %v11928_v62 }
 0x9b5   : >> { %11966 = vmatprep.subr.bf16.mxu0 %v12648_v23  ;;  %11930 = vmatprep.subr.bf16.mxu1 %v12648_v23 }
 0x9b6   : >> { %11204 = vmatmul.mubr.msk.f32.gmra.mrb[2].mxu1 %vm964_vm0, %v10086_v1  ;;  %11360 = vmatmul.mubr.msk.f32.gmra.mrb[2].mxu0 %vm964_vm0, %v10186_v3 }
 0x9b7   : >> { %11206 = vmatprep.mubr.msk.f32.mxu1 %vm12649_vm7, %v12650_v29  ;;  %11362 = vmatprep.mubr.msk.f32.mxu0 %vm12649_vm7, %v12650_v29 }
 0x9ba   : >> { %11207 = vmatmul.mubr.msk.f32.gmra.mrb[4].mxu1 %vm964_vm0, %v10087_v4  ;;  %11363 = vmatmul.mubr.msk.f32.gmra.mrb[4].mxu0 %vm964_vm0, %v10187_v5 }
 0x9bb   : >> { %11213 = vmatprep.mubr.msk.f32.mxu1 %vm12649_vm7, %v12650_v29  ;;  %11369 = vmatprep.mubr.msk.f32.mxu0 %vm12649_vm7, %v12650_v29 }
 0x9be   : >> { %11214 = vmatmul.mubr.msk.f32.vlgmr.msra.gmra.mrb[0].mxu1 %vm964_vm0, %v10093_v10  ;;  %11370 = vmatmul.mubr.msk.f32.vlgmr.msra.gmra.mrb[0].mxu0 %vm964_vm0, %v10195_v11 }
 0x9bf   : >> { %11216 = vmatprep.mubr.msk.f32.mxu1 %vm12649_vm7, %v12650_v29  ;;  %11372 = vmatprep.mubr.msk.f32.mxu0 %vm12649_vm7, %v12650_v29 }
 0x9c0   : >> { %11968 = vmatpush3.bf16.msra.mxu0 %v11967_v12  ;;  %11932 = vmatpush3.bf16.msra.mxu1 %v11931_v13 }
 0x9c1   : >> { %11969 = vmatprep.subr.bf16.mxu0 %v12648_v23  ;;  %11933 = vmatprep.subr.bf16.mxu1 %v12648_v23 }
 0x9c2   : >> { %11217 = vmatmul.mubr.msk.f32.gmra.mrb[2].mxu1 %vm964_vm0, %v10094_v15  ;;  %11373 = vmatmul.mubr.msk.f32.gmra.mrb[2].mxu0 %vm964_vm0, %v10196_v16 }
 0x9c3   : >> { %11219 = vmatprep.mubr.msk.f32.mxu1 %vm12649_vm7, %v12650_v29  ;;  %11375 = vmatprep.mubr.msk.f32.mxu0 %vm12649_vm7, %v12650_v29 }
 0x9c6   : >> { %11220 = vmatmul.mubr.msk.f32.gmra.mrb[4].mxu1 %vm964_vm0, %v10095_v17  ;;  %11376 = vmatmul.mubr.msk.f32.gmra.mrb[4].mxu0 %vm964_vm0, %v10197_v18  ;;  %v14316_v17 = vld [vmem:[%s14919_s18] ss:$0 sm:$0xff] (%p4616_p2) }
 0x9c7   : >> { %11226 = vmatprep.mubr.msk.f32.mxu1 %vm12649_vm7, %v12650_v29  ;;  %11382 = vmatprep.mubr.msk.f32.mxu0 %vm12649_vm7, %v12650_v29 }
 0x9ca   : >> { %11227 = vmatmul.mubr.msk.f32.vlgmr.msra.gmra.mrb[0].mxu1 %vm964_vm0, %v10101_v22  ;;  %11383 = vmatmul.mubr.msk.f32.vlgmr.msra.gmra.mrb[0].mxu0 %vm964_vm0, %v10203_v24 }
 0x9cb   : >> { %11229 = vmatprep.mubr.msk.f32.mxu1 %vm12649_vm7, %v12650_v29  ;;  %11385 = vmatprep.mubr.msk.f32.mxu0 %vm12649_vm7, %v12650_v29 }
 0x9cc   : >> { %11971 = vmatpush3.bf16.msra.mxu0 %v11970_v25  ;;  %11935 = vmatpush3.bf16.msra.mxu1 %v11934_v26 }
 0x9cd   : >> { %11972 = vmatprep.subr.bf16.mxu0 %v12648_v23  ;;  %11936 = vmatprep.subr.bf16.mxu1 %v12648_v23 }
 0x9ce   : >> { %11230 = vmatmul.mubr.msk.f32.gmra.mrb[2].mxu1 %vm964_vm0, %v10102_v27  ;;  %11386 = vmatmul.mubr.msk.f32.gmra.mrb[2].mxu0 %vm964_vm0, %v10204_v28 }
 0x9cf   : >> { %11232 = vmatprep.mubr.msk.f32.mxu1 %vm12649_vm7, %v12650_v29  ;;  %11388 = vmatprep.mubr.msk.f32.mxu0 %vm12649_vm7, %v12650_v29 }
 0x9d2   : >> { %11233 = vmatmul.mubr.msk.f32.gmra.mrb[4].mxu1 %vm964_vm0, %v10103_v30  ;;  %11389 = vmatmul.mubr.msk.f32.gmra.mrb[4].mxu0 %vm964_vm0, %v10205_v31 }
 0x9d3   : >> { %11239 = vmatprep.mubr.msk.f32.mxu1 %vm12649_vm7, %v12650_v29  ;;  %11395 = vmatprep.mubr.msk.f32.mxu0 %vm12649_vm7, %v12650_v29 }
 0x9d6   : >> { %11240 = vmatmul.mubr.msk.f32.vlgmr.msra.gmra.mrb[0].mxu1 %vm964_vm0, %v10111_v36  ;;  %11396 = vmatmul.mubr.msk.f32.vlgmr.msra.gmra.mrb[0].mxu0 %vm964_vm0, %v10211_v37 }
 0x9d7   : >> { %11242 = vmatprep.mubr.msk.f32.mxu1 %vm12649_vm7, %v12650_v29  ;;  %11398 = vmatprep.mubr.msk.f32.mxu0 %vm12649_vm7, %v12650_v29 }
 0x9d8   : >> { %11974 = vmatpush3.bf16.msra.mxu0 %v11973_v38  ;;  %11938 = vmatpush3.bf16.msra.mxu1 %v11937_v39 }
 0x9d9   : >> { %11975 = vmatprep.subr.bf16.mxu0 %v12648_v23  ;;  %v10231_v23 = vld [vmem:[%s14916_s15 + $0x188] sm:$0xff] }
 0x9da   : >> { %11243 = vmatmul.mubr.msk.f32.gmra.mrb[2].mxu1 %vm964_vm0, %v10112_v40  ;;  %11399 = vmatmul.mubr.msk.f32.gmra.mrb[2].mxu0 %vm964_vm0, %v10212_v41  ;;  %v11976_v47 = vpack.c.bf16 %v10231_v23, %v10230_v44 }
 0x9db   : >> { %11245 = vmatprep.mubr.msk.f32.mxu1 %vm12649_vm7, %v12650_v29  ;;  %11401 = vmatprep.mubr.msk.f32.mxu0 %vm12649_vm7, %v12650_v29 }
 0x9de   : >> { %11246 = vmatmul.mubr.msk.f32.gmra.mrb[4].mxu1 %vm964_vm0, %v10113_v42  ;;  %11402 = vmatmul.mubr.msk.f32.gmra.mrb[4].mxu0 %vm964_vm0, %v10213_v43 }
 0x9df   : >> { %11252 = vmatprep.mubr.msk.f32.mxu1 %vm12649_vm7, %v12650_v29  ;;  %11408 = vmatprep.mubr.msk.f32.mxu0 %vm12649_vm7, %v12650_v29 }
 0x9e2   : >> { %11253 = vmatmul.mubr.msk.f32.vlgmr.msra.gmra.mrb[0].mxu1 %vm964_vm0, %v10119_v45  ;;  %11409 = vmatmul.mubr.msk.f32.vlgmr.msra.gmra.mrb[0].mxu0 %vm964_vm0, %v10219_v46 }
 0x9e3   : >> { %11255 = vmatprep.mubr.msk.f32.mxu1 %vm12649_vm7, %v12650_v29  ;;  %11411 = vmatprep.mubr.msk.f32.mxu0 %vm12649_vm7, %v12650_v29 }
 0x9e4   : >> { %11977 = vmatpush3.bf16.msra.mxu0 %v11976_v47 }
 0x9e6   : >> { %11256 = vmatmul.mubr.msk.f32.gmra.mrb[2].mxu1 %vm964_vm0, %v10120_v48  ;;  %11412 = vmatmul.mubr.msk.f32.gmra.mrb[2].mxu0 %vm964_vm0, %v10220_v50 }
 0x9e7   : >> { %11258 = vmatprep.mubr.msk.f32.mxu1 %vm12649_vm7, %v12650_v29  ;;  %11414 = vmatprep.mubr.msk.f32.mxu0 %vm12649_vm7, %v12650_v29 }
 0x9ea   : >> { %11259 = vmatmul.mubr.msk.f32.gmra.mrb[4].mxu1 %vm964_vm0, %v10121_v51  ;;  %11415 = vmatmul.mubr.msk.f32.gmra.mrb[4].mxu0 %vm964_vm0, %v10221_v52 }
 0x9eb   : >> { %11421 = vmatprep.mubr.msk.f32.mxu0 %vm12649_vm7, %v12650_v29  ;;  %11436 = vmatprep.mubr.msk.f32.mxu1 %vm7084_vm8, %v12991_v14 }
 0x9ee   : >> { %11422 = vmatmul.mubr.msk.f32.vlgmr.msra.gmra.mrb[0].mxu0 %vm964_vm0, %v10227_v53 }
 0x9ef   : >> { %11424 = vmatprep.mubr.msk.f32.mxu0 %vm12649_vm7, %v12650_v29 }
 0x9f2   : >> { %11425 = vmatmul.mubr.msk.f32.gmra.mrb[2].mxu0 %vm964_vm0, %v10228_v2 }
 0x9f3   : >> { %11427 = vmatprep.mubr.msk.f32.mxu0 %vm12649_vm7, %v12650_v29 }
 0x9f6   : >> { %11428 = vmatmul.mubr.msk.f32.gmra.mrb[4].mxu0 %vm964_vm0, %v10229_v54 }
 0xab5   : >> { %v5781_v56 = vpop.f32.mrb[0].mxu1 }
 0xab6   : >> { %v11254_v49 = vpop.f32.mrb[1].mxu1 }
 0xab9   : >> { %v5786_v57 = vpop.f32.mrb[2].mxu1 }
 0xaba   : >> { %v11257_v59 = vpop.f32.mrb[3].mxu1 }
 0xabd   : >> { %v5791_v60 = vpop.f32.mrb[4].mxu1 }
 0xabe   : >> { %v11260_v61 = vpop.f32.mrb[5].mxu1 }
 0xac1   : >> { %v7061_v62 = vpop.f32.mrb[0].mxu0 }
 0xac2   : >> { %v12208_v1 = vadd.f32 %v7061_v62, %v5781_v56  ;;  %v11423_v3 = vpop.f32.mrb[1].mxu0 }
 0xac5   : >> { %v7066_v4 = vpop.f32.mrb[2].mxu0 }
 0xac6   : >> { %v12209_v5 = vadd.f32 %v7066_v4, %v5786_v57  ;;  %v11426_v29 = vpop.f32.mrb[3].mxu0 }
 0xac8   : >> { %v11978_v6 = vpack.c.bf16 %v12209_v5, %v12208_v1 }
 0xac9   : >> { %v7071_v7 = vpop.f32.mrb[4].mxu0 }
 0xaca   : >> { %v12210_v8 = vadd.f32 %v7071_v7, %v5791_v60  ;;  %v11429_v9 = vpop.f32.mrb[5].mxu0  ;;  %11979 = vmatprep.subr.bf16.mxu1 %v11978_v6 }
 0xacb   : >> { %11981 = vmatpush3.bf16.msra.mxu1 %v11978_v6 }
 0xacc   : >> { %11434 = vmatprep.subr.msk.mxu1 %vm7091_vm9, %v12210_v8 }
 0xacf   : >> { %11435 = vmatpush3.msk.msra.mxu1 %vm7091_vm9, %v12210_v8 }
 0xad0   : >> { %11437 = vmatmul.mubr.msk.f32.vlgmr.msra.gmra.mrb[6].mxu1 %vm7084_vm8, %v13006_v21 }
 0xba3   : >> { %v11438_v10 = vpop.f32.mrb[6].mxu1  ;;  %4618 = sbr.rel (!%p4616_p2) target bundleno = 2391 (0x957), region = 383 }
 0xba4   : >> { %v7167_v11 = vadd.f32 %v11438_v10, %v13817_v55  ;;  %v7161_v12 = vpop.f32.mrb[7].mxu1 }
 0xba5   : >> { %v7162_v13 = vadd.f32 %v13817_v55, %v7161_v12 }
 0xba6   : >> { %v7171_v15 = vmax.f32 %v7167_v11, 0.0 }
 0xba7   : >> { %v7170_v16 = vmax.f32 %v7162_v13, 0.0 }
 0xba8   : >> { %7176 = vst.msk [vmem:[%s7173_s5 + $0x8] sm:$0x1] %vm7175_vm10, %v7171_v15 }
 0xba9   : >> { %7174 = vst.msk [vmem:[%s7173_s5] sm:$0xff] %vm1022_vm2, %v7170_v16 }
 0xbaa LB: >> { %v10242_v18 = vld [vmem:[%s14918_s17 + $0x20] sm:$0xff]  ;;  %v10243_v19 = vld [vmem:[%s14918_s17 + $0x28] sm:$0xff]  ;;  %v12651_v55 = vmov 0.0|0.0   ;;  %v10244_v58 = vld [vmem:[%s14918_s17 + $0x30] sm:$0xff]  ;;  %vm12652_vm11 = vmmov 0   ;;  %v12653_v27 = vmov 0.0   ;;  %s12636_s26 = sphi %s14318_s26, %s7183_s26  }
 0xbab   : >> { %v10310_v21 = vld [vmem:[%s14918_s17 + $0x180] sm:$0xff]  ;;  %11982 = vmatprep.subr.bf16.mxu1 %v12651_v55  ;;  %12054 = vmatprep.subr.bf16.mxu0 %v12651_v55  ;;  %v11983_v63 = vpack.c.bf16 %v10243_v19, %v10242_v18  ;;  %v10311_v20 = vld [vmem:[%s14918_s17 + $0x188] sm:$0xff]  ;;  %v10245_v22 = vld [vmem:[%s14918_s17 + $0x38] sm:$0xff]  ;;  %s10410_s5 = sshll.u32 %s12636_s26, 5  ;;  %s10394_s3 = sshll.u32 %s12636_s26, 2 }
 0xbac   : >> { %v12055_v24 = vpack.c.bf16 %v10311_v20, %v10310_v21  ;;  %v10312_v25 = vld [vmem:[%s14918_s17 + $0x190] sm:$0xff]  ;;  %v10313_v26 = vld [vmem:[%s14918_s17 + $0x198] sm:$0xff]  ;;  %11447 = vmatprep.mubr.msk.f32.mxu1 %vm12652_vm11, %v12653_v27  ;;  %11579 = vmatprep.mubr.msk.f32.mxu0 %vm12652_vm11, %v12653_v27  ;;  %v11986_v28 = vpack.c.bf16 %v10245_v22, %v10244_v58  ;;  %v7188_v31 = vld [vmem:[%s14918_s17] sm:$0xff]  ;;  %s14368_s6 = scalar_lea.vmem [#allocation8], %s10410_s5  ;;  %s9282_s28 = scalar_lea.vmem [#allocation9], %s10394_s3 }
 0xbad   : >> { %11984 = vmatpush3.bf16.msra.mxu1 %v11983_v63  ;;  %v12058_v30 = vpack.c.bf16 %v10313_v26, %v10312_v25  ;;  %v7189_v32 = vld [vmem:[%s14918_s17 + $0x8] sm:$0xff]  ;;  %v10316_v33 = vld [vmem:[%s14918_s17 + $0x1a0] sm:$0xff]  ;;  %v7190_v39 = vld [vmem:[%s14918_s17 + $0x10] sm:$0xff]  ;;  %s7183_s26 = sadd.s32 1, %s12636_s26  }
 0xbae   : >> { %12056 = vmatpush3.bf16.msra.mxu0 %v12055_v24  ;;  %11985 = vmatprep.subr.bf16.mxu1 %v12651_v55  ;;  %v10317_v34 = vld [vmem:[%s14918_s17 + $0x1a8] sm:$0xff]  ;;  %v11989_v36 = vpack.c.bf16 %v7189_v32, %v7188_v31  ;;  %v7191_v40 = vld [vmem:[%s14918_s17 + $0x18] sm:$0xff]  ;;  %v10318_v41 = vld [vmem:[%s14918_s17 + $0x1b0] sm:$0xff]  ;;  %p7180_p3 = scmp.ge.s32.totalorder %s7183_s26, 3  }
 0xbaf   : >> { %12057 = vmatprep.subr.bf16.mxu0 %v12651_v55  ;;  %v12061_v38 = vpack.c.bf16 %v10317_v34, %v10316_v33  ;;  %v10319_v42 = vld [vmem:[%s14918_s17 + $0x1b8] sm:$0xff]  ;;  %v11992_v43 = vpack.c.bf16 %v7191_v40, %v7190_v39  ;;  %v10248_v23 = vld [vmem:[%s14918_s17 + $0x40] sm:$0xff]  ;;  %v10249_v45 = vld [vmem:[%s14918_s17 + $0x48] sm:$0xff]  ;;  %vm12655_vm12 = vmmov (%p7180_p3), 0   ;;  %vm9317_vm13 = vcmask (%p7180_p3), 523264   ;;  %s10398_s1 = sshll.u32 (%p7180_p3), %s12808_s7, 4 }
 0xbb0   : >> { %v7192_v35 = vld [vmem:[%s14368_s6 + $0x1] sm:$0x1f]  ;;  %v12064_v44 = vpack.c.bf16 %v10319_v42, %v10318_v41  ;;  %v10323_v47 = vld [vmem:[%s14918_s17 + $0x1c8] sm:$0xff]  ;;  %v11995_v50 = vpack.c.bf16 %v10249_v45, %v10248_v23  ;;  %v10250_v53 = vld [vmem:[%s14918_s17 + $0x50] sm:$0xff]  ;;  %s9574_s25 = sshll.u32 (%p7180_p3), %s13189_s8, 4  ;;  %s14979_s30 = sld [smem:[#allocation30_spill]] (%p7180_p3)  ;;  %s14857_s25 = int_to_ptr.vmem [resolvable:$true] %s9574_s25 }
 0xbb1   : >> { %11987 = vmatpush3.bf16.msra.mxu1 %v11986_v28  ;;  %v10309_v37 = vld [vmem:[%s14368_s6 + $0x22] sm:$0x1f]  ;;  %v10251_v2 = vld [vmem:[%s14918_s17 + $0x58] sm:$0xff]  ;;  %v10324_v54 = vld [vmem:[%s14918_s17 + $0x1d0] sm:$0xff]  ;;  %s14981_s3 = sand.u32 (%p7180_p3), 1, %s12600_s2   ;;  %s12656_s7 = smov (%p7180_p3), [#allocation10]  }
 0xbb2   : >> { %12059 = vmatpush3.bf16.msra.mxu0 %v12058_v30  ;;  %11988 = vmatprep.subr.bf16.mxu1 %v12651_v55  ;;  %v10322_v46 = vld [vmem:[%s14918_s17 + $0x1c0] sm:$0xff]  ;;  %v10325_v56 = vld [vmem:[%s14918_s17 + $0x1d8] sm:$0xff]  ;;  %v11998_v49 = vpack.c.bf16 %v10251_v2, %v10250_v53  ;;  %v10254_v60 = vld [vmem:[%s14918_s17 + $0x68] sm:$0xff]  ;;  %s12522_s9 = sshll.u32 (%p7180_p3), %s12656_s7, 4  ;;  %s12523_s9 = int_to_ptr.vmem [resolvable:$false] %s12522_s9 }
 0xbb3   : >> { %12060 = vmatprep.subr.bf16.mxu0 %v12651_v55  ;;  %v7187_v48 = vld [vmem:[%s14368_s6] sm:$0x1f]  ;;  %v12067_v52 = vpack.c.bf16 %v10323_v47, %v10322_v46  ;;  %v12070_v57 = vpack.c.bf16 %v10325_v56, %v10324_v54  ;;  %v10331_v62 = vld [vmem:[%s14918_s17 + $0x1e8] sm:$0xff]  ;;  %v10255_v29 = vld [vmem:[%s14918_s17 + $0x70] sm:$0xff]  ;;  %s12524_s0 = scalar_lea.vmem (%p7180_p3), %s12523_s9, 32  ;;  %p12525_p9 = scmp.lt.s32.totalorder (%p7180_p3), %s14857_s25, %s12523_s9 }
 0xbb4   : >> { %11448 = vmatmul.mubr.msk.f32.vlgmr.msra.gmra.mrb[0].mxu1 %vm1022_vm2, %v7192_v35  ;;  %v10315_v51 = vld [vmem:[%s14368_s6 + $0x23] sm:$0x1f]  ;;  %v10256_v6 = vld [vmem:[%s14918_s17 + $0x78] sm:$0xff]  ;;  %v10332_v7 = vld [vmem:[%s14918_s17 + $0x1f0] sm:$0xff] }
 0xbb5   : >> { %11580 = vmatmul.mubr.msk.f32.vlgmr.msra.gmra.mrb[0].mxu0 %vm1022_vm2, %v10309_v37  ;;  %11990 = vmatpush3.bf16.msra.mxu1 %v11989_v36  ;;  %v10253_v59 = vld [vmem:[%s14918_s17 + $0x60] sm:$0xff]  ;;  %v10333_v8 = vld [vmem:[%s14918_s17 + $0x1f8] sm:$0xff]  ;;  %v12004_v9 = vpack.c.bf16 %v10256_v6, %v10255_v29  ;;  %v10259_v12 = vld [vmem:[%s14918_s17 + $0x88] sm:$0xff] }
 0xbb6   : >> { %12062 = vmatpush3.bf16.msra.mxu0 %v12061_v38  ;;  %11991 = vmatprep.subr.bf16.mxu1 %v12651_v55  ;;  %v10330_v61 = vld [vmem:[%s14918_s17 + $0x1e0] sm:$0xff]  ;;  %v12001_v3 = vpack.c.bf16 %v10254_v60, %v10253_v59  ;;  %v12076_v10 = vpack.c.bf16 %v10333_v8, %v10332_v7  ;;  %v10337_v15 = vld [vmem:[%s14918_s17 + $0x208] sm:$0xff]  ;;  %v10329_v19 = vld [vmem:[%s14368_s6 + $0x30] sm:$0x1f]  ;;  %s14980_s5 = smov (%p7180_p3), %s14979_s30  ;;  %s14855_s26 = scalar_lea.hbm (%p7180_p3), %s14979_s30, %s10398_s1 }
 0xbb7   : >> { %12063 = vmatprep.subr.bf16.mxu0 %v12651_v55  ;;  %11458 = vmatprep.mubr.msk.f32.mxu1 %vm12652_vm11, %v12653_v27  ;;  %v7344_v1 = vld [vmem:[%s14368_s6 + $0x2] sm:$0x1f]  ;;  %v12073_v5 = vpack.c.bf16 %v10331_v62, %v10330_v61  ;;  %v10260_v63 = vld [vmem:[%s14918_s17 + $0x90] sm:$0xff]  ;;  %v10261_v20 = vld [vmem:[%s14918_s17 + $0x98] sm:$0xff] }
 0xbb8   : >> { %11590 = vmatprep.mubr.msk.f32.mxu0 %vm12652_vm11, %v12653_v27  ;;  %v10321_v4 = vld [vmem:[%s14368_s6 + $0x24] sm:$0x1f]  ;;  %v10338_v58 = vld [vmem:[%s14918_s17 + $0x210] sm:$0xff]  ;;  %v10339_v22 = vld [vmem:[%s14918_s17 + $0x218] sm:$0xff]  ;;  %v12010_v24 = vpack.c.bf16 %v10261_v20, %v10260_v63 }
 0xbb9   : >> { %11993 = vmatpush3.bf16.msra.mxu1 %v11992_v43  ;;  %v10258_v11 = vld [vmem:[%s14918_s17 + $0x80] sm:$0xff]  ;;  %v12082_v25 = vpack.c.bf16 %v10339_v22, %v10338_v58  ;;  %v10267_v28 = vld [vmem:[%s14918_s17 + $0xa8] sm:$0xff]  ;;  %v10335_v34 = vld [vmem:[%s14368_s6 + $0x31] sm:$0x1f] }
 0xbba   : >> { %12065 = vmatpush3.bf16.msra.mxu0 %v12064_v44  ;;  %11994 = vmatprep.subr.bf16.mxu1 %v12651_v55  ;;  %v10336_v13 = vld [vmem:[%s14918_s17 + $0x200] sm:$0xff]  ;;  %v12007_v18 = vpack.c.bf16 %v10259_v12, %v10258_v11  ;;  %v10343_v31 = vld [vmem:[%s14918_s17 + $0x228] sm:$0xff]  ;;  %v10268_v36 = vld [vmem:[%s14918_s17 + $0xb0] sm:$0xff] }
 0xbbb   : >> { %12066 = vmatprep.subr.bf16.mxu0 %v12651_v55  ;;  %v7424_v16 = vld [vmem:[%s14368_s6 + $0x3] sm:$0x1f]  ;;  %v12079_v21 = vpack.c.bf16 %v10337_v15, %v10336_v13  ;;  %v10269_v37 = vld [vmem:[%s14918_s17 + $0xb8] sm:$0xff]  ;;  %v10344_v38 = vld [vmem:[%s14918_s17 + $0x230] sm:$0xff] }
 0xbbc   : >> { %11459 = vmatmul.mubr.msk.f32.vlgmr.msra.gmra.mrb[0].mxu1 %vm1022_vm2, %v7187_v48  ;;  %v10266_v26 = vld [vmem:[%s14918_s17 + $0xa0] sm:$0xff]  ;;  %v10345_v39 = vld [vmem:[%s14918_s17 + $0x238] sm:$0xff]  ;;  %v12016_v40 = vpack.c.bf16 %v10269_v37, %v10268_v36  ;;  %v10273_v43 = vld [vmem:[%s14918_s17 + $0xc8] sm:$0xff] }
 0xbbd   : >> { %11591 = vmatmul.mubr.msk.f32.vlgmr.msra.gmra.mrb[0].mxu0 %vm1022_vm2, %v10315_v51  ;;  %11996 = vmatpush3.bf16.msra.mxu1 %v11995_v50  ;;  %v10342_v30 = vld [vmem:[%s14918_s17 + $0x220] sm:$0xff]  ;;  %v12013_v33 = vpack.c.bf16 %v10267_v28, %v10266_v26  ;;  %v12088_v41 = vpack.c.bf16 %v10345_v39, %v10344_v38  ;;  %v10349_v23 = vld [vmem:[%s14918_s17 + $0x248] sm:$0xff]  ;;  %v10265_v45 = vld [vmem:[%s14368_s6 + $0x10] sm:$0x1f] }
 0xbbe   : >> { %12068 = vmatpush3.bf16.msra.mxu0 %v12067_v52  ;;  %11997 = vmatprep.subr.bf16.mxu1 %v12651_v55  ;;  %v7504_v32 = vld [vmem:[%s14368_s6 + $0x4] sm:$0x1f]  ;;  %v12085_v35 = vpack.c.bf16 %v10343_v31, %v10342_v30  ;;  %v10341_v47 = vld [vmem:[%s14368_s6 + $0x32] sm:$0x1f]  ;;  %v10275_v51 = vld [vmem:[%s14918_s17 + $0xd8] sm:$0xff] }
 0xbbf   : >> { %12069 = vmatprep.subr.bf16.mxu0 %v12651_v55  ;;  %11469 = vmatprep.mubr.msk.f32.mxu1 %vm12652_vm11, %v12653_v27  ;;  %v10272_v42 = vld [vmem:[%s14918_s17 + $0xc0] sm:$0xff]  ;;  %v10274_v50 = vld [vmem:[%s14918_s17 + $0xd0] sm:$0xff]  ;;  %v10351_v53 = vld [vmem:[%s14918_s17 + $0x258] sm:$0xff] }
 0xbc0   : >> { %11601 = vmatprep.mubr.msk.f32.mxu0 %vm12652_vm11, %v12653_v27  ;;  %v10348_v44 = vld [vmem:[%s14918_s17 + $0x240] sm:$0xff]  ;;  %v12019_v46 = vpack.c.bf16 %v10273_v43, %v10272_v42  ;;  %v10350_v52 = vld [vmem:[%s14918_s17 + $0x250] sm:$0xff]  ;;  %v12022_v2 = vpack.c.bf16 %v10275_v51, %v10274_v50  ;;  %v10355_v59 = vld [vmem:[%s14918_s17 + $0x268] sm:$0xff] }
 0xbc1   : >> { %11999 = vmatpush3.bf16.msra.mxu1 %v11998_v49  ;;  %v12091_v48 = vpack.c.bf16 %v10349_v23, %v10348_v44  ;;  %v12094_v54 = vpack.c.bf16 %v10351_v53, %v10350_v52  ;;  %v10278_v56 = vld [vmem:[%s14918_s17 + $0xe0] sm:$0xff]  ;;  %v10279_v49 = vld [vmem:[%s14918_s17 + $0xe8] sm:$0xff]  ;;  %v10271_v60 = vld [vmem:[%s14368_s6 + $0x11] sm:$0x1f] }
 0xbc2   : >> { %12071 = vmatpush3.bf16.msra.mxu0 %v12070_v57  ;;  %12000 = vmatprep.subr.bf16.mxu1 %v12651_v55  ;;  %v10354_v57 = vld [vmem:[%s14918_s17 + $0x260] sm:$0xff]  ;;  %v12025_v61 = vpack.c.bf16 %v10279_v49, %v10278_v56  ;;  %v10347_v62 = vld [vmem:[%s14368_s6 + $0x33] sm:$0x1f]  ;;  %v10357_v29 = vld [vmem:[%s14918_s17 + $0x278] sm:$0xff] }
 0xbc3   : >> { %12072 = vmatprep.subr.bf16.mxu0 %v12651_v55  ;;  %v10284_v8 = vld [vmem:[%s14918_s17 + $0x100] sm:$0xff]  ;;  %v10363_v11 = vld [vmem:[%s14918_s17 + $0x288] sm:$0xff]  ;;  %v10277_v12 = vld [vmem:[%s14368_s6 + $0x12] sm:$0x1f] }
 0xbc4   : >> { %11470 = vmatmul.mubr.msk.f32.vlgmr.msra.gmra.mrb[0].mxu1 %vm1022_vm2, %v7344_v1  ;;  %v12097_v1 = vpack.c.bf16 %v10355_v59, %v10354_v57  ;;  %v10353_v15 = vld [vmem:[%s14368_s6 + $0x34] sm:$0x1f]  ;;  %v10290_v22 = vld [vmem:[%s14918_s17 + $0x120] sm:$0xff]  ;;  %v10369_v26 = vld [vmem:[%s14918_s17 + $0x2a8] sm:$0xff] }
 0xbc5   : >> { %11602 = vmatmul.mubr.msk.f32.vlgmr.msra.gmra.mrb[0].mxu0 %vm1022_vm2, %v10321_v4  ;;  %12002 = vmatpush3.bf16.msra.mxu1 %v12001_v3  ;;  %v10280_v3 = vld [vmem:[%s14918_s17 + $0xf0] sm:$0xff]  ;;  %v10281_v4 = vld [vmem:[%s14918_s17 + $0xf8] sm:$0xff]  ;;  %v10361_v31 = vld [vmem:[%s14368_s6 + $0x40] sm:$0x1f] }
 0xbc6   : >> { %12074 = vmatpush3.bf16.msra.mxu0 %v12073_v5  ;;  %12003 = vmatprep.subr.bf16.mxu1 %v12651_v55  ;;  %v10356_v5 = vld [vmem:[%s14918_s17 + $0x270] sm:$0xff]  ;;  %v12028_v6 = vpack.c.bf16 %v10281_v4, %v10280_v3  ;;  %v10365_v63 = vld [vmem:[%s14918_s17 + $0x298] sm:$0xff]  ;;  %v10298_v39 = vld [vmem:[%s14918_s17 + $0x140] sm:$0xff] }
 0xbc7   : >> { %12075 = vmatprep.subr.bf16.mxu0 %v12651_v55  ;;  %11480 = vmatprep.mubr.msk.f32.mxu1 %vm12652_vm11, %v12653_v27  ;;  %v12100_v7 = vpack.c.bf16 %v10357_v29, %v10356_v5  ;;  %v10283_v28 = vld [vmem:[%s14368_s6 + $0x13] sm:$0x1f]  ;;  %v10371_v36 = vld [vmem:[%s14918_s17 + $0x2b8] sm:$0xff]  ;;  %v10375_v42 = vld [vmem:[%s14918_s17 + $0x2c8] sm:$0xff] }
 0xbc8   : >> { %11612 = vmatprep.mubr.msk.f32.mxu0 %vm12652_vm11, %v12653_v27  ;;  %v10289_v43 = vld [vmem:[%s14368_s6 + $0x14] sm:$0x1f]  ;;  %v10367_v23 = vld [vmem:[%s14368_s6 + $0x41] sm:$0x1f]  ;;  %v10381_v56 = vld [vmem:[%s14918_s17 + $0x2e8] sm:$0xff] }
 0xbc9   : >> { %12005 = vmatpush3.bf16.msra.mxu1 %v12004_v9  ;;  %v10285_v9 = vld [vmem:[%s14918_s17 + $0x108] sm:$0xff]  ;;  %v10377_v50 = vld [vmem:[%s14918_s17 + $0x2d8] sm:$0xff]  ;;  %v10304_v53 = vld [vmem:[%s14918_s17 + $0x160] sm:$0xff] }
 0xbca   : >> { %12077 = vmatpush3.bf16.msra.mxu0 %v12076_v10  ;;  %12006 = vmatprep.subr.bf16.mxu1 %v12651_v55  ;;  %v10362_v10 = vld [vmem:[%s14918_s17 + $0x280] sm:$0xff]  ;;  %v12031_v13 = vpack.c.bf16 %v10285_v9, %v10284_v8  ;;  %v10383_v3 = vld [vmem:[%s14918_s17 + $0x2f8] sm:$0xff] }
 0xbcb   : >> { %12078 = vmatprep.subr.bf16.mxu0 %v12651_v55  ;;  %v10297_v49 = vld [vmem:[%s14368_s6 + $0x20] sm:$0x1f] }
 0xbcc   : >> { %11481 = vmatmul.mubr.msk.f32.vlgmr.msra.gmra.mrb[0].mxu1 %vm1022_vm2, %v7424_v16  ;;  %v12103_v16 = vpack.c.bf16 %v10363_v11, %v10362_v10  ;;  %v10373_v59 = vld [vmem:[%s14368_s6 + $0x42] sm:$0x1f]  ;;  %v10388_v10 = vld [vmem:[%s14918_s17 + $0x310] sm:$0xff]  ;;  %v10389_v11 = vld [vmem:[%s14918_s17 + $0x318] sm:$0xff] }
 0xbcd   : >> { %11613 = vmatmul.mubr.msk.f32.vlgmr.msra.gmra.mrb[0].mxu0 %vm1022_vm2, %v10329_v19  ;;  %12008 = vmatpush3.bf16.msra.mxu1 %v12007_v18  ;;  %v10286_v18 = vld [vmem:[%s14918_s17 + $0x110] sm:$0xff]  ;;  %v10287_v19 = vld [vmem:[%s14918_s17 + $0x118] sm:$0xff]  ;;  %v10386_v29 = vld [vmem:[%s14918_s17 + $0x300] sm:$0xff] }
 0xbce   : >> { %12080 = vmatpush3.bf16.msra.mxu0 %v12079_v21  ;;  %12009 = vmatprep.subr.bf16.mxu1 %v12651_v55  ;;  %v10364_v21 = vld [vmem:[%s14918_s17 + $0x290] sm:$0xff]  ;;  %v12034_v20 = vpack.c.bf16 %v10287_v19, %v10286_v18  ;;  %v10379_v8 = vld [vmem:[%s14368_s6 + $0x43] sm:$0x1f] }
 0xbcf   : >> { %12081 = vmatprep.subr.bf16.mxu0 %v12651_v55  ;;  %11491 = vmatprep.mubr.msk.f32.mxu1 %vm12652_vm11, %v12653_v27  ;;  %v12106_v58 = vpack.c.bf16 %v10365_v63, %v10364_v21 }
 0xbd0   : >> { %11623 = vmatprep.mubr.msk.f32.mxu0 %vm12652_vm11, %v12653_v27 }
 0xbd1   : >> { %12011 = vmatpush3.bf16.msra.mxu1 %v12010_v24  ;;  %v10291_v24 = vld [vmem:[%s14918_s17 + $0x128] sm:$0xff] }
 0xbd2   : >> { %12083 = vmatpush3.bf16.msra.mxu0 %v12082_v25  ;;  %12012 = vmatprep.subr.bf16.mxu1 %v12651_v55  ;;  %v10368_v25 = vld [vmem:[%s14918_s17 + $0x2a0] sm:$0xff]  ;;  %v12037_v30 = vpack.c.bf16 %v10291_v24, %v10290_v22  ;;  %v9309_v22 = vld [vmem:[%s14920_s19 + $0x8] sm:$0xff] (%p7180_p3)  ;;  %v9310_v24 = vld [vmem:[%s14920_s19 + $0x10] sm:$0xff] (%p7180_p3) }
 0xbd3   : >> { %12084 = vmatprep.subr.bf16.mxu0 %v12651_v55 }
 0xbd4   : >> { %11492 = vmatmul.mubr.msk.f32.vlgmr.msra.gmra.mrb[0].mxu1 %vm1022_vm2, %v7504_v32  ;;  %v12109_v32 = vpack.c.bf16 %v10369_v26, %v10368_v25  ;;  %v12654_v25 = vmov (%p7180_p3), 0.0|0.0  }
 0xbd5   : >> { %11624 = vmatmul.mubr.msk.f32.vlgmr.msra.gmra.mrb[0].mxu0 %vm1022_vm2, %v10335_v34  ;;  %12014 = vmatpush3.bf16.msra.mxu1 %v12013_v33  ;;  %v10292_v33 = vld [vmem:[%s14918_s17 + $0x130] sm:$0xff]  ;;  %v10293_v34 = vld [vmem:[%s14918_s17 + $0x138] sm:$0xff] }
 0xbd6   : >> { %12086 = vmatpush3.bf16.msra.mxu0 %v12085_v35  ;;  %12015 = vmatprep.subr.bf16.mxu1 %v12651_v55  ;;  %v10370_v35 = vld [vmem:[%s14918_s17 + $0x2b0] sm:$0xff]  ;;  %v12040_v37 = vpack.c.bf16 %v10293_v34, %v10292_v33  ;;  %v9289_v33 = vld [vmem:[#allocation6 + $0x4] sm:$0x7] (%p7180_p3) }
 0xbd7   : >> { %12087 = vmatprep.subr.bf16.mxu0 %v12651_v55  ;;  %11502 = vmatprep.mubr.msk.f32.mxu1 %vm12652_vm11, %v12653_v27  ;;  %v12112_v38 = vpack.c.bf16 %v10371_v36, %v10370_v35 }
 0xbd8   : >> { %11634 = vmatprep.mubr.msk.f32.mxu0 %vm12652_vm11, %v12653_v27 }
 0xbd9   : >> { %12017 = vmatpush3.bf16.msra.mxu1 %v12016_v40  ;;  %v10299_v40 = vld [vmem:[%s14918_s17 + $0x148] sm:$0xff] }
 0xbda   : >> { %12089 = vmatpush3.bf16.msra.mxu0 %v12088_v41  ;;  %12018 = vmatprep.subr.bf16.mxu1 %v12651_v55  ;;  %v10374_v41 = vld [vmem:[%s14918_s17 + $0x2c0] sm:$0xff]  ;;  %v12043_v44 = vpack.c.bf16 %v10299_v40, %v10298_v39 }
 0xbdb   : >> { %12090 = vmatprep.subr.bf16.mxu0 %v12651_v55  ;;  %v9392_v39 = vld [vmem:[%s14922_s21] sm:$0xff] (%p7180_p3) }
 0xbdc   : >> { %11503 = vmatmul.mubr.msk.f32.vlgmr.msra.gmra.mrb[0].mxu1 %vm1022_vm2, %v10265_v45  ;;  %v12115_v45 = vpack.c.bf16 %v10375_v42, %v10374_v41  ;;  %v9393_v41 = vld [vmem:[%s14922_s21 + $0x8] sm:$0xff] (%p7180_p3) }
 0xbdd   : >> { %11635 = vmatmul.mubr.msk.f32.vlgmr.msra.gmra.mrb[0].mxu0 %vm1022_vm2, %v10341_v47  ;;  %12020 = vmatpush3.bf16.msra.mxu1 %v12019_v46  ;;  %v10300_v46 = vld [vmem:[%s14918_s17 + $0x150] sm:$0xff]  ;;  %v10301_v47 = vld [vmem:[%s14918_s17 + $0x158] sm:$0xff] }
 0xbde   : >> { %12092 = vmatpush3.bf16.msra.mxu0 %v12091_v48  ;;  %12021 = vmatprep.subr.bf16.mxu1 %v12651_v55  ;;  %v10376_v48 = vld [vmem:[%s14918_s17 + $0x2d0] sm:$0xff]  ;;  %v12046_v51 = vpack.c.bf16 %v10301_v47, %v10300_v46 }
 0xbdf   : >> { %12093 = vmatprep.subr.bf16.mxu0 %v12651_v55  ;;  %11513 = vmatprep.mubr.msk.f32.mxu1 %vm12652_vm11, %v12653_v27  ;;  %v12118_v52 = vpack.c.bf16 %v10377_v50, %v10376_v48 }
 0xbe0   : >> { %11645 = vmatprep.mubr.msk.f32.mxu0 %vm12652_vm11, %v12653_v27 }
 0xbe1   : >> { %12023 = vmatpush3.bf16.msra.mxu1 %v12022_v2  ;;  %v10305_v2 = vld [vmem:[%s14918_s17 + $0x168] sm:$0xff] }
 0xbe2   : >> { %12095 = vmatpush3.bf16.msra.mxu0 %v12094_v54  ;;  %12024 = vmatprep.subr.bf16.mxu1 %v12651_v55  ;;  %v10380_v54 = vld [vmem:[%s14918_s17 + $0x2e0] sm:$0xff]  ;;  %v12049_v57 = vpack.c.bf16 %v10305_v2, %v10304_v53 }
 0xbe3   : >> { %12096 = vmatprep.subr.bf16.mxu0 %v12651_v55 }
 0xbe4   : >> { %11514 = vmatmul.mubr.msk.f32.vlgmr.msra.gmra.mrb[0].mxu1 %vm1022_vm2, %v10271_v60  ;;  %v12121_v60 = vpack.c.bf16 %v10381_v56, %v10380_v54  ;;  %v9394_v56 = vld [vmem:[%s14922_s21 + $0x10] sm:$0xff] (%p7180_p3) }
 0xbe5   : >> { %11646 = vmatmul.mubr.msk.f32.vlgmr.msra.gmra.mrb[0].mxu0 %vm1022_vm2, %v10347_v62  ;;  %12026 = vmatpush3.bf16.msra.mxu1 %v12025_v61  ;;  %v10306_v61 = vld [vmem:[%s14918_s17 + $0x170] sm:$0xff]  ;;  %v10307_v62 = vld [vmem:[%s14918_s17 + $0x178] sm:$0xff] }
 0xbe6   : >> { %12098 = vmatpush3.bf16.msra.mxu0 %v12097_v1  ;;  %12027 = vmatprep.subr.bf16.mxu1 %v12651_v55  ;;  %v10382_v1 = vld [vmem:[%s14918_s17 + $0x2f0] sm:$0xff]  ;;  %v12052_v4 = vpack.c.bf16 %v10307_v62, %v10306_v61 }
 0xbe7   : >> { %12099 = vmatprep.subr.bf16.mxu0 %v12651_v55  ;;  %11524 = vmatprep.mubr.msk.f32.mxu1 %vm12652_vm11, %v12653_v27  ;;  %v12124_v5 = vpack.c.bf16 %v10383_v3, %v10382_v1  ;;  %v9471_v3 = vld [vmem:[%s14924_s23] sm:$0xff] (%p7180_p3) }
 0xbe8   : >> { %11656 = vmatprep.mubr.msk.f32.mxu0 %vm12652_vm11, %v12653_v27 }
 0xbe9   : >> { %12029 = vmatpush3.bf16.msra.mxu1 %v12028_v6  ;;  %v10387_v6 = vld [vmem:[%s14918_s17 + $0x308] sm:$0xff] }
 0xbea   : >> { %12101 = vmatpush3.bf16.msra.mxu0 %v12100_v7  ;;  %12030 = vmatprep.subr.bf16.mxu1 %v12651_v55  ;;  %v10303_v7 = vld [vmem:[%s14368_s6 + $0x21] sm:$0x1f]  ;;  %v12127_v9 = vpack.c.bf16 %v10387_v6, %v10386_v29  ;;  %v9396_v29 = vld [vmem:[%s14923_s22] sm:$0x1] (%p7180_p3) }
 0xbeb   : >> { %12102 = vmatprep.subr.bf16.mxu0 %v12651_v55 }
 0xbec   : >> { %11525 = vmatmul.mubr.msk.f32.vlgmr.msra.gmra.mrb[0].mxu1 %vm1022_vm2, %v10277_v12  ;;  %v12130_v12 = vpack.c.bf16 %v10389_v11, %v10388_v10 }
 0xbed   : >> { %11657 = vmatmul.mubr.msk.f32.vlgmr.msra.gmra.mrb[0].mxu0 %vm1022_vm2, %v10353_v15  ;;  %12032 = vmatpush3.bf16.msra.mxu1 %v12031_v13  ;;  %v10385_v13 = vld [vmem:[%s14368_s6 + $0x44] sm:$0x1f]  ;;  %s12518_s6 = scalar_lea.vmem (%p7180_p3), %s14857_s25, 16 }
 0xbee   : >> { %12104 = vmatpush3.bf16.msra.mxu0 %v12103_v16  ;;  %12033 = vmatprep.subr.bf16.mxu1 %v12651_v55  ;;  %p12519_p4 = scmp.ne.s32.totalorder (%p7180_p3), %s14857_s25, %s12518_s6  ;;  %p12526_p10 = scmp.lt.s32.totalorder (%p7180_p3), %s12524_s0, %s12518_s6 }
 0xbef   : >> { %12105 = vmatprep.subr.bf16.mxu0 %v12651_v55  ;;  %11535 = vmatprep.mubr.msk.f32.mxu1 %vm12652_vm11, %v12653_v27 }
 0xbf0   : >> { %11667 = vmatprep.mubr.msk.f32.mxu0 %vm12652_vm11, %v12653_v27  ;;  %p12520_p7 = pnand (%p7180_p3), %p12519_p4, %p12825_p5  ;;  %p12527_p11 = por (%p7180_p3), %p12526_p10, %p12525_p9 }
 0xbf1   : >> { %12035 = vmatpush3.bf16.msra.mxu1 %v12034_v20 }
 0xbf2   : >> { %12107 = vmatpush3.bf16.msra.mxu0 %v12106_v58  ;;  %12036 = vmatprep.subr.bf16.mxu1 %v12651_v55  ;;  %v9308_v58 = vld [vmem:[%s14920_s19] sm:$0xff] (%p7180_p3)  ;;  %p12521_p8 = pneg (%p7180_p3), %p12520_p7 }
 0xbf3   : >> { %12108 = vmatprep.subr.bf16.mxu0 %v12651_v55  ;;  %v12133_v26 = vpack.c.bf16 (%p7180_p3), %v9309_v22, %v9308_v58 }
 0xbf4   : >> { %11536 = vmatmul.mubr.msk.f32.vlgmr.msra.gmra.mrb[0].mxu1 %vm1022_vm2, %v10283_v28  ;;  %v9311_v28 = vld [vmem:[%s14920_s19 + $0x18] sm:$0xff] (%p7180_p3)  ;;  %p12528_p12 = pnand (%p7180_p3), %p12527_p11, %p12521_p8 }
 0xbf5   : >> { %11668 = vmatmul.mubr.msk.f32.vlgmr.msra.gmra.mrb[0].mxu0 %vm1022_vm2, %v10361_v31  ;;  %12038 = vmatpush3.bf16.msra.mxu1 %v12037_v30  ;;  %v9285_v30 = vld [vmem:[#allocation6] sm:$0x7] (%p7180_p3)  ;;  %v12136_v31 = vpack.c.bf16 (%p7180_p3), %v9311_v28, %v9310_v24 }
 0xbf6   : >> { %12110 = vmatpush3.bf16.msra.mxu0 %v12109_v32  ;;  %12039 = vmatprep.subr.bf16.mxu1 %v12651_v55 }
 0xbf7   : >> { %12111 = vmatprep.subr.bf16.mxu0 %v12651_v55  ;;  %11546 = vmatprep.mubr.msk.f32.mxu1 %vm12652_vm11, %v12653_v27 }
 0xbf8   : >> { %11678 = vmatprep.mubr.msk.f32.mxu0 %vm12652_vm11, %v12653_v27 }
 0xbf9   : >> { %12041 = vmatpush3.bf16.msra.mxu1 %v12040_v37  ;;  %v9295_v37 = vld [vmem:[#allocation6 + $0x8] sm:$0x7] (%p7180_p3) }
 0xbfa   : >> { %12113 = vmatpush3.bf16.msra.mxu0 %v12112_v38  ;;  %12042 = vmatprep.subr.bf16.mxu1 %v12651_v55 }
 0xbfb   : >> { %12114 = vmatprep.subr.bf16.mxu0 %v12651_v55 }
 0xbfc   : >> { %11547 = vmatmul.mubr.msk.f32.vlgmr.msra.gmra.mrb[0].mxu1 %vm1022_vm2, %v10289_v43  ;;  %v12145_v43 = vpack.c.bf16 (%p7180_p3), %v9393_v41, %v9392_v39 }
 0xbfd   : >> { %11679 = vmatmul.mubr.msk.f32.vlgmr.msra.gmra.mrb[0].mxu0 %vm1022_vm2, %v10367_v23  ;;  %12044 = vmatpush3.bf16.msra.mxu1 %v12043_v44  ;;  %v9314_v23 = vld [vmem:[%s14920_s19 + $0x30] sm:$0xff] (%p7180_p3) }
 0xbfe   : >> { %12116 = vmatpush3.bf16.msra.mxu0 %v12115_v45  ;;  %12045 = vmatprep.subr.bf16.mxu1 %v12651_v55  ;;  %v9315_v45 = vld [vmem:[%s14920_s19 + $0x38] sm:$0xff] (%p7180_p3) }
 0xbff   : >> { %12117 = vmatprep.subr.bf16.mxu0 %v12651_v55  ;;  %11557 = vmatprep.mubr.msk.f32.mxu1 %vm12652_vm11, %v12653_v27  ;;  %v12142_v48 = vpack.c.bf16 (%p7180_p3), %v9315_v45, %v9314_v23 }
 0xc00   : >> { %11689 = vmatprep.mubr.msk.f32.mxu0 %vm12652_vm11, %v12653_v27 }
 0xc01   : >> { %12047 = vmatpush3.bf16.msra.mxu1 %v12046_v51 }
 0xc02   : >> { %12119 = vmatpush3.bf16.msra.mxu0 %v12118_v52  ;;  %12048 = vmatprep.subr.bf16.mxu1 %v12651_v55 }
 0xc03   : >> { %12120 = vmatprep.subr.bf16.mxu0 %v12651_v55 }
 0xc04   : >> { %11558 = vmatmul.mubr.msk.f32.vlgmr.msra.gmra.mrb[0].mxu1 %vm1022_vm2, %v10297_v49  ;;  %v9395_v49 = vld [vmem:[%s14922_s21 + $0x18] sm:$0xff] (%p7180_p3) }
 0xc05   : >> { %11690 = vmatmul.mubr.msk.f32.vlgmr.msra.gmra.mrb[0].mxu0 %vm1022_vm2, %v10373_v59  ;;  %12050 = vmatpush3.bf16.msra.mxu1 %v12049_v57  ;;  %v12148_v57 = vpack.c.bf16 (%p7180_p3), %v9395_v49, %v9394_v56  ;;  %v9316_v59 = vld [vmem:[%s14921_s20] sm:$0x1] (%p7180_p3) }
 0xc06   : >> { %12122 = vmatpush3.bf16.msra.mxu0 %v12121_v60  ;;  %12051 = vmatprep.subr.bf16.mxu1 %v12651_v55 }
 0xc07   : >> { %12123 = vmatprep.subr.bf16.mxu0 %v12651_v55  ;;  %11568 = vmatprep.mubr.msk.f32.mxu1 %vm12652_vm11, %v12653_v27 }
 0xc08   : >> { %11700 = vmatprep.mubr.msk.f32.mxu0 %vm12652_vm11, %v12653_v27 }
 0xc09   : >> { %12053 = vmatpush3.bf16.msra.mxu1 %v12052_v4  ;;  %v9472_v4 = vld [vmem:[%s14924_s23 + $0x8] sm:$0xff] (%p7180_p3) }
 0xc0a   : >> { %12125 = vmatpush3.bf16.msra.mxu0 %v12124_v5  ;;  %11714 = vmatprep.subr.mxu1 %v12653_v27  ;;  %v12151_v5 = vpack.c.bf16 (%p7180_p3), %v9472_v4, %v9471_v3 }
 0xc0b   : >> { %12126 = vmatprep.subr.bf16.mxu0 %v12651_v55 }
 0xc0c   : >> { %11569 = vmatmul.mubr.msk.f32.vlgmr.msra.gmra.mrb[0].mxu1 %vm1022_vm2, %v10303_v7 }
 0xc0d   : >> { %11701 = vmatmul.mubr.msk.f32.vlgmr.msra.gmra.mrb[0].mxu0 %vm1022_vm2, %v10379_v8  ;;  %11716 = vmatprep.mubr.msk.f32.mxu1 %vm12652_vm11, %v12653_v27 }
 0xc0e   : >> { %12128 = vmatpush3.bf16.msra.mxu0 %v12127_v9  ;;  %11711 = vmatprep.mubr.msk.f32.mxu0 %vm12652_vm11, %v12653_v27 }
 0xc0f   : >> { %12129 = vmatprep.subr.bf16.mxu0 %v12651_v55 }
 0xc12   : >> { %12131 = vmatpush3.bf16.msra.mxu0 %v12130_v12 }
 0xc13   : > { %12132 = vmatprep.subr.bf16.mxu0 (%p7180_p3), %v12654_v25 }
 0xc15   : >> { %11712 = vmatmul.mubr.msk.f32.vlgmr.msra.gmra.mrb[0].mxu0 %vm1022_vm2, %v10385_v13 }
 0xc16   : > { %11735 = vmatprep.mubr.msk.f32.mxu0 (%p7180_p3), %vm12655_vm12, %v12638_v0  ;;  %12134 = vmatpush3.bf16.msra.mxu0 (%p7180_p3), %v12133_v26 }
 0xc17   : > { %12135 = vmatprep.subr.bf16.mxu0 (%p7180_p3), %v12654_v25 }
 0xc1a   : > { %12137 = vmatpush3.bf16.msra.mxu0 (%p7180_p3), %v12136_v31 }
 0xc1b   : > { %12138 = vmatprep.subr.bf16.mxu0 (%p7180_p3), %v12654_v25 }
 0xcdf   : >> { %v8145_v15 = vpop.f32.mrb[0].mxu1 }
 0xce0   : >> { %v11570_v16 = vpop.f32.mrb[1].mxu1 }
 0xce8   : >> { %v9191_v18 = vpop.f32.mrb[0].mxu0 }
 0xce9   : >> { %v12349_v19 = vadd.f32 %v9191_v18, %v8145_v15  ;;  %v11713_v21 = vpop.f32.mrb[1].mxu0 }
 0xceb   : >> { %11715 = vmatpush3.msk.msra.mxu1 %vm4056_vm3, %v12349_v19 }
 0xcec   : >> { %11717 = vmatmul.mubr.msk.f32.vlgmr.msra.gmra.mrb[2].mxu1 %vm4052_vm4, %v12991_v14  ;;  %v9312_v14 = vld [vmem:[%s14920_s19 + $0x20] sm:$0xff] (%p7180_p3)  ;;  %12144 = vmatprep.subr.bf16.mxu1 (%p7180_p3), %v12654_v25 }
 0xced   : > { %11746 = vmatprep.mubr.msk.f32.mxu1 (%p7180_p3), %vm12655_vm12, %v12638_v0  ;;  %12146 = vmatpush3.bf16.msra.mxu1 (%p7180_p3), %v12145_v43 }
 0xcee   : > { %12147 = vmatprep.subr.bf16.mxu1 (%p7180_p3), %v12654_v25 }
 0xcf1   : > { %12149 = vmatpush3.bf16.msra.mxu1 (%p7180_p3), %v12148_v57 }
 0xcf2   : > { %12150 = vmatprep.subr.bf16.mxu1 (%p7180_p3), %v12654_v25 }
 0xdbe   : > { %7182 = sbr.rel (!%p7180_p3) target bundleno = 2986 (0xbaa), region = 394 }
 0xdbf   : >> { %v9276_v63 = vpop.f32.mrb[2].mxu1 }
 0xdc0   : >> { %v9277_v27 = vadd.f32 %v14316_v17, %v9276_v63  ;;  %v11718_v20 = vpop.f32.mrb[3].mxu1  ;;  %v9313_v17 = vld [vmem:[%s14920_s19 + $0x28] sm:$0xff] (%p7180_p3) }
 0xdc1   : > { %v12139_v44 = vpack.c.bf16 (%p7180_p3), %v9313_v17, %v9312_v14 }
 0xdc2   : >> { %v9280_v55 = vmax.f32 %v9277_v27, 0.0 }
 0xdc3   : > { %12140 = vmatpush3.bf16.msra.mxu0 (%p7180_p3), %v12139_v44 }
 0xdc4   : >> { %9284 = vst.msk [vmem:[%s9282_s28] sm:$0x7] %vm4290_vm5, %v9280_v55  ;;  %12141 = vmatprep.subr.bf16.mxu0 (%p7180_p3), %v12654_v25  ;;  %s9562_s28 = scalar_lea.sflag (%p7180_p3), [#allocation11], %s14981_s3 }
 0xdc7   : > { %12143 = vmatpush3.bf16.msra.mxu0 %v12142_v48 }
 0xdcb   : > { %v9286_v32 = vld [vmem:[#allocation9] sm:$0x7]  ;;  %v9291_v34 = vld [vmem:[#allocation9 + $0x4] sm:$0x7]  ;;  %v9297_v38 = vld [vmem:[#allocation9 + $0x8] sm:$0x7] }
 0xdcc   : > { %v9287_v35 = vmul.f32 %v9286_v32, %v9285_v30  ;;  %v9292_v36 = vmul.f32 %v9291_v34, %v9289_v33  ;;  %v9298_v40 = vmul.f32 %v9297_v38, %v9295_v37 }
 0xdce   : > { %v9293_v42 = vadd.f32 %v9292_v36, %v9287_v35 }
 0xdd0   : > { %v9299_v46 = vadd.f32 %v9298_v40, %v9293_v42 }
 0xdd2   : > { %v9301_v47 = vsel %vm4290_vm5, %v9299_v46, 0.0 }
 0xdd3   : > { %v9302_v50 = vrot.slane %v9301_v47, 4 }
 0xdd5   : > { %v9303_v51 = vadd.f32 %v9302_v50, %v9301_v47 }
 0xdd7   : > { %v9304_v52 = vrot.slane %v9303_v51, 2 }
 0xdd9   : > { %v9305_v53 = vadd.f32 %v9304_v52, %v9303_v51 }
 0xddb   : > { %v9306_v2 = vrot.slane %v9305_v53, 1 }
 0xddd   : > { %v9307_v54 = vadd.f32 %v9306_v2, %v9305_v53 }
 0xddf   : > { %11736 = vmatmul.mubr.msk.f32.vlgmr.msra.gmra.mrb[0].mxu0 %vm9317_vm13, %v9307_v54 }
 0xeb2   : > { %v9387_v60 = vpop.f32.mrb[0].mxu0 }
 0xeb3   : > { %v9388_v61 = vadd.f32 %v9387_v60, %v9316_v59  ;;  %v11737_v62 = vpop.f32.mrb[1].mxu0 }
 0xeb5   : > { %v9391_v1 = vmax.f32 %v9388_v61, 0.0 }
 0xeb7   : > { %11747 = vmatmul.mubr.msk.f32.vlgmr.msra.gmra.mrb[0].mxu1 %vm1022_vm2, %v9391_v1  ;;  %vm9547_vm2 = vcmask 73728  }
 0xeb8   : > { %11753 = vmatprep.mubr.msk.f32.mxu1 %vm12655_vm12, %v12638_v0  ;;  %12152 = vmatpush3.bf16.msra.mxu1 %v12151_v5  ;;  %v9473_v0 = vld [vmem:[%s14925_s24] sm:$0x1] }
 0xf8a   : > { %v9466_v6 = vpop.f32.mrb[0].mxu1 }
 0xf8b   : > { %v9467_v7 = vadd.f32 %v9466_v6, %v9396_v29  ;;  %v11748_v8 = vpop.f32.mrb[1].mxu1 }
 0xf8d   : > { %v9470_v9 = vmax.f32 %v9467_v7, 0.0 }
 0xf8f   : > { %11754 = vmatmul.mubr.msk.f32.vlgmr.msra.gmra.mrb[2].mxu1 %vm964_vm0, %v9470_v9 }
0x1062   : > { %v9543_v10 = vpop.f32.mrb[2].mxu1 }
0x1063   : > { %v9544_v11 = vadd.f32 %v9543_v10, %v9473_v0  ;;  %v11755_v12 = vpop.f32.mrb[3].mxu1 }
0x1065   : > { %v9548_v13 = vsel %vm9547_vm2, %v9544_v11, -inf }
0x1066   : > { %9549 = vmax.xlane.f32.xlu0 %v9548_v13 }
0x10f3   : > { %v9550_v15 = vpop.xlane.xlu0 %9549 }
0x10f4   : > { %v9551_v16 = vsub.f32 %v9544_v11, %v9550_v15 }
0x10f6   : > { %v9552_v18 = vmul.f32 1.442695, %v9551_v16 }
0x10f8   : > { %12514 = vpow2.f32 %v9552_v18 }
0x1102   : > { %v12515_v19 = vpop.eup %12514 }
0x1103   : > { %v9554_v21 = vsel %vm9547_vm2, %v12515_v19, 0.0 }
0x1104   : > { %9555 = vadd.xlane.f32.xlu0 %v9554_v21 }
0x1191   : > { %v9556_v63 = vpop.xlane.xlu0 %9555 }
0x1192   : > { %12516 = vlog2.f32 %v9556_v63 }
0x119c   : > { %v12517_v27 = vpop.eup %12516 }
0x119d   : > { %v9558_v20 = vmul.f32 0.6931472, %v12517_v27 }
0x119f   : > { %v9559_v55 = vsub.f32 %v9551_v16, %v9558_v20 }
0x11a1   : > { %9560 = vst.msk [vmem:[%s13189_s8] sm:$0x1] %vm9547_vm2, %v9559_v55 }
0x11a2   : > { %12531 = shalt.err (!%p12528_p12)
}
0x11a3   : > { %s12532_s8 = scalar_lea.hbm %s14855_s26, 16  ;;  %s12536_s30 = scalar_lea.hbm %s14980_s5, 32 }
0x11a4   : > { %p12533_p13 = scmp.ne.s32.totalorder %s14855_s26, %s12532_s8  ;;  %p12537_p2 = scmp.lt.u32.totalorder %s14855_s26, %s14980_s5 }
0x11a5   : > { %p12538_p3 = scmp.lt.u32.totalorder %s12536_s30, %s12532_s8  ;;  %p12540_p7 = scmp.lt.u32.totalorder %s12532_s8, %s14855_s26 }
0x11a6   : > { %p12534_p0 = pnand %p12533_p13, %p12825_p5 }
0x11a7   : > { %p12539_p4 = por %p12538_p3, %p12537_p2 }
0x11a8   : > { %p12535_p1 = pneg %p12534_p0 }
0x11a9   : > { %p12541_p8 = por %p12540_p7, %p12539_p4 }
0x11ab   : > { %p12542_p9 = pnand %p12541_p8, %p12535_p1 }
0x11ad   : > { %12545 = shalt.err (!%p12542_p9)
}
0x11ae   : > { %12397 = dma.vmem_to_hbm [thread:$0]  (%p12825_p5), %s14857_s25, 16, %s14855_s26, %s9562_s28  }
0x11af PF: > { %s14982_s6 = sld [smem:[#allocation15_spill]]  ;;  %s14983_s7 = sld [smem:[#allocation13_spill]] }
0x11b5   : > { %p12403_p10 = scmp.ge.s32.totalorder %s14982_s6, 2  ;;  %s9586_s1 = sand.u32 1, %s14983_s7  }
0x11b6   : > { %s9587_s4 = scalar_lea.sflag [#allocation11], %s9586_s1 }
0x11b7   : > { %p12400_p11 = pnand %p12403_p10, %p12829_p6 }
0x11b9   : > { %12591 = dma.done.wait (!%p12400_p11), %s9587_s4, 16  }
0x11ba   : > { %12593 = vsyncadd (!%p12400_p11), %s9587_s4, 4294967280  ;;  %s14985_s30 = sld [smem:[#allocation16_spill]]  ;;  %s14986_s8 = sld [smem:[#allocation14_spill]] }
0x11bb   : > { %s14987_s6 = sld [smem:[#allocation17_spill]]  ;;  %s14988_s29 = smov %s12600_s2 }
0x11c0   : > { %p35_p12 = scmp.ge.s32.totalorder %s14985_s30, 4   ;;  %s14989_s2 = smov %s14986_s8 }
0x11c2   :  { %37 = sbr.rel (!%p35_p12) target bundleno = 15 (0xf), region = 405 }
0x11c9   :  { %9591 = vsyncpa [#allocation11], 1 }
0x11ca   :  { %9593 = vsyncpa [#allocation11 + $0x1], 1 }

</bundles_post_ra>
